<compile_context>
chip_gen: v5e
topology: v5e:2x2
jax: 0.10.0
libtpu: 0.0.40
codegen_flags: <defaults>
</compile_context>

<pallas_src>
import functools

import jax
import jax.numpy as jnp
from jax import lax
from jax.experimental import pallas as pl
from jax.experimental.pallas import tpu as pltpu


def _round_up(n, m):
    return ((n + m - 1) // m) * m


def _nbytes(shape, dtype):
    n = 1
    for d in shape:
        n *= int(d)
    return n * jnp.dtype(dtype).itemsize


# ----------------------------------------------------------------------------
# Fused kernel: multi-layer LSTM recurrence + posterior MLP epilogue.
# ----------------------------------------------------------------------------
def make_stateful_lstm_kernel(L, T, Hp, depth, ln_widths, unroll, t_chunk,
                              carry_in_vregs):
    n_lstm = 3 * L                 # per layer: wih^T, whh^T, bias(=b_ih+b_hh)
    n_mlp = 4 * depth + 2          # per posterior layer: W, b, gamma, beta; then last W, b
    n_in = 3 + n_lstm + n_mlp
    f32, bf16 = jnp.float32, jnp.bfloat16

    def kernel(*args):
        x_ref, h0_ref, c0_ref = args[0:3]
        lstm_w = args[3:3 + n_lstm]
        mlp_w = args[3 + n_lstm:n_in]
        out_ref, h_n_ref, c_n_ref = args[n_in:n_in + 3]
        scratch = list(args[n_in + 3:])
        gates_ref = scratch.pop(0)                   # (T, B, 4Hp) bf16
        seq_ref = scratch.pop(0) if L > 1 else None  # (T, B, Hp)  bf16
        if not carry_in_vregs:
            h_sc = scratch.pop(0)                    # (B, Hp) f32
            c_sc = scratch.pop(0)

        Bblk = x_ref.shape[1]

        # ---- hoisted input projection, chunked over rows (bounds f32 temp) --
        def project(src_ref, wih_ref, b_ref):
            in_dim = src_ref.shape[2]
            for t0 in range(0, T, t_chunk):
                tc = min(t_chunk, T - t0)
                rows = src_ref[pl.ds(t0, tc)].reshape(tc * Bblk, in_dim)  # bf16
                g = jnp.dot(rows, wih_ref[...],
                            preferred_element_type=f32) + b_ref[...]
                gates_ref[pl.ds(t0, tc)] = g.astype(bf16).reshape(tc, Bblk, 4 * Hp)

        # ---- one LSTM cell step: only h_prev @ W_hh on the serial path ------
        def cell(gpre, h_prev, c_prev, whh_ref):
            gh = jnp.dot(h_prev.astype(bf16), whh_ref[...],
                         preferred_element_type=f32)          # (B, 4Hp) f32
            g = gpre.astype(f32) + gh
            # Hp is a multiple of 128 -> each gate slice is lane-aligned.
            i_g = jax.nn.sigmoid(g[:, 0 * Hp:1 * Hp])
            f_g = jax.nn.sigmoid(g[:, 1 * Hp:2 * Hp])
            g_g = jnp.tanh(g[:, 2 * Hp:3 * Hp])
            o_g = jax.nn.sigmoid(g[:, 3 * Hp:4 * Hp])
            c_new = f_g * c_prev + i_g * g_g
            h_new = o_g * jnp.tanh(c_new)
            return h_new, c_new

        h_last = None
        for l in range(L):                           # static layer loop
            wih_ref = lstm_w[3 * l]                  # (in_l, 4Hp) bf16
            whh_ref = lstm_w[3 * l + 1]              # (Hp,   4Hp) bf16
            b_ref = lstm_w[3 * l + 2]                # (1,    4Hp) f32

            project(x_ref if l == 0 else seq_ref, wih_ref, b_ref)

            write_seq = l < L - 1                    # last layer's sequence unused

            if carry_in_vregs:
                # (h, c) live in vregs across the T-step serial recurrence.
                def step(t, carry, whh_ref=whh_ref, write_seq=write_seq):
                    h_prev, c_prev = carry
                    h_new, c_new = cell(gates_ref[t], h_prev, c_prev, whh_ref)
                    if write_seq:
                        seq_ref[t] = h_new.astype(bf16)
                    return (h_new, c_new)

                h_last, c_last = lax.fori_loop(
                    0, T, step, (h0_ref[l], c0_ref[l]), unroll=unroll)
            else:
                # Fallback for very large B*H: state in VMEM scratch.
                h_sc[...] = h0_ref[l]
                c_sc[...] = c0_ref[l]

                def step(t, carry, whh_ref=whh_ref, write_seq=write_seq):
                    h_new, c_new = cell(gates_ref[t], h_sc[...], c_sc[...],
                                        whh_ref)
                    h_sc[...] = h_new
                    c_sc[...] = c_new
                    if write_seq:
                        seq_ref[t] = h_new.astype(bf16)
                    return carry

                lax.fori_loop(0, T, step, 0, unroll=unroll)
                h_last, c_last = h_sc[...], c_sc[...]

            h_n_ref[l] = h_last
            c_n_ref[l] = c_last

        # ---- fused posterior MLP epilogue on the last layer's h -------------
        out = h_last                                 # (B, Hp) f32, padded cols == 0
        wi = 0
        for d in range(depth):
            W_ref, b_r, g_r, be_r = mlp_w[wi:wi + 4]
            wi += 4
            y = jnp.dot(out.astype(bf16), W_ref[...],
                        preferred_element_type=f32) + b_r[...]
            wp = y.shape[-1]
            rw = ln_widths[d]                        # real LayerNorm width
            mu = jnp.sum(y, axis=-1, keepdims=True) * (1.0 / rw)
            cen = y - mu
            if rw != wp:                             # mask padded lanes out of var
                mask = lax.broadcasted_iota(jnp.int32, (1, wp), 1) < rw
                cen_m = jnp.where(mask, cen, 0.0)
            else:
                cen_m = cen
            var = jnp.sum(cen_m * cen_m, axis=-1, keepdims=True) * (1.0 / rw)
            y_hat = cen * lax.rsqrt(var + 1e-5)
            # gamma/beta are zero on padded lanes -> padded lanes stay 0.
            out = jnp.maximum(y_hat * g_r[...] + be_r[...], 0.0)
        W_ref, b_r = mlp_w[wi:wi + 2]
        out_ref[...] = jnp.dot(out.astype(bf16), W_ref[...],
                               preferred_element_type=f32) + b_r[...]

    return kernel


# ----------------------------------------------------------------------------
# Full StatefulLSTM forward (state_connected=True, dense input path).
# ----------------------------------------------------------------------------
@functools.partial(jax.jit, static_argnums=(2, 3))
def stateful_lstm_forward(x, params, layers, hidden_size, h0=None, c0=None):
    """x: (B, T, I) batch_first f32.  Returns (out[:, None, :], (h_n, c_n))."""
    B, T, _ = x.shape
    L, H = layers, hidden_size
    depth = len(params["posterior"])
    out_size = params["last_fc"][0].shape[1]
    f32, bf16 = jnp.float32, jnp.bfloat16

    # ---- padded, lane/sublane-dense sizes ----
    Bp = _round_up(max(B, 8), 8)
    Hp = _round_up(H, 128)
    out_p = _round_up(out_size, 128)

    # state_connected=True: accept carried-in state; zero init when absent.
    if h0 is None:
        h0 = jnp.zeros((L, B, H), f32)
    if c0 is None:
        c0 = jnp.zeros((L, B, H), f32)
    h0p = jnp.pad(h0.astype(f32), ((0, 0), (0, Bp - B), (0, Hp - H)))
    c0p = jnp.pad(c0.astype(f32), ((0, 0), (0, Bp - B), (0, Hp - H)))

    # time-major (T, Bp, I) bf16 input: one cheap wrapper transpose replaces
    # the T-iteration on-chip relayout.
    x_tm = jnp.pad(jnp.transpose(x.astype(bf16), (1, 0, 2)),
                   ((0, 0), (0, Bp - B), (0, 0)))

    def pad_gate_cols(w):
        # (..., 4*H) -> (..., 4*Hp): pad each of the 4 gate blocks with zeros.
        lead = w.shape[:-1]
        w4 = w.reshape(lead + (4, H))
        w4 = jnp.pad(w4, [(0, 0)] * len(lead) + [(0, 0), (0, Hp - H)])
        return w4.reshape(lead + (4 * Hp,))

    inputs = [x_tm, h0p, c0p]
    for l, (wih_t, whh_t, bias) in enumerate(params["lstm"]):
        wih_p = pad_gate_cols(wih_t)                     # (in_l, 4Hp)
        if l > 0:
            wih_p = jnp.pad(wih_p, ((0, Hp - H), (0, 0)))
        whh_p = jnp.pad(pad_gate_cols(whh_t), ((0, Hp - H), (0, 0)))
        bias_p = pad_gate_cols(bias)
        inputs += [wih_p.astype(bf16), whh_p.astype(bf16), bias_p]

    ln_widths = tuple(int(g.shape[1]) for (_, _, g, _) in params["posterior"])
    prev_p = Hp
    for (W, b, g, be) in params["posterior"]:
        in_f, out_f = W.shape
        w_out_p = _round_up(out_f, 128)
        inputs += [
            jnp.pad(W, ((0, prev_p - in_f), (0, w_out_p - out_f))).astype(bf16),
            jnp.pad(b, ((0, 0), (0, w_out_p - out_f))),
            jnp.pad(g, ((0, 0), (0, w_out_p - out_f))),     # gamma padded with 0
            jnp.pad(be, ((0, 0), (0, w_out_p - out_f))),
        ]
        prev_p = w_out_p
    Wl, bl = params["last_fc"]
    in_f, out_f = Wl.shape
    inputs += [jnp.pad(Wl, ((0, prev_p - in_f), (0, out_p - out_f))).astype(bf16),
               jnp.pad(bl, ((0, 0), (0, out_p - out_f)))]

    out_shapes = (jax.ShapeDtypeStruct((Bp, out_p), f32),
                  jax.ShapeDtypeStruct((L, Bp, Hp), f32),
                  jax.ShapeDtypeStruct((L, Bp, Hp), f32))

    # (h, c) in vregs only while 2*B*H*4 bytes fits comfortably in the 256 KiB
    # vreg file; otherwise fall back to VMEM state scratch.
    carry_in_vregs = (2 * Bp * Hp * 4) <= (96 * 1024)

    scratch_shapes = [pltpu.VMEM((T, Bp, 4 * Hp), bf16)]   # gate pre-activations
    if L > 1:
        scratch_shapes.append(pltpu.VMEM((T, Bp, Hp), bf16))   # inter-layer seq
    if not carry_in_vregs:
        scratch_shapes += [pltpu.VMEM((Bp, Hp), f32), pltpu.VMEM((Bp, Hp), f32)]

    # Full unroll for short sequences; partial (divisor of T, <= 8) otherwise.
    if T <= 32:
        unroll = T
    else:
        unroll = next((u for u in (8, 7, 6, 5, 4, 3, 2) if T % u == 0), 1)

    # Chunk the hoisted projection to ~512 rows of (B*T) at a time.
    t_chunk = max(1, min(T, 512 // Bp)) if Bp <= 512 else 1

    vmem_bytes = (sum(_nbytes(a.shape, a.dtype) for a in inputs)
                  + sum(_nbytes(s.shape, s.dtype) for s in out_shapes)
                  + sum(_nbytes(s.shape, s.dtype) for s in scratch_shapes))
    # Generation-aware cap (~0.8x physical VMEM), 2x headroom for temporaries.
    try:
        cap = int(0.8 * int(pltpu.get_tpu_info().vmem_capacity_bytes))
    except Exception:
        cap = 100 << 20
    vmem_limit = min(cap, max(32 << 20, 2 * vmem_bytes))

    vmem = pl.BlockSpec(memory_space=pltpu.MemorySpace.VMEM)
    kernel = make_stateful_lstm_kernel(L, T, Hp, depth, ln_widths, unroll,
                                       t_chunk, carry_in_vregs)
    out, h_n, c_n = pl.pallas_call(
        kernel,
        out_shape=out_shapes,
        in_specs=[vmem] * len(inputs),
        out_specs=(vmem, vmem, vmem),
        scratch_shapes=scratch_shapes,
        compiler_params=pltpu.CompilerParams(vmem_limit_bytes=vmem_limit),
    )(*inputs)

    # strip padding
    out = out[:B, :out_size]
    h_n = h_n[:, :B, :H]
    c_n = c_n[:, :B, :H]
    return out[:, None, :], (h_n, c_n)       # out.unsqueeze(1), (h, c)


# ----------------------------------------------------------------------------
# Deterministic parameter init (mirrors the module's __init__ shapes).
# ----------------------------------------------------------------------------
def init_params(key, input_size, hidden_size, output_size, layers,
                output_depth=4, output_size_decay=0.5):
    params = {"lstm": [], "posterior": []}
    k = 1.0 / jnp.sqrt(jnp.float32(hidden_size))

    def uni(key, shape):
        return jax.random.uniform(key, shape, jnp.float32, -k, k)

    for l in range(layers):
        in_l = input_size if l == 0 else hidden_size
        key, k1, k2, k3, k4 = jax.random.split(key, 5)
        w_ih = uni(k1, (4 * hidden_size, in_l))          # torch layout
        w_hh = uni(k2, (4 * hidden_size, hidden_size))
        b_ih = uni(k3, (4 * hidden_size,))
        b_hh = uni(k4, (4 * hidden_size,))
        params["lstm"].append((w_ih.T, w_hh.T,
                               (b_ih + b_hh)[None, :]))  # transposed for x @ W

    for i in range(int(output_depth)):
        in_f = int(hidden_size * output_size_decay ** i)
        out_f = int(hidden_size * output_size_decay ** (i + 1))
        key, k1, k2 = jax.random.split(key, 3)
        kf = 1.0 / jnp.sqrt(jnp.float32(in_f))
        W = jax.random.uniform(k1, (out_f, in_f), jnp.float32, -kf, kf)
        b = jax.random.uniform(k2, (out_f,), jnp.float32, -kf, kf)
        gamma = jnp.ones((out_f,), jnp.float32)
        beta = jnp.zeros((out_f,), jnp.float32)
        params["posterior"].append((W.T, b[None, :],
                                    gamma[None, :], beta[None, :]))

    in_f = int(hidden_size * output_size_decay ** int(output_depth))
    key, k1, k2 = jax.random.split(key, 3)
    kf = 1.0 / jnp.sqrt(jnp.float32(in_f))
    W = jax.random.uniform(k1, (output_size, in_f), jnp.float32, -kf, kf)
    b = jax.random.uniform(k2, (output_size,), jnp.float32, -kf, kf)
    params["last_fc"] = (W.T, b[None, :])
    return params


# ----------------------------------------------------------------------------
# Pure-JAX references.
# ----------------------------------------------------------------------------
def ref_forward_f32(x, params, layers, hidden_size):
    """Full-f32 module semantics (drift bound for the bf16-on-MXU kernel)."""
    B, T, _ = x.shape
    H = hidden_size
    layer_in = x
    hs, cs = [], []
    for l in range(layers):
        wih, whh, b = params["lstm"][l]
        hl = jnp.zeros((B, H), jnp.float32)
        cl = jnp.zeros((B, H), jnp.float32)
        outs = []
        for t in range(T):
            g = layer_in[:, t, :] @ wih + hl @ whh + b
            i_g = jax.nn.sigmoid(g[:, :H])
            f_g = jax.nn.sigmoid(g[:, H:2 * H])
            g_g = jnp.tanh(g[:, 2 * H:3 * H])
            o_g = jax.nn.sigmoid(g[:, 3 * H:])
            cl = f_g * cl + i_g * g_g
            hl = o_g * jnp.tanh(cl)
            outs.append(hl)
        layer_in = jnp.stack(outs, axis=1)
        hs.append(hl)
        cs.append(cl)
    out = hs[-1]
    for (W, b, gmm, bet) in params["posterior"]:
        y = out @ W + b
        mu = y.mean(-1, keepdims=True)
        var = ((y - mu) ** 2).mean(-1, keepdims=True)
        out = jnp.maximum((y - mu) / jnp.sqrt(var + 1e-5) * gmm + bet, 0.0)
    W, b = params["last_fc"]
    out = out @ W + b
    return out[:, None, :], (jnp.stack(hs), jnp.stack(cs))


def ref_forward_bf16(x, params, layers, hidden_size):
    """Reference mirroring the kernel's mixed precision exactly
    (bf16 MXU operands, f32 accumulation / state / LayerNorm)."""
    f32, bf16 = jnp.float32, jnp.bfloat16
    B, T, _ = x.shape
    H = hidden_size
    layer_in = x.astype(bf16)                           # (B, T, in) bf16
    hs, cs = [], []
    for l in range(layers):
        wih, whh, b = params["lstm"][l]
        wih_b, whh_b = wih.astype(bf16), whh.astype(bf16)
        gx = (jnp.dot(layer_in.reshape(B * T, -1), wih_b,
                      preferred_element_type=f32).reshape(B, T, 4 * H)
              + b).astype(bf16)                         # matches gates scratch
        hl = jnp.zeros((B, H), f32)
        cl = jnp.zeros((B, H), f32)
        outs = []
        for t in range(T):
            gh = jnp.dot(hl.astype(bf16), whh_b, preferred_element_type=f32)
            g = gx[:, t, :].astype(f32) + gh
            i_g = jax.nn.sigmoid(g[:, :H])
            f_g = jax.nn.sigmoid(g[:, H:2 * H])
            g_g = jnp.tanh(g[:, 2 * H:3 * H])
            o_g = jax.nn.sigmoid(g[:, 3 * H:])
            cl = f_g * cl + i_g * g_g
            hl = o_g * jnp.tanh(cl)
            outs.append(hl.astype(bf16))                # matches bf16 seq scratch
        layer_in = jnp.stack(outs, axis=1)
        hs.append(hl)
        cs.append(cl)
    out = hs[-1]
    for (W, bb, gmm, bet) in params["posterior"]:
        y = jnp.dot(out.astype(bf16), W.astype(bf16),
                    preferred_element_type=f32) + bb
        mu = y.mean(-1, keepdims=True)
        var = ((y - mu) ** 2).mean(-1, keepdims=True)
        out = jnp.maximum((y - mu) * lax.rsqrt(var + 1e-5) * gmm + bet, 0.0)
    W, bb = params["last_fc"]
    out = jnp.dot(out.astype(bf16), W.astype(bf16),
                  preferred_element_type=f32) + bb
    return out[:, None, :], (jnp.stack(hs), jnp.stack(cs))


if __name__ == "__main__":
    B, T = 2, 8
    input_size, hidden_size, output_size, layers = 16, 32, 4, 2

    key = jax.random.PRNGKey(0)
    key, pkey, xkey = jax.random.split(key, 3)
    params = init_params(pkey, input_size, hidden_size, output_size, layers)
    x = jax.random.normal(xkey, (B, T, input_size), jnp.float32)

    out, (h_n, c_n) = stateful_lstm_forward(x, params, layers, hidden_size)
    jax.block_until_ready((out, h_n, c_n))

    assert out.shape == (B, 1, output_size)
    assert h_n.shape == (layers, B, hidden_size)
    assert c_n.shape == (layers, B, hidden_size)

    # Primary correctness check: pure-JAX reference with identical mixed
    # precision (bf16 MXU operands, f32 accumulation / state).  Padding is
    # mathematically inert, so the padded kernel must match the unpadded ref.
    out_m, (h_m, c_m) = ref_forward_bf16(x, params, layers, hidden_size)
    assert jnp.allclose(out, out_m, atol=2e-2), "output mismatch (matched ref)"
    assert jnp.allclose(h_n, h_m, atol=2e-2), "h state mismatch (matched ref)"
    assert jnp.allclose(c_n, c_m, atol=2e-2), "c state mismatch (matched ref)"

    # Loose drift bound vs the full-f32 module semantics (bounds the numerical
    # drift introduced by running the matmuls in bf16 on the MXU).
    out_f, (h_f, c_f) = ref_forward_f32(x, params, layers, hidden_size)
    assert jnp.allclose(h_n, h_f, atol=1e-1), "h state drift too large vs f32"
    assert jnp.allclose(c_n, c_f, atol=1e-1), "c state drift too large vs f32"

    print("KERNEL_OK")
</pallas_src>

<mosaic_0001>
module attributes {stable_mosaic.version = 11 : i64} {
  func.func @kernel(%arg0: memref<8x8x16xbf16, #tpu.memory_space<vmem>>, %arg1: memref<2x8x128xf32, #tpu.memory_space<vmem>>, %arg2: memref<2x8x128xf32, #tpu.memory_space<vmem>>, %arg3: memref<16x512xbf16, #tpu.memory_space<vmem>>, %arg4: memref<128x512xbf16, #tpu.memory_space<vmem>>, %arg5: memref<1x512xf32, #tpu.memory_space<vmem>>, %arg6: memref<128x512xbf16, #tpu.memory_space<vmem>>, %arg7: memref<128x512xbf16, #tpu.memory_space<vmem>>, %arg8: memref<1x512xf32, #tpu.memory_space<vmem>>, %arg9: memref<128x128xbf16, #tpu.memory_space<vmem>>, %arg10: memref<1x128xf32, #tpu.memory_space<vmem>>, %arg11: memref<1x128xf32, #tpu.memory_space<vmem>>, %arg12: memref<1x128xf32, #tpu.memory_space<vmem>>, %arg13: memref<128x128xbf16, #tpu.memory_space<vmem>>, %arg14: memref<1x128xf32, #tpu.memory_space<vmem>>, %arg15: memref<1x128xf32, #tpu.memory_space<vmem>>, %arg16: memref<1x128xf32, #tpu.memory_space<vmem>>, %arg17: memref<128x128xbf16, #tpu.memory_space<vmem>>, %arg18: memref<1x128xf32, #tpu.memory_space<vmem>>, %arg19: memref<1x128xf32, #tpu.memory_space<vmem>>, %arg20: memref<1x128xf32, #tpu.memory_space<vmem>>, %arg21: memref<128x128xbf16, #tpu.memory_space<vmem>>, %arg22: memref<1x128xf32, #tpu.memory_space<vmem>>, %arg23: memref<1x128xf32, #tpu.memory_space<vmem>>, %arg24: memref<1x128xf32, #tpu.memory_space<vmem>>, %arg25: memref<128x128xbf16, #tpu.memory_space<vmem>>, %arg26: memref<1x128xf32, #tpu.memory_space<vmem>>, %arg27: memref<8x128xf32, #tpu.memory_space<vmem>>, %arg28: memref<2x8x128xf32, #tpu.memory_space<vmem>>, %arg29: memref<2x8x128xf32, #tpu.memory_space<vmem>>, %arg30: memref<8x8x512xbf16, #tpu.memory_space<vmem>>, %arg31: memref<8x8x128xbf16, #tpu.memory_space<vmem>>) attributes {dimension_semantics = [], scalar_prefetch = 0 : i64, scratch_operands = 2 : i64, tpu.core_type = #tpu.core_type<tc>} {
    %c0 = arith.constant 0 : index
    %c0_0 = arith.constant 0 : index
    %c0_1 = arith.constant 0 : index
    %0 = vector.load %arg0[%c0, %c0_0, %c0_1] : memref<8x8x16xbf16, #tpu.memory_space<vmem>>, vector<8x8x16xbf16>
    %1 = vector.shape_cast %0 : vector<8x8x16xbf16> to vector<64x16xbf16>
    %c0_2 = arith.constant 0 : index
    %c0_3 = arith.constant 0 : index
    %2 = vector.load %arg3[%c0_2, %c0_3] : memref<16x512xbf16, #tpu.memory_space<vmem>>, vector<16x512xbf16>
    %cst = arith.constant dense<0.000000e+00> : vector<64x512xf32>
    %3 = tpu.matmul %1, %2, %cst {dimension_numbers = #tpu.dot_dimension_numbers<[1], [0], [0], [1], [0, 0, 1, 1], [], []>} : vector<64x16xbf16>, vector<16x512xbf16>, vector<64x512xf32> -> vector<64x512xf32>
    %c0_4 = arith.constant 0 : index
    %c0_5 = arith.constant 0 : index
    %4 = vector.load %arg5[%c0_4, %c0_5] : memref<1x512xf32, #tpu.memory_space<vmem>>, vector<1x512xf32>
    %5 = vector.broadcast %4 : vector<1x512xf32> to vector<64x512xf32>
    %6 = arith.addf %3, %5 : vector<64x512xf32>
    %7 = arith.truncf %6 : vector<64x512xf32> to vector<64x512xbf16>
    %8 = vector.shape_cast %7 : vector<64x512xbf16> to vector<8x8x512xbf16>
    %c0_6 = arith.constant 0 : index
    %c0_7 = arith.constant 0 : index
    %c0_8 = arith.constant 0 : index
    %9 = vector.load %arg30[%c0_6, %c0_7, %c0_8] : memref<8x8x512xbf16, #tpu.memory_space<vmem>>, vector<8x8x512xbf16>
    tpu.vector_store %arg30[%c0_6, %c0_7, %c0_8], %8 {strides = array<i32>} : memref<8x8x512xbf16, #tpu.memory_space<vmem>>, vector<8x8x512xbf16>,
    %c0_9 = arith.constant 0 : index
    %c0_10 = arith.constant 0 : index
    %c0_11 = arith.constant 0 : index
    %10 = vector.load %arg1[%c0_9, %c0_10, %c0_11] : memref<2x8x128xf32, #tpu.memory_space<vmem>>, vector<1x8x128xf32>
    %11 = vector.shape_cast %10 : vector<1x8x128xf32> to vector<8x128xf32>
    %c0_12 = arith.constant 0 : index
    %c0_13 = arith.constant 0 : index
    %c0_14 = arith.constant 0 : index
    %12 = vector.load %arg2[%c0_12, %c0_13, %c0_14] : memref<2x8x128xf32, #tpu.memory_space<vmem>>, vector<1x8x128xf32>
    %13 = vector.shape_cast %12 : vector<1x8x128xf32> to vector<8x128xf32>
    %c0_i32 = arith.constant 0 : i32
    %14 = arith.index_cast %c0_i32 : i32 to index
    %c0_15 = arith.constant 0 : index
    %c0_16 = arith.constant 0 : index
    %15 = vector.load %arg30[%14, %c0_15, %c0_16] : memref<8x8x512xbf16, #tpu.memory_space<vmem>>, vector<1x8x512xbf16>
    %16 = vector.shape_cast %15 : vector<1x8x512xbf16> to vector<8x512xbf16>
    %17 = arith.truncf %11 : vector<8x128xf32> to vector<8x128xbf16>
    %c0_17 = arith.constant 0 : index
    %c0_18 = arith.constant 0 : index
    %18 = vector.load %arg4[%c0_17, %c0_18] : memref<128x512xbf16, #tpu.memory_space<vmem>>, vector<128x512xbf16>
    %cst_19 = arith.constant dense<0.000000e+00> : vector<8x512xf32>
    %19 = tpu.matmul %17, %18, %cst_19 {dimension_numbers = #tpu.dot_dimension_numbers<[1], [0], [0], [1], [0, 0, 1, 1], [], []>} : vector<8x128xbf16>, vector<128x512xbf16>, vector<8x512xf32> -> vector<8x512xf32>
    %20 = arith.extf %16 : vector<8x512xbf16> to vector<8x512xf32>
    %21 = arith.addf %20, %19 : vector<8x512xf32>
    %22 = vector.extract_strided_slice %21 {offsets = [0, 0], sizes = [8, 128], strides = [1, 1]} : vector<8x512xf32> to vector<8x128xf32>
    %23 = arith.negf %22 : vector<8x128xf32>
    %24 = math.exp %23 : vector<8x128xf32>
    %cst_20 = arith.constant 1.000000e+00 : f32
    %25 = vector.broadcast %cst_20 : f32 to vector<8x128xf32>
    %26 = arith.addf %25, %24 : vector<8x128xf32>
    %27 = arith.divf %25, %26 : vector<8x128xf32>
    %28 = vector.extract_strided_slice %21 {offsets = [0, 128], sizes = [8, 128], strides = [1, 1]} : vector<8x512xf32> to vector<8x128xf32>
    %29 = arith.negf %28 : vector<8x128xf32>
    %30 = math.exp %29 : vector<8x128xf32>
    %cst_21 = arith.constant 1.000000e+00 : f32
    %31 = vector.broadcast %cst_21 : f32 to vector<8x128xf32>
    %32 = arith.addf %31, %30 : vector<8x128xf32>
    %33 = arith.divf %31, %32 : vector<8x128xf32>
    %34 = vector.extract_strided_slice %21 {offsets = [0, 256], sizes = [8, 128], strides = [1, 1]} : vector<8x512xf32> to vector<8x128xf32>
    %35 = math.tanh %34 : vector<8x128xf32>
    %36 = vector.extract_strided_slice %21 {offsets = [0, 384], sizes = [8, 128], strides = [1, 1]} : vector<8x512xf32> to vector<8x128xf32>
    %37 = arith.negf %36 : vector<8x128xf32>
    %38 = math.exp %37 : vector<8x128xf32>
    %cst_22 = arith.constant 1.000000e+00 : f32
    %39 = vector.broadcast %cst_22 : f32 to vector<8x128xf32>
    %40 = arith.addf %39, %38 : vector<8x128xf32>
    %41 = arith.divf %39, %40 : vector<8x128xf32>
    %42 = arith.mulf %33, %13 : vector<8x128xf32>
    %43 = arith.mulf %27, %35 : vector<8x128xf32>
    %44 = arith.addf %42, %43 : vector<8x128xf32>
    %45 = math.tanh %44 : vector<8x128xf32>
    %46 = arith.mulf %41, %45 : vector<8x128xf32>
    %47 = arith.truncf %46 : vector<8x128xf32> to vector<8x128xbf16>
    %48 = arith.index_cast %c0_i32 : i32 to index
    %c0_23 = arith.constant 0 : index
    %c0_24 = arith.constant 0 : index
    %49 = vector.load %arg31[%48, %c0_23, %c0_24] : memref<8x8x128xbf16, #tpu.memory_space<vmem>>, vector<1x8x128xbf16>
    %50 = vector.shape_cast %49 : vector<1x8x128xbf16> to vector<8x128xbf16>
    %51 = vector.shape_cast %47 : vector<8x128xbf16> to vector<1x8x128xbf16>
    tpu.vector_store %arg31[%48, %c0_23, %c0_24], %51 {strides = array<i32>} : memref<8x8x128xbf16, #tpu.memory_space<vmem>>, vector<1x8x128xbf16>,
    %c1_i32 = arith.constant 1 : i32
    %52 = arith.index_cast %c1_i32 : i32 to index
    %c0_25 = arith.constant 0 : index
    %c0_26 = arith.constant 0 : index
    %53 = vector.load %arg30[%52, %c0_25, %c0_26] : memref<8x8x512xbf16, #tpu.memory_space<vmem>>, vector<1x8x512xbf16>
    %54 = vector.shape_cast %53 : vector<1x8x512xbf16> to vector<8x512xbf16>
    %55 = arith.truncf %46 : vector<8x128xf32> to vector<8x128xbf16>
    %c0_27 = arith.constant 0 : index
    %c0_28 = arith.constant 0 : index
    %56 = vector.load %arg4[%c0_27, %c0_28] : memref<128x512xbf16, #tpu.memory_space<vmem>>, vector<128x512xbf16>
    %cst_29 = arith.constant dense<0.000000e+00> : vector<8x512xf32>
    %57 = tpu.matmul %55, %56, %cst_29 {dimension_numbers = #tpu.dot_dimension_numbers<[1], [0], [0], [1], [0, 0, 1, 1], [], []>} : vector<8x128xbf16>, vector<128x512xbf16>, vector<8x512xf32> -> vector<8x512xf32>
    %58 = arith.extf %54 : vector<8x512xbf16> to vector<8x512xf32>
    %59 = arith.addf %58, %57 : vector<8x512xf32>
    %60 = vector.extract_strided_slice %59 {offsets = [0, 0], sizes = [8, 128], strides = [1, 1]} : vector<8x512xf32> to vector<8x128xf32>
    %61 = arith.negf %60 : vector<8x128xf32>
    %62 = math.exp %61 : vector<8x128xf32>
    %cst_30 = arith.constant 1.000000e+00 : f32
    %63 = vector.broadcast %cst_30 : f32 to vector<8x128xf32>
    %64 = arith.addf %63, %62 : vector<8x128xf32>
    %65 = arith.divf %63, %64 : vector<8x128xf32>
    %66 = vector.extract_strided_slice %59 {offsets = [0, 128], sizes = [8, 128], strides = [1, 1]} : vector<8x512xf32> to vector<8x128xf32>
    %67 = arith.negf %66 : vector<8x128xf32>
    %68 = math.exp %67 : vector<8x128xf32>
    %cst_31 = arith.constant 1.000000e+00 : f32
    %69 = vector.broadcast %cst_31 : f32 to vector<8x128xf32>
    %70 = arith.addf %69, %68 : vector<8x128xf32>
    %71 = arith.divf %69, %70 : vector<8x128xf32>
    %72 = vector.extract_strided_slice %59 {offsets = [0, 256], sizes = [8, 128], strides = [1, 1]} : vector<8x512xf32> to vector<8x128xf32>
    %73 = math.tanh %72 : vector<8x128xf32>
    %74 = vector.extract_strided_slice %59 {offsets = [0, 384], sizes = [8, 128], strides = [1, 1]} : vector<8x512xf32> to vector<8x128xf32>
    %75 = arith.negf %74 : vector<8x128xf32>
    %76 = math.exp %75 : vector<8x128xf32>
    %cst_32 = arith.constant 1.000000e+00 : f32
    %77 = vector.broadcast %cst_32 : f32 to vector<8x128xf32>
    %78 = arith.addf %77, %76 : vector<8x128xf32>
    %79 = arith.divf %77, %78 : vector<8x128xf32>
    %80 = arith.mulf %71, %44 : vector<8x128xf32>
    %81 = arith.mulf %65, %73 : vector<8x128xf32>
    %82 = arith.addf %80, %81 : vector<8x128xf32>
    %83 = math.tanh %82 : vector<8x128xf32>
    %84 = arith.mulf %79, %83 : vector<8x128xf32>
    %85 = arith.truncf %84 : vector<8x128xf32> to vector<8x128xbf16>
    %86 = arith.index_cast %c1_i32 : i32 to index
    %c0_33 = arith.constant 0 : index
    %c0_34 = arith.constant 0 : index
    %87 = vector.load %arg31[%86, %c0_33, %c0_34] : memref<8x8x128xbf16, #tpu.memory_space<vmem>>, vector<1x8x128xbf16>
    %88 = vector.shape_cast %87 : vector<1x8x128xbf16> to vector<8x128xbf16>
    %89 = vector.shape_cast %85 : vector<8x128xbf16> to vector<1x8x128xbf16>
    tpu.vector_store %arg31[%86, %c0_33, %c0_34], %89 {strides = array<i32>} : memref<8x8x128xbf16, #tpu.memory_space<vmem>>, vector<1x8x128xbf16>,
    %c2_i32 = arith.constant 2 : i32
    %90 = arith.index_cast %c2_i32 : i32 to index
    %c0_35 = arith.constant 0 : index
    %c0_36 = arith.constant 0 : index
    %91 = vector.load %arg30[%90, %c0_35, %c0_36] : memref<8x8x512xbf16, #tpu.memory_space<vmem>>, vector<1x8x512xbf16>
    %92 = vector.shape_cast %91 : vector<1x8x512xbf16> to vector<8x512xbf16>
    %93 = arith.truncf %84 : vector<8x128xf32> to vector<8x128xbf16>
    %c0_37 = arith.constant 0 : index
    %c0_38 = arith.constant 0 : index
    %94 = vector.load %arg4[%c0_37, %c0_38] : memref<128x512xbf16, #tpu.memory_space<vmem>>, vector<128x512xbf16>
    %cst_39 = arith.constant dense<0.000000e+00> : vector<8x512xf32>
    %95 = tpu.matmul %93, %94, %cst_39 {dimension_numbers = #tpu.dot_dimension_numbers<[1], [0], [0], [1], [0, 0, 1, 1], [], []>} : vector<8x128xbf16>, vector<128x512xbf16>, vector<8x512xf32> -> vector<8x512xf32>
    %96 = arith.extf %92 : vector<8x512xbf16> to vector<8x512xf32>
    %97 = arith.addf %96, %95 : vector<8x512xf32>
    %98 = vector.extract_strided_slice %97 {offsets = [0, 0], sizes = [8, 128], strides = [1, 1]} : vector<8x512xf32> to vector<8x128xf32>
    %99 = arith.negf %98 : vector<8x128xf32>
    %100 = math.exp %99 : vector<8x128xf32>
    %cst_40 = arith.constant 1.000000e+00 : f32
    %101 = vector.broadcast %cst_40 : f32 to vector<8x128xf32>
    %102 = arith.addf %101, %100 : vector<8x128xf32>
    %103 = arith.divf %101, %102 : vector<8x128xf32>
    %104 = vector.extract_strided_slice %97 {offsets = [0, 128], sizes = [8, 128], strides = [1, 1]} : vector<8x512xf32> to vector<8x128xf32>
    %105 = arith.negf %104 : vector<8x128xf32>
    %106 = math.exp %105 : vector<8x128xf32>
    %cst_41 = arith.constant 1.000000e+00 : f32
    %107 = vector.broadcast %cst_41 : f32 to vector<8x128xf32>
    %108 = arith.addf %107, %106 : vector<8x128xf32>
    %109 = arith.divf %107, %108 : vector<8x128xf32>
    %110 = vector.extract_strided_slice %97 {offsets = [0, 256], sizes = [8, 128], strides = [1, 1]} : vector<8x512xf32> to vector<8x128xf32>
    %111 = math.tanh %110 : vector<8x128xf32>
    %112 = vector.extract_strided_slice %97 {offsets = [0, 384], sizes = [8, 128], strides = [1, 1]} : vector<8x512xf32> to vector<8x128xf32>
    %113 = arith.negf %112 : vector<8x128xf32>
    %114 = math.exp %113 : vector<8x128xf32>
    %cst_42 = arith.constant 1.000000e+00 : f32
    %115 = vector.broadcast %cst_42 : f32 to vector<8x128xf32>
    %116 = arith.addf %115, %114 : vector<8x128xf32>
    %117 = arith.divf %115, %116 : vector<8x128xf32>
    %118 = arith.mulf %109, %82 : vector<8x128xf32>
    %119 = arith.mulf %103, %111 : vector<8x128xf32>
    %120 = arith.addf %118, %119 : vector<8x128xf32>
    %121 = math.tanh %120 : vector<8x128xf32>
    %122 = arith.mulf %117, %121 : vector<8x128xf32>
    %123 = arith.truncf %122 : vector<8x128xf32> to vector<8x128xbf16>
    %124 = arith.index_cast %c2_i32 : i32 to index
    %c0_43 = arith.constant 0 : index
    %c0_44 = arith.constant 0 : index
    %125 = vector.load %arg31[%124, %c0_43, %c0_44] : memref<8x8x128xbf16, #tpu.memory_space<vmem>>, vector<1x8x128xbf16>
    %126 = vector.shape_cast %125 : vector<1x8x128xbf16> to vector<8x128xbf16>
    %127 = vector.shape_cast %123 : vector<8x128xbf16> to vector<1x8x128xbf16>
    tpu.vector_store %arg31[%124, %c0_43, %c0_44], %127 {strides = array<i32>} : memref<8x8x128xbf16, #tpu.memory_space<vmem>>, vector<1x8x128xbf16>,
    %c3_i32 = arith.constant 3 : i32
    %128 = arith.index_cast %c3_i32 : i32 to index
    %c0_45 = arith.constant 0 : index
    %c0_46 = arith.constant 0 : index
    %129 = vector.load %arg30[%128, %c0_45, %c0_46] : memref<8x8x512xbf16, #tpu.memory_space<vmem>>, vector<1x8x512xbf16>
    %130 = vector.shape_cast %129 : vector<1x8x512xbf16> to vector<8x512xbf16>
    %131 = arith.truncf %122 : vector<8x128xf32> to vector<8x128xbf16>
    %c0_47 = arith.constant 0 : index
    %c0_48 = arith.constant 0 : index
    %132 = vector.load %arg4[%c0_47, %c0_48] : memref<128x512xbf16, #tpu.memory_space<vmem>>, vector<128x512xbf16>
    %cst_49 = arith.constant dense<0.000000e+00> : vector<8x512xf32>
    %133 = tpu.matmul %131, %132, %cst_49 {dimension_numbers = #tpu.dot_dimension_numbers<[1], [0], [0], [1], [0, 0, 1, 1], [], []>} : vector<8x128xbf16>, vector<128x512xbf16>, vector<8x512xf32> -> vector<8x512xf32>
    %134 = arith.extf %130 : vector<8x512xbf16> to vector<8x512xf32>
    %135 = arith.addf %134, %133 : vector<8x512xf32>
    %136 = vector.extract_strided_slice %135 {offsets = [0, 0], sizes = [8, 128], strides = [1, 1]} : vector<8x512xf32> to vector<8x128xf32>
    %137 = arith.negf %136 : vector<8x128xf32>
    %138 = math.exp %137 : vector<8x128xf32>
    %cst_50 = arith.constant 1.000000e+00 : f32
    %139 = vector.broadcast %cst_50 : f32 to vector<8x128xf32>
    %140 = arith.addf %139, %138 : vector<8x128xf32>
    %141 = arith.divf %139, %140 : vector<8x128xf32>
    %142 = vector.extract_strided_slice %135 {offsets = [0, 128], sizes = [8, 128], strides = [1, 1]} : vector<8x512xf32> to vector<8x128xf32>
    %143 = arith.negf %142 : vector<8x128xf32>
    %144 = math.exp %143 : vector<8x128xf32>
    %cst_51 = arith.constant 1.000000e+00 : f32
    %145 = vector.broadcast %cst_51 : f32 to vector<8x128xf32>
    %146 = arith.addf %145, %144 : vector<8x128xf32>
    %147 = arith.divf %145, %146 : vector<8x128xf32>
    %148 = vector.extract_strided_slice %135 {offsets = [0, 256], sizes = [8, 128], strides = [1, 1]} : vector<8x512xf32> to vector<8x128xf32>
    %149 = math.tanh %148 : vector<8x128xf32>
    %150 = vector.extract_strided_slice %135 {offsets = [0, 384], sizes = [8, 128], strides = [1, 1]} : vector<8x512xf32> to vector<8x128xf32>
    %151 = arith.negf %150 : vector<8x128xf32>
    %152 = math.exp %151 : vector<8x128xf32>
    %cst_52 = arith.constant 1.000000e+00 : f32
    %153 = vector.broadcast %cst_52 : f32 to vector<8x128xf32>
    %154 = arith.addf %153, %152 : vector<8x128xf32>
    %155 = arith.divf %153, %154 : vector<8x128xf32>
    %156 = arith.mulf %147, %120 : vector<8x128xf32>
    %157 = arith.mulf %141, %149 : vector<8x128xf32>
    %158 = arith.addf %156, %157 : vector<8x128xf32>
    %159 = math.tanh %158 : vector<8x128xf32>
    %160 = arith.mulf %155, %159 : vector<8x128xf32>
    %161 = arith.truncf %160 : vector<8x128xf32> to vector<8x128xbf16>
    %162 = arith.index_cast %c3_i32 : i32 to index
    %c0_53 = arith.constant 0 : index
    %c0_54 = arith.constant 0 : index
    %163 = vector.load %arg31[%162, %c0_53, %c0_54] : memref<8x8x128xbf16, #tpu.memory_space<vmem>>, vector<1x8x128xbf16>
    %164 = vector.shape_cast %163 : vector<1x8x128xbf16> to vector<8x128xbf16>
    %165 = vector.shape_cast %161 : vector<8x128xbf16> to vector<1x8x128xbf16>
    tpu.vector_store %arg31[%162, %c0_53, %c0_54], %165 {strides = array<i32>} : memref<8x8x128xbf16, #tpu.memory_space<vmem>>, vector<1x8x128xbf16>,
    %c4_i32 = arith.constant 4 : i32
    %166 = arith.index_cast %c4_i32 : i32 to index
    %c0_55 = arith.constant 0 : index
    %c0_56 = arith.constant 0 : index
    %167 = vector.load %arg30[%166, %c0_55, %c0_56] : memref<8x8x512xbf16, #tpu.memory_space<vmem>>, vector<1x8x512xbf16>
    %168 = vector.shape_cast %167 : vector<1x8x512xbf16> to vector<8x512xbf16>
    %169 = arith.truncf %160 : vector<8x128xf32> to vector<8x128xbf16>
    %c0_57 = arith.constant 0 : index
    %c0_58 = arith.constant 0 : index
    %170 = vector.load %arg4[%c0_57, %c0_58] : memref<128x512xbf16, #tpu.memory_space<vmem>>, vector<128x512xbf16>
    %cst_59 = arith.constant dense<0.000000e+00> : vector<8x512xf32>
    %171 = tpu.matmul %169, %170, %cst_59 {dimension_numbers = #tpu.dot_dimension_numbers<[1], [0], [0], [1], [0, 0, 1, 1], [], []>} : vector<8x128xbf16>, vector<128x512xbf16>, vector<8x512xf32> -> vector<8x512xf32>
    %172 = arith.extf %168 : vector<8x512xbf16> to vector<8x512xf32>
    %173 = arith.addf %172, %171 : vector<8x512xf32>
    %174 = vector.extract_strided_slice %173 {offsets = [0, 0], sizes = [8, 128], strides = [1, 1]} : vector<8x512xf32> to vector<8x128xf32>
    %175 = arith.negf %174 : vector<8x128xf32>
    %176 = math.exp %175 : vector<8x128xf32>
    %cst_60 = arith.constant 1.000000e+00 : f32
    %177 = vector.broadcast %cst_60 : f32 to vector<8x128xf32>
    %178 = arith.addf %177, %176 : vector<8x128xf32>
    %179 = arith.divf %177, %178 : vector<8x128xf32>
    %180 = vector.extract_strided_slice %173 {offsets = [0, 128], sizes = [8, 128], strides = [1, 1]} : vector<8x512xf32> to vector<8x128xf32>
    %181 = arith.negf %180 : vector<8x128xf32>
    %182 = math.exp %181 : vector<8x128xf32>
    %cst_61 = arith.constant 1.000000e+00 : f32
    %183 = vector.broadcast %cst_61 : f32 to vector<8x128xf32>
    %184 = arith.addf %183, %182 : vector<8x128xf32>
    %185 = arith.divf %183, %184 : vector<8x128xf32>
    %186 = vector.extract_strided_slice %173 {offsets = [0, 256], sizes = [8, 128], strides = [1, 1]} : vector<8x512xf32> to vector<8x128xf32>
    %187 = math.tanh %186 : vector<8x128xf32>
    %188 = vector.extract_strided_slice %173 {offsets = [0, 384], sizes = [8, 128], strides = [1, 1]} : vector<8x512xf32> to vector<8x128xf32>
    %189 = arith.negf %188 : vector<8x128xf32>
    %190 = math.exp %189 : vector<8x128xf32>
    %cst_62 = arith.constant 1.000000e+00 : f32
    %191 = vector.broadcast %cst_62 : f32 to vector<8x128xf32>
    %192 = arith.addf %191, %190 : vector<8x128xf32>
    %193 = arith.divf %191, %192 : vector<8x128xf32>
    %194 = arith.mulf %185, %158 : vector<8x128xf32>
    %195 = arith.mulf %179, %187 : vector<8x128xf32>
    %196 = arith.addf %194, %195 : vector<8x128xf32>
    %197 = math.tanh %196 : vector<8x128xf32>
    %198 = arith.mulf %193, %197 : vector<8x128xf32>
    %199 = arith.truncf %198 : vector<8x128xf32> to vector<8x128xbf16>
    %200 = arith.index_cast %c4_i32 : i32 to index
    %c0_63 = arith.constant 0 : index
    %c0_64 = arith.constant 0 : index
    %201 = vector.load %arg31[%200, %c0_63, %c0_64] : memref<8x8x128xbf16, #tpu.memory_space<vmem>>, vector<1x8x128xbf16>
    %202 = vector.shape_cast %201 : vector<1x8x128xbf16> to vector<8x128xbf16>
    %203 = vector.shape_cast %199 : vector<8x128xbf16> to vector<1x8x128xbf16>
    tpu.vector_store %arg31[%200, %c0_63, %c0_64], %203 {strides = array<i32>} : memref<8x8x128xbf16, #tpu.memory_space<vmem>>, vector<1x8x128xbf16>,
    %c5_i32 = arith.constant 5 : i32
    %204 = arith.index_cast %c5_i32 : i32 to index
    %c0_65 = arith.constant 0 : index
    %c0_66 = arith.constant 0 : index
    %205 = vector.load %arg30[%204, %c0_65, %c0_66] : memref<8x8x512xbf16, #tpu.memory_space<vmem>>, vector<1x8x512xbf16>
    %206 = vector.shape_cast %205 : vector<1x8x512xbf16> to vector<8x512xbf16>
    %207 = arith.truncf %198 : vector<8x128xf32> to vector<8x128xbf16>
    %c0_67 = arith.constant 0 : index
    %c0_68 = arith.constant 0 : index
    %208 = vector.load %arg4[%c0_67, %c0_68] : memref<128x512xbf16, #tpu.memory_space<vmem>>, vector<128x512xbf16>
    %cst_69 = arith.constant dense<0.000000e+00> : vector<8x512xf32>
    %209 = tpu.matmul %207, %208, %cst_69 {dimension_numbers = #tpu.dot_dimension_numbers<[1], [0], [0], [1], [0, 0, 1, 1], [], []>} : vector<8x128xbf16>, vector<128x512xbf16>, vector<8x512xf32> -> vector<8x512xf32>
    %210 = arith.extf %206 : vector<8x512xbf16> to vector<8x512xf32>
    %211 = arith.addf %210, %209 : vector<8x512xf32>
    %212 = vector.extract_strided_slice %211 {offsets = [0, 0], sizes = [8, 128], strides = [1, 1]} : vector<8x512xf32> to vector<8x128xf32>
    %213 = arith.negf %212 : vector<8x128xf32>
    %214 = math.exp %213 : vector<8x128xf32>
    %cst_70 = arith.constant 1.000000e+00 : f32
    %215 = vector.broadcast %cst_70 : f32 to vector<8x128xf32>
    %216 = arith.addf %215, %214 : vector<8x128xf32>
    %217 = arith.divf %215, %216 : vector<8x128xf32>
    %218 = vector.extract_strided_slice %211 {offsets = [0, 128], sizes = [8, 128], strides = [1, 1]} : vector<8x512xf32> to vector<8x128xf32>
    %219 = arith.negf %218 : vector<8x128xf32>
    %220 = math.exp %219 : vector<8x128xf32>
    %cst_71 = arith.constant 1.000000e+00 : f32
    %221 = vector.broadcast %cst_71 : f32 to vector<8x128xf32>
    %222 = arith.addf %221, %220 : vector<8x128xf32>
    %223 = arith.divf %221, %222 : vector<8x128xf32>
    %224 = vector.extract_strided_slice %211 {offsets = [0, 256], sizes = [8, 128], strides = [1, 1]} : vector<8x512xf32> to vector<8x128xf32>
    %225 = math.tanh %224 : vector<8x128xf32>
    %226 = vector.extract_strided_slice %211 {offsets = [0, 384], sizes = [8, 128], strides = [1, 1]} : vector<8x512xf32> to vector<8x128xf32>
    %227 = arith.negf %226 : vector<8x128xf32>
    %228 = math.exp %227 : vector<8x128xf32>
    %cst_72 = arith.constant 1.000000e+00 : f32
    %229 = vector.broadcast %cst_72 : f32 to vector<8x128xf32>
    %230 = arith.addf %229, %228 : vector<8x128xf32>
    %231 = arith.divf %229, %230 : vector<8x128xf32>
    %232 = arith.mulf %223, %196 : vector<8x128xf32>
    %233 = arith.mulf %217, %225 : vector<8x128xf32>
    %234 = arith.addf %232, %233 : vector<8x128xf32>
    %235 = math.tanh %234 : vector<8x128xf32>
    %236 = arith.mulf %231, %235 : vector<8x128xf32>
    %237 = arith.truncf %236 : vector<8x128xf32> to vector<8x128xbf16>
    %238 = arith.index_cast %c5_i32 : i32 to index
    %c0_73 = arith.constant 0 : index
    %c0_74 = arith.constant 0 : index
    %239 = vector.load %arg31[%238, %c0_73, %c0_74] : memref<8x8x128xbf16, #tpu.memory_space<vmem>>, vector<1x8x128xbf16>
    %240 = vector.shape_cast %239 : vector<1x8x128xbf16> to vector<8x128xbf16>
    %241 = vector.shape_cast %237 : vector<8x128xbf16> to vector<1x8x128xbf16>
    tpu.vector_store %arg31[%238, %c0_73, %c0_74], %241 {strides = array<i32>} : memref<8x8x128xbf16, #tpu.memory_space<vmem>>, vector<1x8x128xbf16>,
    %c6_i32 = arith.constant 6 : i32
    %242 = arith.index_cast %c6_i32 : i32 to index
    %c0_75 = arith.constant 0 : index
    %c0_76 = arith.constant 0 : index
    %243 = vector.load %arg30[%242, %c0_75, %c0_76] : memref<8x8x512xbf16, #tpu.memory_space<vmem>>, vector<1x8x512xbf16>
    %244 = vector.shape_cast %243 : vector<1x8x512xbf16> to vector<8x512xbf16>
    %245 = arith.truncf %236 : vector<8x128xf32> to vector<8x128xbf16>
    %c0_77 = arith.constant 0 : index
    %c0_78 = arith.constant 0 : index
    %246 = vector.load %arg4[%c0_77, %c0_78] : memref<128x512xbf16, #tpu.memory_space<vmem>>, vector<128x512xbf16>
    %cst_79 = arith.constant dense<0.000000e+00> : vector<8x512xf32>
    %247 = tpu.matmul %245, %246, %cst_79 {dimension_numbers = #tpu.dot_dimension_numbers<[1], [0], [0], [1], [0, 0, 1, 1], [], []>} : vector<8x128xbf16>, vector<128x512xbf16>, vector<8x512xf32> -> vector<8x512xf32>
    %248 = arith.extf %244 : vector<8x512xbf16> to vector<8x512xf32>
    %249 = arith.addf %248, %247 : vector<8x512xf32>
    %250 = vector.extract_strided_slice %249 {offsets = [0, 0], sizes = [8, 128], strides = [1, 1]} : vector<8x512xf32> to vector<8x128xf32>
    %251 = arith.negf %250 : vector<8x128xf32>
    %252 = math.exp %251 : vector<8x128xf32>
    %cst_80 = arith.constant 1.000000e+00 : f32
    %253 = vector.broadcast %cst_80 : f32 to vector<8x128xf32>
    %254 = arith.addf %253, %252 : vector<8x128xf32>
    %255 = arith.divf %253, %254 : vector<8x128xf32>
    %256 = vector.extract_strided_slice %249 {offsets = [0, 128], sizes = [8, 128], strides = [1, 1]} : vector<8x512xf32> to vector<8x128xf32>
    %257 = arith.negf %256 : vector<8x128xf32>
    %258 = math.exp %257 : vector<8x128xf32>
    %cst_81 = arith.constant 1.000000e+00 : f32
    %259 = vector.broadcast %cst_81 : f32 to vector<8x128xf32>
    %260 = arith.addf %259, %258 : vector<8x128xf32>
    %261 = arith.divf %259, %260 : vector<8x128xf32>
    %262 = vector.extract_strided_slice %249 {offsets = [0, 256], sizes = [8, 128], strides = [1, 1]} : vector<8x512xf32> to vector<8x128xf32>
    %263 = math.tanh %262 : vector<8x128xf32>
    %264 = vector.extract_strided_slice %249 {offsets = [0, 384], sizes = [8, 128], strides = [1, 1]} : vector<8x512xf32> to vector<8x128xf32>
    %265 = arith.negf %264 : vector<8x128xf32>
    %266 = math.exp %265 : vector<8x128xf32>
    %cst_82 = arith.constant 1.000000e+00 : f32
    %267 = vector.broadcast %cst_82 : f32 to vector<8x128xf32>
    %268 = arith.addf %267, %266 : vector<8x128xf32>
    %269 = arith.divf %267, %268 : vector<8x128xf32>
    %270 = arith.mulf %261, %234 : vector<8x128xf32>
    %271 = arith.mulf %255, %263 : vector<8x128xf32>
    %272 = arith.addf %270, %271 : vector<8x128xf32>
    %273 = math.tanh %272 : vector<8x128xf32>
    %274 = arith.mulf %269, %273 : vector<8x128xf32>
    %275 = arith.truncf %274 : vector<8x128xf32> to vector<8x128xbf16>
    %276 = arith.index_cast %c6_i32 : i32 to index
    %c0_83 = arith.constant 0 : index
    %c0_84 = arith.constant 0 : index
    %277 = vector.load %arg31[%276, %c0_83, %c0_84] : memref<8x8x128xbf16, #tpu.memory_space<vmem>>, vector<1x8x128xbf16>
    %278 = vector.shape_cast %277 : vector<1x8x128xbf16> to vector<8x128xbf16>
    %279 = vector.shape_cast %275 : vector<8x128xbf16> to vector<1x8x128xbf16>
    tpu.vector_store %arg31[%276, %c0_83, %c0_84], %279 {strides = array<i32>} : memref<8x8x128xbf16, #tpu.memory_space<vmem>>, vector<1x8x128xbf16>,
    %c7_i32 = arith.constant 7 : i32
    %280 = arith.index_cast %c7_i32 : i32 to index
    %c0_85 = arith.constant 0 : index
    %c0_86 = arith.constant 0 : index
    %281 = vector.load %arg30[%280, %c0_85, %c0_86] : memref<8x8x512xbf16, #tpu.memory_space<vmem>>, vector<1x8x512xbf16>
    %282 = vector.shape_cast %281 : vector<1x8x512xbf16> to vector<8x512xbf16>
    %283 = arith.truncf %274 : vector<8x128xf32> to vector<8x128xbf16>
    %c0_87 = arith.constant 0 : index
    %c0_88 = arith.constant 0 : index
    %284 = vector.load %arg4[%c0_87, %c0_88] : memref<128x512xbf16, #tpu.memory_space<vmem>>, vector<128x512xbf16>
    %cst_89 = arith.constant dense<0.000000e+00> : vector<8x512xf32>
    %285 = tpu.matmul %283, %284, %cst_89 {dimension_numbers = #tpu.dot_dimension_numbers<[1], [0], [0], [1], [0, 0, 1, 1], [], []>} : vector<8x128xbf16>, vector<128x512xbf16>, vector<8x512xf32> -> vector<8x512xf32>
    %286 = arith.extf %282 : vector<8x512xbf16> to vector<8x512xf32>
    %287 = arith.addf %286, %285 : vector<8x512xf32>
    %288 = vector.extract_strided_slice %287 {offsets = [0, 0], sizes = [8, 128], strides = [1, 1]} : vector<8x512xf32> to vector<8x128xf32>
    %289 = arith.negf %288 : vector<8x128xf32>
    %290 = math.exp %289 : vector<8x128xf32>
    %cst_90 = arith.constant 1.000000e+00 : f32
    %291 = vector.broadcast %cst_90 : f32 to vector<8x128xf32>
    %292 = arith.addf %291, %290 : vector<8x128xf32>
    %293 = arith.divf %291, %292 : vector<8x128xf32>
    %294 = vector.extract_strided_slice %287 {offsets = [0, 128], sizes = [8, 128], strides = [1, 1]} : vector<8x512xf32> to vector<8x128xf32>
    %295 = arith.negf %294 : vector<8x128xf32>
    %296 = math.exp %295 : vector<8x128xf32>
    %cst_91 = arith.constant 1.000000e+00 : f32
    %297 = vector.broadcast %cst_91 : f32 to vector<8x128xf32>
    %298 = arith.addf %297, %296 : vector<8x128xf32>
    %299 = arith.divf %297, %298 : vector<8x128xf32>
    %300 = vector.extract_strided_slice %287 {offsets = [0, 256], sizes = [8, 128], strides = [1, 1]} : vector<8x512xf32> to vector<8x128xf32>
    %301 = math.tanh %300 : vector<8x128xf32>
    %302 = vector.extract_strided_slice %287 {offsets = [0, 384], sizes = [8, 128], strides = [1, 1]} : vector<8x512xf32> to vector<8x128xf32>
    %303 = arith.negf %302 : vector<8x128xf32>
    %304 = math.exp %303 : vector<8x128xf32>
    %cst_92 = arith.constant 1.000000e+00 : f32
    %305 = vector.broadcast %cst_92 : f32 to vector<8x128xf32>
    %306 = arith.addf %305, %304 : vector<8x128xf32>
    %307 = arith.divf %305, %306 : vector<8x128xf32>
    %308 = arith.mulf %299, %272 : vector<8x128xf32>
    %309 = arith.mulf %293, %301 : vector<8x128xf32>
    %310 = arith.addf %308, %309 : vector<8x128xf32>
    %311 = math.tanh %310 : vector<8x128xf32>
    %312 = arith.mulf %307, %311 : vector<8x128xf32>
    %313 = arith.truncf %312 : vector<8x128xf32> to vector<8x128xbf16>
    %314 = arith.index_cast %c7_i32 : i32 to index
    %c0_93 = arith.constant 0 : index
    %c0_94 = arith.constant 0 : index
    %315 = vector.load %arg31[%314, %c0_93, %c0_94] : memref<8x8x128xbf16, #tpu.memory_space<vmem>>, vector<1x8x128xbf16>
    %316 = vector.shape_cast %315 : vector<1x8x128xbf16> to vector<8x128xbf16>
    %317 = vector.shape_cast %313 : vector<8x128xbf16> to vector<1x8x128xbf16>
    tpu.vector_store %arg31[%314, %c0_93, %c0_94], %317 {strides = array<i32>} : memref<8x8x128xbf16, #tpu.memory_space<vmem>>, vector<1x8x128xbf16>,
    %c8_i32 = arith.constant 8 : i32
    %c0_95 = arith.constant 0 : index
    %c0_96 = arith.constant 0 : index
    %c0_97 = arith.constant 0 : index
    %318 = vector.load %arg28[%c0_95, %c0_96, %c0_97] : memref<2x8x128xf32, #tpu.memory_space<vmem>>, vector<1x8x128xf32>
    %319 = vector.shape_cast %318 : vector<1x8x128xf32> to vector<8x128xf32>
    %320 = vector.shape_cast %312 : vector<8x128xf32> to vector<1x8x128xf32>
    tpu.vector_store %arg28[%c0_95, %c0_96, %c0_97], %320 {strides = array<i32>} : memref<2x8x128xf32, #tpu.memory_space<vmem>>, vector<1x8x128xf32>,
    %c0_98 = arith.constant 0 : index
    %c0_99 = arith.constant 0 : index
    %c0_100 = arith.constant 0 : index
    %321 = vector.load %arg29[%c0_98, %c0_99, %c0_100] : memref<2x8x128xf32, #tpu.memory_space<vmem>>, vector<1x8x128xf32>
    %322 = vector.shape_cast %321 : vector<1x8x128xf32> to vector<8x128xf32>
    %323 = vector.shape_cast %310 : vector<8x128xf32> to vector<1x8x128xf32>
    tpu.vector_store %arg29[%c0_98, %c0_99, %c0_100], %323 {strides = array<i32>} : memref<2x8x128xf32, #tpu.memory_space<vmem>>, vector<1x8x128xf32>,
    %c0_101 = arith.constant 0 : index
    %c0_102 = arith.constant 0 : index
    %c0_103 = arith.constant 0 : index
    %324 = vector.load %arg31[%c0_101, %c0_102, %c0_103] : memref<8x8x128xbf16, #tpu.memory_space<vmem>>, vector<8x8x128xbf16>
    %325 = vector.shape_cast %324 : vector<8x8x128xbf16> to vector<64x128xbf16>
    %c0_104 = arith.constant 0 : index
    %c0_105 = arith.constant 0 : index
    %326 = vector.load %arg6[%c0_104, %c0_105] : memref<128x512xbf16, #tpu.memory_space<vmem>>, vector<128x512xbf16>
    %cst_106 = arith.constant dense<0.000000e+00> : vector<64x512xf32>
    %327 = tpu.matmul %325, %326, %cst_106 {dimension_numbers = #tpu.dot_dimension_numbers<[1], [0], [0], [1], [0, 0, 1, 1], [], []>} : vector<64x128xbf16>, vector<128x512xbf16>, vector<64x512xf32> -> vector<64x512xf32>
    %c0_107 = arith.constant 0 : index
    %c0_108 = arith.constant 0 : index
    %328 = vector.load %arg8[%c0_107, %c0_108] : memref<1x512xf32, #tpu.memory_space<vmem>>, vector<1x512xf32>
    %329 = vector.broadcast %328 : vector<1x512xf32> to vector<64x512xf32>
    %330 = arith.addf %327, %329 : vector<64x512xf32>
    %331 = arith.truncf %330 : vector<64x512xf32> to vector<64x512xbf16>
    %332 = vector.shape_cast %331 : vector<64x512xbf16> to vector<8x8x512xbf16>
    %c0_109 = arith.constant 0 : index
    %c0_110 = arith.constant 0 : index
    %c0_111 = arith.constant 0 : index
    %333 = vector.load %arg30[%c0_109, %c0_110, %c0_111] : memref<8x8x512xbf16, #tpu.memory_space<vmem>>, vector<8x8x512xbf16>
    tpu.vector_store %arg30[%c0_109, %c0_110, %c0_111], %332 {strides = array<i32>} : memref<8x8x512xbf16, #tpu.memory_space<vmem>>, vector<8x8x512xbf16>,
    %c1 = arith.constant 1 : index
    %c0_112 = arith.constant 0 : index
    %c0_113 = arith.constant 0 : index
    %334 = vector.load %arg1[%c1, %c0_112, %c0_113] : memref<2x8x128xf32, #tpu.memory_space<vmem>>, vector<1x8x128xf32>
    %335 = vector.shape_cast %334 : vector<1x8x128xf32> to vector<8x128xf32>
    %c1_114 = arith.constant 1 : index
    %c0_115 = arith.constant 0 : index
    %c0_116 = arith.constant 0 : index
    %336 = vector.load %arg2[%c1_114, %c0_115, %c0_116] : memref<2x8x128xf32, #tpu.memory_space<vmem>>, vector<1x8x128xf32>
    %337 = vector.shape_cast %336 : vector<1x8x128xf32> to vector<8x128xf32>
    %c0_i32_117 = arith.constant 0 : i32
    %338 = arith.index_cast %c0_i32_117 : i32 to index
    %c0_118 = arith.constant 0 : index
    %c0_119 = arith.constant 0 : index
    %339 = vector.load %arg30[%338, %c0_118, %c0_119] : memref<8x8x512xbf16, #tpu.memory_space<vmem>>, vector<1x8x512xbf16>
    %340 = vector.shape_cast %339 : vector<1x8x512xbf16> to vector<8x512xbf16>
    %341 = arith.truncf %335 : vector<8x128xf32> to vector<8x128xbf16>
    %c0_120 = arith.constant 0 : index
    %c0_121 = arith.constant 0 : index
    %342 = vector.load %arg7[%c0_120, %c0_121] : memref<128x512xbf16, #tpu.memory_space<vmem>>, vector<128x512xbf16>
    %cst_122 = arith.constant dense<0.000000e+00> : vector<8x512xf32>
    %343 = tpu.matmul %341, %342, %cst_122 {dimension_numbers = #tpu.dot_dimension_numbers<[1], [0], [0], [1], [0, 0, 1, 1], [], []>} : vector<8x128xbf16>, vector<128x512xbf16>, vector<8x512xf32> -> vector<8x512xf32>
    %344 = arith.extf %340 : vector<8x512xbf16> to vector<8x512xf32>
    %345 = arith.addf %344, %343 : vector<8x512xf32>
    %346 = vector.extract_strided_slice %345 {offsets = [0, 0], sizes = [8, 128], strides = [1, 1]} : vector<8x512xf32> to vector<8x128xf32>
    %347 = arith.negf %346 : vector<8x128xf32>
    %348 = math.exp %347 : vector<8x128xf32>
    %cst_123 = arith.constant 1.000000e+00 : f32
    %349 = vector.broadcast %cst_123 : f32 to vector<8x128xf32>
    %350 = arith.addf %349, %348 : vector<8x128xf32>
    %351 = arith.divf %349, %350 : vector<8x128xf32>
    %352 = vector.extract_strided_slice %345 {offsets = [0, 128], sizes = [8, 128], strides = [1, 1]} : vector<8x512xf32> to vector<8x128xf32>
    %353 = arith.negf %352 : vector<8x128xf32>
    %354 = math.exp %353 : vector<8x128xf32>
    %cst_124 = arith.constant 1.000000e+00 : f32
    %355 = vector.broadcast %cst_124 : f32 to vector<8x128xf32>
    %356 = arith.addf %355, %354 : vector<8x128xf32>
    %357 = arith.divf %355, %356 : vector<8x128xf32>
    %358 = vector.extract_strided_slice %345 {offsets = [0, 256], sizes = [8, 128], strides = [1, 1]} : vector<8x512xf32> to vector<8x128xf32>
    %359 = math.tanh %358 : vector<8x128xf32>
    %360 = vector.extract_strided_slice %345 {offsets = [0, 384], sizes = [8, 128], strides = [1, 1]} : vector<8x512xf32> to vector<8x128xf32>
    %361 = arith.negf %360 : vector<8x128xf32>
    %362 = math.exp %361 : vector<8x128xf32>
    %cst_125 = arith.constant 1.000000e+00 : f32
    %363 = vector.broadcast %cst_125 : f32 to vector<8x128xf32>
    %364 = arith.addf %363, %362 : vector<8x128xf32>
    %365 = arith.divf %363, %364 : vector<8x128xf32>
    %366 = arith.mulf %357, %337 : vector<8x128xf32>
    %367 = arith.mulf %351, %359 : vector<8x128xf32>
    %368 = arith.addf %366, %367 : vector<8x128xf32>
    %369 = math.tanh %368 : vector<8x128xf32>
    %370 = arith.mulf %365, %369 : vector<8x128xf32>
    %c1_i32_126 = arith.constant 1 : i32
    %371 = arith.index_cast %c1_i32_126 : i32 to index
    %c0_127 = arith.constant 0 : index
    %c0_128 = arith.constant 0 : index
    %372 = vector.load %arg30[%371, %c0_127, %c0_128] : memref<8x8x512xbf16, #tpu.memory_space<vmem>>, vector<1x8x512xbf16>
    %373 = vector.shape_cast %372 : vector<1x8x512xbf16> to vector<8x512xbf16>
    %374 = arith.truncf %370 : vector<8x128xf32> to vector<8x128xbf16>
    %c0_129 = arith.constant 0 : index
    %c0_130 = arith.constant 0 : index
    %375 = vector.load %arg7[%c0_129, %c0_130] : memref<128x512xbf16, #tpu.memory_space<vmem>>, vector<128x512xbf16>
    %cst_131 = arith.constant dense<0.000000e+00> : vector<8x512xf32>
    %376 = tpu.matmul %374, %375, %cst_131 {dimension_numbers = #tpu.dot_dimension_numbers<[1], [0], [0], [1], [0, 0, 1, 1], [], []>} : vector<8x128xbf16>, vector<128x512xbf16>, vector<8x512xf32> -> vector<8x512xf32>
    %377 = arith.extf %373 : vector<8x512xbf16> to vector<8x512xf32>
    %378 = arith.addf %377, %376 : vector<8x512xf32>
    %379 = vector.extract_strided_slice %378 {offsets = [0, 0], sizes = [8, 128], strides = [1, 1]} : vector<8x512xf32> to vector<8x128xf32>
    %380 = arith.negf %379 : vector<8x128xf32>
    %381 = math.exp %380 : vector<8x128xf32>
    %cst_132 = arith.constant 1.000000e+00 : f32
    %382 = vector.broadcast %cst_132 : f32 to vector<8x128xf32>
    %383 = arith.addf %382, %381 : vector<8x128xf32>
    %384 = arith.divf %382, %383 : vector<8x128xf32>
    %385 = vector.extract_strided_slice %378 {offsets = [0, 128], sizes = [8, 128], strides = [1, 1]} : vector<8x512xf32> to vector<8x128xf32>
    %386 = arith.negf %385 : vector<8x128xf32>
    %387 = math.exp %386 : vector<8x128xf32>
    %cst_133 = arith.constant 1.000000e+00 : f32
    %388 = vector.broadcast %cst_133 : f32 to vector<8x128xf32>
    %389 = arith.addf %388, %387 : vector<8x128xf32>
    %390 = arith.divf %388, %389 : vector<8x128xf32>
    %391 = vector.extract_strided_slice %378 {offsets = [0, 256], sizes = [8, 128], strides = [1, 1]} : vector<8x512xf32> to vector<8x128xf32>
    %392 = math.tanh %391 : vector<8x128xf32>
    %393 = vector.extract_strided_slice %378 {offsets = [0, 384], sizes = [8, 128], strides = [1, 1]} : vector<8x512xf32> to vector<8x128xf32>
    %394 = arith.negf %393 : vector<8x128xf32>
    %395 = math.exp %394 : vector<8x128xf32>
    %cst_134 = arith.constant 1.000000e+00 : f32
    %396 = vector.broadcast %cst_134 : f32 to vector<8x128xf32>
    %397 = arith.addf %396, %395 : vector<8x128xf32>
    %398 = arith.divf %396, %397 : vector<8x128xf32>
    %399 = arith.mulf %390, %368 : vector<8x128xf32>
    %400 = arith.mulf %384, %392 : vector<8x128xf32>
    %401 = arith.addf %399, %400 : vector<8x128xf32>
    %402 = math.tanh %401 : vector<8x128xf32>
    %403 = arith.mulf %398, %402 : vector<8x128xf32>
    %c2_i32_135 = arith.constant 2 : i32
    %404 = arith.index_cast %c2_i32_135 : i32 to index
    %c0_136 = arith.constant 0 : index
    %c0_137 = arith.constant 0 : index
    %405 = vector.load %arg30[%404, %c0_136, %c0_137] : memref<8x8x512xbf16, #tpu.memory_space<vmem>>, vector<1x8x512xbf16>
    %406 = vector.shape_cast %405 : vector<1x8x512xbf16> to vector<8x512xbf16>
    %407 = arith.truncf %403 : vector<8x128xf32> to vector<8x128xbf16>
    %c0_138 = arith.constant 0 : index
    %c0_139 = arith.constant 0 : index
    %408 = vector.load %arg7[%c0_138, %c0_139] : memref<128x512xbf16, #tpu.memory_space<vmem>>, vector<128x512xbf16>
    %cst_140 = arith.constant dense<0.000000e+00> : vector<8x512xf32>
    %409 = tpu.matmul %407, %408, %cst_140 {dimension_numbers = #tpu.dot_dimension_numbers<[1], [0], [0], [1], [0, 0, 1, 1], [], []>} : vector<8x128xbf16>, vector<128x512xbf16>, vector<8x512xf32> -> vector<8x512xf32>
    %410 = arith.extf %406 : vector<8x512xbf16> to vector<8x512xf32>
    %411 = arith.addf %410, %409 : vector<8x512xf32>
    %412 = vector.extract_strided_slice %411 {offsets = [0, 0], sizes = [8, 128], strides = [1, 1]} : vector<8x512xf32> to vector<8x128xf32>
    %413 = arith.negf %412 : vector<8x128xf32>
    %414 = math.exp %413 : vector<8x128xf32>
    %cst_141 = arith.constant 1.000000e+00 : f32
    %415 = vector.broadcast %cst_141 : f32 to vector<8x128xf32>
    %416 = arith.addf %415, %414 : vector<8x128xf32>
    %417 = arith.divf %415, %416 : vector<8x128xf32>
    %418 = vector.extract_strided_slice %411 {offsets = [0, 128], sizes = [8, 128], strides = [1, 1]} : vector<8x512xf32> to vector<8x128xf32>
    %419 = arith.negf %418 : vector<8x128xf32>
    %420 = math.exp %419 : vector<8x128xf32>
    %cst_142 = arith.constant 1.000000e+00 : f32
    %421 = vector.broadcast %cst_142 : f32 to vector<8x128xf32>
    %422 = arith.addf %421, %420 : vector<8x128xf32>
    %423 = arith.divf %421, %422 : vector<8x128xf32>
    %424 = vector.extract_strided_slice %411 {offsets = [0, 256], sizes = [8, 128], strides = [1, 1]} : vector<8x512xf32> to vector<8x128xf32>
    %425 = math.tanh %424 : vector<8x128xf32>
    %426 = vector.extract_strided_slice %411 {offsets = [0, 384], sizes = [8, 128], strides = [1, 1]} : vector<8x512xf32> to vector<8x128xf32>
    %427 = arith.negf %426 : vector<8x128xf32>
    %428 = math.exp %427 : vector<8x128xf32>
    %cst_143 = arith.constant 1.000000e+00 : f32
    %429 = vector.broadcast %cst_143 : f32 to vector<8x128xf32>
    %430 = arith.addf %429, %428 : vector<8x128xf32>
    %431 = arith.divf %429, %430 : vector<8x128xf32>
    %432 = arith.mulf %423, %401 : vector<8x128xf32>
    %433 = arith.mulf %417, %425 : vector<8x128xf32>
    %434 = arith.addf %432, %433 : vector<8x128xf32>
    %435 = math.tanh %434 : vector<8x128xf32>
    %436 = arith.mulf %431, %435 : vector<8x128xf32>
    %c3_i32_144 = arith.constant 3 : i32
    %437 = arith.index_cast %c3_i32_144 : i32 to index
    %c0_145 = arith.constant 0 : index
    %c0_146 = arith.constant 0 : index
    %438 = vector.load %arg30[%437, %c0_145, %c0_146] : memref<8x8x512xbf16, #tpu.memory_space<vmem>>, vector<1x8x512xbf16>
    %439 = vector.shape_cast %438 : vector<1x8x512xbf16> to vector<8x512xbf16>
    %440 = arith.truncf %436 : vector<8x128xf32> to vector<8x128xbf16>
    %c0_147 = arith.constant 0 : index
    %c0_148 = arith.constant 0 : index
    %441 = vector.load %arg7[%c0_147, %c0_148] : memref<128x512xbf16, #tpu.memory_space<vmem>>, vector<128x512xbf16>
    %cst_149 = arith.constant dense<0.000000e+00> : vector<8x512xf32>
    %442 = tpu.matmul %440, %441, %cst_149 {dimension_numbers = #tpu.dot_dimension_numbers<[1], [0], [0], [1], [0, 0, 1, 1], [], []>} : vector<8x128xbf16>, vector<128x512xbf16>, vector<8x512xf32> -> vector<8x512xf32>
    %443 = arith.extf %439 : vector<8x512xbf16> to vector<8x512xf32>
    %444 = arith.addf %443, %442 : vector<8x512xf32>
    %445 = vector.extract_strided_slice %444 {offsets = [0, 0], sizes = [8, 128], strides = [1, 1]} : vector<8x512xf32> to vector<8x128xf32>
    %446 = arith.negf %445 : vector<8x128xf32>
    %447 = math.exp %446 : vector<8x128xf32>
    %cst_150 = arith.constant 1.000000e+00 : f32
    %448 = vector.broadcast %cst_150 : f32 to vector<8x128xf32>
    %449 = arith.addf %448, %447 : vector<8x128xf32>
    %450 = arith.divf %448, %449 : vector<8x128xf32>
    %451 = vector.extract_strided_slice %444 {offsets = [0, 128], sizes = [8, 128], strides = [1, 1]} : vector<8x512xf32> to vector<8x128xf32>
    %452 = arith.negf %451 : vector<8x128xf32>
    %453 = math.exp %452 : vector<8x128xf32>
    %cst_151 = arith.constant 1.000000e+00 : f32
    %454 = vector.broadcast %cst_151 : f32 to vector<8x128xf32>
    %455 = arith.addf %454, %453 : vector<8x128xf32>
    %456 = arith.divf %454, %455 : vector<8x128xf32>
    %457 = vector.extract_strided_slice %444 {offsets = [0, 256], sizes = [8, 128], strides = [1, 1]} : vector<8x512xf32> to vector<8x128xf32>
    %458 = math.tanh %457 : vector<8x128xf32>
    %459 = vector.extract_strided_slice %444 {offsets = [0, 384], sizes = [8, 128], strides = [1, 1]} : vector<8x512xf32> to vector<8x128xf32>
    %460 = arith.negf %459 : vector<8x128xf32>
    %461 = math.exp %460 : vector<8x128xf32>
    %cst_152 = arith.constant 1.000000e+00 : f32
    %462 = vector.broadcast %cst_152 : f32 to vector<8x128xf32>
    %463 = arith.addf %462, %461 : vector<8x128xf32>
    %464 = arith.divf %462, %463 : vector<8x128xf32>
    %465 = arith.mulf %456, %434 : vector<8x128xf32>
    %466 = arith.mulf %450, %458 : vector<8x128xf32>
    %467 = arith.addf %465, %466 : vector<8x128xf32>
    %468 = math.tanh %467 : vector<8x128xf32>
    %469 = arith.mulf %464, %468 : vector<8x128xf32>
    %c4_i32_153 = arith.constant 4 : i32
    %470 = arith.index_cast %c4_i32_153 : i32 to index
    %c0_154 = arith.constant 0 : index
    %c0_155 = arith.constant 0 : index
    %471 = vector.load %arg30[%470, %c0_154, %c0_155] : memref<8x8x512xbf16, #tpu.memory_space<vmem>>, vector<1x8x512xbf16>
    %472 = vector.shape_cast %471 : vector<1x8x512xbf16> to vector<8x512xbf16>
    %473 = arith.truncf %469 : vector<8x128xf32> to vector<8x128xbf16>
    %c0_156 = arith.constant 0 : index
    %c0_157 = arith.constant 0 : index
    %474 = vector.load %arg7[%c0_156, %c0_157] : memref<128x512xbf16, #tpu.memory_space<vmem>>, vector<128x512xbf16>
    %cst_158 = arith.constant dense<0.000000e+00> : vector<8x512xf32>
    %475 = tpu.matmul %473, %474, %cst_158 {dimension_numbers = #tpu.dot_dimension_numbers<[1], [0], [0], [1], [0, 0, 1, 1], [], []>} : vector<8x128xbf16>, vector<128x512xbf16>, vector<8x512xf32> -> vector<8x512xf32>
    %476 = arith.extf %472 : vector<8x512xbf16> to vector<8x512xf32>
    %477 = arith.addf %476, %475 : vector<8x512xf32>
    %478 = vector.extract_strided_slice %477 {offsets = [0, 0], sizes = [8, 128], strides = [1, 1]} : vector<8x512xf32> to vector<8x128xf32>
    %479 = arith.negf %478 : vector<8x128xf32>
    %480 = math.exp %479 : vector<8x128xf32>
    %cst_159 = arith.constant 1.000000e+00 : f32
    %481 = vector.broadcast %cst_159 : f32 to vector<8x128xf32>
    %482 = arith.addf %481, %480 : vector<8x128xf32>
    %483 = arith.divf %481, %482 : vector<8x128xf32>
    %484 = vector.extract_strided_slice %477 {offsets = [0, 128], sizes = [8, 128], strides = [1, 1]} : vector<8x512xf32> to vector<8x128xf32>
    %485 = arith.negf %484 : vector<8x128xf32>
    %486 = math.exp %485 : vector<8x128xf32>
    %cst_160 = arith.constant 1.000000e+00 : f32
    %487 = vector.broadcast %cst_160 : f32 to vector<8x128xf32>
    %488 = arith.addf %487, %486 : vector<8x128xf32>
    %489 = arith.divf %487, %488 : vector<8x128xf32>
    %490 = vector.extract_strided_slice %477 {offsets = [0, 256], sizes = [8, 128], strides = [1, 1]} : vector<8x512xf32> to vector<8x128xf32>
    %491 = math.tanh %490 : vector<8x128xf32>
    %492 = vector.extract_strided_slice %477 {offsets = [0, 384], sizes = [8, 128], strides = [1, 1]} : vector<8x512xf32> to vector<8x128xf32>
    %493 = arith.negf %492 : vector<8x128xf32>
    %494 = math.exp %493 : vector<8x128xf32>
    %cst_161 = arith.constant 1.000000e+00 : f32
    %495 = vector.broadcast %cst_161 : f32 to vector<8x128xf32>
    %496 = arith.addf %495, %494 : vector<8x128xf32>
    %497 = arith.divf %495, %496 : vector<8x128xf32>
    %498 = arith.mulf %489, %467 : vector<8x128xf32>
    %499 = arith.mulf %483, %491 : vector<8x128xf32>
    %500 = arith.addf %498, %499 : vector<8x128xf32>
    %501 = math.tanh %500 : vector<8x128xf32>
    %502 = arith.mulf %497, %501 : vector<8x128xf32>
    %c5_i32_162 = arith.constant 5 : i32
    %503 = arith.index_cast %c5_i32_162 : i32 to index
    %c0_163 = arith.constant 0 : index
    %c0_164 = arith.constant 0 : index
    %504 = vector.load %arg30[%503, %c0_163, %c0_164] : memref<8x8x512xbf16, #tpu.memory_space<vmem>>, vector<1x8x512xbf16>
    %505 = vector.shape_cast %504 : vector<1x8x512xbf16> to vector<8x512xbf16>
    %506 = arith.truncf %502 : vector<8x128xf32> to vector<8x128xbf16>
    %c0_165 = arith.constant 0 : index
    %c0_166 = arith.constant 0 : index
    %507 = vector.load %arg7[%c0_165, %c0_166] : memref<128x512xbf16, #tpu.memory_space<vmem>>, vector<128x512xbf16>
    %cst_167 = arith.constant dense<0.000000e+00> : vector<8x512xf32>
    %508 = tpu.matmul %506, %507, %cst_167 {dimension_numbers = #tpu.dot_dimension_numbers<[1], [0], [0], [1], [0, 0, 1, 1], [], []>} : vector<8x128xbf16>, vector<128x512xbf16>, vector<8x512xf32> -> vector<8x512xf32>
    %509 = arith.extf %505 : vector<8x512xbf16> to vector<8x512xf32>
    %510 = arith.addf %509, %508 : vector<8x512xf32>
    %511 = vector.extract_strided_slice %510 {offsets = [0, 0], sizes = [8, 128], strides = [1, 1]} : vector<8x512xf32> to vector<8x128xf32>
    %512 = arith.negf %511 : vector<8x128xf32>
    %513 = math.exp %512 : vector<8x128xf32>
    %cst_168 = arith.constant 1.000000e+00 : f32
    %514 = vector.broadcast %cst_168 : f32 to vector<8x128xf32>
    %515 = arith.addf %514, %513 : vector<8x128xf32>
    %516 = arith.divf %514, %515 : vector<8x128xf32>
    %517 = vector.extract_strided_slice %510 {offsets = [0, 128], sizes = [8, 128], strides = [1, 1]} : vector<8x512xf32> to vector<8x128xf32>
    %518 = arith.negf %517 : vector<8x128xf32>
    %519 = math.exp %518 : vector<8x128xf32>
    %cst_169 = arith.constant 1.000000e+00 : f32
    %520 = vector.broadcast %cst_169 : f32 to vector<8x128xf32>
    %521 = arith.addf %520, %519 : vector<8x128xf32>
    %522 = arith.divf %520, %521 : vector<8x128xf32>
    %523 = vector.extract_strided_slice %510 {offsets = [0, 256], sizes = [8, 128], strides = [1, 1]} : vector<8x512xf32> to vector<8x128xf32>
    %524 = math.tanh %523 : vector<8x128xf32>
    %525 = vector.extract_strided_slice %510 {offsets = [0, 384], sizes = [8, 128], strides = [1, 1]} : vector<8x512xf32> to vector<8x128xf32>
    %526 = arith.negf %525 : vector<8x128xf32>
    %527 = math.exp %526 : vector<8x128xf32>
    %cst_170 = arith.constant 1.000000e+00 : f32
    %528 = vector.broadcast %cst_170 : f32 to vector<8x128xf32>
    %529 = arith.addf %528, %527 : vector<8x128xf32>
    %530 = arith.divf %528, %529 : vector<8x128xf32>
    %531 = arith.mulf %522, %500 : vector<8x128xf32>
    %532 = arith.mulf %516, %524 : vector<8x128xf32>
    %533 = arith.addf %531, %532 : vector<8x128xf32>
    %534 = math.tanh %533 : vector<8x128xf32>
    %535 = arith.mulf %530, %534 : vector<8x128xf32>
    %c6_i32_171 = arith.constant 6 : i32
    %536 = arith.index_cast %c6_i32_171 : i32 to index
    %c0_172 = arith.constant 0 : index
    %c0_173 = arith.constant 0 : index
    %537 = vector.load %arg30[%536, %c0_172, %c0_173] : memref<8x8x512xbf16, #tpu.memory_space<vmem>>, vector<1x8x512xbf16>
    %538 = vector.shape_cast %537 : vector<1x8x512xbf16> to vector<8x512xbf16>
    %539 = arith.truncf %535 : vector<8x128xf32> to vector<8x128xbf16>
    %c0_174 = arith.constant 0 : index
    %c0_175 = arith.constant 0 : index
    %540 = vector.load %arg7[%c0_174, %c0_175] : memref<128x512xbf16, #tpu.memory_space<vmem>>, vector<128x512xbf16>
    %cst_176 = arith.constant dense<0.000000e+00> : vector<8x512xf32>
    %541 = tpu.matmul %539, %540, %cst_176 {dimension_numbers = #tpu.dot_dimension_numbers<[1], [0], [0], [1], [0, 0, 1, 1], [], []>} : vector<8x128xbf16>, vector<128x512xbf16>, vector<8x512xf32> -> vector<8x512xf32>
    %542 = arith.extf %538 : vector<8x512xbf16> to vector<8x512xf32>
    %543 = arith.addf %542, %541 : vector<8x512xf32>
    %544 = vector.extract_strided_slice %543 {offsets = [0, 0], sizes = [8, 128], strides = [1, 1]} : vector<8x512xf32> to vector<8x128xf32>
    %545 = arith.negf %544 : vector<8x128xf32>
    %546 = math.exp %545 : vector<8x128xf32>
    %cst_177 = arith.constant 1.000000e+00 : f32
    %547 = vector.broadcast %cst_177 : f32 to vector<8x128xf32>
    %548 = arith.addf %547, %546 : vector<8x128xf32>
    %549 = arith.divf %547, %548 : vector<8x128xf32>
    %550 = vector.extract_strided_slice %543 {offsets = [0, 128], sizes = [8, 128], strides = [1, 1]} : vector<8x512xf32> to vector<8x128xf32>
    %551 = arith.negf %550 : vector<8x128xf32>
    %552 = math.exp %551 : vector<8x128xf32>
    %cst_178 = arith.constant 1.000000e+00 : f32
    %553 = vector.broadcast %cst_178 : f32 to vector<8x128xf32>
    %554 = arith.addf %553, %552 : vector<8x128xf32>
    %555 = arith.divf %553, %554 : vector<8x128xf32>
    %556 = vector.extract_strided_slice %543 {offsets = [0, 256], sizes = [8, 128], strides = [1, 1]} : vector<8x512xf32> to vector<8x128xf32>
    %557 = math.tanh %556 : vector<8x128xf32>
    %558 = vector.extract_strided_slice %543 {offsets = [0, 384], sizes = [8, 128], strides = [1, 1]} : vector<8x512xf32> to vector<8x128xf32>
    %559 = arith.negf %558 : vector<8x128xf32>
    %560 = math.exp %559 : vector<8x128xf32>
    %cst_179 = arith.constant 1.000000e+00 : f32
    %561 = vector.broadcast %cst_179 : f32 to vector<8x128xf32>
    %562 = arith.addf %561, %560 : vector<8x128xf32>
    %563 = arith.divf %561, %562 : vector<8x128xf32>
    %564 = arith.mulf %555, %533 : vector<8x128xf32>
    %565 = arith.mulf %549, %557 : vector<8x128xf32>
    %566 = arith.addf %564, %565 : vector<8x128xf32>
    %567 = math.tanh %566 : vector<8x128xf32>
    %568 = arith.mulf %563, %567 : vector<8x128xf32>
    %c7_i32_180 = arith.constant 7 : i32
    %569 = arith.index_cast %c7_i32_180 : i32 to index
    %c0_181 = arith.constant 0 : index
    %c0_182 = arith.constant 0 : index
    %570 = vector.load %arg30[%569, %c0_181, %c0_182] : memref<8x8x512xbf16, #tpu.memory_space<vmem>>, vector<1x8x512xbf16>
    %571 = vector.shape_cast %570 : vector<1x8x512xbf16> to vector<8x512xbf16>
    %572 = arith.truncf %568 : vector<8x128xf32> to vector<8x128xbf16>
    %c0_183 = arith.constant 0 : index
    %c0_184 = arith.constant 0 : index
    %573 = vector.load %arg7[%c0_183, %c0_184] : memref<128x512xbf16, #tpu.memory_space<vmem>>, vector<128x512xbf16>
    %cst_185 = arith.constant dense<0.000000e+00> : vector<8x512xf32>
    %574 = tpu.matmul %572, %573, %cst_185 {dimension_numbers = #tpu.dot_dimension_numbers<[1], [0], [0], [1], [0, 0, 1, 1], [], []>} : vector<8x128xbf16>, vector<128x512xbf16>, vector<8x512xf32> -> vector<8x512xf32>
    %575 = arith.extf %571 : vector<8x512xbf16> to vector<8x512xf32>
    %576 = arith.addf %575, %574 : vector<8x512xf32>
    %577 = vector.extract_strided_slice %576 {offsets = [0, 0], sizes = [8, 128], strides = [1, 1]} : vector<8x512xf32> to vector<8x128xf32>
    %578 = arith.negf %577 : vector<8x128xf32>
    %579 = math.exp %578 : vector<8x128xf32>
    %cst_186 = arith.constant 1.000000e+00 : f32
    %580 = vector.broadcast %cst_186 : f32 to vector<8x128xf32>
    %581 = arith.addf %580, %579 : vector<8x128xf32>
    %582 = arith.divf %580, %581 : vector<8x128xf32>
    %583 = vector.extract_strided_slice %576 {offsets = [0, 128], sizes = [8, 128], strides = [1, 1]} : vector<8x512xf32> to vector<8x128xf32>
    %584 = arith.negf %583 : vector<8x128xf32>
    %585 = math.exp %584 : vector<8x128xf32>
    %cst_187 = arith.constant 1.000000e+00 : f32
    %586 = vector.broadcast %cst_187 : f32 to vector<8x128xf32>
    %587 = arith.addf %586, %585 : vector<8x128xf32>
    %588 = arith.divf %586, %587 : vector<8x128xf32>
    %589 = vector.extract_strided_slice %576 {offsets = [0, 256], sizes = [8, 128], strides = [1, 1]} : vector<8x512xf32> to vector<8x128xf32>
    %590 = math.tanh %589 : vector<8x128xf32>
    %591 = vector.extract_strided_slice %576 {offsets = [0, 384], sizes = [8, 128], strides = [1, 1]} : vector<8x512xf32> to vector<8x128xf32>
    %592 = arith.negf %591 : vector<8x128xf32>
    %593 = math.exp %592 : vector<8x128xf32>
    %cst_188 = arith.constant 1.000000e+00 : f32
    %594 = vector.broadcast %cst_188 : f32 to vector<8x128xf32>
    %595 = arith.addf %594, %593 : vector<8x128xf32>
    %596 = arith.divf %594, %595 : vector<8x128xf32>
    %597 = arith.mulf %588, %566 : vector<8x128xf32>
    %598 = arith.mulf %582, %590 : vector<8x128xf32>
    %599 = arith.addf %597, %598 : vector<8x128xf32>
    %600 = math.tanh %599 : vector<8x128xf32>
    %601 = arith.mulf %596, %600 : vector<8x128xf32>
    %c8_i32_189 = arith.constant 8 : i32
    %c1_190 = arith.constant 1 : index
    %c0_191 = arith.constant 0 : index
    %c0_192 = arith.constant 0 : index
    %602 = vector.load %arg28[%c1_190, %c0_191, %c0_192] : memref<2x8x128xf32, #tpu.memory_space<vmem>>, vector<1x8x128xf32>
    %603 = vector.shape_cast %602 : vector<1x8x128xf32> to vector<8x128xf32>
    %604 = vector.shape_cast %601 : vector<8x128xf32> to vector<1x8x128xf32>
    tpu.vector_store %arg28[%c1_190, %c0_191, %c0_192], %604 {strides = array<i32>} : memref<2x8x128xf32, #tpu.memory_space<vmem>>, vector<1x8x128xf32>,
    %c1_193 = arith.constant 1 : index
    %c0_194 = arith.constant 0 : index
    %c0_195 = arith.constant 0 : index
    %605 = vector.load %arg29[%c1_193, %c0_194, %c0_195] : memref<2x8x128xf32, #tpu.memory_space<vmem>>, vector<1x8x128xf32>
    %606 = vector.shape_cast %605 : vector<1x8x128xf32> to vector<8x128xf32>
    %607 = vector.shape_cast %599 : vector<8x128xf32> to vector<1x8x128xf32>
    tpu.vector_store %arg29[%c1_193, %c0_194, %c0_195], %607 {strides = array<i32>} : memref<2x8x128xf32, #tpu.memory_space<vmem>>, vector<1x8x128xf32>,
    %608 = arith.truncf %601 : vector<8x128xf32> to vector<8x128xbf16>
    %c0_196 = arith.constant 0 : index
    %c0_197 = arith.constant 0 : index
    %609 = vector.load %arg9[%c0_196, %c0_197] : memref<128x128xbf16, #tpu.memory_space<vmem>>, vector<128x128xbf16>
    %cst_198 = arith.constant dense<0.000000e+00> : vector<8x128xf32>
    %610 = tpu.matmul %608, %609, %cst_198 {dimension_numbers = #tpu.dot_dimension_numbers<[1], [0], [0], [1], [0, 0, 1, 1], [], []>} : vector<8x128xbf16>, vector<128x128xbf16>, vector<8x128xf32> -> vector<8x128xf32>
    %c0_199 = arith.constant 0 : index
    %c0_200 = arith.constant 0 : index
    %611 = vector.load %arg10[%c0_199, %c0_200] : memref<1x128xf32, #tpu.memory_space<vmem>>, vector<1x128xf32>
    %612 = vector.broadcast %611 : vector<1x128xf32> to vector<8x128xf32>
    %613 = arith.addf %610, %612 : vector<8x128xf32>
    %cst_201 = arith.constant dense<0.000000e+00> : vector<8xf32>
    %614 = vector.multi_reduction <add>, %613, %cst_201 [1] : vector<8x128xf32> to vector<8xf32>
    %615 = vector.shape_cast %614 : vector<8xf32> to vector<8x1xf32>
    %cst_202 = arith.constant 6.250000e-02 : f32
    %616 = vector.broadcast %cst_202 : f32 to vector<8x1xf32>
    %617 = arith.mulf %615, %616 : vector<8x1xf32>
    %618 = vector.broadcast %617 : vector<8x1xf32> to vector<8x128xf32>
    %619 = arith.subf %613, %618 : vector<8x128xf32>
    %620 = tpu.iota {dimensions = array<i32: 1>} : vector<1x128xi32>
    %c16_i32 = arith.constant 16 : i32
    %621 = vector.broadcast %c16_i32 : i32 to vector<1x128xi32>
    %622 = arith.cmpi slt, %620, %621 : vector<1x128xi32>
    %cst_203 = arith.constant 0.000000e+00 : f32
    %623 = vector.shape_cast %622 : vector<1x128xi1> to vector<1x128xi1>
    %624 = vector.broadcast %623 : vector<1x128xi1> to vector<8x128xi1>
    %625 = vector.broadcast %cst_203 : f32 to vector<8x128xf32>
    %626 = arith.select %624, %619, %625 : vector<8x128xi1>, vector<8x128xf32>
    %627 = arith.mulf %626, %626 : vector<8x128xf32>
    %cst_204 = arith.constant dense<0.000000e+00> : vector<8xf32>
    %628 = vector.multi_reduction <add>, %627, %cst_204 [1] : vector<8x128xf32> to vector<8xf32>
    %629 = vector.shape_cast %628 : vector<8xf32> to vector<8x1xf32>
    %cst_205 = arith.constant 6.250000e-02 : f32
    %630 = vector.broadcast %cst_205 : f32 to vector<8x1xf32>
    %631 = arith.mulf %629, %630 : vector<8x1xf32>
    %cst_206 = arith.constant 9.99999974E-6 : f32
    %632 = vector.broadcast %cst_206 : f32 to vector<8x1xf32>
    %633 = arith.addf %631, %632 : vector<8x1xf32>
    %634 = math.rsqrt %633 : vector<8x1xf32>
    %635 = vector.broadcast %634 : vector<8x1xf32> to vector<8x128xf32>
    %636 = arith.mulf %619, %635 : vector<8x128xf32>
    %c0_207 = arith.constant 0 : index
    %c0_208 = arith.constant 0 : index
    %637 = vector.load %arg11[%c0_207, %c0_208] : memref<1x128xf32, #tpu.memory_space<vmem>>, vector<1x128xf32>
    %638 = vector.broadcast %637 : vector<1x128xf32> to vector<8x128xf32>
    %639 = arith.mulf %636, %638 : vector<8x128xf32>
    %c0_209 = arith.constant 0 : index
    %c0_210 = arith.constant 0 : index
    %640 = vector.load %arg12[%c0_209, %c0_210] : memref<1x128xf32, #tpu.memory_space<vmem>>, vector<1x128xf32>
    %641 = vector.broadcast %640 : vector<1x128xf32> to vector<8x128xf32>
    %642 = arith.addf %639, %641 : vector<8x128xf32>
    %cst_211 = arith.constant 0.000000e+00 : f32
    %643 = vector.broadcast %cst_211 : f32 to vector<8x128xf32>
    %644 = arith.maximumf %642, %643 : vector<8x128xf32>
    %645 = arith.truncf %644 : vector<8x128xf32> to vector<8x128xbf16>
    %c0_212 = arith.constant 0 : index
    %c0_213 = arith.constant 0 : index
    %646 = vector.load %arg13[%c0_212, %c0_213] : memref<128x128xbf16, #tpu.memory_space<vmem>>, vector<128x128xbf16>
    %cst_214 = arith.constant dense<0.000000e+00> : vector<8x128xf32>
    %647 = tpu.matmul %645, %646, %cst_214 {dimension_numbers = #tpu.dot_dimension_numbers<[1], [0], [0], [1], [0, 0, 1, 1], [], []>} : vector<8x128xbf16>, vector<128x128xbf16>, vector<8x128xf32> -> vector<8x128xf32>
    %c0_215 = arith.constant 0 : index
    %c0_216 = arith.constant 0 : index
    %648 = vector.load %arg14[%c0_215, %c0_216] : memref<1x128xf32, #tpu.memory_space<vmem>>, vector<1x128xf32>
    %649 = vector.broadcast %648 : vector<1x128xf32> to vector<8x128xf32>
    %650 = arith.addf %647, %649 : vector<8x128xf32>
    %cst_217 = arith.constant dense<0.000000e+00> : vector<8xf32>
    %651 = vector.multi_reduction <add>, %650, %cst_217 [1] : vector<8x128xf32> to vector<8xf32>
    %652 = vector.shape_cast %651 : vector<8xf32> to vector<8x1xf32>
    %cst_218 = arith.constant 1.250000e-01 : f32
    %653 = vector.broadcast %cst_218 : f32 to vector<8x1xf32>
    %654 = arith.mulf %652, %653 : vector<8x1xf32>
    %655 = vector.broadcast %654 : vector<8x1xf32> to vector<8x128xf32>
    %656 = arith.subf %650, %655 : vector<8x128xf32>
    %657 = tpu.iota {dimensions = array<i32: 1>} : vector<1x128xi32>
    %c8_i32_219 = arith.constant 8 : i32
    %658 = vector.broadcast %c8_i32_219 : i32 to vector<1x128xi32>
    %659 = arith.cmpi slt, %657, %658 : vector<1x128xi32>
    %cst_220 = arith.constant 0.000000e+00 : f32
    %660 = vector.shape_cast %659 : vector<1x128xi1> to vector<1x128xi1>
    %661 = vector.broadcast %660 : vector<1x128xi1> to vector<8x128xi1>
    %662 = vector.broadcast %cst_220 : f32 to vector<8x128xf32>
    %663 = arith.select %661, %656, %662 : vector<8x128xi1>, vector<8x128xf32>
    %664 = arith.mulf %663, %663 : vector<8x128xf32>
    %cst_221 = arith.constant dense<0.000000e+00> : vector<8xf32>
    %665 = vector.multi_reduction <add>, %664, %cst_221 [1] : vector<8x128xf32> to vector<8xf32>
    %666 = vector.shape_cast %665 : vector<8xf32> to vector<8x1xf32>
    %cst_222 = arith.constant 1.250000e-01 : f32
    %667 = vector.broadcast %cst_222 : f32 to vector<8x1xf32>
    %668 = arith.mulf %666, %667 : vector<8x1xf32>
    %cst_223 = arith.constant 9.99999974E-6 : f32
    %669 = vector.broadcast %cst_223 : f32 to vector<8x1xf32>
    %670 = arith.addf %668, %669 : vector<8x1xf32>
    %671 = math.rsqrt %670 : vector<8x1xf32>
    %672 = vector.broadcast %671 : vector<8x1xf32> to vector<8x128xf32>
    %673 = arith.mulf %656, %672 : vector<8x128xf32>
    %c0_224 = arith.constant 0 : index
    %c0_225 = arith.constant 0 : index
    %674 = vector.load %arg15[%c0_224, %c0_225] : memref<1x128xf32, #tpu.memory_space<vmem>>, vector<1x128xf32>
    %675 = vector.broadcast %674 : vector<1x128xf32> to vector<8x128xf32>
    %676 = arith.mulf %673, %675 : vector<8x128xf32>
    %c0_226 = arith.constant 0 : index
    %c0_227 = arith.constant 0 : index
    %677 = vector.load %arg16[%c0_226, %c0_227] : memref<1x128xf32, #tpu.memory_space<vmem>>, vector<1x128xf32>
    %678 = vector.broadcast %677 : vector<1x128xf32> to vector<8x128xf32>
    %679 = arith.addf %676, %678 : vector<8x128xf32>
    %cst_228 = arith.constant 0.000000e+00 : f32
    %680 = vector.broadcast %cst_228 : f32 to vector<8x128xf32>
    %681 = arith.maximumf %679, %680 : vector<8x128xf32>
    %682 = arith.truncf %681 : vector<8x128xf32> to vector<8x128xbf16>
    %c0_229 = arith.constant 0 : index
    %c0_230 = arith.constant 0 : index
    %683 = vector.load %arg17[%c0_229, %c0_230] : memref<128x128xbf16, #tpu.memory_space<vmem>>, vector<128x128xbf16>
    %cst_231 = arith.constant dense<0.000000e+00> : vector<8x128xf32>
    %684 = tpu.matmul %682, %683, %cst_231 {dimension_numbers = #tpu.dot_dimension_numbers<[1], [0], [0], [1], [0, 0, 1, 1], [], []>} : vector<8x128xbf16>, vector<128x128xbf16>, vector<8x128xf32> -> vector<8x128xf32>
    %c0_232 = arith.constant 0 : index
    %c0_233 = arith.constant 0 : index
    %685 = vector.load %arg18[%c0_232, %c0_233] : memref<1x128xf32, #tpu.memory_space<vmem>>, vector<1x128xf32>
    %686 = vector.broadcast %685 : vector<1x128xf32> to vector<8x128xf32>
    %687 = arith.addf %684, %686 : vector<8x128xf32>
    %cst_234 = arith.constant dense<0.000000e+00> : vector<8xf32>
    %688 = vector.multi_reduction <add>, %687, %cst_234 [1] : vector<8x128xf32> to vector<8xf32>
    %689 = vector.shape_cast %688 : vector<8xf32> to vector<8x1xf32>
    %cst_235 = arith.constant 2.500000e-01 : f32
    %690 = vector.broadcast %cst_235 : f32 to vector<8x1xf32>
    %691 = arith.mulf %689, %690 : vector<8x1xf32>
    %692 = vector.broadcast %691 : vector<8x1xf32> to vector<8x128xf32>
    %693 = arith.subf %687, %692 : vector<8x128xf32>
    %694 = tpu.iota {dimensions = array<i32: 1>} : vector<1x128xi32>
    %c4_i32_236 = arith.constant 4 : i32
    %695 = vector.broadcast %c4_i32_236 : i32 to vector<1x128xi32>
    %696 = arith.cmpi slt, %694, %695 : vector<1x128xi32>
    %cst_237 = arith.constant 0.000000e+00 : f32
    %697 = vector.shape_cast %696 : vector<1x128xi1> to vector<1x128xi1>
    %698 = vector.broadcast %697 : vector<1x128xi1> to vector<8x128xi1>
    %699 = vector.broadcast %cst_237 : f32 to vector<8x128xf32>
    %700 = arith.select %698, %693, %699 : vector<8x128xi1>, vector<8x128xf32>
    %701 = arith.mulf %700, %700 : vector<8x128xf32>
    %cst_238 = arith.constant dense<0.000000e+00> : vector<8xf32>
    %702 = vector.multi_reduction <add>, %701, %cst_238 [1] : vector<8x128xf32> to vector<8xf32>
    %703 = vector.shape_cast %702 : vector<8xf32> to vector<8x1xf32>
    %cst_239 = arith.constant 2.500000e-01 : f32
    %704 = vector.broadcast %cst_239 : f32 to vector<8x1xf32>
    %705 = arith.mulf %703, %704 : vector<8x1xf32>
    %cst_240 = arith.constant 9.99999974E-6 : f32
    %706 = vector.broadcast %cst_240 : f32 to vector<8x1xf32>
    %707 = arith.addf %705, %706 : vector<8x1xf32>
    %708 = math.rsqrt %707 : vector<8x1xf32>
    %709 = vector.broadcast %708 : vector<8x1xf32> to vector<8x128xf32>
    %710 = arith.mulf %693, %709 : vector<8x128xf32>
    %c0_241 = arith.constant 0 : index
    %c0_242 = arith.constant 0 : index
    %711 = vector.load %arg19[%c0_241, %c0_242] : memref<1x128xf32, #tpu.memory_space<vmem>>, vector<1x128xf32>
    %712 = vector.broadcast %711 : vector<1x128xf32> to vector<8x128xf32>
    %713 = arith.mulf %710, %712 : vector<8x128xf32>
    %c0_243 = arith.constant 0 : index
    %c0_244 = arith.constant 0 : index
    %714 = vector.load %arg20[%c0_243, %c0_244] : memref<1x128xf32, #tpu.memory_space<vmem>>, vector<1x128xf32>
    %715 = vector.broadcast %714 : vector<1x128xf32> to vector<8x128xf32>
    %716 = arith.addf %713, %715 : vector<8x128xf32>
    %cst_245 = arith.constant 0.000000e+00 : f32
    %717 = vector.broadcast %cst_245 : f32 to vector<8x128xf32>
    %718 = arith.maximumf %716, %717 : vector<8x128xf32>
    %719 = arith.truncf %718 : vector<8x128xf32> to vector<8x128xbf16>
    %c0_246 = arith.constant 0 : index
    %c0_247 = arith.constant 0 : index
    %720 = vector.load %arg21[%c0_246, %c0_247] : memref<128x128xbf16, #tpu.memory_space<vmem>>, vector<128x128xbf16>
    %cst_248 = arith.constant dense<0.000000e+00> : vector<8x128xf32>
    %721 = tpu.matmul %719, %720, %cst_248 {dimension_numbers = #tpu.dot_dimension_numbers<[1], [0], [0], [1], [0, 0, 1, 1], [], []>} : vector<8x128xbf16>, vector<128x128xbf16>, vector<8x128xf32> -> vector<8x128xf32>
    %c0_249 = arith.constant 0 : index
    %c0_250 = arith.constant 0 : index
    %722 = vector.load %arg22[%c0_249, %c0_250] : memref<1x128xf32, #tpu.memory_space<vmem>>, vector<1x128xf32>
    %723 = vector.broadcast %722 : vector<1x128xf32> to vector<8x128xf32>
    %724 = arith.addf %721, %723 : vector<8x128xf32>
    %cst_251 = arith.constant dense<0.000000e+00> : vector<8xf32>
    %725 = vector.multi_reduction <add>, %724, %cst_251 [1] : vector<8x128xf32> to vector<8xf32>
    %726 = vector.shape_cast %725 : vector<8xf32> to vector<8x1xf32>
    %cst_252 = arith.constant 5.000000e-01 : f32
    %727 = vector.broadcast %cst_252 : f32 to vector<8x1xf32>
    %728 = arith.mulf %726, %727 : vector<8x1xf32>
    %729 = vector.broadcast %728 : vector<8x1xf32> to vector<8x128xf32>
    %730 = arith.subf %724, %729 : vector<8x128xf32>
    %731 = tpu.iota {dimensions = array<i32: 1>} : vector<1x128xi32>
    %c2_i32_253 = arith.constant 2 : i32
    %732 = vector.broadcast %c2_i32_253 : i32 to vector<1x128xi32>
    %733 = arith.cmpi slt, %731, %732 : vector<1x128xi32>
    %cst_254 = arith.constant 0.000000e+00 : f32
    %734 = vector.shape_cast %733 : vector<1x128xi1> to vector<1x128xi1>
    %735 = vector.broadcast %734 : vector<1x128xi1> to vector<8x128xi1>
    %736 = vector.broadcast %cst_254 : f32 to vector<8x128xf32>
    %737 = arith.select %735, %730, %736 : vector<8x128xi1>, vector<8x128xf32>
    %738 = arith.mulf %737, %737 : vector<8x128xf32>
    %cst_255 = arith.constant dense<0.000000e+00> : vector<8xf32>
    %739 = vector.multi_reduction <add>, %738, %cst_255 [1] : vector<8x128xf32> to vector<8xf32>
    %740 = vector.shape_cast %739 : vector<8xf32> to vector<8x1xf32>
    %cst_256 = arith.constant 5.000000e-01 : f32
    %741 = vector.broadcast %cst_256 : f32 to vector<8x1xf32>
    %742 = arith.mulf %740, %741 : vector<8x1xf32>
    %cst_257 = arith.constant 9.99999974E-6 : f32
    %743 = vector.broadcast %cst_257 : f32 to vector<8x1xf32>
    %744 = arith.addf %742, %743 : vector<8x1xf32>
    %745 = math.rsqrt %744 : vector<8x1xf32>
    %746 = vector.broadcast %745 : vector<8x1xf32> to vector<8x128xf32>
    %747 = arith.mulf %730, %746 : vector<8x128xf32>
    %c0_258 = arith.constant 0 : index
    %c0_259 = arith.constant 0 : index
    %748 = vector.load %arg23[%c0_258, %c0_259] : memref<1x128xf32, #tpu.memory_space<vmem>>, vector<1x128xf32>
    %749 = vector.broadcast %748 : vector<1x128xf32> to vector<8x128xf32>
    %750 = arith.mulf %747, %749 : vector<8x128xf32>
    %c0_260 = arith.constant 0 : index
    %c0_261 = arith.constant 0 : index
    %751 = vector.load %arg24[%c0_260, %c0_261] : memref<1x128xf32, #tpu.memory_space<vmem>>, vector<1x128xf32>
    %752 = vector.broadcast %751 : vector<1x128xf32> to vector<8x128xf32>
    %753 = arith.addf %750, %752 : vector<8x128xf32>
    %cst_262 = arith.constant 0.000000e+00 : f32
    %754 = vector.broadcast %cst_262 : f32 to vector<8x128xf32>
    %755 = arith.maximumf %753, %754 : vector<8x128xf32>
    %756 = arith.truncf %755 : vector<8x128xf32> to vector<8x128xbf16>
    %c0_263 = arith.constant 0 : index
    %c0_264 = arith.constant 0 : index
    %757 = vector.load %arg25[%c0_263, %c0_264] : memref<128x128xbf16, #tpu.memory_space<vmem>>, vector<128x128xbf16>
    %cst_265 = arith.constant dense<0.000000e+00> : vector<8x128xf32>
    %758 = tpu.matmul %756, %757, %cst_265 {dimension_numbers = #tpu.dot_dimension_numbers<[1], [0], [0], [1], [0, 0, 1, 1], [], []>} : vector<8x128xbf16>, vector<128x128xbf16>, vector<8x128xf32> -> vector<8x128xf32>
    %c0_266 = arith.constant 0 : index
    %c0_267 = arith.constant 0 : index
    %759 = vector.load %arg26[%c0_266, %c0_267] : memref<1x128xf32, #tpu.memory_space<vmem>>, vector<1x128xf32>
    %760 = vector.broadcast %759 : vector<1x128xf32> to vector<8x128xf32>
    %761 = arith.addf %758, %760 : vector<8x128xf32>
    %c0_268 = arith.constant 0 : index
    %c0_269 = arith.constant 0 : index
    %762 = vector.load %arg27[%c0_268, %c0_269] : memref<8x128xf32, #tpu.memory_space<vmem>>, vector<8x128xf32>
    tpu.vector_store %arg27[%c0_268, %c0_269], %761 {strides = array<i32>} : memref<8x128xf32, #tpu.memory_space<vmem>>, vector<8x128xf32>,
    return
  }
}

</mosaic_0001>

<bundles_post_ra>
// kernel: stateful_lstm_forward.1
= control target key start
LH: loop header
LB: loop body
LE: loop exit
PB: predicated region body
PF: predicated region fallthrough
CT: control target
= control target key end

     0   :  { %s7333_s3 = smov 3   ;;  %s7334_s10 = smov 4   ;;  %vm182_vm0 = vcmask 130048   ;;  %s8985_s0 = inlined_call_operand.smem [shape: u32[30], index: -1, kind: input, shape index: {}] }
   0x1   :  { %s5071_s6 = sld [smem:[%s8985_s0 + %s7333_s3]]   ;;  %s7335_s14 = smov 1  }
   0x2   :  { %s7373_s9 = sld [smem:[%s8985_s0]]   ;;  %s7336_s18 = smov 5  }
   0x3   :  { %s7378_s13 = sld [smem:[%s8985_s0 + %s7334_s10]]   ;;  %s7337_s22 = smov 2  }
   0x4   :  { %s7475_s17 = sld [smem:[%s8985_s0 + %s7335_s14]]   ;;  %s7338_s26 = smov 6  }
   0x5   :  { %s5073_s21 = sld [smem:[%s8985_s0 + %s7336_s18]]   ;;  %s7339_s30 = smov 7  }
   0x6   :  { %s7670_s25 = sld [smem:[%s8985_s0 + %s7337_s22]]   ;;  %s7340_s4 = smov 8  }
   0x7   :  { %v5116_v0 = vld [vmem:[%s5071_s6] sm:$0xf]  ;;  %v6660_v1 = vld [vmem:[%s5071_s6 + $0xc] sm:$0xf0]  ;;  %v5124_v2 = vld [vmem:[%s5071_s6 + $0x8] sm:$0xf]  ;;  %s8088_s29 = sld [smem:[%s8985_s0 + %s7338_s26]]  }
   0x8   :  { %v5117_v3 = vor.u32 %v6660_v1, %v5116_v0  ;;  %v6661_v4 = vld [vmem:[%s5071_s6 + $0x14] sm:$0xf0]  ;;  %v6659_v5 = vld [vmem:[%s5071_s6 + $0xc] sm:$0xf]  ;;  %v5126_v6 = vld [vmem:[%s5071_s6 + $0x18] sm:$0xf0]  ;;  %s8230_s3 = sld [smem:[%s8985_s0 + %s7339_s30]]  }
   0x9   :  { %v5125_v7 = vor.u32 %v6661_v4, %v5124_v2  ;;  %v5129_v8 = vor.u32 %v6659_v5, %v5126_v6  ;;  %v7381_v9 = vld [vmem:[%s7373_s9] sm:$0xff]  ;;  %v7384_v10 = vld [vmem:[%s7373_s9 + $0x18] sm:$0xff]  ;;  %v5118_v12 = vld [vmem:[%s5071_s6 + $0x10] sm:$0xf0]  ;;  %s8292_s7 = sld [smem:[%s8985_s0 + %s7340_s4]]   ;;  %s7341_s8 = smov 29  }
   0xa   :  { %v6658_v11 = vld [vmem:[%s5071_s6 + $0x4] sm:$0xf]  ;;  %202 = vmatpush.bf16.msra.mxu0 %v5117_v3  ;;  %7026 = vmatpush.bf16.msra.mxu1 %v5117_v3  ;;  %v5262_v15 = vld [vmem:[%s7378_s13 + $0xf0] sm:$0xf0]  ;;  %v5260_v16 = vld [vmem:[%s7378_s13 + $0xe0] sm:$0xf]  ;;  %s8403_s11 = sld [smem:[%s8985_s0 + %s7341_s8]]  }
   0xb   :  { %v6690_v13 = vld [vmem:[%s7378_s13 + $0xe4] sm:$0xf]  ;;  %260 = vmatpush.bf16.msra.mxu2 %v5125_v7  ;;  %289 = vmatpush.bf16.msra.mxu3 %v5129_v8  ;;  %v5121_v14 = vor.u32 %v6658_v11, %v5118_v12  ;;  %v6692_v17 = vld [vmem:[%s7378_s13 + $0xec] sm:$0xf0]  ;;  %v5244_v20 = vld [vmem:[%s7378_s13 + $0xc0] sm:$0xf] }
   0xc   :  { %v5265_v18 = vor.u32 %v6690_v13, %v5262_v15  ;;  %v5261_v19 = vor.u32 %v6692_v17, %v5260_v16  ;;  %v6688_v21 = vld [vmem:[%s7378_s13 + $0xcc] sm:$0xf0]  ;;  %v6691_v22 = vld [vmem:[%s7378_s13 + $0xec] sm:$0xf]  ;;  %v5270_v23 = vld [vmem:[%s7378_s13 + $0xf8] sm:$0xf0] }
   0xd   :  { %5130 = vmatmul.msk.bf16.vlgmr.msra.gmra.mxu0 %vm182_vm0, %v7381_v9  ;;  %5133 = vmatmul.msk.bf16.vlgmr.msra.gmra.mxu1 %vm182_vm0, %v7384_v10  ;;  %v6686_v24 = vld [vmem:[%s7378_s13 + $0xc4] sm:$0xf]  ;;  %v5246_v25 = vld [vmem:[%s7378_s13 + $0xd0] sm:$0xf0]  ;;  %v5273_v26 = vor.u32 %v6691_v22, %v5270_v23  ;;  %v6687_v28 = vld [vmem:[%s7378_s13 + $0xcc] sm:$0xf]  ;;  %v5245_v30 = vor.u32 %v6688_v21, %v5244_v20 }
   0xe   :  { %231 = vmatpush.bf16.msrb.mxu1 %v5121_v14  ;;  %5138 = vmatmul.msk.bf16.vlgmr.msra.gmra.mxu2 %vm182_vm0, %v7381_v9  ;;  %v5249_v27 = vor.u32 %v6686_v24, %v5246_v25  ;;  %v5254_v29 = vld [vmem:[%s7378_s13 + $0xd8] sm:$0xf0]  ;;  %v5228_v31 = vld [vmem:[%s7378_s13 + $0xa0] sm:$0xf]  ;;  %v5268_v33 = vld [vmem:[%s7378_s13 + $0xe8] sm:$0xf] }
   0xf   :  { %5142 = vmatmul.msk.bf16.vlgmr.msra.gmra.mxu3 %vm182_vm0, %v7381_v9  ;;  %540 = vmatpush.bf16.msrb.mxu0 %v5261_v19  ;;  %v5257_v32 = vor.u32 %v6687_v28, %v5254_v29  ;;  %v6693_v34 = vld [vmem:[%s7378_s13 + $0xf4] sm:$0xf0]  ;;  %v6684_v35 = vld [vmem:[%s7378_s13 + $0xac] sm:$0xf0]  ;;  %v6682_v37 = vld [vmem:[%s7378_s13 + $0xa4] sm:$0xf] }
  0x10   :  { %579 = vmatpush.bf16.msrb.mxu3 %v5273_v26  ;;  %v5269_v36 = vor.u32 %v6693_v34, %v5268_v33  ;;  %v5230_v38 = vld [vmem:[%s7378_s13 + $0xb0] sm:$0xf0]  ;;  %v5252_v40 = vld [vmem:[%s7378_s13 + $0xc8] sm:$0xf]  ;;  %v6689_v41 = vld [vmem:[%s7378_s13 + $0xd4] sm:$0xf0]  ;;  %v5229_v43 = vor.u32 %v6684_v35, %v5228_v31 }
  0x11   :  { %v5233_v39 = vor.u32 %v6682_v37, %v5230_v38  ;;  %v6683_v42 = vld [vmem:[%s7378_s13 + $0xac] sm:$0xf]  ;;  %v5253_v44 = vor.u32 %v6689_v41, %v5252_v40  ;;  %v5238_v45 = vld [vmem:[%s7378_s13 + $0xb8] sm:$0xf0]  ;;  %v6678_v46 = vld [vmem:[%s7378_s13 + $0x84] sm:$0xf] }
  0x12   :  { %553 = vmatpush.bf16.msra.mxu1 %v5265_v18  ;;  %566 = vmatpush.bf16.msrb.mxu2 %v5269_v36  ;;  %v5214_v47 = vld [vmem:[%s7378_s13 + $0x90] sm:$0xf0]  ;;  %v5212_v48 = vld [vmem:[%s7378_s13 + $0x80] sm:$0xf]  ;;  %v6680_v49 = vld [vmem:[%s7378_s13 + $0x8c] sm:$0xf0]  ;;  %v5241_v50 = vor.u32 %v6683_v42, %v5238_v45 }
  0x13   :  { %541 = vmatpush.bf16.msrb.mxu0 %v5245_v30  ;;  %v5236_v51 = vld [vmem:[%s7378_s13 + $0xa8] sm:$0xf]  ;;  %v6685_v52 = vld [vmem:[%s7378_s13 + $0xb4] sm:$0xf0]  ;;  %v5217_v53 = vor.u32 %v6678_v46, %v5214_v47  ;;  %v6679_v55 = vld [vmem:[%s7378_s13 + $0x8c] sm:$0xf]  ;;  %v5213_v56 = vor.u32 %v6680_v49, %v5212_v48 }
  0x14   :  { %580 = vmatpush.bf16.msrb.mxu3 %v5257_v32  ;;  %v5237_v54 = vor.u32 %v6685_v52, %v5236_v51  ;;  %v5220_v57 = vld [vmem:[%s7378_s13 + $0x88] sm:$0xf]  ;;  %v6681_v58 = vld [vmem:[%s7378_s13 + $0x94] sm:$0xf0]  ;;  %v5222_v59 = vld [vmem:[%s7378_s13 + $0x98] sm:$0xf0] }
  0x15   :  { %v7427_v60 = vld [vmem:[%s7373_s9 + $0x8] sm:$0xff]  ;;  %v5196_v61 = vld [vmem:[%s7378_s13 + $0x60] sm:$0xf]  ;;  %v6676_v62 = vld [vmem:[%s7378_s13 + $0x6c] sm:$0xf0]  ;;  %v5225_v63 = vor.u32 %v6679_v55, %v5222_v59  ;;  %v5221_v0 = vor.u32 %v6681_v58, %v5220_v57  ;;  %s7342_s12 = smov 28  }
  0x16   :  { %554 = vmatpush.bf16.msra.mxu1 %v5249_v27  ;;  %567 = vmatpush.bf16.msrb.mxu2 %v5253_v44  ;;  %v5197_v1 = vor.u32 %v6676_v62, %v5196_v61  ;;  %v5180_v2 = vld [vmem:[%s7378_s13 + $0x40] sm:$0xf]  ;;  %v6672_v3 = vld [vmem:[%s7378_s13 + $0x4c] sm:$0xf0]  ;;  %v5204_v4 = vld [vmem:[%s7378_s13 + $0x68] sm:$0xf]  ;;  %s8489_s15 = sld [smem:[%s8985_s0 + %s7342_s12]]  }
  0x17   :  { %542 = vmatpush.bf16.msrb.mxu0 %v5229_v43  ;;  %v6677_v5 = vld [vmem:[%s7378_s13 + $0x74] sm:$0xf0]  ;;  %v6675_v6 = vld [vmem:[%s7378_s13 + $0x6c] sm:$0xf]  ;;  %v5206_v7 = vld [vmem:[%s7378_s13 + $0x78] sm:$0xf0]  ;;  %v5181_v15 = vor.u32 %v6672_v3, %v5180_v2 }
  0x18   :  { %581 = vmatpush.bf16.msrb.mxu3 %v5241_v50  ;;  %v5164_v8 = vld [vmem:[%s7378_s13 + $0x20] sm:$0xf]  ;;  %v6674_v11 = vld [vmem:[%s7378_s13 + $0x64] sm:$0xf]  ;;  %v5205_v12 = vor.u32 %v6677_v5, %v5204_v4  ;;  %v5209_v13 = vor.u32 %v6675_v6, %v5206_v7  ;;  %v5188_v14 = vld [vmem:[%s7378_s13 + $0x48] sm:$0xf] }
  0x19   :  { %v6673_v17 = vld [vmem:[%s7378_s13 + $0x54] sm:$0xf0]  ;;  %v6671_v18 = vld [vmem:[%s7378_s13 + $0x4c] sm:$0xf]  ;;  %v5190_v19 = vld [vmem:[%s7378_s13 + $0x58] sm:$0xf0] }
  0x1a   :  { %555 = vmatpush.bf16.msra.mxu1 %v5233_v39  ;;  %568 = vmatpush.bf16.msrb.mxu2 %v5237_v54  ;;  %v6668_v20 = vld [vmem:[%s7378_s13 + $0x2c] sm:$0xf0]  ;;  %v5193_v21 = vor.u32 %v6671_v18, %v5190_v19  ;;  %v6670_v22 = vld [vmem:[%s7378_s13 + $0x44] sm:$0xf]  ;;  %v5182_v23 = vld [vmem:[%s7378_s13 + $0x50] sm:$0xf0]  ;;  %v5189_v27 = vor.u32 %v6673_v17, %v5188_v14 }
  0x1b   :  { %543 = vmatpush.bf16.msrb.mxu0 %v5213_v56  ;;  %v5185_v24 = vor.u32 %v6670_v22, %v5182_v23  ;;  %v6667_v25 = vld [vmem:[%s7378_s13 + $0x2c] sm:$0xf]  ;;  %v5174_v26 = vld [vmem:[%s7378_s13 + $0x38] sm:$0xf0]  ;;  %v5165_v28 = vor.u32 %v6668_v20, %v5164_v8  ;;  %v5172_v29 = vld [vmem:[%s7378_s13 + $0x28] sm:$0xf] }
  0x1c   :  { %582 = vmatpush.bf16.msrb.mxu3 %v5225_v63  ;;  %v6669_v30 = vld [vmem:[%s7378_s13 + $0x34] sm:$0xf0]  ;;  %v5148_v31 = vld [vmem:[%s7378_s13] sm:$0xf]  ;;  %v6664_v32 = vld [vmem:[%s7378_s13 + $0xc] sm:$0xf0]  ;;  %v5177_v33 = vor.u32 %v6667_v25, %v5174_v26 }
  0x1d   :  { %5131 = vmatmul.msk.bf16.gmra.mxu0 %vm182_vm0, %v7427_v60  ;;  %5134 = vmatmul.msk.bf16.vlgmr.msrb.gmra.mxu1 %vm182_vm0, %v7381_v9  ;;  %v5198_v9 = vld [vmem:[%s7378_s13 + $0x70] sm:$0xf0]  ;;  %v5173_v34 = vor.u32 %v6669_v30, %v5172_v29  ;;  %v6663_v35 = vld [vmem:[%s7378_s13 + $0xc] sm:$0xf]  ;;  %v5158_v36 = vld [vmem:[%s7378_s13 + $0x18] sm:$0xf0]  ;;  %v5149_v37 = vor.u32 %v6664_v32, %v5148_v31 }
  0x1e   :  { %556 = vmatpush.bf16.msra.mxu1 %v5217_v53  ;;  %5139 = vmatmul.msk.bf16.gmra.mxu2 %vm182_vm0, %v7427_v60  ;;  %v5201_v16 = vor.u32 %v6674_v11, %v5198_v9  ;;  %v5156_v38 = vld [vmem:[%s7378_s13 + $0x8] sm:$0xf]  ;;  %v6665_v39 = vld [vmem:[%s7378_s13 + $0x14] sm:$0xf0]  ;;  %v6656_v40 = vld [vmem:[%s7373_s9 + $0x10] sm:$0xff]  ;;  %v5161_v41 = vor.u32 %v6663_v35, %v5158_v36  ;;  %s7343_s16 = smov 10  }
  0x1f   :  { %5143 = vmatmul.msk.bf16.gmra.mxu3 %vm182_vm0, %v7427_v60  ;;  %569 = vmatpush.bf16.msrb.mxu2 %v5221_v0  ;;  %v5157_v42 = vor.u32 %v6665_v39, %v5156_v38  ;;  %v6666_v43 = vld [vmem:[%s7378_s13 + $0x24] sm:$0xf]  ;;  %v5166_v44 = vld [vmem:[%s7378_s13 + $0x30] sm:$0xf0]  ;;  %v132_v51 = vld [vmem:[%s5073_s21] sm:$0xf]  ;;  %s8869_s19 = sld [smem:[%s8985_s0 + %s7343_s16]]  }
  0x20   :  { %544 = vmatpush.bf16.msrb.mxu0 %v5197_v1  ;;  %583 = vmatpush.bf16.msrb.mxu3 %v5209_v13  ;;  %v5169_v45 = vor.u32 %v6666_v43, %v5166_v44  ;;  %v6662_v46 = vld [vmem:[%s7378_s13 + $0x4] sm:$0xf]  ;;  %v5150_v47 = vld [vmem:[%s7378_s13 + $0x10] sm:$0xf0]  ;;  %v7491_v52 = vperm.slane %v132_v51, 0  ;;  %v7496_v56 = vperm.slane %v132_v51, 2 }
  0x21   :  { %v5153_v48 = vor.u32 %v6662_v46, %v5150_v47  ;;  %v343_v49 = vld [vmem:[%s7475_s17] sm:$0xff]  ;;  %v7498_v57 = vperm.slane %v132_v51, 3  ;;  %v7512_v9 = vperm.slane %v132_v51, 1  ;;  %s7344_s20 = smov 9   ;;  %s7345_s24 = smov 11  }
  0x22   :  { %557 = vmatpush.bf16.msra.mxu1 %v5201_v16  ;;  %v347_v50 = vpack.c.bf16 %v343_v49, %v343_v49  ;;  %s8874_s23 = sld [smem:[%s8985_s0 + %s7344_s20]]   ;;  %s7346_s28 = smov 12  }
  0x23   :  { %570 = vmatpush.bf16.msrb.mxu2 %v5205_v12  ;;  %s8895_s27 = sld [smem:[%s8985_s0 + %s7345_s24]]   ;;  %s7347_s2 = smov 14  }
  0x24   :  { %545 = vmatpush.bf16.msrb.mxu0 %v5181_v15  ;;  %584 = vmatpush.bf16.msrb.mxu3 %v5193_v21  ;;  %s8903_s1 = sld [smem:[%s8985_s0 + %s7346_s28]]   ;;  %s7348_s6 = smov 13  }
  0x25   :  { %s8908_s5 = sld [smem:[%s8985_s0 + %s7347_s2]]   ;;  %s7349_s10 = smov 15  }
  0x26   :  { %558 = vmatpush.bf16.msra.mxu1 %v5185_v24  ;;  %s5081_s9 = sld [smem:[%s8985_s0 + %s7348_s6]]   ;;  %s7350_s14 = smov 16  }
  0x27   :  { %571 = vmatpush.bf16.msrb.mxu2 %v5189_v27  ;;  %s7351_s18 = smov 18   ;;  %s7352_s22 = smov 17  }
  0x28   :  { %546 = vmatpush.bf16.msrb.mxu0 %v5165_v28  ;;  %585 = vmatpush.bf16.msrb.mxu3 %v5177_v33  ;;  %s8930_s21 = sld [smem:[%s8985_s0 + %s7351_s18]]   ;;  %s7353_s26 = smov 19  }
  0x29   :  { %s7354_s30 = smov 20   ;;  %s7355_s4 = smov 22  }
  0x2a   :  { %559 = vmatpush.bf16.msra.mxu1 %v5169_v45  ;;  %s7356_s8 = smov 21   ;;  %s7357_s12 = smov 23  }
  0x2b   :  { %572 = vmatpush.bf16.msrb.mxu2 %v5173_v34  ;;  %s7358_s16 = smov 24   ;;  %s7359_s20 = smov 26  }
  0x2c   :  { %547 = vmatpush.bf16.msrb.mxu0 %v5149_v37  ;;  %586 = vmatpush.bf16.msrb.mxu3 %v5161_v41  ;;  %s7360_s24 = smov 25   ;;  %s7361_s28 = smov 27  }
  0x2d   :  { %5132 = vmatmul.msk.bf16.gmra.mxu0 %vm182_vm0, %v6656_v40  ;;  %5135 = vmatmul.msk.bf16.gmra.mxu1 %vm182_vm0, %v7427_v60 }
  0x2e   :  { %5140 = vmatmul.msk.bf16.gmra.mxu2 %vm182_vm0, %v6656_v40  ;;  %560 = vmatpush.bf16.msra.mxu1 %v5153_v48 }
  0x2f   :  { %5144 = vmatmul.msk.bf16.gmra.mxu3 %vm182_vm0, %v6656_v40  ;;  %573 = vmatpush.bf16.msrb.mxu2 %v5157_v42 }
  0x3d   :  { %5136 = vmatmul.msk.bf16.gmra.mxu1 %vm182_vm0, %v6656_v40  ;;  %548 = vmatmul.bf16.vlgmr.msrb.gmra.mxu0 %v347_v50 }
  0x3e   :  { %5141 = vmatmul.msk.bf16.gmra.mxu2 %vm182_vm0, %v7384_v10 }
  0x3f   :  { %5145 = vmatmul.msk.bf16.gmra.mxu3 %vm182_vm0, %v7384_v10 }
  0x4d   :  { %5137 = vmatmul.msk.bf16.gmra.mxu1 %vm182_vm0, %v7384_v10 }
  0x4e   :  { %574 = vmatmul.bf16.vlgmr.msrb.gmra.mxu2 %v347_v50 }
  0x4f   :  { %587 = vmatmul.bf16.vlgmr.msrb.gmra.mxu3 %v347_v50 }
  0x5d   :  { %561 = vmatmul.bf16.vlgmr.msra.gmra.mxu1 %v347_v50 }
  0x8a   :  { %v204_v53 = vpop.f32.mrf.mxu0  ;;  %v219_v54 = vpop.f32.mrf.mxu1 }
  0x8b   :  { %v7494_v55 = vadd.f32 %v219_v54, %v7491_v52  ;;  %v205_v30 = vadd.f32 %v204_v53, %v7491_v52 }
  0x91   :  { %v262_v10 = vpop.f32.mrf.mxu2 }
  0x92   :  { %v263_v58 = vadd.f32 %v262_v10, %v7496_v56  ;;  %v291_v59 = vpop.f32.mrf.mxu3  ;;  %v206_v60 = vpop.f32.mrf.mxu0 }
  0x93   :  { %v292_v61 = vadd.f32 %v291_v59, %v7498_v57  ;;  %v7502_v62 = vpop.f32.mrf.mxu1  ;;  %v207_v11 = vadd.f32 %v206_v60, %v7491_v52 }
  0x95   :  { %v7504_v63 = vpack.c.bf16 %v292_v61, %v263_v58 }
  0x99   :  { %v264_v0 = vpop.f32.mrf.mxu2 }
  0x9a   :  { %v265_v1 = vadd.f32 %v264_v0, %v7496_v56  ;;  %v293_v2 = vpop.f32.mrf.mxu3  ;;  %v209_v3 = vpop.f32.mrf.mxu0 }
  0x9b   :  { %v294_v4 = vadd.f32 %v293_v2, %v7498_v57  ;;  %v210_v5 = vadd.f32 %v209_v3, %v7491_v52  ;;  %v233_v6 = vpop.f32.mrf.mxu1 }
  0x9c   :  { %v234_v31 = vadd.f32 %v233_v6, %v7512_v9 }
  0x9d   :  { %v7509_v7 = vpack.c.bf16 %v294_v4, %v265_v1 }
  0x9e   :  { %v7535_v40 = vpack.c.bf16 %v234_v31, %v205_v30  ;;  %v5401_v30 = vld [vmem:[%s7378_s13 + $0xf8] sm:$0xf0] }
  0xa0   :  { %v592_v44 = vunpack.c.l.bf16 %v7535_v40 }
  0xa1   :  { %v267_v8 = vpop.f32.mrf.mxu2 }
  0xa2   :  { %v268_v12 = vadd.f32 %v267_v8, %v7496_v56  ;;  %v296_v13 = vpop.f32.mrf.mxu3  ;;  %v211_v14 = vpop.f32.mrf.mxu0 }
  0xa3   :  { %v297_v15 = vadd.f32 %v296_v13, %v7498_v57  ;;  %v235_v16 = vpop.f32.mrf.mxu1  ;;  %v212_v33 = vadd.f32 %v211_v14, %v7491_v52  ;;  %v6724_v13 = vld [vmem:[%s7378_s13 + $0xec] sm:$0xf0]  ;;  %v6722_v14 = vld [vmem:[%s7378_s13 + $0xe4] sm:$0xf] }
  0xa4   :  { %v236_v17 = vadd.f32 %v235_v16, %v7512_v9 }
  0xa5   :  { %v7517_v18 = vpack.c.bf16 %v297_v15, %v268_v12  ;;  %v5393_v15 = vld [vmem:[%s7378_s13 + $0xf0] sm:$0xf0] }
  0xa6   :  { %v7519_v19 = vpack.c.bf16 %v236_v17, %v207_v11  ;;  %v5391_v11 = vld [vmem:[%s7378_s13 + $0xe0] sm:$0xf] }
  0xa9   :  { %v269_v20 = vpop.f32.mrf.mxu2 }
  0xaa   :  { %v270_v21 = vadd.f32 %v269_v20, %v7496_v56  ;;  %v298_v22 = vpop.f32.mrf.mxu3  ;;  %v214_v23 = vpop.f32.mrf.mxu0  ;;  %v5392_v20 = vor.u32 %v6724_v13, %v5391_v11  ;;  %v6717_v13 = vld [vmem:[%s7378_s13 + $0xb4] sm:$0xf0] }
  0xab   :  { %v299_v24 = vadd.f32 %v298_v22, %v7498_v57  ;;  %v215_v25 = vadd.f32 %v214_v23, %v7491_v52  ;;  %v238_v26 = vpop.f32.mrf.mxu1  ;;  %v6725_v22 = vld [vmem:[%s7378_s13 + $0xf4] sm:$0xf0] }
  0xac   :  { %v239_v27 = vadd.f32 %v238_v26, %v7512_v9  ;;  %860 = vmatpush.bf16.msra.mxu0 %v5392_v20 }
  0xad   :  { %v7525_v28 = vpack.c.bf16 %v299_v24, %v270_v21  ;;  %v5399_v21 = vld [vmem:[%s7378_s13 + $0xe8] sm:$0xf] }
  0xae   :  { %v7527_v29 = vpack.c.bf16 %v239_v27, %v210_v5  ;;  %v5400_v26 = vor.u32 %v6725_v22, %v5399_v21  ;;  %v6723_v27 = vld [vmem:[%s7378_s13 + $0xec] sm:$0xf]  ;;  %v5369_v21 = vld [vmem:[%s7378_s13 + $0xb8] sm:$0xf0] }
  0xb0   :  { %886 = vmatpush.bf16.msra.mxu2 %v5400_v26  ;;  %v5297_v26 = vld [vmem:[%s7378_s13 + $0x30] sm:$0xf0] }
  0xb1   :  { %v272_v32 = vpop.f32.mrf.mxu2 }
  0xb2   :  { %v273_v34 = vadd.f32 %v272_v32, %v7496_v56  ;;  %v301_v35 = vpop.f32.mrf.mxu3  ;;  %v216_v36 = vpop.f32.mrf.mxu0  ;;  %v5404_v32 = vor.u32 %v6723_v27, %v5401_v30  ;;  %v5345_v30 = vld [vmem:[%s7378_s13 + $0x90] sm:$0xf0] }
  0xb3   :  { %v302_v37 = vadd.f32 %v301_v35, %v7498_v57  ;;  %v240_v38 = vpop.f32.mrf.mxu1  ;;  %v217_v59 = vadd.f32 %v216_v36, %v7491_v52  ;;  %v5377_v36 = vld [vmem:[%s7378_s13 + $0xd0] sm:$0xf0] }
  0xb4   :  { %v241_v39 = vadd.f32 %v240_v38, %v7512_v9  ;;  %v6721_v38 = vld [vmem:[%s7378_s13 + $0xd4] sm:$0xf0]  ;;  %899 = vmatpush.bf16.msra.mxu3 %v5404_v32 }
  0xb5   :  { %v7537_v41 = vpack.c.bf16 %v302_v37, %v273_v34  ;;  %v6718_v34 = vld [vmem:[%s7378_s13 + $0xc4] sm:$0xf]  ;;  %v5383_v37 = vld [vmem:[%s7378_s13 + $0xc8] sm:$0xf] }
  0xb6   :  { %v7539_v42 = vpack.c.bf16 %v241_v39, %v212_v33  ;;  %v6720_v33 = vld [vmem:[%s7378_s13 + $0xcc] sm:$0xf0] }
  0xb9   :  { %v274_v43 = vpop.f32.mrf.mxu2 }
  0xba   :  { %v275_v45 = vadd.f32 %v274_v43, %v7496_v56  ;;  %v303_v46 = vpop.f32.mrf.mxu3  ;;  %v549_v47 = vpop.f32.mrf.mxu0 }
  0xbb   :  { %v304_v48 = vadd.f32 %v303_v46, %v7498_v57  ;;  %v243_v49 = vpop.f32.mrf.mxu1  ;;  %v596_v50 = vadd.f32 %v592_v44, %v549_v47  ;;  %v5380_v44 = vor.u32 %v6718_v34, %v5377_v36  ;;  %v6719_v46 = vld [vmem:[%s7378_s13 + $0xcc] sm:$0xf]  ;;  %v5385_v47 = vld [vmem:[%s7378_s13 + $0xd8] sm:$0xf0] }
  0xbc   :  { %v244_v51 = vadd.f32 %v243_v49, %v7512_v9  ;;  %v5388_v49 = vor.u32 %v6719_v46, %v5385_v47  ;;  %v6711_v34 = vld [vmem:[%s7378_s13 + $0x8c] sm:$0xf]  ;;  %v5327_v46 = vld [vmem:[%s7378_s13 + $0x60] sm:$0xf]  ;;  %v6708_v47 = vld [vmem:[%s7378_s13 + $0x6c] sm:$0xf0] }
  0xbd   :  { %v7545_v53 = vpack.c.bf16 %v304_v48, %v275_v45  ;;  %v5274_v54 = vmul.f32 -1.442695, %v596_v50  ;;  %v5384_v45 = vor.u32 %v6721_v38, %v5383_v37  ;;  %v594_v50 = vunpack.c.l.bf16 %v7504_v63 }
  0xbe   :  { %v7547_v10 = vpack.c.bf16 %v244_v51, %v215_v25  ;;  %v5396_v25 = vor.u32 %v6722_v14, %v5393_v15  ;;  %900 = vmatpush.bf16.msra.mxu3 %v5388_v49  ;;  %v6715_v14 = vld [vmem:[%s7378_s13 + $0xac] sm:$0xf] }
  0xbf   :  { %7069 = vpow2.f32 %v5274_v54  ;;  %v5359_v54 = vld [vmem:[%s7378_s13 + $0xa0] sm:$0xf]  ;;  %887 = vmatpush.bf16.msra.mxu2 %v5384_v45 }
  0xc0   :  { %873 = vmatpush.bf16.msrb.mxu1 %v5396_v25  ;;  %v6712_v25 = vld [vmem:[%s7378_s13 + $0x8c] sm:$0xf0] }
  0xc1   :  { %v277_v58 = vpop.f32.mrf.mxu2 }
  0xc2   :  { %v278_v60 = vadd.f32 %v277_v58, %v7496_v56  ;;  %v306_v61 = vpop.f32.mrf.mxu3  ;;  %v551_v0 = vpop.f32.mrf.mxu0 }
  0xc3   :  { %v307_v1 = vadd.f32 %v306_v61, %v7498_v57  ;;  %v245_v2 = vpop.f32.mrf.mxu1  ;;  %v595_v61 = vunpack.c.h.bf16 %v7504_v63  ;;  %v222_v63 = vadd.f32 %v7502_v62, %v7491_v52  ;;  %v6710_v52 = vld [vmem:[%s7378_s13 + $0x84] sm:$0xf] }
  0xc4   :  { %v246_v3 = vadd.f32 %v245_v2, %v7512_v9  ;;  %874 = vmatpush.bf16.msrb.mxu1 %v5380_v44  ;;  %v5361_v2 = vld [vmem:[%s7378_s13 + $0xb0] sm:$0xf0] }
  0xc5   :  { %v7070_v4 = vpop.eup %7069  ;;  %v7553_v5 = vpack.c.bf16 %v307_v1, %v278_v60  ;;  %v6714_v1 = vld [vmem:[%s7378_s13 + $0xa4] sm:$0xf] }
  0xc6   :  { %v7555_v6 = vadd.f32 1.0, %v7070_v4  ;;  %v7557_v8 = vpack.c.bf16 %v246_v3, %v217_v59  ;;  %v5364_v11 = vor.u32 %v6714_v1, %v5361_v2  ;;  %v5337_v1 = vld [vmem:[%s7378_s13 + $0x78] sm:$0xf0] }
  0xc8   :  { %7071 = vrcp.f32 %v7555_v6  ;;  %v613_v51 = vand.u32 2147483647, %v7555_v6  ;;  %v615_v60 = vand.u32 2147483648, %v7555_v6  ;;  %vm609_vm2 = vweird.f32 %v7555_v6  ;;  %875 = vmatpush.bf16.msrb.mxu1 %v5364_v11  ;;  %v5311_v11 = vld [vmem:[%s7378_s13 + $0x40] sm:$0xf] }
  0xc9   :  { %v279_v12 = vpop.f32.mrf.mxu2 }
  0xca   :  { %v280_v16 = vadd.f32 %v279_v12, %v7496_v56  ;;  %v308_v17 = vpop.f32.mrf.mxu3  ;;  %v5375_v56 = vld [vmem:[%s7378_s13 + $0xc0] sm:$0xf]  ;;  %v5367_v12 = vld [vmem:[%s7378_s13 + $0xa8] sm:$0xf]  ;;  %vm7616_vm4 = vcmp.eq.f32.partialorder %v613_v51, 8.507059e+37 }
  0xcb   :  { %v309_v23 = vadd.f32 %v308_v17, %v7498_v57  ;;  %v248_v24 = vpop.f32.mrf.mxu1  ;;  %v5376_v57 = vor.u32 %v6720_v33, %v5375_v56  ;;  %v5368_v20 = vor.u32 %v6717_v13, %v5367_v12  ;;  %v5348_v56 = vor.u32 %v6710_v52, %v5345_v30  ;;  %v6713_v33 = vld [vmem:[%s7378_s13 + $0x94] sm:$0xf0]  ;;  %v5329_v51 = vld [vmem:[%s7378_s13 + $0x70] sm:$0xf0]  ;;  %v6704_v12 = vld [vmem:[%s7378_s13 + $0x4c] sm:$0xf0] }
  0xcc   :  { %v249_v31 = vadd.f32 %v248_v24, %v7512_v9  ;;  %v5343_v24 = vld [vmem:[%s7378_s13 + $0x80] sm:$0xf]  ;;  %v6702_v13 = vld [vmem:[%s7378_s13 + $0x44] sm:$0xf]  ;;  %v6700_v52 = vld [vmem:[%s7378_s13 + $0x2c] sm:$0xf0] }
  0xcd   :  { %v7574_v35 = vpack.c.bf16 %v309_v23, %v280_v16  ;;  %861 = vmatpush.bf16.msra.mxu0 %v5376_v57  ;;  %v5372_v23 = vor.u32 %v6715_v14, %v5369_v21  ;;  %888 = vmatpush.bf16.msra.mxu2 %v5368_v20  ;;  %v5344_v27 = vor.u32 %v6712_v25, %v5343_v24  ;;  %v5353_v57 = vld [vmem:[%s7378_s13 + $0x98] sm:$0xf0]  ;;  %v6703_v21 = vld [vmem:[%s7378_s13 + $0x4c] sm:$0xf] }
  0xce   :  { %v7579_v39 = vpop.eup %7071  ;;  %v7582_v43 = vpack.c.bf16 %v249_v31, %v7494_v55  ;;  %v6716_v55 = vld [vmem:[%s7378_s13 + $0xac] sm:$0xf0]  ;;  %v5351_v31 = vld [vmem:[%s7378_s13 + $0x88] sm:$0xf]  ;;  %v5356_v44 = vor.u32 %v6711_v34, %v5353_v57  ;;  %876 = vmatpush.bf16.msrb.mxu1 %v5348_v56  ;;  %v5312_v14 = vor.u32 %v6704_v12, %v5311_v11  ;;  %v6699_v56 = vld [vmem:[%s7378_s13 + $0x2c] sm:$0xf] }
  0xcf   :  { %v605_v48 = vmul.f32 %v7579_v39, %v7555_v6  ;;  %v5360_v0 = vor.u32 %v6716_v55, %v5359_v54  ;;  %vm610_vm1 = vweird.f32 %v7579_v39  ;;  %901 = vmatpush.bf16.msra.mxu3 %v5372_v23  ;;  %v5352_v38 = vor.u32 %v6713_v33, %v5351_v31  ;;  %v6709_v54 = vld [vmem:[%s7378_s13 + $0x74] sm:$0xf0]  ;;  %v5295_v23 = vld [vmem:[%s7378_s13 + $0x20] sm:$0xf]  ;;  %v5303_v6 = vld [vmem:[%s7378_s13 + $0x28] sm:$0xf] }
  0xd0   :  { %vm7612_vm3 = vmor %vm609_vm2, %vm610_vm1  ;;  %v5305_v33 = vld [vmem:[%s7378_s13 + $0x38] sm:$0xf0]  ;;  %v5279_v34 = vld [vmem:[%s7378_s13] sm:$0xf] }
  0xd1   :  { %v606_v58 = vsub.f32 1.0, %v605_v48  ;;  %v575_v59 = vpop.f32.mrf.mxu2  ;;  %862 = vmatpush.bf16.msra.mxu0 %v5360_v0  ;;  %v6706_v48 = vld [vmem:[%s7378_s13 + $0x64] sm:$0xf]  ;;  %889 = vmatpush.bf16.msra.mxu2 %v5352_v38  ;;  %v6707_v0 = vld [vmem:[%s7378_s13 + $0x6c] sm:$0xf] }
  0xd2   :  { %v598_v3 = vadd.f32 %v594_v50, %v575_v59  ;;  %v588_v4 = vpop.f32.mrf.mxu3  ;;  %v5328_v50 = vor.u32 %v6708_v47, %v5327_v46  ;;  %v6694_v38 = vld [vmem:[%s7378_s13 + $0x4] sm:$0xf]  ;;  %v5287_v46 = vld [vmem:[%s7378_s13 + $0x8] sm:$0xf]  ;;  %v6697_v47 = vld [vmem:[%s7378_s13 + $0x14] sm:$0xf0] }
  0xd3   :  { %v607_v15 = vmul.f32 %v7579_v39, %v606_v58  ;;  %v599_v16 = vadd.f32 %v595_v61, %v588_v4  ;;  %v250_v17 = vpop.f32.mrf.mxu1  ;;  %v593_v58 = vunpack.c.h.bf16 %v7535_v40  ;;  %902 = vmatpush.bf16.msra.mxu3 %v5356_v44  ;;  %v5340_v4 = vor.u32 %v6707_v0, %v5337_v1 }
  0xd4   :  { %7073 = vtanh.f32 %v598_v3  ;;  %v251_v22 = vadd.f32 %v250_v17, %v7512_v9  ;;  %v616_v9 = vor.u32 1.1754944e-38, %v615_v60  ;;  %v5332_v60 = vor.u32 %v6706_v48, %v5329_v51 }
  0xd5   :  { %v608_v62 = vadd.f32 %v7579_v39, %v607_v15  ;;  %v5276_v37 = vmul.f32 -1.442695, %v599_v16  ;;  %863 = vmatpush.bf16.msra.mxu0 %v5344_v27  ;;  %v5319_v15 = vld [vmem:[%s7378_s13 + $0x48] sm:$0xf]  ;;  %v6705_v16 = vld [vmem:[%s7378_s13 + $0x54] sm:$0xf0] }
  0xd6   :  { %v7622_v32 = vpack.c.bf16 %v251_v22, %v222_v63  ;;  %v5313_v63 = vld [vmem:[%s7378_s13 + $0x50] sm:$0xf0]  ;;  %877 = vmatpush.bf16.msrb.mxu1 %v5332_v60  ;;  %v5320_v20 = vor.u32 %v6705_v16, %v5319_v15  ;;  %v5321_v22 = vld [vmem:[%s7378_s13 + $0x58] sm:$0xf0]  ;;  %v6701_v27 = vld [vmem:[%s7378_s13 + $0x34] sm:$0xf0] }
  0xd7   :  { %v612_v36 = vsel %vm7612_vm3, %v7579_v39, %v608_v62  ;;  %v5335_v39 = vld [vmem:[%s7378_s13 + $0x68] sm:$0xf]  ;;  %7075 = vpow2.f32 %v5276_v37  ;;  %v5316_v17 = vor.u32 %v6702_v13, %v5313_v63  ;;  %903 = vmatpush.bf16.msra.mxu3 %v5340_v4  ;;  %v5324_v25 = vor.u32 %v6703_v21, %v5321_v22  ;;  %v6698_v62 = vld [vmem:[%s7378_s13 + $0x24] sm:$0xf]  ;;  %v6696_v37 = vld [vmem:[%s7378_s13 + $0xc] sm:$0xf0] }
  0xd8   :  { %v617_v45 = vsel %vm7616_vm4, %v616_v9, %v612_v36  ;;  %v5336_v61 = vor.u32 %v6709_v54, %v5335_v39  ;;  %v5296_v9 = vor.u32 %v6700_v52, %v5295_v23  ;;  %v5300_v30 = vor.u32 %v6698_v62, %v5297_v26 }
  0xd9   :  { %v577_v49 = vpop.f32.mrf.mxu2  ;;  %864 = vmatpush.bf16.msra.mxu0 %v5328_v50  ;;  %v5304_v31 = vor.u32 %v6701_v27, %v5303_v6  ;;  %v5308_v36 = vor.u32 %v6699_v56, %v5305_v33  ;;  %v5280_v48 = vor.u32 %v6696_v37, %v5279_v34  ;;  %v5289_v50 = vld [vmem:[%s7378_s13 + $0x18] sm:$0xf0]  ;;  %v5288_v54 = vor.u32 %v6697_v47, %v5287_v46  ;;  %v6756_v27 = vld [vmem:[%s7378_s13 + $0xec] sm:$0xf0]  ;;  %v5524_v56 = vld [vmem:[%s7378_s13 + $0xf0] sm:$0xf0] }
  0xda   :  { %v7074_v55 = vpop.eup %7073  ;;  %v590_v59 = vpop.f32.mrf.mxu3  ;;  %890 = vmatpush.bf16.msra.mxu2 %v5336_v61  ;;  %878 = vmatpush.bf16.msrb.mxu1 %v5316_v17  ;;  %v6695_v49 = vld [vmem:[%s7378_s13 + $0xc] sm:$0xf]  ;;  %v5530_v33 = vld [vmem:[%s7378_s13 + $0xe8] sm:$0xf]  ;;  %v6757_v34 = vld [vmem:[%s7378_s13 + $0xf4] sm:$0xf0] }
  0xdb   :  { %v7641_v2 = vmul.f32 %v7074_v55, %v617_v45  ;;  %v562_v3 = vpop.f32.mrf.mxu1  ;;  %904 = vmatpush.bf16.msra.mxu3 %v5324_v25  ;;  %v5281_v45 = vld [vmem:[%s7378_s13 + $0x10] sm:$0xf0]  ;;  %v5292_v55 = vor.u32 %v6695_v49, %v5289_v50  ;;  %v6755_v37 = vld [vmem:[%s7378_s13 + $0xec] sm:$0xf]  ;;  %v6752_v46 = vld [vmem:[%s7378_s13 + $0xcc] sm:$0xf0] }
  0xdc   :  { %v597_v40 = vadd.f32 %v593_v58, %v562_v3  ;;  %v5284_v39 = vor.u32 %v6694_v38, %v5281_v45  ;;  %v5532_v38 = vld [vmem:[%s7378_s13 + $0xf8] sm:$0xf0]  ;;  %v5506_v45 = vld [vmem:[%s7378_s13 + $0xc0] sm:$0xf]  ;;  %v6750_v47 = vld [vmem:[%s7378_s13 + $0xc4] sm:$0xf] }
  0xdd   :  { %865 = vmatpush.bf16.msra.mxu0 %v5312_v14  ;;  %v7076_v57 = vpop.eup %7075  ;;  %v344_v14 = vld [vmem:[%s7670_s25] sm:$0xff]  ;;  %v5508_v49 = vld [vmem:[%s7378_s13 + $0xd0] sm:$0xf0]  ;;  %v5514_v50 = vld [vmem:[%s7378_s13 + $0xc8] sm:$0xf] }
  0xde   :  { %v5275_v24 = vmul.f32 -1.442695, %v597_v40  ;;  %891 = vmatpush.bf16.msra.mxu2 %v5320_v20  ;;  %v642_v51 = vadd.f32 1.0, %v7076_v57  ;;  %879 = vmatpush.bf16.msrb.mxu1 %v5300_v30  ;;  %v6754_v30 = vld [vmem:[%s7378_s13 + $0xe4] sm:$0xf] }
  0xdf   :  { %905 = vmatpush.bf16.msra.mxu3 %v5308_v36  ;;  %v5527_v57 = vor.u32 %v6754_v30, %v5524_v56  ;;  %v5531_v36 = vor.u32 %v6757_v34, %v5530_v33  ;;  %v912_v30 = vunpack.c.l.bf16 %v7519_v19  ;;  %v5460_v33 = vld [vmem:[%s7378_s13 + $0x70] sm:$0xf0]  ;;  %v5466_v34 = vld [vmem:[%s7378_s13 + $0x68] sm:$0xf] }
  0xe0   :  { %7077 = vpow2.f32 %v5275_v24  ;;  %v654_v23 = vand.u32 2147483648, %v642_v51  ;;  %vm648_vm10 = vweird.f32 %v642_v51  ;;  %v652_v24 = vand.u32 2147483647, %v642_v51 }
  0xe1   :  { %866 = vmatpush.bf16.msra.mxu0 %v5296_v9  ;;  %7079 = vrcp.f32 %v642_v51  ;;  %v5522_v9 = vld [vmem:[%s7378_s13 + $0xe0] sm:$0xf] }
  0xe2   :  { %892 = vmatpush.bf16.msra.mxu2 %v5304_v31  ;;  %880 = vmatpush.bf16.msrb.mxu1 %v5284_v39  ;;  %v655_v52 = vor.u32 1.1754944e-38, %v654_v23  ;;  %vm653_vm12 = vcmp.eq.f32.partialorder %v652_v24, 8.507059e+37  ;;  %v5523_v31 = vor.u32 %v6756_v27, %v5522_v9  ;;  %v5511_v39 = vor.u32 %v6750_v47, %v5508_v49  ;;  %v5482_v23 = vld [vmem:[%s7378_s13 + $0x88] sm:$0xf]  ;;  %v6745_v24 = vld [vmem:[%s7378_s13 + $0x94] sm:$0xf0] }
  0xe3   :  { %v564_v44 = vpop.f32.mrf.mxu1  ;;  %906 = vmatpush.bf16.msra.mxu3 %v5292_v55  ;;  %v6751_v55 = vld [vmem:[%s7378_s13 + $0xcc] sm:$0xf]  ;;  %v6740_v9 = vld [vmem:[%s7378_s13 + $0x6c] sm:$0xf0]  ;;  %v6738_v27 = vld [vmem:[%s7378_s13 + $0x64] sm:$0xf] }
  0xe4   :  { %v5535_v44 = vor.u32 %v6755_v37, %v5532_v38  ;;  %v5463_v38 = vor.u32 %v6738_v27, %v5460_v33  ;;  %v5442_v49 = vld [vmem:[%s7378_s13 + $0x40] sm:$0xf]  ;;  %v6726_v27 = vld [vmem:[%s7378_s13 + $0x4] sm:$0xf]  ;;  %v6729_v33 = vld [vmem:[%s7378_s13 + $0x14] sm:$0xf0] }
  0xe5   :  { %867 = vmatpush.bf16.msra.mxu0 %v5280_v48  ;;  %v5507_v48 = vor.u32 %v6752_v46, %v5506_v45  ;;  %v6739_v45 = vld [vmem:[%s7378_s13 + $0x6c] sm:$0xf]  ;;  %v5468_v46 = vld [vmem:[%s7378_s13 + $0x78] sm:$0xf0] }
  0xe6   :  { %v7078_v58 = vpop.eup %7077  ;;  %893 = vmatpush.bf16.msra.mxu2 %v5288_v54  ;;  %1194 = vmatpush.bf16.msra.mxu1 %v5527_v57  ;;  %v6741_v57 = vld [vmem:[%s7378_s13 + $0x74] sm:$0xf0] }
  0xe7   :  { %v622_v59 = vadd.f32 1.0, %v7078_v58  ;;  %v7080_v60 = vpop.eup %7079  ;;  %1220 = vmatpush.bf16.msrb.mxu3 %v5535_v44  ;;  %v5516_v58 = vld [vmem:[%s7378_s13 + $0xd8] sm:$0xf0]  ;;  %v5467_v44 = vor.u32 %v6741_v57, %v5466_v34 }
  0xe8   :  { %v644_v1 = vmul.f32 %v7080_v60, %v642_v51  ;;  %vm649_vm9 = vweird.f32 %v7080_v60  ;;  %v6753_v51 = vld [vmem:[%s7378_s13 + $0xd4] sm:$0xf0] }
  0xe9   :  { %7081 = vrcp.f32 %v622_v59  ;;  %v634_v4 = vand.u32 2147483648, %v622_v59  ;;  %v632_v12 = vand.u32 2147483647, %v622_v59  ;;  %vm628_vm6 = vweird.f32 %v622_v59  ;;  %vm650_vm11 = vmor %vm648_vm10, %vm649_vm9  ;;  %1181 = vmatpush.bf16.msrb.mxu0 %v5523_v31 }
  0xea   :  { %v645_v13 = vsub.f32 1.0, %v644_v1  ;;  %1207 = vmatpush.bf16.msrb.mxu2 %v5531_v36  ;;  %v5515_v54 = vor.u32 %v6753_v51, %v5514_v50  ;;  %1195 = vmatpush.bf16.msra.mxu1 %v5511_v39  ;;  %v913_v31 = vunpack.c.h.bf16 %v7519_v19  ;;  %v5471_v19 = vor.u32 %v6739_v45, %v5468_v46  ;;  %v6736_v50 = vld [vmem:[%s7378_s13 + $0x4c] sm:$0xf0]  ;;  %v6734_v51 = vld [vmem:[%s7378_s13 + $0x44] sm:$0xf] }
  0xeb   :  { %v635_v63 = vor.u32 1.1754944e-38, %v634_v4  ;;  %vm633_vm8 = vcmp.eq.f32.partialorder %v632_v12, 8.507059e+37  ;;  %v5498_v4 = vld [vmem:[%s7378_s13 + $0xa8] sm:$0xf] }
  0xec   :  { %v646_v16 = vmul.f32 %v7080_v60, %v645_v13 }
  0xed   :  { %1182 = vmatpush.bf16.msrb.mxu0 %v5507_v48 }
  0xee   :  { %v647_v22 = vadd.f32 %v7080_v60, %v646_v16  ;;  %1208 = vmatpush.bf16.msrb.mxu2 %v5515_v54  ;;  %v6744_v16 = vld [vmem:[%s7378_s13 + $0x8c] sm:$0xf0] }
  0xef   :  { %v7082_v61 = vpop.eup %7081 }
  0xf0   :  { %v624_v0 = vmul.f32 %v7082_v61, %v622_v59  ;;  %vm629_vm5 = vweird.f32 %v7082_v61  ;;  %v651_v25 = vsel %vm650_vm11, %v7080_v60, %v647_v22  ;;  %v5519_v59 = vor.u32 %v6751_v55, %v5516_v58  ;;  %v5490_v60 = vld [vmem:[%s7378_s13 + $0xa0] sm:$0xf]  ;;  %v5476_v22 = vld [vmem:[%s7378_s13 + $0x90] sm:$0xf0] }
  0xf1   :  { %vm630_vm7 = vmor %vm628_vm6, %vm629_vm5  ;;  %v5443_v55 = vor.u32 %v6736_v50, %v5442_v49  ;;  %v5444_v58 = vld [vmem:[%s7378_s13 + $0x50] sm:$0xf0] }
  0xf2   :  { %v625_v3 = vsub.f32 1.0, %v624_v0  ;;  %v6746_v0 = vld [vmem:[%s7378_s13 + $0xa4] sm:$0xf]  ;;  %1221 = vmatpush.bf16.msrb.mxu3 %v5519_v59  ;;  %v5447_v59 = vor.u32 %v6734_v51, %v5444_v58  ;;  %v914_v51 = vunpack.c.l.bf16 %v7509_v7 }
  0xf4   :  { %v626_v11 = vmul.f32 %v7082_v61, %v625_v3  ;;  %v5492_v3 = vld [vmem:[%s7378_s13 + $0xb0] sm:$0xf0] }
  0xf5   :  { %v5495_v12 = vor.u32 %v6746_v0, %v5492_v3  ;;  %v6735_v0 = vld [vmem:[%s7378_s13 + $0x4c] sm:$0xf]  ;;  %v5452_v3 = vld [vmem:[%s7378_s13 + $0x58] sm:$0xf0] }
  0xf6   :  { %v627_v40 = vadd.f32 %v7082_v61, %v626_v11  ;;  %v6749_v11 = vld [vmem:[%s7378_s13 + $0xb4] sm:$0xf0] }
  0xf7   :  { %v5499_v13 = vor.u32 %v6749_v11, %v5498_v4  ;;  %1196 = vmatpush.bf16.msra.mxu1 %v5495_v12  ;;  %v5426_v4 = vld [vmem:[%s7378_s13 + $0x20] sm:$0xf]  ;;  %v6732_v11 = vld [vmem:[%s7378_s13 + $0x2c] sm:$0xf0]  ;;  %v915_v12 = vunpack.c.h.bf16 %v7509_v7 }
  0xf8   :  { %v631_v15 = vsel %vm630_vm7, %v7082_v61, %v627_v40  ;;  %v6748_v61 = vld [vmem:[%s7378_s13 + $0xac] sm:$0xf0]  ;;  %v6747_v40 = vld [vmem:[%s7378_s13 + $0xac] sm:$0xf] }
  0xf9   :  { %v636_v17 = vsel %vm633_vm8, %v635_v63, %v631_v15  ;;  %v5491_v1 = vor.u32 %v6748_v61, %v5490_v60  ;;  %1209 = vmatpush.bf16.msrb.mxu2 %v5499_v13  ;;  %v5474_v15 = vld [vmem:[%s7378_s13 + $0x80] sm:$0xf]  ;;  %v5450_v60 = vld [vmem:[%s7378_s13 + $0x48] sm:$0xf]  ;;  %v6737_v61 = vld [vmem:[%s7378_s13 + $0x54] sm:$0xf0]  ;;  %v5455_v13 = vor.u32 %v6735_v0, %v5452_v3 }
  0xfa   :  { %v658_v20 = vmul.f32 %v636_v17, %v344_v14  ;;  %v5500_v14 = vld [vmem:[%s7378_s13 + $0xb8] sm:$0xf0]  ;;  %v6742_v17 = vld [vmem:[%s7378_s13 + $0x84] sm:$0xf] }
  0xfb   :  { %1183 = vmatpush.bf16.msrb.mxu0 %v5491_v1  ;;  %v5503_v63 = vor.u32 %v6747_v40, %v5500_v14  ;;  %v5451_v1 = vor.u32 %v6737_v61, %v5450_v60  ;;  %v5427_v40 = vor.u32 %v6732_v11, %v5426_v4  ;;  %v6730_v14 = vld [vmem:[%s7378_s13 + $0x24] sm:$0xf] }
  0xfc   :  { %v7674_v21 = vadd.f32 %v7641_v2, %v658_v20  ;;  %v656_v2 = vsel %vm653_vm12, %v655_v52, %v651_v25  ;;  %v5475_v20 = vor.u32 %v6744_v16, %v5474_v15  ;;  %v5479_v25 = vor.u32 %v6742_v17, %v5476_v22  ;;  %v5434_v15 = vld [vmem:[%s7378_s13 + $0x28] sm:$0xf]  ;;  %v6733_v22 = vld [vmem:[%s7378_s13 + $0x34] sm:$0xf0] }
  0xfd   :  { %1222 = vmatpush.bf16.msrb.mxu3 %v5503_v63  ;;  %v5483_v52 = vor.u32 %v6745_v24, %v5482_v23  ;;  %v5428_v63 = vld [vmem:[%s7378_s13 + $0x30] sm:$0xf0]  ;;  %v6731_v23 = vld [vmem:[%s7378_s13 + $0x2c] sm:$0xf]  ;;  %v5436_v24 = vld [vmem:[%s7378_s13 + $0x38] sm:$0xf0] }
  0xfe   :  { %7083 = vtanh.f32 %v7674_v21  ;;  %1197 = vmatpush.bf16.msra.mxu1 %v5479_v25 }
  0xff   :  { %1184 = vmatpush.bf16.msrb.mxu0 %v5475_v20  ;;  %1210 = vmatpush.bf16.msrb.mxu2 %v5483_v52  ;;  %v5431_v20 = vor.u32 %v6730_v14, %v5428_v63 }
 0x102   :  { %1198 = vmatpush.bf16.msra.mxu1 %v5463_v38 }
 0x103   :  { %1211 = vmatpush.bf16.msrb.mxu2 %v5467_v44 }
 0x104   :  { %v7084_v62 = vpop.eup %7083 }
 0x105   :  { %v662_v26 = vmul.f32 %v7084_v62, %v656_v2  ;;  %v6743_v62 = vld [vmem:[%s7378_s13 + $0x8c] sm:$0xf]  ;;  %v5484_v2 = vld [vmem:[%s7378_s13 + $0x98] sm:$0xf0] }
 0x106   :  { %1199 = vmatpush.bf16.msra.mxu1 %v5447_v59 }
 0x107   :  { %v663_v6 = vpack.c.bf16 %v662_v26, %v662_v26  ;;  %v5487_v26 = vor.u32 %v6743_v62, %v5484_v2  ;;  %1212 = vmatpush.bf16.msrb.mxu2 %v5451_v1  ;;  %v5435_v2 = vor.u32 %v6733_v22, %v5434_v15 }
 0x109   :  { %664 = vst [vmem:[#allocation3] sm:$0xf] %v663_v6  ;;  %868 = vmatmul.bf16.vlgmr.msra.gmra.mxu0 %v663_v6  ;;  %881 = vmatmul.bf16.vlgmr.msrb.gmra.mxu1 %v663_v6 }
 0x10a   :  { %894 = vmatmul.bf16.vlgmr.msra.gmra.mxu2 %v663_v6  ;;  %907 = vmatmul.bf16.vlgmr.msra.gmra.mxu3 %v663_v6  ;;  %v5458_v6 = vld [vmem:[%s7378_s13 + $0x60] sm:$0xf] }
 0x10b   :  { %1223 = vmatpush.bf16.msrb.mxu3 %v5487_v26  ;;  %v5459_v56 = vor.u32 %v6740_v9, %v5458_v6  ;;  %v5439_v26 = vor.u32 %v6731_v23, %v5436_v24  ;;  %v5410_v6 = vld [vmem:[%s7378_s13] sm:$0xf]  ;;  %v6728_v9 = vld [vmem:[%s7378_s13 + $0xc] sm:$0xf0]  ;;  %1200 = vmatpush.bf16.msra.mxu1 %v5431_v20 }
 0x10c   :  { %1213 = vmatpush.bf16.msrb.mxu2 %v5435_v2 }
 0x10d   :  { %1185 = vmatpush.bf16.msrb.mxu0 %v5459_v56  ;;  %v5418_v56 = vld [vmem:[%s7378_s13 + $0x8] sm:$0xf] }
 0x10e   :  { %v5419_v44 = vor.u32 %v6729_v33, %v5418_v56 }
 0x10f   :  { %1224 = vmatpush.bf16.msrb.mxu3 %v5471_v19 }
 0x110   :  { %1214 = vmatpush.bf16.msrb.mxu2 %v5419_v44  ;;  %v5655_v44 = vld [vmem:[%s7378_s13 + $0xf0] sm:$0xf0] }
 0x111   :  { %1186 = vmatpush.bf16.msrb.mxu0 %v5443_v55 }
 0x113   :  { %1225 = vmatpush.bf16.msrb.mxu3 %v5455_v13 }
 0x115   :  { %1187 = vmatpush.bf16.msrb.mxu0 %v5427_v40 }
 0x117   :  { %1226 = vmatpush.bf16.msrb.mxu3 %v5439_v26 }
 0x186   :  { %v869_v36 = vpop.f32.mrf.mxu0  ;;  %v882_v37 = vpop.f32.mrf.mxu1 }
 0x187   :  { %v916_v47 = vadd.f32 %v912_v30, %v869_v36  ;;  %v917_v48 = vadd.f32 %v913_v31, %v882_v37  ;;  %v5411_v30 = vor.u32 %v6728_v9, %v5410_v6  ;;  %v5412_v31 = vld [vmem:[%s7378_s13 + $0x10] sm:$0xf0]  ;;  %v6727_v36 = vld [vmem:[%s7378_s13 + $0xc] sm:$0xf]  ;;  %v5420_v37 = vld [vmem:[%s7378_s13 + $0x18] sm:$0xf0] }
 0x188   :  { %v5415_v57 = vor.u32 %v6726_v27, %v5412_v31 }
 0x189   :  { %v5405_v39 = vmul.f32 -1.442695, %v916_v47  ;;  %v5406_v54 = vmul.f32 -1.442695, %v917_v48  ;;  %v5423_v47 = vor.u32 %v6727_v36, %v5420_v37  ;;  %1188 = vmatpush.bf16.msrb.mxu0 %v5411_v30  ;;  %v6788_v36 = vld [vmem:[%s7378_s13 + $0xec] sm:$0xf0] }
 0x18a   :  { %1201 = vmatpush.bf16.msra.mxu1 %v5415_v57  ;;  %v5653_v57 = vld [vmem:[%s7378_s13 + $0xe0] sm:$0xf]  ;;  %v6786_v37 = vld [vmem:[%s7378_s13 + $0xe4] sm:$0xf] }
 0x18b   :  { %7085 = vpow2.f32 %v5405_v39  ;;  %1227 = vmatpush.bf16.msrb.mxu3 %v5423_v47  ;;  %v5658_v47 = vor.u32 %v6786_v37, %v5655_v44  ;;  %v5597_v44 = vld [vmem:[%s7378_s13 + $0x68] sm:$0xf] }
 0x18c   :  { %7087 = vpow2.f32 %v5406_v54 }
 0x18d   :  { %v895_v16 = vpop.f32.mrf.mxu2  ;;  %v908_v17 = vpop.f32.mrf.mxu3 }
 0x18e   :  { %v919_v25 = vadd.f32 %v915_v12, %v908_v17  ;;  %v871_v52 = vpop.f32.mrf.mxu0  ;;  %v884_v62 = vpop.f32.mrf.mxu1  ;;  %v918_v55 = vadd.f32 %v914_v51, %v895_v16  ;;  %1515 = vmatpush.bf16.msrb.mxu1 %v5658_v47  ;;  %v5637_v51 = vld [vmem:[%s7378_s13 + $0xc0] sm:$0xf] }
 0x190   :  { %v5407_v34 = vmul.f32 -1.442695, %v919_v25 }
 0x191   :  { %v7086_v38 = vpop.eup %7085 }
 0x192   :  { %v7088_v45 = vpop.eup %7087  ;;  %v923_v46 = vadd.f32 1.0, %v7086_v38  ;;  %7089 = vpow2.f32 %v5407_v34  ;;  %v5654_v38 = vor.u32 %v6788_v36, %v5653_v57  ;;  %v1233_v57 = vunpack.c.l.bf16 %v7527_v29 }
 0x193   :  { %v942_v48 = vadd.f32 1.0, %v7088_v45  ;;  %v5661_v45 = vld [vmem:[%s7378_s13 + $0xe8] sm:$0xf]  ;;  %v1234_v36 = vunpack.c.h.bf16 %v7527_v29 }
 0x194   :  { %7091 = vrcp.f32 %v923_v46  ;;  %v935_v1 = vand.u32 2147483648, %v923_v46  ;;  %v933_v11 = vand.u32 2147483647, %v923_v46  ;;  %vm929_vm15 = vweird.f32 %v923_v46  ;;  %1502 = vmatpush.bf16.msra.mxu0 %v5654_v38  ;;  %v5591_v38 = vld [vmem:[%s7378_s13 + $0x70] sm:$0xf0] }
 0x195   :  { %7093 = vrcp.f32 %v942_v48  ;;  %v897_v19 = vpop.f32.mrf.mxu2  ;;  %v910_v49 = vpop.f32.mrf.mxu3  ;;  %v954_v3 = vand.u32 2147483648, %v942_v48  ;;  %v952_v13 = vand.u32 2147483647, %v942_v48  ;;  %vm948_vm0 = vweird.f32 %v942_v48 }
 0x196   :  { %v936_v14 = vor.u32 1.1754944e-38, %v935_v1  ;;  %vm934_vm3 = vcmp.eq.f32.partialorder %v933_v11, 8.507059e+37  ;;  %v6787_v19 = vld [vmem:[%s7378_s13 + $0xec] sm:$0xf]  ;;  %v5663_v49 = vld [vmem:[%s7378_s13 + $0xf8] sm:$0xf0] }
 0x197   :  { %v955_v16 = vor.u32 1.1754944e-38, %v954_v3  ;;  %vm953_vm4 = vcmp.eq.f32.partialorder %v952_v13, 8.507059e+37  ;;  %v6783_v1 = vld [vmem:[%s7378_s13 + $0xcc] sm:$0xf]  ;;  %v5647_v3 = vld [vmem:[%s7378_s13 + $0xd8] sm:$0xf0] }
 0x198   :  { %v7090_v50 = vpop.eup %7089  ;;  %v5621_v11 = vld [vmem:[%s7378_s13 + $0xa0] sm:$0xf]  ;;  %v6778_v13 = vld [vmem:[%s7378_s13 + $0xa4] sm:$0xf] }
 0x199   :  { %v962_v39 = vadd.f32 1.0, %v7090_v50  ;;  %v5666_v50 = vor.u32 %v6787_v19, %v5663_v49  ;;  %v6771_v49 = vld [vmem:[%s7378_s13 + $0x6c] sm:$0xf] }
 0x19a   :  { %v7092_v54 = vpop.eup %7091 }
 0x19b   :  { %v7094_v58 = vpop.eup %7093  ;;  %v925_v59 = vmul.f32 %v7092_v54, %v923_v46  ;;  %7095 = vrcp.f32 %v962_v39  ;;  %vm930_vm13 = vweird.f32 %v7092_v54  ;;  %v974_v9 = vand.u32 2147483648, %v962_v39  ;;  %v6789_v46 = vld [vmem:[%s7378_s13 + $0xf4] sm:$0xf0]  ;;  %1541 = vmatpush.bf16.msra.mxu3 %v5666_v50  ;;  %v5599_v50 = vld [vmem:[%s7378_s13 + $0x78] sm:$0xf0] }
 0x19c   :  { %v944_v60 = vmul.f32 %v7094_v58, %v942_v48  ;;  %7097 = vtanh.f32 %v918_v55  ;;  %vm949_vm14 = vweird.f32 %v7094_v58  ;;  %vm931_vm1 = vmor %vm929_vm15, %vm930_vm13  ;;  %vm968_vm6 = vweird.f32 %v962_v39 }
 0x19d   :  { %v926_v61 = vsub.f32 1.0, %v925_v59  ;;  %vm950_vm2 = vmor %vm948_vm0, %vm949_vm14  ;;  %v972_v27 = vand.u32 2147483647, %v962_v39  ;;  %v975_v31 = vor.u32 1.1754944e-38, %v974_v9  ;;  %v5662_v48 = vor.u32 %v6789_v46, %v5661_v45  ;;  %v5645_v59 = vld [vmem:[%s7378_s13 + $0xc8] sm:$0xf] }
 0x19e   :  { %v945_v0 = vsub.f32 1.0, %v944_v60  ;;  %v6785_v60 = vld [vmem:[%s7378_s13 + $0xd4] sm:$0xf0]  ;;  %v5602_v29 = vor.u32 %v6771_v49, %v5599_v50 }
 0x19f   :  { %v927_v4 = vmul.f32 %v7092_v54, %v926_v61  ;;  %vm973_vm8 = vcmp.eq.f32.partialorder %v972_v27, 8.507059e+37  ;;  %1528 = vmatpush.bf16.msra.mxu2 %v5662_v48  ;;  %v6773_v45 = vld [vmem:[%s7378_s13 + $0x74] sm:$0xf0] }
 0x1a0   :  { %v946_v12 = vmul.f32 %v7094_v58, %v945_v0  ;;  %v5646_v0 = vor.u32 %v6785_v60, %v5645_v59  ;;  %v5598_v19 = vor.u32 %v6773_v45, %v5597_v44  ;;  %v6759_v44 = vld [vmem:[%s7378_s13 + $0xc] sm:$0xf]  ;;  %v5551_v45 = vld [vmem:[%s7378_s13 + $0x18] sm:$0xf0] }
 0x1a1   :  { %v7096_v40 = vpop.eup %7095  ;;  %v928_v7 = vadd.f32 %v7092_v54, %v927_v4  ;;  %v5650_v4 = vor.u32 %v6783_v1, %v5647_v3  ;;  %v5581_v3 = vld [vmem:[%s7378_s13 + $0x48] sm:$0xf]  ;;  %v5554_v49 = vor.u32 %v6759_v44, %v5551_v45  ;;  %v5786_v45 = vld [vmem:[%s7378_s13 + $0xf0] sm:$0xf0] }
 0x1a2   :  { %v947_v63 = vadd.f32 %v7094_v58, %v946_v12  ;;  %v964_v15 = vmul.f32 %v7096_v40, %v962_v39  ;;  %v7098_v20 = vpop.eup %7097  ;;  %vm969_vm5 = vweird.f32 %v7096_v40  ;;  %v6784_v39 = vld [vmem:[%s7378_s13 + $0xcc] sm:$0xf0] }
 0x1a3   :  { %v932_v17 = vsel %vm931_vm1, %v7092_v54, %v928_v7  ;;  %vm970_vm7 = vmor %vm968_vm6, %vm969_vm5  ;;  %v6782_v54 = vld [vmem:[%s7378_s13 + $0xc4] sm:$0xf]  ;;  %v5638_v55 = vor.u32 %v6784_v39, %v5637_v51  ;;  %1529 = vmatpush.bf16.msra.mxu2 %v5646_v0  ;;  %v6780_v12 = vld [vmem:[%s7378_s13 + $0xac] sm:$0xf0]  ;;  %1542 = vmatpush.bf16.msra.mxu3 %v5650_v4 }
 0x1a4   :  { %v937_v22 = vsel %vm934_vm3, %v936_v14, %v932_v17  ;;  %v951_v23 = vsel %vm950_vm2, %v7094_v58, %v947_v63  ;;  %v965_v24 = vsub.f32 1.0, %v964_v15  ;;  %v5639_v58 = vld [vmem:[%s7378_s13 + $0xd0] sm:$0xf0]  ;;  %v5629_v14 = vld [vmem:[%s7378_s13 + $0xa8] sm:$0xf] }
 0x1a5   :  { %v956_v25 = vsel %vm953_vm4, %v955_v16, %v951_v23  ;;  %v979_v52 = vmul.f32 %v7098_v20, %v937_v22  ;;  %v5642_v61 = vor.u32 %v6782_v54, %v5639_v58  ;;  %1503 = vmatpush.bf16.msra.mxu0 %v5638_v55  ;;  %v5623_v7 = vld [vmem:[%s7378_s13 + $0xb0] sm:$0xf0]  ;;  %v6781_v63 = vld [vmem:[%s7378_s13 + $0xb4] sm:$0xf0]  ;;  %v6779_v17 = vld [vmem:[%s7378_s13 + $0xac] sm:$0xf] }
 0x1a6   :  { %v978_v62 = vmul.f32 %v956_v25, %v7674_v21  ;;  %v966_v2 = vmul.f32 %v7096_v40, %v965_v24  ;;  %v5626_v15 = vor.u32 %v6778_v13, %v5623_v7  ;;  %v5630_v16 = vor.u32 %v6781_v63, %v5629_v14  ;;  %v5631_v20 = vld [vmem:[%s7378_s13 + $0xb8] sm:$0xf0]  ;;  %v5605_v23 = vld [vmem:[%s7378_s13 + $0x80] sm:$0xf]  ;;  %v6776_v24 = vld [vmem:[%s7378_s13 + $0x8c] sm:$0xf0] }
 0x1a7   :  { %1516 = vmatpush.bf16.msrb.mxu1 %v5642_v61  ;;  %v5634_v22 = vor.u32 %v6779_v17, %v5631_v20  ;;  %v6774_v25 = vld [vmem:[%s7378_s13 + $0x84] sm:$0xf]  ;;  %v5573_v54 = vld [vmem:[%s7378_s13 + $0x40] sm:$0xf]  ;;  %v6768_v55 = vld [vmem:[%s7378_s13 + $0x4c] sm:$0xf0]  ;;  %v1236_v14 = vunpack.c.h.bf16 %v7517_v18 }
 0x1a8   :  { %v7746_v26 = vadd.f32 %v979_v52, %v978_v62  ;;  %v967_v6 = vadd.f32 %v7096_v40, %v966_v2  ;;  %1530 = vmatpush.bf16.msra.mxu2 %v5630_v16  ;;  %v5606_v52 = vor.u32 %v6776_v24, %v5605_v23  ;;  %v5607_v62 = vld [vmem:[%s7378_s13 + $0x90] sm:$0xf0]  ;;  %v5613_v2 = vld [vmem:[%s7378_s13 + $0x88] sm:$0xf]  ;;  %v6766_v58 = vld [vmem:[%s7378_s13 + $0x44] sm:$0xf]  ;;  %v5574_v61 = vor.u32 %v6768_v55, %v5573_v54 }
 0x1a9   :  { %1543 = vmatpush.bf16.msra.mxu3 %v5634_v22  ;;  %v5610_v9 = vor.u32 %v6774_v25, %v5607_v62  ;;  %v5575_v0 = vld [vmem:[%s7378_s13 + $0x50] sm:$0xf0]  ;;  %v6769_v4 = vld [vmem:[%s7378_s13 + $0x54] sm:$0xf0]  ;;  %v5583_v13 = vld [vmem:[%s7378_s13 + $0x58] sm:$0xf0]  ;;  %v1235_v54 = vunpack.c.l.bf16 %v7517_v18 }
 0x1aa   :  { %7099 = vtanh.f32 %v7746_v26  ;;  %v971_v30 = vsel %vm970_vm7, %v7096_v40, %v967_v6  ;;  %v5622_v40 = vor.u32 %v6780_v12, %v5621_v11  ;;  %v6777_v6 = vld [vmem:[%s7378_s13 + $0x94] sm:$0xf0]  ;;  %v5578_v1 = vor.u32 %v6766_v58, %v5575_v0  ;;  %v6767_v11 = vld [vmem:[%s7378_s13 + $0x4c] sm:$0xf]  ;;  %v6764_v7 = vld [vmem:[%s7378_s13 + $0x2c] sm:$0xf0] }
 0x1ab   :  { %v976_v56 = vsel %vm973_vm8, %v975_v31, %v971_v30  ;;  %1517 = vmatpush.bf16.msrb.mxu1 %v5626_v15  ;;  %v5614_v27 = vor.u32 %v6777_v6, %v5613_v2  ;;  %v6775_v30 = vld [vmem:[%s7378_s13 + $0x8c] sm:$0xf]  ;;  %v5615_v31 = vld [vmem:[%s7378_s13 + $0x98] sm:$0xf0]  ;;  %v5582_v12 = vor.u32 %v6769_v4, %v5581_v3  ;;  %v5586_v63 = vor.u32 %v6767_v11, %v5583_v13  ;;  %v6762_v16 = vld [vmem:[%s7378_s13 + $0x24] sm:$0xf] }
 0x1ac   :  { %1504 = vmatpush.bf16.msra.mxu0 %v5622_v40  ;;  %v5557_v40 = vld [vmem:[%s7378_s13 + $0x20] sm:$0xf]  ;;  %v5559_v17 = vld [vmem:[%s7378_s13 + $0x30] sm:$0xf0]  ;;  %v5565_v20 = vld [vmem:[%s7378_s13 + $0x28] sm:$0xf] }
 0x1ad   :  { %1531 = vmatpush.bf16.msra.mxu2 %v5614_v27  ;;  %v5558_v15 = vor.u32 %v6764_v7, %v5557_v40  ;;  %v5562_v24 = vor.u32 %v6762_v16, %v5559_v17  ;;  %v6765_v25 = vld [vmem:[%s7378_s13 + $0x34] sm:$0xf0]  ;;  %v5567_v62 = vld [vmem:[%s7378_s13 + $0x38] sm:$0xf0] }
 0x1ae   :  { %v5566_v27 = vor.u32 %v6765_v25, %v5565_v20 }
 0x1af   :  { %1518 = vmatpush.bf16.msrb.mxu1 %v5610_v9 }
 0x1b0   :  { %v7100_v21 = vpop.eup %7099  ;;  %1505 = vmatpush.bf16.msra.mxu0 %v5606_v52  ;;  %v6763_v52 = vld [vmem:[%s7378_s13 + $0x2c] sm:$0xf] }
 0x1b1   :  { %v982_v33 = vmul.f32 %v7100_v21, %v976_v56  ;;  %v5618_v21 = vor.u32 %v6775_v30, %v5615_v31  ;;  %v5589_v56 = vld [vmem:[%s7378_s13 + $0x60] sm:$0xf]  ;;  %1532 = vmatpush.bf16.msra.mxu2 %v5598_v19  ;;  %v5570_v30 = vor.u32 %v6763_v52, %v5567_v62 }
 0x1b2   :  { %v5541_v31 = vld [vmem:[%s7378_s13] sm:$0xf] }
 0x1b3   :  { %v983_v34 = vpack.c.bf16 %v982_v33, %v982_v33  ;;  %v6772_v33 = vld [vmem:[%s7378_s13 + $0x6c] sm:$0xf0]  ;;  %1544 = vmatpush.bf16.msra.mxu3 %v5618_v21 }
 0x1b4   :  { %v5590_v37 = vor.u32 %v6772_v33, %v5589_v56  ;;  %v6760_v21 = vld [vmem:[%s7378_s13 + $0xc] sm:$0xf0]  ;;  %v6758_v56 = vld [vmem:[%s7378_s13 + $0x4] sm:$0xf] }
 0x1b5   :  { %985 = vst [vmem:[#allocation3 + $0x4] sm:$0xf] %v983_v34  ;;  %1189 = vmatmul.bf16.vlgmr.msrb.gmra.mxu0 %v983_v34  ;;  %1202 = vmatmul.bf16.vlgmr.msra.gmra.mxu1 %v983_v34  ;;  %v5542_v33 = vor.u32 %v6760_v21, %v5541_v31 }
 0x1b6   :  { %1215 = vmatmul.bf16.vlgmr.msrb.gmra.mxu2 %v983_v34  ;;  %1228 = vmatmul.bf16.vlgmr.msrb.gmra.mxu3 %v983_v34  ;;  %v6770_v34 = vld [vmem:[%s7378_s13 + $0x64] sm:$0xf] }
 0x1b7   :  { %v5594_v48 = vor.u32 %v6770_v34, %v5591_v38  ;;  %1506 = vmatpush.bf16.msra.mxu0 %v5590_v37  ;;  %1545 = vmatpush.bf16.msra.mxu3 %v5602_v29  ;;  %v5543_v34 = vld [vmem:[%s7378_s13 + $0x10] sm:$0xf0] }
 0x1b8   :  { %1533 = vmatpush.bf16.msra.mxu2 %v5582_v12  ;;  %v5546_v38 = vor.u32 %v6758_v56, %v5543_v34 }
 0x1b9   :  { %1519 = vmatpush.bf16.msrb.mxu1 %v5594_v48 }
 0x1bb   :  { %1507 = vmatpush.bf16.msra.mxu0 %v5574_v61  ;;  %1546 = vmatpush.bf16.msra.mxu3 %v5586_v63 }
 0x1bc   :  { %1534 = vmatpush.bf16.msra.mxu2 %v5566_v27 }
 0x1bd   :  { %1520 = vmatpush.bf16.msrb.mxu1 %v5578_v1 }
 0x1bf   :  { %1508 = vmatpush.bf16.msra.mxu0 %v5558_v15  ;;  %1547 = vmatpush.bf16.msra.mxu3 %v5570_v30 }
 0x1c1   :  { %1521 = vmatpush.bf16.msrb.mxu1 %v5562_v24 }
 0x1c3   :  { %1509 = vmatpush.bf16.msra.mxu0 %v5542_v33  ;;  %1548 = vmatpush.bf16.msra.mxu3 %v5554_v49  ;;  %v6819_v49 = vld [vmem:[%s7378_s13 + $0xec] sm:$0xf] }
 0x1c5   :  { %1522 = vmatpush.bf16.msrb.mxu1 %v5546_v38  ;;  %v6818_v38 = vld [vmem:[%s7378_s13 + $0xe4] sm:$0xf] }
 0x232   :  { %v1190_v46 = vpop.f32.mrf.mxu0  ;;  %v1203_v47 = vpop.f32.mrf.mxu1 }
 0x233   :  { %v1237_v51 = vadd.f32 %v1233_v57, %v1190_v46  ;;  %v1238_v39 = vadd.f32 %v1234_v36, %v1203_v47  ;;  %v5549_v57 = vld [vmem:[%s7378_s13 + $0x8] sm:$0xf]  ;;  %v6761_v36 = vld [vmem:[%s7378_s13 + $0x14] sm:$0xf0] }
 0x234   :  { %v5550_v47 = vor.u32 %v6761_v36, %v5549_v57  ;;  %v5784_v36 = vld [vmem:[%s7378_s13 + $0xe0] sm:$0xf] }
 0x235   :  { %v5536_v59 = vmul.f32 -1.442695, %v1237_v51  ;;  %v5537_v60 = vmul.f32 -1.442695, %v1238_v39 }
 0x236   :  { %1535 = vmatpush.bf16.msra.mxu2 %v5550_v47  ;;  %v6821_v47 = vld [vmem:[%s7378_s13 + $0xf4] sm:$0xf0] }
 0x237   :  { %7101 = vpow2.f32 %v5536_v59 }
 0x238   :  { %7103 = vpow2.f32 %v5537_v60 }
 0x239   :  { %v1216_v22 = vpop.f32.mrf.mxu2  ;;  %v1229_v23 = vpop.f32.mrf.mxu3 }
 0x23a   :  { %v1240_v2 = vadd.f32 %v1236_v14, %v1229_v23  ;;  %v1192_v6 = vpop.f32.mrf.mxu0  ;;  %v1205_v9 = vpop.f32.mrf.mxu1  ;;  %v1239_v59 = vadd.f32 %v1235_v54, %v1216_v22  ;;  %v6814_v54 = vld [vmem:[%s7378_s13 + $0xc4] sm:$0xf] }
 0x23c   :  { %v5538_v37 = vmul.f32 -1.442695, %v1240_v2 }
 0x23d   :  { %v7102_v46 = vpop.eup %7101 }
 0x23e   :  { %v7104_v48 = vpop.eup %7103  ;;  %v1244_v19 = vadd.f32 1.0, %v7102_v46  ;;  %7105 = vpow2.f32 %v5538_v37  ;;  %v6820_v37 = vld [vmem:[%s7378_s13 + $0xec] sm:$0xf0]  ;;  %v5792_v46 = vld [vmem:[%s7378_s13 + $0xe8] sm:$0xf] }
 0x23f   :  { %v1263_v50 = vadd.f32 1.0, %v7104_v48  ;;  %v5785_v44 = vor.u32 %v6820_v37, %v5784_v36  ;;  %v5789_v48 = vor.u32 %v6818_v38, %v5786_v45  ;;  %v5722_v37 = vld [vmem:[%s7378_s13 + $0x70] sm:$0xf0]  ;;  %v5728_v38 = vld [vmem:[%s7378_s13 + $0x68] sm:$0xf] }
 0x240   :  { %7107 = vrcp.f32 %v1244_v19  ;;  %v1256_v4 = vand.u32 2147483648, %v1244_v19  ;;  %v1254_v13 = vand.u32 2147483647, %v1244_v19  ;;  %vm1250_vm11 = vweird.f32 %v1244_v19 }
 0x241   :  { %7109 = vrcp.f32 %v1263_v50  ;;  %v1218_v51 = vpop.f32.mrf.mxu2  ;;  %v1231_v39 = vpop.f32.mrf.mxu3  ;;  %v1275_v11 = vand.u32 2147483648, %v1263_v50  ;;  %v1273_v7 = vand.u32 2147483647, %v1263_v50  ;;  %vm1269_vm12 = vweird.f32 %v1263_v50  ;;  %1823 = vmatpush.bf16.msrb.mxu0 %v5785_v44  ;;  %1836 = vmatpush.bf16.msra.mxu1 %v5789_v48  ;;  %v6805_v44 = vld [vmem:[%s7378_s13 + $0x74] sm:$0xf0] }
 0x242   :  { %v1257_v63 = vor.u32 1.1754944e-38, %v1256_v4  ;;  %vm1255_vm15 = vcmp.eq.f32.partialorder %v1254_v13, 8.507059e+37  ;;  %v5768_v39 = vld [vmem:[%s7378_s13 + $0xc0] sm:$0xf]  ;;  %v6810_v13 = vld [vmem:[%s7378_s13 + $0xa4] sm:$0xf]  ;;  %v5729_v48 = vor.u32 %v6805_v44, %v5728_v38 }
 0x243   :  { %v1276_v17 = vor.u32 1.1754944e-38, %v1275_v11  ;;  %vm1274_vm0 = vcmp.eq.f32.partialorder %v1273_v7, 8.507059e+37  ;;  %v5752_v11 = vld [vmem:[%s7378_s13 + $0xa0] sm:$0xf]  ;;  %v5754_v7 = vld [vmem:[%s7378_s13 + $0xb0] sm:$0xf0] }
 0x244   :  { %v7106_v29 = vpop.eup %7105 }
 0x245   :  { %v1283_v55 = vadd.f32 1.0, %v7106_v29  ;;  %v6816_v29 = vld [vmem:[%s7378_s13 + $0xcc] sm:$0xf0] }
 0x246   :  { %v7108_v58 = vpop.eup %7107 }
 0x247   :  { %v7110_v60 = vpop.eup %7109  ;;  %v1246_v61 = vmul.f32 %v7108_v58, %v1244_v19  ;;  %7111 = vrcp.f32 %v1283_v55  ;;  %vm1251_vm9 = vweird.f32 %v7108_v58  ;;  %v1295_v30 = vand.u32 2147483648, %v1283_v55 }
 0x248   :  { %v1265_v0 = vmul.f32 %v7110_v60, %v1263_v50  ;;  %7113 = vtanh.f32 %v1239_v59  ;;  %vm1270_vm10 = vweird.f32 %v7110_v60  ;;  %vm1252_vm13 = vmor %vm1250_vm11, %vm1251_vm9  ;;  %vm1289_vm2 = vweird.f32 %v1283_v55  ;;  %v5794_v50 = vld [vmem:[%s7378_s13 + $0xf8] sm:$0xf0]  ;;  %v5776_v59 = vld [vmem:[%s7378_s13 + $0xc8] sm:$0xf] }
 0x249   :  { %v1247_v1 = vsub.f32 1.0, %v1246_v61  ;;  %vm1271_vm14 = vmor %vm1269_vm12, %vm1270_vm10  ;;  %v1293_v31 = vand.u32 2147483647, %v1283_v55  ;;  %v1296_v56 = vor.u32 1.1754944e-38, %v1295_v30  ;;  %v5793_v19 = vor.u32 %v6821_v47, %v5792_v46  ;;  %v6807_v30 = vld [vmem:[%s7378_s13 + $0x8c] sm:$0xf] }
 0x24a   :  { %v1266_v3 = vsub.f32 1.0, %v1265_v0  ;;  %v5797_v51 = vor.u32 %v6819_v49, %v5794_v50  ;;  %v5730_v49 = vld [vmem:[%s7378_s13 + $0x78] sm:$0xf0] }
 0x24b   :  { %v1248_v12 = vmul.f32 %v7108_v58, %v1247_v1  ;;  %vm1294_vm4 = vcmp.eq.f32.partialorder %v1293_v31, 8.507059e+37  ;;  %1849 = vmatpush.bf16.msrb.mxu2 %v5793_v19  ;;  %v6815_v1 = vld [vmem:[%s7378_s13 + $0xcc] sm:$0xf]  ;;  %v5746_v31 = vld [vmem:[%s7378_s13 + $0x98] sm:$0xf0] }
 0x24c   :  { %v1267_v40 = vmul.f32 %v7110_v60, %v1266_v3  ;;  %1862 = vmatpush.bf16.msrb.mxu3 %v5797_v51  ;;  %v5778_v3 = vld [vmem:[%s7378_s13 + $0xd8] sm:$0xf0]  ;;  %v6803_v19 = vld [vmem:[%s7378_s13 + $0x6c] sm:$0xf] }
 0x24d   :  { %v7112_v14 = vpop.eup %7111  ;;  %v1249_v18 = vadd.f32 %v7108_v58, %v1248_v12  ;;  %v5781_v4 = vor.u32 %v6815_v1, %v5778_v3  ;;  %v6812_v12 = vld [vmem:[%s7378_s13 + $0xac] sm:$0xf0]  ;;  %v6801_v1 = vld [vmem:[%s7378_s13 + $0x54] sm:$0xf0]  ;;  %v6799_v3 = vld [vmem:[%s7378_s13 + $0x4c] sm:$0xf] }
 0x24e   :  { %v1268_v15 = vadd.f32 %v7110_v60, %v1267_v40  ;;  %v1285_v16 = vmul.f32 %v7112_v14, %v1283_v55  ;;  %v7114_v22 = vpop.eup %7113  ;;  %vm1290_vm1 = vweird.f32 %v7112_v14  ;;  %v5769_v55 = vor.u32 %v6816_v29, %v5768_v39  ;;  %v5704_v39 = vld [vmem:[%s7378_s13 + $0x40] sm:$0xf]  ;;  %v6800_v29 = vld [vmem:[%s7378_s13 + $0x4c] sm:$0xf0] }
 0x24f   :  { %v1253_v20 = vsel %vm1252_vm13, %v7108_v58, %v1249_v18  ;;  %vm1291_vm3 = vmor %vm1289_vm2, %vm1290_vm1  ;;  %v5770_v58 = vld [vmem:[%s7378_s13 + $0xd0] sm:$0xf0]  ;;  %v5753_v40 = vor.u32 %v6812_v12, %v5752_v11  ;;  %v6813_v18 = vld [vmem:[%s7378_s13 + $0xb4] sm:$0xf0] }
 0x250   :  { %v1258_v23 = vsel %vm1255_vm15, %v1257_v63, %v1253_v20  ;;  %v1272_v24 = vsel %vm1271_vm14, %v7110_v60, %v1268_v15  ;;  %v1286_v25 = vsub.f32 1.0, %v1285_v16  ;;  %v6817_v60 = vld [vmem:[%s7378_s13 + $0xd4] sm:$0xf0]  ;;  %v5773_v61 = vor.u32 %v6814_v54, %v5770_v58  ;;  %1824 = vmatpush.bf16.msrb.mxu0 %v5769_v55  ;;  %1863 = vmatpush.bf16.msrb.mxu3 %v5781_v4  ;;  %v6811_v16 = vld [vmem:[%s7378_s13 + $0xac] sm:$0xf] }
 0x251   :  { %v1277_v52 = vsel %vm1274_vm0, %v1276_v17, %v1272_v24  ;;  %v1300_v62 = vmul.f32 %v7114_v22, %v1258_v23  ;;  %v5777_v0 = vor.u32 %v6817_v60, %v5776_v59  ;;  %v5757_v63 = vor.u32 %v6810_v13, %v5754_v7  ;;  %v5762_v17 = vld [vmem:[%s7378_s13 + $0xb8] sm:$0xf0]  ;;  %v5736_v22 = vld [vmem:[%s7378_s13 + $0x80] sm:$0xf]  ;;  %v6808_v23 = vld [vmem:[%s7378_s13 + $0x8c] sm:$0xf0] }
 0x252   :  { %v1299_v2 = vmul.f32 %v1277_v52, %v7746_v26  ;;  %v1287_v6 = vmul.f32 %v7112_v14, %v1286_v25  ;;  %1837 = vmatpush.bf16.msra.mxu1 %v5773_v61  ;;  %v5765_v20 = vor.u32 %v6811_v16, %v5762_v17  ;;  %v6806_v24 = vld [vmem:[%s7378_s13 + $0x84] sm:$0xf]  ;;  %v5737_v25 = vor.u32 %v6808_v23, %v5736_v22  ;;  %v5738_v52 = vld [vmem:[%s7378_s13 + $0x90] sm:$0xf0]  ;;  %v5714_v11 = vld [vmem:[%s7378_s13 + $0x58] sm:$0xf0] }
 0x253   :  { %1850 = vmatpush.bf16.msrb.mxu2 %v5777_v0  ;;  %v6798_v54 = vld [vmem:[%s7378_s13 + $0x44] sm:$0xf]  ;;  %v5705_v59 = vor.u32 %v6800_v29, %v5704_v39  ;;  %v5706_v60 = vld [vmem:[%s7378_s13 + $0x50] sm:$0xf0]  ;;  %v5712_v0 = vld [vmem:[%s7378_s13 + $0x48] sm:$0xf]  ;;  %v5717_v7 = vor.u32 %v6799_v3, %v5714_v11 }
 0x254   :  { %v7818_v9 = vadd.f32 %v1300_v62, %v1299_v2  ;;  %v1288_v27 = vadd.f32 %v7112_v14, %v1287_v6  ;;  %1825 = vmatpush.bf16.msrb.mxu0 %v5753_v40  ;;  %1864 = vmatpush.bf16.msrb.mxu3 %v5765_v20  ;;  %v5744_v62 = vld [vmem:[%s7378_s13 + $0x88] sm:$0xf]  ;;  %v6809_v2 = vld [vmem:[%s7378_s13 + $0x94] sm:$0xf0]  ;;  %v5741_v6 = vor.u32 %v6806_v24, %v5738_v52  ;;  %v5688_v12 = vld [vmem:[%s7378_s13 + $0x20] sm:$0xf]  ;;  %v1557_v40 = vunpack.c.h.bf16 %v7525_v28 }
 0x255   :  { %v5709_v61 = vor.u32 %v6798_v54, %v5706_v60  ;;  %v5713_v4 = vor.u32 %v6801_v1, %v5712_v0  ;;  %v6796_v13 = vld [vmem:[%s7378_s13 + $0x2c] sm:$0xf0]  ;;  %v6797_v22 = vld [vmem:[%s7378_s13 + $0x34] sm:$0xf0]  ;;  %v6795_v23 = vld [vmem:[%s7378_s13 + $0x2c] sm:$0xf] }
 0x256   :  { %7115 = vtanh.f32 %v7818_v9  ;;  %v1292_v21 = vsel %vm1291_vm3, %v7112_v14, %v1288_v27  ;;  %v5760_v14 = vld [vmem:[%s7378_s13 + $0xa8] sm:$0xf]  ;;  %1838 = vmatpush.bf16.msra.mxu1 %v5757_v63  ;;  %v5745_v27 = vor.u32 %v6809_v2, %v5744_v62  ;;  %v5690_v63 = vld [vmem:[%s7378_s13 + $0x30] sm:$0xf0]  ;;  %v5698_v24 = vld [vmem:[%s7378_s13 + $0x38] sm:$0xf0] }
 0x257   :  { %v1297_v33 = vsel %vm1294_vm4, %v1296_v56, %v1292_v21  ;;  %v5761_v15 = vor.u32 %v6813_v18, %v5760_v14  ;;  %v5749_v21 = vor.u32 %v6807_v30, %v5746_v31  ;;  %v5720_v56 = vld [vmem:[%s7378_s13 + $0x60] sm:$0xf]  ;;  %v5689_v14 = vor.u32 %v6796_v13, %v5688_v12  ;;  %v6794_v18 = vld [vmem:[%s7378_s13 + $0x24] sm:$0xf]  ;;  %v6792_v30 = vld [vmem:[%s7378_s13 + $0xc] sm:$0xf0] }
 0x258   :  { %1826 = vmatpush.bf16.msrb.mxu0 %v5737_v25  ;;  %v5693_v20 = vor.u32 %v6794_v18, %v5690_v63  ;;  %v6790_v31 = vld [vmem:[%s7378_s13 + $0x4] sm:$0xf] }
 0x259   :  { %1851 = vmatpush.bf16.msrb.mxu2 %v5761_v15  ;;  %1865 = vmatpush.bf16.msrb.mxu3 %v5749_v21  ;;  %v5696_v15 = vld [vmem:[%s7378_s13 + $0x28] sm:$0xf] }
 0x25a   :  { %1839 = vmatpush.bf16.msra.mxu1 %v5741_v6  ;;  %v5697_v2 = vor.u32 %v6797_v22, %v5696_v15  ;;  %v5701_v6 = vor.u32 %v6795_v23, %v5698_v24 }
 0x25c   :  { %v7116_v26 = vpop.eup %7115 }
 0x25d   :  { %v1303_v34 = vmul.f32 %v7116_v26, %v1297_v33  ;;  %1852 = vmatpush.bf16.msrb.mxu2 %v5745_v27  ;;  %v6804_v26 = vld [vmem:[%s7378_s13 + $0x6c] sm:$0xf0]  ;;  %v6802_v33 = vld [vmem:[%s7378_s13 + $0x64] sm:$0xf]  ;;  %v5672_v27 = vld [vmem:[%s7378_s13] sm:$0xf] }
 0x25e   :  { %v5721_v36 = vor.u32 %v6804_v26, %v5720_v56  ;;  %v5725_v47 = vor.u32 %v6802_v33, %v5722_v37  ;;  %v5673_v21 = vor.u32 %v6792_v30, %v5672_v27  ;;  %v5674_v56 = vld [vmem:[%s7378_s13 + $0x10] sm:$0xf0]  ;;  %v5680_v26 = vld [vmem:[%s7378_s13 + $0x8] sm:$0xf]  ;;  %v6793_v33 = vld [vmem:[%s7378_s13 + $0x14] sm:$0xf0] }
 0x25f   :  { %v1304_v57 = vpack.c.bf16 %v1303_v34, %v1303_v34  ;;  %v1554_v34 = vunpack.c.l.bf16 %v7539_v42  ;;  %v5682_v37 = vld [vmem:[%s7378_s13 + $0x18] sm:$0xf0]  ;;  %v5681_v44 = vor.u32 %v6793_v33, %v5680_v26  ;;  %v6852_v26 = vld [vmem:[%s7378_s13 + $0xec] sm:$0xf0]  ;;  %v6850_v33 = vld [vmem:[%s7378_s13 + $0xe4] sm:$0xf] }
 0x260   :  { %1827 = vmatpush.bf16.msrb.mxu0 %v5721_v36  ;;  %1840 = vmatpush.bf16.msra.mxu1 %v5725_v47  ;;  %v6791_v36 = vld [vmem:[%s7378_s13 + $0xc] sm:$0xf] }
 0x261   :  { %1306 = vst [vmem:[#allocation3 + $0x8] sm:$0xf] %v1304_v57  ;;  %1510 = vmatmul.bf16.vlgmr.msra.gmra.mxu0 %v1304_v57  ;;  %1523 = vmatmul.bf16.vlgmr.msrb.gmra.mxu1 %v1304_v57  ;;  %v5685_v47 = vor.u32 %v6791_v36, %v5682_v37  ;;  %v5923_v36 = vld [vmem:[%s7378_s13 + $0xe8] sm:$0xf]  ;;  %v6853_v37 = vld [vmem:[%s7378_s13 + $0xf4] sm:$0xf0] }
 0x262   :  { %1536 = vmatmul.bf16.vlgmr.msra.gmra.mxu2 %v1304_v57  ;;  %1549 = vmatmul.bf16.vlgmr.msra.gmra.mxu3 %v1304_v57  ;;  %v1555_v57 = vunpack.c.h.bf16 %v7539_v42  ;;  %v5733_v42 = vor.u32 %v6803_v19, %v5730_v49 }
 0x263   :  { %1853 = vmatpush.bf16.msrb.mxu2 %v5729_v48 }
 0x264   :  { %1866 = vmatpush.bf16.msrb.mxu3 %v5733_v42  ;;  %1828 = vmatpush.bf16.msrb.mxu0 %v5705_v59 }
 0x265   :  { %1841 = vmatpush.bf16.msra.mxu1 %v5709_v61 }
 0x267   :  { %1854 = vmatpush.bf16.msrb.mxu2 %v5713_v4 }
 0x268   :  { %1867 = vmatpush.bf16.msrb.mxu3 %v5717_v7  ;;  %1829 = vmatpush.bf16.msrb.mxu0 %v5689_v14 }
 0x269   :  { %1842 = vmatpush.bf16.msra.mxu1 %v5693_v20 }
 0x26b   :  { %1855 = vmatpush.bf16.msrb.mxu2 %v5697_v2 }
 0x26c   :  { %1868 = vmatpush.bf16.msrb.mxu3 %v5701_v6  ;;  %1830 = vmatpush.bf16.msrb.mxu0 %v5673_v21 }
 0x26f   :  { %1856 = vmatpush.bf16.msrb.mxu2 %v5681_v44  ;;  %v5924_v44 = vor.u32 %v6853_v37, %v5923_v36  ;;  %v6835_v37 = vld [vmem:[%s7378_s13 + $0x6c] sm:$0xf] }
 0x270   :  { %1869 = vmatpush.bf16.msrb.mxu3 %v5685_v47 }
 0x273   :  { %2170 = vmatpush.bf16.msra.mxu2 %v5924_v44 }
 0x2de   :  { %v1511_v45 = vpop.f32.mrf.mxu0  ;;  %v1524_v46 = vpop.f32.mrf.mxu1 }
 0x2df   :  { %v1558_v50 = vadd.f32 %v1554_v34, %v1511_v45  ;;  %v1559_v51 = vadd.f32 %v1555_v57, %v1524_v46  ;;  %v5677_v57 = vor.u32 %v6790_v31, %v5674_v56  ;;  %v5915_v56 = vld [vmem:[%s7378_s13 + $0xe0] sm:$0xf] }
 0x2e1   :  { %v5667_v55 = vmul.f32 -1.442695, %v1558_v50  ;;  %v5668_v58 = vmul.f32 -1.442695, %v1559_v51  ;;  %1843 = vmatpush.bf16.msra.mxu1 %v5677_v57  ;;  %v1556_v51 = vunpack.c.l.bf16 %v7525_v28  ;;  %v5917_v57 = vld [vmem:[%s7378_s13 + $0xf0] sm:$0xf0] }
 0x2e3   :  { %7117 = vpow2.f32 %v5667_v55 }
 0x2e4   :  { %7119 = vpow2.f32 %v5668_v58 }
 0x2e5   :  { %v1537_v16 = vpop.f32.mrf.mxu2  ;;  %v1550_v17 = vpop.f32.mrf.mxu3 }
 0x2e6   :  { %v1561_v25 = vadd.f32 %v1557_v40, %v1550_v17  ;;  %v1513_v52 = vpop.f32.mrf.mxu0  ;;  %v1526_v62 = vpop.f32.mrf.mxu1  ;;  %v1560_v29 = vadd.f32 %v1556_v51, %v1537_v16  ;;  %v5901_v51 = vld [vmem:[%s7378_s13 + $0xd0] sm:$0xf0] }
 0x2e8   :  { %v5669_v34 = vmul.f32 -1.442695, %v1561_v25 }
 0x2e9   :  { %v7118_v38 = vpop.eup %7117 }
 0x2ea   :  { %v7120_v45 = vpop.eup %7119  ;;  %v1565_v46 = vadd.f32 1.0, %v7118_v38  ;;  %7121 = vpow2.f32 %v5669_v34  ;;  %v5916_v34 = vor.u32 %v6852_v26, %v5915_v56  ;;  %v5920_v38 = vor.u32 %v6850_v33, %v5917_v57  ;;  %v5859_v56 = vld [vmem:[%s7378_s13 + $0x68] sm:$0xf]  ;;  %v6837_v26 = vld [vmem:[%s7378_s13 + $0x74] sm:$0xf0] }
 0x2eb   :  { %v1584_v48 = vadd.f32 1.0, %v7120_v45  ;;  %v6851_v45 = vld [vmem:[%s7378_s13 + $0xec] sm:$0xf]  ;;  %v5860_v36 = vor.u32 %v6837_v26, %v5859_v56 }
 0x2ec   :  { %7123 = vrcp.f32 %v1565_v46  ;;  %v1577_v61 = vand.u32 2147483648, %v1565_v46  ;;  %v1575_v3 = vand.u32 2147483647, %v1565_v46  ;;  %vm1571_vm7 = vweird.f32 %v1565_v46  ;;  %2144 = vmatpush.bf16.msra.mxu0 %v5916_v34  ;;  %2157 = vmatpush.bf16.msrb.mxu1 %v5920_v38  ;;  %v5861_v38 = vld [vmem:[%s7378_s13 + $0x78] sm:$0xf0] }
 0x2ed   :  { %7125 = vrcp.f32 %v1584_v48  ;;  %v1539_v19 = vpop.f32.mrf.mxu2  ;;  %v1552_v49 = vpop.f32.mrf.mxu3  ;;  %v1596_v0 = vand.u32 2147483648, %v1584_v48  ;;  %v1594_v11 = vand.u32 2147483647, %v1584_v48  ;;  %vm1590_vm8 = vweird.f32 %v1584_v48 }
 0x2ee   :  { %v1578_v13 = vor.u32 1.1754944e-38, %v1577_v61  ;;  %vm1576_vm11 = vcmp.eq.f32.partialorder %v1575_v3, 8.507059e+37  ;;  %v6848_v19 = vld [vmem:[%s7378_s13 + $0xcc] sm:$0xf0]  ;;  %v6846_v49 = vld [vmem:[%s7378_s13 + $0xc4] sm:$0xf] }
 0x2ef   :  { %v1597_v14 = vor.u32 1.1754944e-38, %v1596_v0  ;;  %vm1595_vm12 = vcmp.eq.f32.partialorder %v1594_v11, 8.507059e+37  ;;  %v6844_v61 = vld [vmem:[%s7378_s13 + $0xac] sm:$0xf0]  ;;  %v6842_v0 = vld [vmem:[%s7378_s13 + $0xa4] sm:$0xf] }
 0x2f0   :  { %v7122_v50 = vpop.eup %7121  ;;  %v5885_v3 = vld [vmem:[%s7378_s13 + $0xb0] sm:$0xf0]  ;;  %v6845_v11 = vld [vmem:[%s7378_s13 + $0xb4] sm:$0xf0] }
 0x2f1   :  { %v1604_v42 = vadd.f32 1.0, %v7122_v50 }
 0x2f2   :  { %v7124_v39 = vpop.eup %7123 }
 0x2f3   :  { %v7126_v54 = vpop.eup %7125  ;;  %v1567_v55 = vmul.f32 %v7124_v39, %v1565_v46  ;;  %7127 = vrcp.f32 %v1604_v42  ;;  %vm1572_vm5 = vweird.f32 %v7124_v39  ;;  %v1616_v62 = vand.u32 2147483648, %v1604_v42  ;;  %v5925_v46 = vld [vmem:[%s7378_s13 + $0xf8] sm:$0xf0] }
 0x2f4   :  { %v1586_v58 = vmul.f32 %v7126_v54, %v1584_v48  ;;  %7129 = vtanh.f32 %v1560_v29  ;;  %vm1591_vm6 = vweird.f32 %v7126_v54  ;;  %vm1573_vm9 = vmor %vm1571_vm7, %vm1572_vm5  ;;  %vm1610_vm14 = vweird.f32 %v1604_v42  ;;  %v5899_v48 = vld [vmem:[%s7378_s13 + $0xc0] sm:$0xf] }
 0x2f5   :  { %v1568_v59 = vsub.f32 1.0, %v1567_v55  ;;  %vm1592_vm10 = vmor %vm1590_vm8, %vm1591_vm6  ;;  %v1614_v2 = vand.u32 2147483647, %v1604_v42  ;;  %v1617_v27 = vor.u32 1.1754944e-38, %v1616_v62  ;;  %v5928_v47 = vor.u32 %v6851_v45, %v5925_v46  ;;  %v6847_v55 = vld [vmem:[%s7378_s13 + $0xcc] sm:$0xf] }
 0x2f6   :  { %v1587_v60 = vsub.f32 1.0, %v1586_v58  ;;  %v5900_v50 = vor.u32 %v6848_v19, %v5899_v48  ;;  %v5904_v29 = vor.u32 %v6846_v49, %v5901_v51  ;;  %v5909_v58 = vld [vmem:[%s7378_s13 + $0xd8] sm:$0xf0]  ;;  %v5835_v46 = vld [vmem:[%s7378_s13 + $0x40] sm:$0xf] }
 0x2f7   :  { %v1569_v1 = vmul.f32 %v7124_v39, %v1568_v59  ;;  %vm1615_vm0 = vcmp.eq.f32.partialorder %v1614_v2, 8.507059e+37  ;;  %2183 = vmatpush.bf16.msra.mxu3 %v5928_v47  ;;  %v5912_v59 = vor.u32 %v6847_v55, %v5909_v58  ;;  %v5851_v2 = vld [vmem:[%s7378_s13 + $0x60] sm:$0xf]  ;;  %v6832_v47 = vld [vmem:[%s7378_s13 + $0x4c] sm:$0xf0] }
 0x2f8   :  { %v1588_v4 = vmul.f32 %v7126_v54, %v1587_v60  ;;  %2145 = vmatpush.bf16.msra.mxu0 %v5900_v50  ;;  %2158 = vmatpush.bf16.msrb.mxu1 %v5904_v29  ;;  %v5883_v60 = vld [vmem:[%s7378_s13 + $0xa0] sm:$0xf]  ;;  %v6830_v48 = vld [vmem:[%s7378_s13 + $0x44] sm:$0xf]  ;;  %v5836_v50 = vor.u32 %v6832_v47, %v5835_v46  ;;  %v5837_v51 = vld [vmem:[%s7378_s13 + $0x50] sm:$0xf0] }
 0x2f9   :  { %v7128_v12 = vpop.eup %7127  ;;  %v1570_v28 = vadd.f32 %v7124_v39, %v1569_v1  ;;  %v5884_v1 = vor.u32 %v6844_v61, %v5883_v60  ;;  %v6833_v29 = vld [vmem:[%s7378_s13 + $0x54] sm:$0xf0]  ;;  %v5845_v58 = vld [vmem:[%s7378_s13 + $0x58] sm:$0xf0]  ;;  %v6828_v60 = vld [vmem:[%s7378_s13 + $0x2c] sm:$0xf0]  ;;  %v1878_v61 = vunpack.c.h.bf16 %v7537_v41 }
 0x2fa   :  { %v1589_v40 = vadd.f32 %v7126_v54, %v1588_v4  ;;  %v1606_v7 = vmul.f32 %v7128_v12, %v1604_v42  ;;  %v7130_v63 = vpop.eup %7129  ;;  %vm1611_vm13 = vweird.f32 %v7128_v12  ;;  %v5907_v42 = vld [vmem:[%s7378_s13 + $0xc8] sm:$0xf] }
 0x2fb   :  { %v1574_v18 = vsel %vm1573_vm9, %v7124_v39, %v1570_v28  ;;  %vm1612_vm15 = vmor %vm1610_vm14, %vm1611_vm13  ;;  %v6849_v39 = vld [vmem:[%s7378_s13 + $0xd4] sm:$0xf0]  ;;  %2184 = vmatpush.bf16.msra.mxu3 %v5912_v59  ;;  %v5891_v4 = vld [vmem:[%s7378_s13 + $0xa8] sm:$0xf] }
 0x2fc   :  { %v1579_v15 = vsel %vm1576_vm11, %v1578_v13, %v1574_v18  ;;  %v1593_v16 = vsel %vm1592_vm10, %v7126_v54, %v1589_v40  ;;  %v1607_v17 = vsub.f32 1.0, %v1606_v7  ;;  %v5908_v54 = vor.u32 %v6849_v39, %v5907_v42  ;;  %v6843_v13 = vld [vmem:[%s7378_s13 + $0xac] sm:$0xf]  ;;  %v5893_v40 = vld [vmem:[%s7378_s13 + $0xb8] sm:$0xf0]  ;;  %2146 = vmatpush.bf16.msra.mxu0 %v5884_v1 }
 0x2fd   :  { %v1598_v20 = vsel %vm1595_vm12, %v1597_v14, %v1593_v16  ;;  %v1621_v22 = vmul.f32 %v7130_v63, %v1579_v15  ;;  %v5892_v28 = vor.u32 %v6845_v11, %v5891_v4  ;;  %v5896_v7 = vor.u32 %v6843_v13, %v5893_v40  ;;  %v5867_v14 = vld [vmem:[%s7378_s13 + $0x80] sm:$0xf]  ;;  %v6840_v18 = vld [vmem:[%s7378_s13 + $0x8c] sm:$0xf0]  ;;  %v6838_v63 = vld [vmem:[%s7378_s13 + $0x84] sm:$0xf] }
 0x2fe   :  { %v1620_v23 = vmul.f32 %v1598_v20, %v7818_v9  ;;  %v1608_v24 = vmul.f32 %v7128_v12, %v1607_v17  ;;  %2171 = vmatpush.bf16.msra.mxu2 %v5908_v54  ;;  %v5868_v15 = vor.u32 %v6840_v18, %v5867_v14  ;;  %v5869_v16 = vld [vmem:[%s7378_s13 + $0x90] sm:$0xf0]  ;;  %v5875_v17 = vld [vmem:[%s7378_s13 + $0x88] sm:$0xf]  ;;  %v6841_v20 = vld [vmem:[%s7378_s13 + $0x94] sm:$0xf0]  ;;  %v5840_v42 = vor.u32 %v6830_v48, %v5837_v51 }
 0x2ff   :  { %2185 = vmatpush.bf16.msra.mxu3 %v5896_v7  ;;  %v5843_v39 = vld [vmem:[%s7378_s13 + $0x48] sm:$0xf]  ;;  %v6831_v54 = vld [vmem:[%s7378_s13 + $0x4c] sm:$0xf]  ;;  %v5819_v59 = vld [vmem:[%s7378_s13 + $0x20] sm:$0xf] }
 0x300   :  { %v7890_v25 = vadd.f32 %v1621_v22, %v1620_v23  ;;  %v1609_v52 = vadd.f32 %v7128_v12, %v1608_v24  ;;  %v5872_v22 = vor.u32 %v6838_v63, %v5869_v16  ;;  %v5876_v23 = vor.u32 %v6841_v20, %v5875_v17  ;;  %v6839_v24 = vld [vmem:[%s7378_s13 + $0x8c] sm:$0xf]  ;;  %2147 = vmatpush.bf16.msra.mxu0 %v5868_v15  ;;  %v5821_v4 = vld [vmem:[%s7378_s13 + $0x30] sm:$0xf0]  ;;  %v5827_v11 = vld [vmem:[%s7378_s13 + $0x28] sm:$0xf] }
 0x301   :  { %v5844_v55 = vor.u32 %v6833_v29, %v5843_v39  ;;  %v5820_v1 = vor.u32 %v6828_v60, %v5819_v59  ;;  %v6829_v40 = vld [vmem:[%s7378_s13 + $0x34] sm:$0xf0]  ;;  %v6827_v7 = vld [vmem:[%s7378_s13 + $0x2c] sm:$0xf]  ;;  %v5829_v14 = vld [vmem:[%s7378_s13 + $0x38] sm:$0xf0] }
 0x302   :  { %7131 = vtanh.f32 %v7890_v25  ;;  %v1613_v6 = vsel %vm1612_vm15, %v7128_v12, %v1609_v52  ;;  %v5888_v12 = vor.u32 %v6842_v0, %v5885_v3  ;;  %2172 = vmatpush.bf16.msra.mxu2 %v5892_v28  ;;  %v5877_v52 = vld [vmem:[%s7378_s13 + $0x98] sm:$0xf0]  ;;  %v5848_v0 = vor.u32 %v6831_v54, %v5845_v58  ;;  %v6826_v3 = vld [vmem:[%s7378_s13 + $0x24] sm:$0xf]  ;;  %v5803_v20 = vld [vmem:[%s7378_s13] sm:$0xf] }
 0x303   :  { %v1618_v30 = vsel %vm1615_vm0, %v1617_v27, %v1613_v6  ;;  %v5880_v62 = vor.u32 %v6839_v24, %v5877_v52  ;;  %v6836_v6 = vld [vmem:[%s7378_s13 + $0x6c] sm:$0xf0]  ;;  %v6834_v27 = vld [vmem:[%s7378_s13 + $0x64] sm:$0xf]  ;;  %v5824_v13 = vor.u32 %v6826_v3, %v5821_v4  ;;  %v5828_v16 = vor.u32 %v6829_v40, %v5827_v11  ;;  %v5805_v52 = vld [vmem:[%s7378_s13 + $0x10] sm:$0xf0] }
 0x304   :  { %2159 = vmatpush.bf16.msrb.mxu1 %v5888_v12  ;;  %v5832_v17 = vor.u32 %v6827_v7, %v5829_v14 }
 0x305   :  { %2186 = vmatpush.bf16.msra.mxu3 %v5880_v62  ;;  %v5811_v62 = vld [vmem:[%s7378_s13 + $0x8] sm:$0xf] }
 0x306   :  { %2173 = vmatpush.bf16.msra.mxu2 %v5876_v23  ;;  %v6822_v23 = vld [vmem:[%s7378_s13 + $0x4] sm:$0xf] }
 0x308   :  { %v7132_v9 = vpop.eup %7131  ;;  %2160 = vmatpush.bf16.msrb.mxu1 %v5872_v22  ;;  %v6824_v22 = vld [vmem:[%s7378_s13 + $0xc] sm:$0xf0] }
 0x309   :  { %v1624_v31 = vmul.f32 %v7132_v9, %v1618_v30  ;;  %v1875_v9 = vunpack.c.l.bf16 %v7547_v10  ;;  %v1876_v30 = vunpack.c.h.bf16 %v7547_v10  ;;  %v5864_v10 = vor.u32 %v6835_v37, %v5861_v38 }
 0x30a   :  { %2174 = vmatpush.bf16.msra.mxu2 %v5860_v36  ;;  %v5804_v24 = vor.u32 %v6824_v22, %v5803_v20  ;;  %v1877_v38 = vunpack.c.l.bf16 %v7537_v41 }
 0x30b   :  { %v1625_v21 = vpack.c.bf16 %v1624_v31, %v1624_v31  ;;  %v5852_v31 = vor.u32 %v6836_v6, %v5851_v2  ;;  %2187 = vmatpush.bf16.msra.mxu3 %v5864_v10  ;;  %v6825_v2 = vld [vmem:[%s7378_s13 + $0x14] sm:$0xf0] }
 0x30d   :  { %1627 = vst [vmem:[#allocation3 + $0xc] sm:$0xf] %v1625_v21  ;;  %1831 = vmatmul.bf16.vlgmr.msrb.gmra.mxu0 %v1625_v21  ;;  %1844 = vmatmul.bf16.vlgmr.msra.gmra.mxu1 %v1625_v21 }
 0x30e   :  { %1857 = vmatmul.bf16.vlgmr.msrb.gmra.mxu2 %v1625_v21  ;;  %1870 = vmatmul.bf16.vlgmr.msrb.gmra.mxu3 %v1625_v21  ;;  %v5853_v21 = vld [vmem:[%s7378_s13 + $0x70] sm:$0xf0] }
 0x30f   :  { %v5856_v57 = vor.u32 %v6834_v27, %v5853_v21  ;;  %2148 = vmatpush.bf16.msra.mxu0 %v5852_v31  ;;  %2175 = vmatpush.bf16.msra.mxu2 %v5844_v55  ;;  %v5808_v27 = vor.u32 %v6822_v23, %v5805_v52  ;;  %v5812_v21 = vor.u32 %v6825_v2, %v5811_v62  ;;  %v6046_v23 = vld [vmem:[%s7378_s13 + $0xe0] sm:$0xf]  ;;  %v6882_v52 = vld [vmem:[%s7378_s13 + $0xe4] sm:$0xf]  ;;  %v6048_v2 = vld [vmem:[%s7378_s13 + $0xf0] sm:$0xf0] }
 0x310   :  { %2188 = vmatpush.bf16.msra.mxu3 %v5848_v0 }
 0x311   :  { %2161 = vmatpush.bf16.msrb.mxu1 %v5856_v57 }
 0x313   :  { %2149 = vmatpush.bf16.msra.mxu0 %v5836_v50  ;;  %2176 = vmatpush.bf16.msra.mxu2 %v5828_v16 }
 0x314   :  { %2189 = vmatpush.bf16.msra.mxu3 %v5832_v17 }
 0x315   :  { %2162 = vmatpush.bf16.msrb.mxu1 %v5840_v42 }
 0x317   :  { %2150 = vmatpush.bf16.msra.mxu0 %v5820_v1  ;;  %2177 = vmatpush.bf16.msra.mxu2 %v5812_v21  ;;  %v6056_v21 = vld [vmem:[%s7378_s13 + $0xf8] sm:$0xf0] }
 0x319   :  { %2163 = vmatpush.bf16.msrb.mxu1 %v5824_v13 }
 0x31b   :  { %2151 = vmatpush.bf16.msra.mxu0 %v5804_v24  ;;  %v6884_v24 = vld [vmem:[%s7378_s13 + $0xec] sm:$0xf0] }
 0x31c   :  { %v6047_v62 = vor.u32 %v6884_v24, %v6046_v23 }
 0x31d   :  { %2164 = vmatpush.bf16.msrb.mxu1 %v5808_v27  ;;  %v6885_v27 = vld [vmem:[%s7378_s13 + $0xf4] sm:$0xf0] }
 0x31f   :  { %2465 = vmatpush.bf16.msrb.mxu0 %v6047_v62 }
 0x38a   :  { %v1832_v33 = vpop.f32.mrf.mxu0  ;;  %v1845_v34 = vpop.f32.mrf.mxu1 }
 0x38b   :  { %v1879_v44 = vadd.f32 %v1875_v9, %v1832_v33  ;;  %v1880_v45 = vadd.f32 %v1876_v30, %v1845_v34  ;;  %v6823_v9 = vld [vmem:[%s7378_s13 + $0xc] sm:$0xf]  ;;  %v5813_v30 = vld [vmem:[%s7378_s13 + $0x18] sm:$0xf0] }
 0x38c   :  { %v5816_v33 = vor.u32 %v6823_v9, %v5813_v30  ;;  %v6051_v9 = vor.u32 %v6882_v52, %v6048_v2  ;;  %v6867_v2 = vld [vmem:[%s7378_s13 + $0x6c] sm:$0xf] }
 0x38d   :  { %v5798_v19 = vmul.f32 -1.442695, %v1879_v44  ;;  %v5799_v49 = vmul.f32 -1.442695, %v1880_v45 }
 0x38e   :  { %2190 = vmatpush.bf16.msra.mxu3 %v5816_v33  ;;  %2478 = vmatpush.bf16.msra.mxu1 %v6051_v9  ;;  %v6880_v33 = vld [vmem:[%s7378_s13 + $0xcc] sm:$0xf0] }
 0x38f   :  { %7133 = vpow2.f32 %v5798_v19 }
 0x390   :  { %7135 = vpow2.f32 %v5799_v49 }
 0x391   :  { %v1858_v12 = vpop.f32.mrf.mxu2  ;;  %v1871_v28 = vpop.f32.mrf.mxu3 }
 0x392   :  { %v1882_v18 = vadd.f32 %v1878_v61, %v1871_v28  ;;  %v1834_v63 = vpop.f32.mrf.mxu0  ;;  %v1847_v15 = vpop.f32.mrf.mxu1  ;;  %v1881_v10 = vadd.f32 %v1877_v38, %v1858_v12  ;;  %v6881_v38 = vld [vmem:[%s7378_s13 + $0xd4] sm:$0xf0] }
 0x394   :  { %v5800_v6 = vmul.f32 -1.442695, %v1882_v18 }
 0x395   :  { %v7134_v31 = vpop.eup %7133 }
 0x396   :  { %v7136_v56 = vpop.eup %7135  ;;  %v1886_v26 = vadd.f32 1.0, %v7134_v31  ;;  %7137 = vpow2.f32 %v5800_v6  ;;  %v6054_v6 = vld [vmem:[%s7378_s13 + $0xe8] sm:$0xf]  ;;  %v6883_v31 = vld [vmem:[%s7378_s13 + $0xec] sm:$0xf] }
 0x397   :  { %v1905_v34 = vadd.f32 1.0, %v7136_v56  ;;  %v6055_v30 = vor.u32 %v6885_v27, %v6054_v6  ;;  %v6059_v56 = vor.u32 %v6883_v31, %v6056_v21  ;;  %v5992_v6 = vld [vmem:[%s7378_s13 + $0x78] sm:$0xf0]  ;;  %v6864_v31 = vld [vmem:[%s7378_s13 + $0x4c] sm:$0xf0] }
 0x398   :  { %7139 = vrcp.f32 %v1886_v26  ;;  %v1898_v50 = vand.u32 2147483648, %v1886_v26  ;;  %v1896_v39 = vand.u32 2147483647, %v1886_v26  ;;  %vm1892_vm3 = vweird.f32 %v1886_v26  ;;  %v6862_v21 = vld [vmem:[%s7378_s13 + $0x44] sm:$0xf] }
 0x399   :  { %7141 = vrcp.f32 %v1905_v34  ;;  %v1860_v57 = vpop.f32.mrf.mxu2  ;;  %v1873_v36 = vpop.f32.mrf.mxu3  ;;  %v1917_v51 = vand.u32 2147483648, %v1905_v34  ;;  %v1915_v54 = vand.u32 2147483647, %v1905_v34  ;;  %vm1911_vm4 = vweird.f32 %v1905_v34  ;;  %2491 = vmatpush.bf16.msrb.mxu2 %v6055_v30  ;;  %2504 = vmatpush.bf16.msrb.mxu3 %v6059_v56  ;;  %v5966_v30 = vld [vmem:[%s7378_s13 + $0x40] sm:$0xf] }
 0x39a   :  { %v1899_v58 = vor.u32 1.1754944e-38, %v1898_v50  ;;  %vm1897_vm7 = vcmp.eq.f32.partialorder %v1896_v39, 8.507059e+37  ;;  %v6032_v36 = vld [vmem:[%s7378_s13 + $0xd0] sm:$0xf0]  ;;  %v6877_v39 = vld [vmem:[%s7378_s13 + $0xb4] sm:$0xf0] }
 0x39b   :  { %v1918_v61 = vor.u32 1.1754944e-38, %v1917_v51  ;;  %vm1916_vm8 = vcmp.eq.f32.partialorder %v1915_v54, 8.507059e+37  ;;  %v6016_v51 = vld [vmem:[%s7378_s13 + $0xb0] sm:$0xf0] }
 0x39c   :  { %v7138_v37 = vpop.eup %7137 }
 0x39d   :  { %v1925_v44 = vadd.f32 1.0, %v7138_v37  ;;  %v6038_v37 = vld [vmem:[%s7378_s13 + $0xc8] sm:$0xf] }
 0x39e   :  { %v7140_v45 = vpop.eup %7139 }
 0x39f   :  { %v7142_v46 = vpop.eup %7141  ;;  %v1888_v47 = vmul.f32 %v7140_v45, %v1886_v26  ;;  %7143 = vrcp.f32 %v1925_v44  ;;  %vm1893_vm1 = vweird.f32 %v7140_v45  ;;  %v1937_v18 = vand.u32 2147483648, %v1925_v44  ;;  %v6030_v26 = vld [vmem:[%s7378_s13 + $0xc0] sm:$0xf] }
 0x3a0   :  { %v1907_v48 = vmul.f32 %v7142_v46, %v1905_v34  ;;  %7145 = vtanh.f32 %v1881_v10  ;;  %vm1912_vm2 = vweird.f32 %v7142_v46  ;;  %vm1894_vm5 = vmor %vm1892_vm3, %vm1893_vm1  ;;  %vm1931_vm10 = vweird.f32 %v1925_v44  ;;  %v6878_v34 = vld [vmem:[%s7378_s13 + $0xc4] sm:$0xf]  ;;  %v6879_v10 = vld [vmem:[%s7378_s13 + $0xcc] sm:$0xf] }
 0x3a1   :  { %v1889_v19 = vsub.f32 1.0, %v1888_v47  ;;  %vm1913_vm6 = vmor %vm1911_vm4, %vm1912_vm2  ;;  %v1935_v63 = vand.u32 2147483647, %v1925_v44  ;;  %v1938_v16 = vor.u32 1.1754944e-38, %v1937_v18  ;;  %v6031_v57 = vor.u32 %v6880_v33, %v6030_v26  ;;  %v6868_v18 = vld [vmem:[%s7378_s13 + $0x6c] sm:$0xf0] }
 0x3a2   :  { %v1908_v49 = vsub.f32 1.0, %v1907_v48  ;;  %v6014_v48 = vld [vmem:[%s7378_s13 + $0xa0] sm:$0xf]  ;;  %v5967_v33 = vor.u32 %v6864_v31, %v5966_v30 }
 0x3a3   :  { %v1890_v42 = vmul.f32 %v7140_v45, %v1889_v19  ;;  %vm1936_vm12 = vcmp.eq.f32.partialorder %v1935_v63, 8.507059e+37  ;;  %2466 = vmatpush.bf16.msrb.mxu0 %v6031_v57  ;;  %v6876_v19 = vld [vmem:[%s7378_s13 + $0xac] sm:$0xf0]  ;;  %v6866_v63 = vld [vmem:[%s7378_s13 + $0x64] sm:$0xf] }
 0x3a4   :  { %v1909_v29 = vmul.f32 %v7142_v46, %v1908_v49  ;;  %v6874_v49 = vld [vmem:[%s7378_s13 + $0xa4] sm:$0xf]  ;;  %v6015_v50 = vor.u32 %v6876_v19, %v6014_v48 }
 0x3a5   :  { %v7144_v55 = vpop.eup %7143  ;;  %v1891_v41 = vadd.f32 %v7140_v45, %v1890_v42  ;;  %v6022_v42 = vld [vmem:[%s7378_s13 + $0xa8] sm:$0xf] }
 0x3a6   :  { %v1910_v59 = vadd.f32 %v7142_v46, %v1909_v29  ;;  %v1927_v60 = vmul.f32 %v7144_v55, %v1925_v44  ;;  %v7146_v1 = vpop.eup %7145  ;;  %vm1932_vm9 = vweird.f32 %v7144_v55  ;;  %v6035_v44 = vor.u32 %v6878_v34, %v6032_v36  ;;  %v5968_v34 = vld [vmem:[%s7378_s13 + $0x50] sm:$0xf0]  ;;  %v5974_v36 = vld [vmem:[%s7378_s13 + $0x48] sm:$0xf] }
 0x3a7   :  { %v1895_v0 = vsel %vm1894_vm5, %v7140_v45, %v1891_v41  ;;  %vm1933_vm11 = vmor %vm1931_vm10, %vm1932_vm9  ;;  %v6039_v45 = vor.u32 %v6881_v38, %v6038_v37  ;;  %v6019_v29 = vor.u32 %v6874_v49, %v6016_v51  ;;  %v6023_v54 = vor.u32 %v6877_v39, %v6022_v42  ;;  %v6024_v41 = vld [vmem:[%s7378_s13 + $0xb8] sm:$0xf0]  ;;  %2467 = vmatpush.bf16.msrb.mxu0 %v6015_v50  ;;  %v6865_v37 = vld [vmem:[%s7378_s13 + $0x54] sm:$0xf0] }
 0x3a8   :  { %v1900_v3 = vsel %vm1897_vm7, %v1899_v58, %v1895_v0  ;;  %v1914_v4 = vsel %vm1913_vm6, %v7142_v46, %v1910_v59  ;;  %v1928_v11 = vsub.f32 1.0, %v1927_v60  ;;  %v6040_v46 = vld [vmem:[%s7378_s13 + $0xd8] sm:$0xf0]  ;;  %2479 = vmatpush.bf16.msra.mxu1 %v6035_v44  ;;  %v5998_v59 = vld [vmem:[%s7378_s13 + $0x80] sm:$0xf]  ;;  %v5971_v57 = vor.u32 %v6862_v21, %v5968_v34 }
 0x3a9   :  { %v1919_v12 = vsel %vm1916_vm8, %v1918_v61, %v1914_v4  ;;  %v1942_v28 = vmul.f32 %v7146_v1, %v1900_v3  ;;  %v6043_v47 = vor.u32 %v6879_v10, %v6040_v46  ;;  %2492 = vmatpush.bf16.msrb.mxu2 %v6039_v45  ;;  %v6872_v60 = vld [vmem:[%s7378_s13 + $0x8c] sm:$0xf0]  ;;  %v6870_v61 = vld [vmem:[%s7378_s13 + $0x84] sm:$0xf]  ;;  %v6000_v1 = vld [vmem:[%s7378_s13 + $0x90] sm:$0xf0]  ;;  %v5975_v44 = vor.u32 %v6865_v37, %v5974_v36 }
 0x3aa   :  { %v1941_v13 = vmul.f32 %v1919_v12, %v7890_v25  ;;  %v1929_v40 = vmul.f32 %v7144_v55, %v1928_v11  ;;  %v5999_v0 = vor.u32 %v6872_v60, %v5998_v59  ;;  %v6006_v3 = vld [vmem:[%s7378_s13 + $0x88] sm:$0xf]  ;;  %v6873_v4 = vld [vmem:[%s7378_s13 + $0x94] sm:$0xf0]  ;;  %v6003_v11 = vor.u32 %v6870_v61, %v6000_v1  ;;  %v6863_v38 = vld [vmem:[%s7378_s13 + $0x4c] sm:$0xf] }
 0x3ab   :  { %2505 = vmatpush.bf16.msrb.mxu3 %v6043_v47  ;;  %v6007_v12 = vor.u32 %v6873_v4, %v6006_v3  ;;  %v5976_v45 = vld [vmem:[%s7378_s13 + $0x58] sm:$0xf0]  ;;  %v5950_v10 = vld [vmem:[%s7378_s13 + $0x20] sm:$0xf]  ;;  %v6860_v46 = vld [vmem:[%s7378_s13 + $0x2c] sm:$0xf0]  ;;  %v2199_v47 = vunpack.c.h.bf16 %v7545_v53 }
 0x3ac   :  { %v7962_v7 = vadd.f32 %v1942_v28, %v1941_v13  ;;  %v1930_v14 = vadd.f32 %v7144_v55, %v1929_v40  ;;  %2480 = vmatpush.bf16.msra.mxu1 %v6019_v29  ;;  %v6871_v28 = vld [vmem:[%s7378_s13 + $0x8c] sm:$0xf]  ;;  %v6008_v13 = vld [vmem:[%s7378_s13 + $0x98] sm:$0xf0]  ;;  %2468 = vmatpush.bf16.msrb.mxu0 %v5999_v0  ;;  %v5979_v48 = vor.u32 %v6863_v38, %v5976_v45  ;;  %v6858_v49 = vld [vmem:[%s7378_s13 + $0x24] sm:$0xf] }
 0x3ad   :  { %2493 = vmatpush.bf16.msrb.mxu2 %v6023_v54  ;;  %v6011_v40 = vor.u32 %v6871_v28, %v6008_v13  ;;  %v5951_v19 = vor.u32 %v6860_v46, %v5950_v10  ;;  %v5952_v50 = vld [vmem:[%s7378_s13 + $0x30] sm:$0xf0]  ;;  %v5958_v51 = vld [vmem:[%s7378_s13 + $0x28] sm:$0xf]  ;;  %v6861_v54 = vld [vmem:[%s7378_s13 + $0x34] sm:$0xf0] }
 0x3ae   :  { %7147 = vtanh.f32 %v7962_v7  ;;  %v1934_v15 = vsel %vm1933_vm11, %v7144_v55, %v1930_v14  ;;  %v6875_v55 = vld [vmem:[%s7378_s13 + $0xac] sm:$0xf]  ;;  %v5982_v14 = vld [vmem:[%s7378_s13 + $0x60] sm:$0xf]  ;;  %v5955_v29 = vor.u32 %v6858_v49, %v5952_v50  ;;  %v5959_v61 = vor.u32 %v6861_v54, %v5958_v51  ;;  %v6856_v3 = vld [vmem:[%s7378_s13 + $0xc] sm:$0xf0] }
 0x3af   :  { %v1939_v17 = vsel %vm1936_vm12, %v1938_v16, %v1934_v15  ;;  %v6027_v58 = vor.u32 %v6875_v55, %v6024_v41  ;;  %v2196_v15 = vunpack.c.l.bf16 %v7557_v8  ;;  %v2197_v16 = vunpack.c.h.bf16 %v7557_v8  ;;  %v6859_v55 = vld [vmem:[%s7378_s13 + $0x2c] sm:$0xf]  ;;  %v5960_v41 = vld [vmem:[%s7378_s13 + $0x38] sm:$0xf0]  ;;  %v5934_v1 = vld [vmem:[%s7378_s13] sm:$0xf] }
 0x3b0   :  { %2481 = vmatpush.bf16.msra.mxu1 %v6003_v11  ;;  %v5995_v8 = vor.u32 %v6867_v2, %v5992_v6  ;;  %v5963_v0 = vor.u32 %v6859_v55, %v5960_v41  ;;  %v6854_v4 = vld [vmem:[%s7378_s13 + $0x4] sm:$0xf]  ;;  %v5935_v11 = vor.u32 %v6856_v3, %v5934_v1  ;;  %v5942_v28 = vld [vmem:[%s7378_s13 + $0x8] sm:$0xf]  ;;  %v6857_v13 = vld [vmem:[%s7378_s13 + $0x14] sm:$0xf0] }
 0x3b1   :  { %2506 = vmatpush.bf16.msrb.mxu3 %v6027_v58  ;;  %2494 = vmatpush.bf16.msrb.mxu2 %v6007_v12  ;;  %v5936_v12 = vld [vmem:[%s7378_s13 + $0x10] sm:$0xf0]  ;;  %v6177_v1 = vld [vmem:[%s7378_s13 + $0xe0] sm:$0xf]  ;;  %v6916_v3 = vld [vmem:[%s7378_s13 + $0xec] sm:$0xf0] }
 0x3b4   :  { %v7148_v25 = vpop.eup %7147 }
 0x3b5   :  { %v1945_v20 = vmul.f32 %v7148_v25, %v1939_v17  ;;  %2507 = vmatpush.bf16.msrb.mxu3 %v6011_v40  ;;  %v5983_v25 = vor.u32 %v6868_v18, %v5982_v14  ;;  %v5984_v17 = vld [vmem:[%s7378_s13 + $0x70] sm:$0xf0]  ;;  %v5939_v14 = vor.u32 %v6854_v4, %v5936_v12  ;;  %v6855_v18 = vld [vmem:[%s7378_s13 + $0xc] sm:$0xf]  ;;  %v6914_v4 = vld [vmem:[%s7378_s13 + $0xe4] sm:$0xf] }
 0x3b6   :  { %v5987_v52 = vor.u32 %v6866_v63, %v5984_v17  ;;  %v5944_v63 = vld [vmem:[%s7378_s13 + $0x18] sm:$0xf0]  ;;  %v6179_v12 = vld [vmem:[%s7378_s13 + $0xf0] sm:$0xf0] }
 0x3b7   :  { %v1946_v22 = vpack.c.bf16 %v1945_v20, %v1945_v20  ;;  %v5990_v20 = vld [vmem:[%s7378_s13 + $0x68] sm:$0xf]  ;;  %2469 = vmatpush.bf16.msrb.mxu0 %v5983_v25 }
 0x3b8   :  { %2482 = vmatpush.bf16.msra.mxu1 %v5987_v52 }
 0x3b9   :  { %1948 = vst [vmem:[#allocation3 + $0x10] sm:$0xf] %v1946_v22  ;;  %2152 = vmatmul.bf16.vlgmr.msra.gmra.mxu0 %v1946_v22  ;;  %2165 = vmatmul.bf16.vlgmr.msrb.gmra.mxu1 %v1946_v22 }
 0x3ba   :  { %2178 = vmatmul.bf16.vlgmr.msra.gmra.mxu2 %v1946_v22  ;;  %2191 = vmatmul.bf16.vlgmr.msra.gmra.mxu3 %v1946_v22  ;;  %v6869_v22 = vld [vmem:[%s7378_s13 + $0x74] sm:$0xf0] }
 0x3bb   :  { %v5991_v62 = vor.u32 %v6869_v22, %v5990_v20  ;;  %2508 = vmatpush.bf16.msrb.mxu3 %v5995_v8  ;;  %2470 = vmatpush.bf16.msrb.mxu0 %v5967_v33  ;;  %v5947_v20 = vor.u32 %v6855_v18, %v5944_v63  ;;  %v6915_v18 = vld [vmem:[%s7378_s13 + $0xec] sm:$0xf]  ;;  %v6187_v63 = vld [vmem:[%s7378_s13 + $0xf8] sm:$0xf0] }
 0x3bc   :  { %2483 = vmatpush.bf16.msra.mxu1 %v5971_v57 }
 0x3bd   :  { %2495 = vmatpush.bf16.msrb.mxu2 %v5991_v62  ;;  %v2198_v62 = vunpack.c.l.bf16 %v7545_v53 }
 0x3bf   :  { %2509 = vmatpush.bf16.msrb.mxu3 %v5979_v48  ;;  %2471 = vmatpush.bf16.msrb.mxu0 %v5951_v19 }
 0x3c0   :  { %2484 = vmatpush.bf16.msra.mxu1 %v5955_v29 }
 0x3c1   :  { %2496 = vmatpush.bf16.msrb.mxu2 %v5975_v44 }
 0x3c3   :  { %2510 = vmatpush.bf16.msrb.mxu3 %v5963_v0  ;;  %2472 = vmatpush.bf16.msrb.mxu0 %v5935_v11  ;;  %v6178_v11 = vor.u32 %v6916_v3, %v6177_v1  ;;  %v6097_v3 = vld [vmem:[%s7378_s13 + $0x40] sm:$0xf] }
 0x3c4   :  { %2485 = vmatpush.bf16.msra.mxu1 %v5939_v14 }
 0x3c5   :  { %2497 = vmatpush.bf16.msrb.mxu2 %v5959_v61 }
 0x3c7   :  { %2511 = vmatpush.bf16.msrb.mxu3 %v5947_v20  ;;  %2786 = vmatpush.bf16.msra.mxu0 %v6178_v11  ;;  %v6894_v11 = vld [vmem:[%s7378_s13 + $0x44] sm:$0xf] }
 0x436   :  { %v2153_v23 = vpop.f32.mrf.mxu0  ;;  %v2166_v24 = vpop.f32.mrf.mxu1 }
 0x437   :  { %v2200_v27 = vadd.f32 %v2196_v15, %v2153_v23  ;;  %v2201_v9 = vadd.f32 %v2197_v16, %v2166_v24  ;;  %v5943_v16 = vor.u32 %v6857_v13, %v5942_v28  ;;  %v6185_v28 = vld [vmem:[%s7378_s13 + $0xe8] sm:$0xf]  ;;  %v6917_v13 = vld [vmem:[%s7378_s13 + $0xf4] sm:$0xf0] }
 0x438   :  { %v6186_v14 = vor.u32 %v6917_v13, %v6185_v28  ;;  %v6099_v28 = vld [vmem:[%s7378_s13 + $0x50] sm:$0xf0]  ;;  %v6105_v13 = vld [vmem:[%s7378_s13 + $0x48] sm:$0xf] }
 0x439   :  { %v5929_v56 = vmul.f32 -1.442695, %v2200_v27  ;;  %v5930_v26 = vmul.f32 -1.442695, %v2201_v9  ;;  %2498 = vmatpush.bf16.msrb.mxu2 %v5943_v16  ;;  %v6161_v16 = vld [vmem:[%s7378_s13 + $0xc0] sm:$0xf] }
 0x43b   :  { %7149 = vpow2.f32 %v5929_v56 }
 0x43c   :  { %7151 = vpow2.f32 %v5930_v26 }
 0x43d   :  { %v2179_v42 = vpop.f32.mrf.mxu2  ;;  %v2192_v39 = vpop.f32.mrf.mxu3  ;;  %2812 = vmatpush.bf16.msra.mxu2 %v6186_v14  ;;  %v6102_v14 = vor.u32 %v6894_v11, %v6099_v28  ;;  %v6949_v11 = vld [vmem:[%s8088_s29 + $0xd4] sm:$0xf0] }
 0x43e   :  { %v2203_v58 = vadd.f32 %v2199_v47, %v2192_v39  ;;  %v2155_v59 = vpop.f32.mrf.mxu0  ;;  %v2168_v60 = vpop.f32.mrf.mxu1  ;;  %v2202_v27 = vadd.f32 %v2198_v62, %v2179_v42 }
 0x440   :  { %v5931_v40 = vmul.f32 -1.442695, %v2203_v58 }
 0x441   :  { %v7150_v15 = vpop.eup %7149 }
 0x442   :  { %v7152_v25 = vpop.eup %7151  ;;  %v2207_v17 = vadd.f32 1.0, %v7150_v15  ;;  %7153 = vpow2.f32 %v5931_v40  ;;  %v6182_v40 = vor.u32 %v6914_v4, %v6179_v12  ;;  %v6190_v15 = vor.u32 %v6915_v18, %v6187_v63  ;;  %v6896_v4 = vld [vmem:[%s7378_s13 + $0x4c] sm:$0xf0]  ;;  %v6895_v63 = vld [vmem:[%s7378_s13 + $0x4c] sm:$0xf] }
 0x443   :  { %v2226_v22 = vadd.f32 1.0, %v7152_v25  ;;  %v6912_v25 = vld [vmem:[%s7378_s13 + $0xcc] sm:$0xf0]  ;;  %v6098_v12 = vor.u32 %v6896_v4, %v6097_v3  ;;  %v6310_v3 = vld [vmem:[%s8088_s29 + $0xd0] sm:$0xf0] }
 0x444   :  { %7155 = vrcp.f32 %v2207_v17  ;;  %v2219_v56 = vand.u32 2147483648, %v2207_v17  ;;  %v2217_v34 = vand.u32 2147483647, %v2207_v17  ;;  %vm2213_vm15 = vweird.f32 %v2207_v17  ;;  %2799 = vmatpush.bf16.msrb.mxu1 %v6182_v40  ;;  %2825 = vmatpush.bf16.msra.mxu3 %v6190_v15  ;;  %v6897_v40 = vld [vmem:[%s7378_s13 + $0x54] sm:$0xf0] }
 0x445   :  { %7157 = vrcp.f32 %v2226_v22  ;;  %v2181_v23 = vpop.f32.mrf.mxu2  ;;  %v2194_v24 = vpop.f32.mrf.mxu3  ;;  %v2238_v26 = vand.u32 2147483648, %v2226_v22  ;;  %v2236_v36 = vand.u32 2147483647, %v2226_v22  ;;  %vm2232_vm0 = vweird.f32 %v2226_v22  ;;  %v6107_v15 = vld [vmem:[%s7378_s13 + $0x58] sm:$0xf0] }
 0x446   :  { %v2220_v38 = vor.u32 1.1754944e-38, %v2219_v56  ;;  %vm2218_vm3 = vcmp.eq.f32.partialorder %v2217_v34, 8.507059e+37  ;;  %v6162_v20 = vor.u32 %v6912_v25, %v6161_v16  ;;  %v6169_v23 = vld [vmem:[%s7378_s13 + $0xc8] sm:$0xf]  ;;  %v6913_v24 = vld [vmem:[%s7378_s13 + $0xd4] sm:$0xf0]  ;;  %v6106_v18 = vor.u32 %v6897_v40, %v6105_v13 }
 0x447   :  { %v2239_v10 = vor.u32 1.1754944e-38, %v2238_v26  ;;  %vm2237_vm4 = vcmp.eq.f32.partialorder %v2236_v36, 8.507059e+37  ;;  %v6170_v62 = vor.u32 %v6913_v24, %v6169_v23  ;;  %v6153_v56 = vld [vmem:[%s7378_s13 + $0xa8] sm:$0xf]  ;;  %v6909_v26 = vld [vmem:[%s7378_s13 + $0xb4] sm:$0xf0]  ;;  %v6110_v16 = vor.u32 %v6895_v63, %v6107_v15 }
 0x448   :  { %v7154_v52 = vpop.eup %7153  ;;  %2787 = vmatpush.bf16.msra.mxu0 %v6162_v20  ;;  %v6154_v34 = vor.u32 %v6909_v26, %v6153_v56  ;;  %v6155_v36 = vld [vmem:[%s7378_s13 + $0xb8] sm:$0xf0]  ;;  %v6081_v25 = vld [vmem:[%s7378_s13 + $0x20] sm:$0xf]  ;;  %v6890_v20 = vld [vmem:[%s7378_s13 + $0x24] sm:$0xf] }
 0x449   :  { %v2246_v2 = vadd.f32 1.0, %v7154_v52  ;;  %2813 = vmatpush.bf16.msra.mxu2 %v6170_v62  ;;  %v6083_v23 = vld [vmem:[%s7378_s13 + $0x30] sm:$0xf0]  ;;  %v6089_v24 = vld [vmem:[%s7378_s13 + $0x28] sm:$0xf] }
 0x44a   :  { %v7156_v6 = vpop.eup %7155  ;;  %v6086_v62 = vor.u32 %v6890_v20, %v6083_v23  ;;  %v6067_v56 = vld [vmem:[%s7378_s13 + $0x10] sm:$0xf0]  ;;  %v6073_v26 = vld [vmem:[%s7378_s13 + $0x8] sm:$0xf]  ;;  %v6947_v13 = vld [vmem:[%s8088_s29 + $0xcc] sm:$0xf] }
 0x44b   :  { %v7158_v9 = vpop.eup %7157  ;;  %v2209_v8 = vmul.f32 %v7156_v6, %v2207_v17  ;;  %7159 = vrcp.f32 %v2246_v2  ;;  %vm2214_vm13 = vweird.f32 %v7156_v6  ;;  %v2258_v55 = vand.u32 2147483648, %v2246_v2  ;;  %v6910_v17 = vld [vmem:[%s7378_s13 + $0xc4] sm:$0xf]  ;;  %v6316_v4 = vld [vmem:[%s8088_s29 + $0xc8] sm:$0xf] }
 0x44c   :  { %v2228_v30 = vmul.f32 %v7158_v9, %v2226_v22  ;;  %7161 = vtanh.f32 %v2202_v27  ;;  %vm2233_vm14 = vweird.f32 %v7158_v9  ;;  %vm2215_vm1 = vmor %vm2213_vm15, %vm2214_vm13  ;;  %vm2252_vm6 = vweird.f32 %v2246_v2  ;;  %v6163_v22 = vld [vmem:[%s7378_s13 + $0xd0] sm:$0xf0]  ;;  %v6318_v40 = vld [vmem:[%s8088_s29 + $0xd8] sm:$0xf0] }
 0x44d   :  { %v2210_v31 = vsub.f32 1.0, %v2209_v8  ;;  %vm2234_vm2 = vmor %vm2232_vm0, %vm2233_vm14  ;;  %v2256_v41 = vand.u32 2147483647, %v2246_v2  ;;  %v2259_v59 = vor.u32 1.1754944e-38, %v2258_v55  ;;  %v6166_v52 = vor.u32 %v6910_v17, %v6163_v22  ;;  %v6908_v8 = vld [vmem:[%s7378_s13 + $0xac] sm:$0xf0]  ;;  %2814 = vmatpush.bf16.msra.mxu2 %v6154_v34 }
 0x44e   :  { %v2229_v21 = vsub.f32 1.0, %v2228_v30  ;;  %v6906_v30 = vld [vmem:[%s7378_s13 + $0xa4] sm:$0xf]  ;;  %v6892_v17 = vld [vmem:[%s7378_s13 + $0x2c] sm:$0xf0]  ;;  %v2517_v34 = vunpack.c.l.bf16 %v7582_v43  ;;  %v6317_v28 = vor.u32 %v6949_v11, %v6316_v4  ;;  %v6321_v63 = vor.u32 %v6947_v13, %v6318_v40 }
 0x44f   :  { %v2211_v33 = vmul.f32 %v7156_v6, %v2210_v31  ;;  %vm2257_vm8 = vcmp.eq.f32.partialorder %v2256_v41, 8.507059e+37  ;;  %2800 = vmatpush.bf16.msrb.mxu1 %v6166_v52  ;;  %v6115_v41 = vld [vmem:[%s7378_s13 + $0x70] sm:$0xf0]  ;;  %v6082_v22 = vor.u32 %v6892_v17, %v6081_v25  ;;  %v6893_v52 = vld [vmem:[%s7378_s13 + $0x34] sm:$0xf0] }
 0x450   :  { %v2230_v57 = vmul.f32 %v7158_v9, %v2229_v21  ;;  %v6147_v21 = vld [vmem:[%s7378_s13 + $0xb0] sm:$0xf0]  ;;  %v6944_v15 = vld [vmem:[%s8088_s29 + $0xac] sm:$0xf0]  ;;  %v6300_v23 = vld [vmem:[%s8088_s29 + $0xa8] sm:$0xf] }
 0x451   :  { %v7160_v37 = vpop.eup %7159  ;;  %v2212_v53 = vadd.f32 %v7156_v6, %v2211_v33  ;;  %v6150_v33 = vor.u32 %v6906_v30, %v6147_v21  ;;  %v6888_v30 = vld [vmem:[%s7378_s13 + $0xc] sm:$0xf0]  ;;  %v6294_v25 = vld [vmem:[%s8088_s29 + $0xb0] sm:$0xf0] }
 0x452   :  { %v2231_v44 = vadd.f32 %v7158_v9, %v2230_v57  ;;  %v2248_v45 = vmul.f32 %v7160_v37, %v2246_v2  ;;  %v7162_v47 = vpop.eup %7161  ;;  %vm2253_vm5 = vweird.f32 %v7160_v37  ;;  %v6911_v2 = vld [vmem:[%s7378_s13 + $0xcc] sm:$0xf]  ;;  %v6932_v11 = vld [vmem:[%s8088_s29 + $0x4c] sm:$0xf0]  ;;  %v6246_v40 = vld [vmem:[%s8088_s29 + $0x50] sm:$0xf0] }
 0x453   :  { %v2216_v46 = vsel %vm2215_vm1, %v7156_v6, %v2212_v53  ;;  %vm2254_vm7 = vmor %vm2252_vm6, %vm2253_vm5  ;;  %v6171_v6 = vld [vmem:[%s7378_s13 + $0xd8] sm:$0xf0]  ;;  %v6907_v57 = vld [vmem:[%s7378_s13 + $0xac] sm:$0xf]  ;;  %2801 = vmatpush.bf16.msrb.mxu1 %v6150_v33 }
 0x454   :  { %v2221_v48 = vsel %vm2218_vm3, %v2220_v38, %v2216_v46  ;;  %v2235_v19 = vsel %vm2234_vm2, %v7158_v9, %v2231_v44  ;;  %v2249_v49 = vsub.f32 1.0, %v2248_v45  ;;  %v6174_v27 = vor.u32 %v6911_v2, %v6171_v6  ;;  %v6145_v9 = vld [vmem:[%s7378_s13 + $0xa0] sm:$0xf]  ;;  %v6904_v38 = vld [vmem:[%s7378_s13 + $0x8c] sm:$0xf0] }
 0x455   :  { %v2240_v50 = vsel %vm2237_vm4, %v2239_v10, %v2235_v19  ;;  %v2263_v51 = vmul.f32 %v7162_v47, %v2221_v48  ;;  %v6146_v31 = vor.u32 %v6908_v8, %v6145_v9  ;;  %v6129_v53 = vld [vmem:[%s7378_s13 + $0x80] sm:$0xf]  ;;  %v6902_v44 = vld [vmem:[%s7378_s13 + $0x84] sm:$0xf]  ;;  %v6131_v10 = vld [vmem:[%s7378_s13 + $0x90] sm:$0xf0]  ;;  %v6090_v2 = vor.u32 %v6893_v52, %v6089_v24 }
 0x456   :  { %v2262_v42 = vmul.f32 %v2240_v50, %v7962_v7  ;;  %v2250_v39 = vmul.f32 %v7160_v37, %v2249_v49  ;;  %2826 = vmatpush.bf16.msra.mxu3 %v6174_v27  ;;  %v6130_v45 = vor.u32 %v6904_v38, %v6129_v53  ;;  %v6137_v46 = vld [vmem:[%s7378_s13 + $0x88] sm:$0xf]  ;;  %v6905_v47 = vld [vmem:[%s7378_s13 + $0x94] sm:$0xf0]  ;;  %v6134_v48 = vor.u32 %v6902_v44, %v6131_v10  ;;  %v6903_v49 = vld [vmem:[%s7378_s13 + $0x8c] sm:$0xf] }
 0x457   :  { %2788 = vmatpush.bf16.msra.mxu0 %v6146_v31  ;;  %v6138_v19 = vor.u32 %v6905_v47, %v6137_v46  ;;  %v6139_v50 = vld [vmem:[%s7378_s13 + $0x98] sm:$0xf0]  ;;  %v6891_v6 = vld [vmem:[%s7378_s13 + $0x2c] sm:$0xf]  ;;  %v6065_v8 = vld [vmem:[%s7378_s13] sm:$0xf] }
 0x458   :  { %v8034_v29 = vadd.f32 %v2263_v51, %v2262_v42  ;;  %v2251_v54 = vadd.f32 %v7160_v37, %v2250_v39  ;;  %v6142_v51 = vor.u32 %v6903_v49, %v6139_v50  ;;  %2802 = vmatpush.bf16.msrb.mxu1 %v6134_v48  ;;  %v6113_v42 = vld [vmem:[%s7378_s13 + $0x60] sm:$0xf]  ;;  %v6900_v39 = vld [vmem:[%s7378_s13 + $0x6c] sm:$0xf0]  ;;  %v6091_v27 = vld [vmem:[%s7378_s13 + $0x38] sm:$0xf0]  ;;  %v6066_v21 = vor.u32 %v6888_v30, %v6065_v8 }
 0x459   :  { %2815 = vmatpush.bf16.msra.mxu2 %v6138_v19  ;;  %v6114_v55 = vor.u32 %v6900_v39, %v6113_v42  ;;  %v6094_v9 = vor.u32 %v6891_v6, %v6091_v27  ;;  %v6886_v31 = vld [vmem:[%s7378_s13 + $0x4] sm:$0xf]  ;;  %v6889_v33 = vld [vmem:[%s7378_s13 + $0x14] sm:$0xf0]  ;;  %v6887_v53 = vld [vmem:[%s7378_s13 + $0xc] sm:$0xf] }
 0x45a   :  { %7163 = vtanh.f32 %v8034_v29  ;;  %v2255_v58 = vsel %vm2254_vm7, %v7160_v37, %v2251_v54  ;;  %v6158_v37 = vor.u32 %v6907_v57, %v6155_v36  ;;  %v6898_v54 = vld [vmem:[%s7378_s13 + $0x64] sm:$0xf]  ;;  %v2518_v57 = vunpack.c.h.bf16 %v7582_v43  ;;  %v6075_v38 = vld [vmem:[%s7378_s13 + $0x18] sm:$0xf0]  ;;  %v6324_v44 = vld [vmem:[%s8088_s29 + $0xe0] sm:$0xf] }
 0x45b   :  { %v2260_v60 = vsel %vm2257_vm8, %v2259_v59, %v2255_v58  ;;  %2789 = vmatpush.bf16.msra.mxu0 %v6130_v45  ;;  %v6121_v58 = vld [vmem:[%s7378_s13 + $0x68] sm:$0xf]  ;;  %v6901_v59 = vld [vmem:[%s7378_s13 + $0x74] sm:$0xf0]  ;;  %v6070_v36 = vor.u32 %v6886_v31, %v6067_v56  ;;  %v6078_v46 = vor.u32 %v6887_v53, %v6075_v38  ;;  %v6952_v47 = vld [vmem:[%s8088_s29 + $0xec] sm:$0xf0] }
 0x45c   :  { %2827 = vmatpush.bf16.msra.mxu3 %v6158_v37  ;;  %v6074_v37 = vor.u32 %v6889_v33, %v6073_v26  ;;  %v6950_v48 = vld [vmem:[%s8088_s29 + $0xe4] sm:$0xf]  ;;  %v6326_v19 = vld [vmem:[%s8088_s29 + $0xf0] sm:$0xf0]  ;;  %v6325_v50 = vor.u32 %v6952_v47, %v6324_v44  ;;  %v6953_v42 = vld [vmem:[%s8088_s29 + $0xf4] sm:$0xf0] }
 0x45d   :  { %v6951_v39 = vld [vmem:[%s8088_s29 + $0xec] sm:$0xf]  ;;  %v6945_v24 = vld [vmem:[%s8088_s29 + $0xb4] sm:$0xf0]  ;;  %v6302_v8 = vld [vmem:[%s8088_s29 + $0xb8] sm:$0xf0] }
 0x45e   :  { %v6943_v52 = vld [vmem:[%s8088_s29 + $0xac] sm:$0xf]  ;;  %v6276_v30 = vld [vmem:[%s8088_s29 + $0x80] sm:$0xf]  ;;  %v6940_v31 = vld [vmem:[%s8088_s29 + $0x8c] sm:$0xf0] }
 0x45f   :  { %2790 = vmatpush.bf16.msra.mxu0 %v6114_v55  ;;  %v6938_v56 = vld [vmem:[%s8088_s29 + $0x84] sm:$0xf]  ;;  %v6278_v26 = vld [vmem:[%s8088_s29 + $0x90] sm:$0xf0]  ;;  %v6284_v33 = vld [vmem:[%s8088_s29 + $0x88] sm:$0xf]  ;;  %v6277_v53 = vor.u32 %v6940_v31, %v6276_v30 }
 0x460   :  { %v7164_v7 = vpop.eup %7163  ;;  %2828 = vmatpush.bf16.msra.mxu3 %v6142_v51  ;;  %v6332_v51 = vld [vmem:[%s8088_s29 + $0xe8] sm:$0xf]  ;;  %v6286_v38 = vld [vmem:[%s8088_s29 + $0x98] sm:$0xf0]  ;;  %v6454_v30 = vld [vmem:[%s8230_s3 + $0xe0] sm:$0xf] }
 0x461   :  { %v2266_v61 = vmul.f32 %v7164_v7, %v2260_v60  ;;  %v6118_v7 = vor.u32 %v6898_v54, %v6115_v41  ;;  %v6122_v60 = vor.u32 %v6901_v59, %v6121_v58  ;;  %v6329_v54 = vor.u32 %v6950_v48, %v6326_v19  ;;  %v6334_v41 = vld [vmem:[%s8088_s29 + $0xf8] sm:$0xf0]  ;;  %v6308_v58 = vld [vmem:[%s8088_s29 + $0xc0] sm:$0xf]  ;;  %v6948_v59 = vld [vmem:[%s8088_s29 + $0xcc] sm:$0xf0] }
 0x462   :  { %v6333_v55 = vor.u32 %v6953_v42, %v6332_v51  ;;  %v6260_v19 = vld [vmem:[%s8088_s29 + $0x60] sm:$0xf]  ;;  %v2519_v51 = vunpack.c.l.bf16 %v7553_v5 }
 0x463   :  { %v2267_v0 = vpack.c.bf16 %v2266_v61, %v2266_v61  ;;  %v6899_v61 = vld [vmem:[%s7378_s13 + $0x6c] sm:$0xf]  ;;  %2803 = vmatpush.bf16.msrb.mxu1 %v6118_v7  ;;  %2816 = vmatpush.bf16.msra.mxu2 %v6122_v60 }
 0x464   :  { %2791 = vmatpush.bf16.msra.mxu0 %v6098_v12 }
 0x465   :  { %2269 = vst [vmem:[#allocation3 + $0x14] sm:$0xf] %v2267_v0  ;;  %2473 = vmatmul.bf16.vlgmr.msrb.gmra.mxu0 %v2267_v0  ;;  %2486 = vmatmul.bf16.vlgmr.msra.gmra.mxu1 %v2267_v0 }
 0x466   :  { %2499 = vmatmul.bf16.vlgmr.msrb.gmra.mxu2 %v2267_v0  ;;  %2512 = vmatmul.bf16.vlgmr.msrb.gmra.mxu3 %v2267_v0  ;;  %v6123_v0 = vld [vmem:[%s7378_s13 + $0x78] sm:$0xf0]  ;;  %s8919_s13 = sld [smem:[%s8985_s0 + %s7349_s10]]  }
 0x467   :  { %v6126_v1 = vor.u32 %v6899_v61, %v6123_v0  ;;  %2804 = vmatpush.bf16.msrb.mxu1 %v6102_v14  ;;  %2817 = vmatpush.bf16.msra.mxu2 %v6106_v18  ;;  %v6337_v61 = vor.u32 %v6951_v39, %v6334_v41  ;;  %v6309_v0 = vor.u32 %v6948_v59, %v6308_v58  ;;  %v6292_v14 = vld [vmem:[%s8088_s29 + $0xa0] sm:$0xf]  ;;  %v2520_v18 = vunpack.c.h.bf16 %v7553_v5  ;;  %v6934_v39 = vld [vmem:[%s8088_s29 + $0x64] sm:$0xf]  ;;  %v6268_v58 = vld [vmem:[%s8088_s29 + $0x68] sm:$0xf] }
 0x468   :  { %2792 = vmatpush.bf16.msra.mxu0 %v6082_v22  ;;  %v6293_v22 = vor.u32 %v6944_v15, %v6292_v14  ;;  %v6937_v59 = vld [vmem:[%s8088_s29 + $0x74] sm:$0xf0]  ;;  %v6252_v14 = vld [vmem:[%s8088_s29 + $0x48] sm:$0xf] }
 0x469   :  { %2829 = vmatpush.bf16.msra.mxu3 %v6126_v1  ;;  %v6946_v1 = vld [vmem:[%s8088_s29 + $0xc4] sm:$0xf]  ;;  %v6269_v5 = vor.u32 %v6937_v59, %v6268_v58  ;;  %v6923_v58 = vld [vmem:[%s8088_s29 + $0xc] sm:$0xf]  ;;  %v6222_v59 = vld [vmem:[%s8088_s29 + $0x18] sm:$0xf0] }
 0x46a   :  { %v6313_v12 = vor.u32 %v6946_v1, %v6310_v3  ;;  %v6244_v1 = vld [vmem:[%s8088_s29 + $0x40] sm:$0xf] }
 0x46b   :  { %2805 = vmatpush.bf16.msrb.mxu1 %v6086_v62  ;;  %2818 = vmatpush.bf16.msra.mxu2 %v6090_v2  ;;  %v6245_v13 = vor.u32 %v6932_v11, %v6244_v1  ;;  %v6225_v1 = vor.u32 %v6923_v58, %v6222_v59  ;;  %v6448_v59 = vld [vmem:[%s8230_s3 + $0xd8] sm:$0xf0] }
 0x46c   :  { %2793 = vmatpush.bf16.msra.mxu0 %v6066_v21  ;;  %v6305_v21 = vor.u32 %v6943_v52, %v6302_v8 }
 0x46d   :  { %2830 = vmatpush.bf16.msra.mxu3 %v6110_v16  ;;  %v6942_v16 = vld [vmem:[%s8088_s29 + $0xa4] sm:$0xf] }
 0x46e   :  { %v6297_v27 = vor.u32 %v6942_v16, %v6294_v25  ;;  %v6931_v16 = vld [vmem:[%s8088_s29 + $0x4c] sm:$0xf]  ;;  %v6254_v25 = vld [vmem:[%s8088_s29 + $0x58] sm:$0xf0] }
 0x46f   :  { %2806 = vmatpush.bf16.msrb.mxu1 %v6070_v36  ;;  %2819 = vmatpush.bf16.msra.mxu2 %v6074_v37  ;;  %v6939_v36 = vld [vmem:[%s8088_s29 + $0x8c] sm:$0xf] }
 0x470   :  { %3148 = vmatpush.bf16.msrb.mxu0 %v6325_v50  ;;  %v6289_v48 = vor.u32 %v6939_v36, %v6286_v38  ;;  %v6936_v50 = vld [vmem:[%s8088_s29 + $0x6c] sm:$0xf0]  ;;  %v6238_v36 = vld [vmem:[%s8088_s29 + $0x38] sm:$0xf0] }
 0x471   :  { %2831 = vmatpush.bf16.msra.mxu3 %v6094_v9  ;;  %v6301_v9 = vor.u32 %v6945_v24, %v6300_v23  ;;  %v6261_v42 = vor.u32 %v6936_v50, %v6260_v19  ;;  %v6928_v24 = vld [vmem:[%s8088_s29 + $0x2c] sm:$0xf0]  ;;  %v6220_v50 = vld [vmem:[%s8088_s29 + $0x8] sm:$0xf] }
 0x473   :  { %3177 = vmatpush.bf16.msra.mxu1 %v6329_v54  ;;  %3206 = vmatpush.bf16.msrb.mxu2 %v6333_v55  ;;  %v6262_v54 = vld [vmem:[%s8088_s29 + $0x70] sm:$0xf0] }
 0x474   :  { %3149 = vmatpush.bf16.msrb.mxu0 %v6309_v0  ;;  %v6265_v41 = vor.u32 %v6934_v39, %v6262_v54  ;;  %v6270_v0 = vld [vmem:[%s8088_s29 + $0x78] sm:$0xf0] }
 0x475   :  { %2832 = vmatpush.bf16.msra.mxu3 %v6078_v46 }
 0x477   :  { %3178 = vmatpush.bf16.msra.mxu1 %v6313_v12  ;;  %3207 = vmatpush.bf16.msrb.mxu2 %v6317_v28  ;;  %v6930_v12 = vld [vmem:[%s8088_s29 + $0x44] sm:$0xf] }
 0x478   :  { %3150 = vmatpush.bf16.msrb.mxu0 %v6293_v22 }
 0x479   :  { %3235 = vmatpush.bf16.msrb.mxu3 %v6337_v61  ;;  %v6935_v61 = vld [vmem:[%s8088_s29 + $0x6c] sm:$0xf] }
 0x47a   :  { %v6273_v4 = vor.u32 %v6935_v61, %v6270_v0 }
 0x47b   :  { %3179 = vmatpush.bf16.msra.mxu1 %v6297_v27  ;;  %3208 = vmatpush.bf16.msrb.mxu2 %v6301_v9  ;;  %v6926_v27 = vld [vmem:[%s8088_s29 + $0x24] sm:$0xf]  ;;  %v6230_v9 = vld [vmem:[%s8088_s29 + $0x30] sm:$0xf0] }
 0x47c   :  { %3151 = vmatpush.bf16.msrb.mxu0 %v6277_v53 }
 0x47d   :  { %3236 = vmatpush.bf16.msrb.mxu3 %v6321_v63 }
 0x480   :  { %3152 = vmatpush.bf16.msrb.mxu0 %v6261_v42 }
 0x481   :  { %3237 = vmatpush.bf16.msrb.mxu3 %v6305_v21 }
 0x484   :  { %3153 = vmatpush.bf16.msrb.mxu0 %v6245_v13 }
 0x485   :  { %3238 = vmatpush.bf16.msrb.mxu3 %v6289_v48 }
 0x489   :  { %3239 = vmatpush.bf16.msrb.mxu3 %v6273_v4 }
 0x4e2   :  { %v2474_v45 = vpop.f32.mrf.mxu0  ;;  %v2487_v10 = vpop.f32.mrf.mxu1 }
 0x4e3   :  { %v2521_v49 = vadd.f32 %v2517_v34, %v2474_v45  ;;  %v2522_v43 = vadd.f32 %v2518_v57, %v2487_v10  ;;  %v6941_v57 = vld [vmem:[%s8088_s29 + $0x94] sm:$0xf0]  ;;  %v6281_v10 = vor.u32 %v6938_v56, %v6278_v26  ;;  %v6236_v56 = vld [vmem:[%s8088_s29 + $0x28] sm:$0xf] }
 0x4e4   :  { %v6285_v46 = vor.u32 %v6941_v57, %v6284_v33  ;;  %v6233_v33 = vor.u32 %v6926_v27, %v6230_v9  ;;  %v6927_v57 = vld [vmem:[%s8088_s29 + $0x2c] sm:$0xf] }
 0x4e5   :  { %v6060_v7 = vmul.f32 -1.442695, %v2521_v49  ;;  %v6061_v60 = vmul.f32 -1.442695, %v2522_v43  ;;  %3180 = vmatpush.bf16.msra.mxu1 %v6281_v10  ;;  %v6241_v38 = vor.u32 %v6927_v57, %v6238_v36  ;;  %v6924_v10 = vld [vmem:[%s8088_s29 + $0xc] sm:$0xf0] }
 0x4e6   :  { %3209 = vmatpush.bf16.msrb.mxu2 %v6285_v46  ;;  %v6922_v46 = vld [vmem:[%s8088_s29 + $0x4] sm:$0xf]  ;;  %v6456_v57 = vld [vmem:[%s8230_s3 + $0xf0] sm:$0xf0]  ;;  %v6983_v36 = vld [vmem:[%s8230_s3 + $0xec] sm:$0xf] }
 0x4e7   :  { %7165 = vpow2.f32 %v6060_v7 }
 0x4e8   :  { %7167 = vpow2.f32 %v6061_v60 }
 0x4e9   :  { %v2500_v17 = vpop.f32.mrf.mxu2  ;;  %v2513_v20 = vpop.f32.mrf.mxu3  ;;  %3181 = vmatpush.bf16.msra.mxu1 %v6265_v41 }
 0x4ea   :  { %v2524_v62 = vadd.f32 %v2520_v18, %v2513_v20  ;;  %v2476_v2 = vpop.f32.mrf.mxu0  ;;  %v2489_v6 = vpop.f32.mrf.mxu1  ;;  %v2523_v60 = vadd.f32 %v2519_v51, %v2500_v17  ;;  %3210 = vmatpush.bf16.msrb.mxu2 %v6269_v5  ;;  %v6933_v18 = vld [vmem:[%s8088_s29 + $0x54] sm:$0xf0]  ;;  %v6228_v17 = vld [vmem:[%s8088_s29 + $0x20] sm:$0xf] }
 0x4eb   :  { %v6253_v2 = vor.u32 %v6933_v18, %v6252_v14  ;;  %v6257_v6 = vor.u32 %v6931_v16, %v6254_v25  ;;  %v6229_v21 = vor.u32 %v6928_v24, %v6228_v17  ;;  %v6925_v51 = vld [vmem:[%s8088_s29 + $0x14] sm:$0xf0]  ;;  %v6918_v17 = vld [vmem:[#allocation3] sm:$0xff] }
 0x4ec   :  { %v6062_v34 = vmul.f32 -1.442695, %v2524_v62  ;;  %v6249_v62 = vor.u32 %v6930_v12, %v6246_v40 }
 0x4ed   :  { %v7166_v37 = vpop.eup %7165  ;;  %3240 = vmatpush.bf16.msrb.mxu3 %v6257_v6  ;;  %3154 = vmatpush.bf16.msrb.mxu0 %v6229_v21  ;;  %v6982_v21 = vld [vmem:[%s8230_s3 + $0xe4] sm:$0xf] }
 0x4ee   :  { %v7168_v44 = vpop.eup %7167  ;;  %v8141_v45 = vadd.f32 1.0, %v7166_v37  ;;  %7169 = vpow2.f32 %v6062_v34  ;;  %3182 = vmatpush.bf16.msra.mxu1 %v6249_v62  ;;  %3211 = vmatpush.bf16.msrb.mxu2 %v6253_v2  ;;  %v6929_v34 = vld [vmem:[%s8088_s29 + $0x34] sm:$0xf0] }
 0x4ef   :  { %v8143_v47 = vadd.f32 1.0, %v7168_v44  ;;  %v6237_v53 = vor.u32 %v6929_v34, %v6236_v56  ;;  %v6212_v44 = vld [vmem:[%s8088_s29] sm:$0xf] }
 0x4f0   :  { %7171 = vrcp.f32 %v8141_v45  ;;  %v2538_v55 = vand.u32 2147483647, %v8141_v45  ;;  %v2540_v23 = vand.u32 2147483648, %v8141_v45  ;;  %vm2534_vm13 = vweird.f32 %v8141_v45 }
 0x4f1   :  { %7173 = vrcp.f32 %v8143_v47  ;;  %v2502_v49 = vpop.f32.mrf.mxu2  ;;  %v2515_v43 = vpop.f32.mrf.mxu3  ;;  %v2559_v22 = vand.u32 2147483648, %v8143_v47  ;;  %v2557_v31 = vand.u32 2147483647, %v8143_v47  ;;  %vm2553_vm12 = vweird.f32 %v8143_v47  ;;  %3241 = vmatpush.bf16.msrb.mxu3 %v6241_v38 }
 0x4f2   :  { %vm8182_vm9 = vcmp.eq.f32.partialorder %v2538_v55, 8.507059e+37  ;;  %v6213_v49 = vor.u32 %v6924_v10, %v6212_v44  ;;  %v6214_v43 = vld [vmem:[%s8088_s29 + $0x10] sm:$0xf0]  ;;  %v2541_v54 = vor.u32 1.1754944e-38, %v2540_v23  ;;  %3183 = vmatpush.bf16.msra.mxu1 %v6233_v33  ;;  %3212 = vmatpush.bf16.msrb.mxu2 %v6237_v53  ;;  %v2839_v23 = vunpack.c.h.bf16 %v7622_v32  ;;  %v6462_v44 = vld [vmem:[%s8230_s3 + $0xe8] sm:$0xf]  ;;  %s8941_s29 = sld [smem:[%s8985_s0 + %s7353_s26]]  }
 0x4f3   :  { %v2560_v39 = vor.u32 1.1754944e-38, %v2559_v22  ;;  %vm2558_vm0 = vcmp.eq.f32.partialorder %v2557_v31, 8.507059e+37  ;;  %v2838_v22 = vunpack.c.l.bf16 %v7622_v32  ;;  %v2841_v32 = vunpack.c.h.bf16 %v7574_v35  ;;  %v6984_v31 = vld [vmem:[%s8230_s3 + $0xec] sm:$0xf0]  ;;  %v6985_v10 = vld [vmem:[%s8230_s3 + $0xf4] sm:$0xf0] }
 0x4f4   :  { %v7170_v7 = vpop.eup %7169  ;;  %3155 = vmatpush.bf16.msrb.mxu0 %v6213_v49  ;;  %v8236_v34 = vor.u32 %v6984_v31, %v6454_v30  ;;  %v8241_v53 = vor.u32 %v6982_v21, %v6456_v57  ;;  %v6438_v49 = vld [vmem:[%s8230_s3 + $0xc0] sm:$0xf]  ;;  %v6977_v31 = vld [vmem:[%s8230_s3 + $0xb4] sm:$0xf0]  ;;  %v6966_v57 = vld [vmem:[%s8230_s3 + $0x64] sm:$0xf] }
 0x4f5   :  { %v8158_v3 = vadd.f32 1.0, %v7170_v7  ;;  %v6217_v7 = vor.u32 %v6922_v46, %v6214_v43  ;;  %3242 = vmatpush.bf16.msrb.mxu3 %v6225_v1  ;;  %v6980_v43 = vld [vmem:[%s8230_s3 + $0xcc] sm:$0xf0]  ;;  %v6390_v21 = vld [vmem:[%s8230_s3 + $0x60] sm:$0xf] }
 0x4f6   :  { %v8162_v28 = vpop.eup %7171 }
 0x4f7   :  { %v8167_v63 = vpop.eup %7173  ;;  %v2530_v15 = vmul.f32 %v8162_v28, %v8141_v45  ;;  %7175 = vrcp.f32 %v8158_v3  ;;  %vm2535_vm10 = vweird.f32 %v8162_v28  ;;  %3184 = vmatpush.bf16.msra.mxu1 %v6217_v7  ;;  %v2579_v40 = vand.u32 2147483648, %v8158_v3  ;;  %v6981_v7 = vld [vmem:[%s8230_s3 + $0xd4] sm:$0xf0] }
 0x4f8   :  { %v2549_v20 = vmul.f32 %v8167_v63, %v8143_v47  ;;  %7177 = vtanh.f32 %v2523_v60  ;;  %vm2554_vm11 = vweird.f32 %v8167_v63  ;;  %vm2536_vm14 = vmor %vm2534_vm13, %vm2535_vm10  ;;  %v6221_v60 = vor.u32 %v6925_v51, %v6220_v50  ;;  %v6978_v50 = vld [vmem:[%s8230_s3 + $0xc4] sm:$0xf] }
 0x4f9   :  { %v2531_v52 = vsub.f32 1.0, %v2530_v15  ;;  %vm2555_vm15 = vmor %vm2553_vm12, %vm2554_vm11  ;;  %vm2573_vm2 = vweird.f32 %v8158_v3  ;;  %v2577_v14 = vand.u32 2147483647, %v8158_v3 }
 0x4fa   :  { %v2550_v8 = vsub.f32 1.0, %v2549_v20  ;;  %3213 = vmatpush.bf16.msrb.mxu2 %v6221_v60  ;;  %v6919_v20 = vld [vmem:[#allocation3 + $0x8] sm:$0xff] }
 0x4fb   :  { %v2532_v26 = vmul.f32 %v8162_v28, %v2531_v52  ;;  %vm2578_vm4 = vcmp.eq.f32.partialorder %v2577_v14, 8.507059e+37 }
 0x4fc   :  { %v2551_v37 = vmul.f32 %v8167_v63, %v2550_v8 }
 0x4fd   :  { %v7176_v48 = vpop.eup %7175  ;;  %v2533_v19 = vadd.f32 %v8162_v28, %v2532_v26 }
 0x4fe   :  { %v7178_v42 = vpop.eup %7177  ;;  %v2552_v55 = vadd.f32 %v8167_v63, %v2551_v37  ;;  %v2569_v41 = vmul.f32 %v7176_v48, %v8158_v3  ;;  %vm2574_vm1 = vweird.f32 %v7176_v48  ;;  %v6920_v3 = vld [vmem:[#allocation3 + $0x10] sm:$0xff]  ;;  %v6464_v37 = vld [vmem:[%s8230_s3 + $0xf8] sm:$0xf0] }
 0x4ff   :  { %v2537_v45 = vsel %vm2536_vm14, %v8162_v28, %v2533_v19  ;;  %vm2575_vm3 = vmor %vm2573_vm2, %vm2574_vm1  ;;  %v8243_v38 = vor.u32 %v6983_v36, %v6464_v37 }
 0x500   :  { %v2542_v5 = vsel %vm8182_vm9, %v2541_v54, %v2537_v45  ;;  %v2556_v61 = vsel %vm2555_vm15, %v8167_v63, %v2552_v55  ;;  %v2570_v0 = vsub.f32 1.0, %v2569_v41  ;;  %v2580_v63 = vor.u32 1.1754944e-38, %v2579_v40  ;;  %v6440_v54 = vld [vmem:[%s8230_s3 + $0xd0] sm:$0xf0]  ;;  %v6979_v55 = vld [vmem:[%s8230_s3 + $0xcc] sm:$0xf] }
 0x501   :  { %v2561_v4 = vsel %vm2558_vm0, %v2560_v39, %v2556_v61  ;;  %v2584_v11 = vmul.f32 %v7178_v42, %v2542_v5  ;;  %v8257_v39 = vor.u32 %v6980_v43, %v6438_v49  ;;  %v8264_v58 = vor.u32 %v6978_v50, %v6440_v54  ;;  %v6446_v45 = vld [vmem:[%s8230_s3 + $0xc8] sm:$0xf]  ;;  %v6422_v61 = vld [vmem:[%s8230_s3 + $0xa0] sm:$0xf]  ;;  %v6392_v49 = vld [vmem:[%s8230_s3 + $0x70] sm:$0xf0] }
 0x502   :  { %v2583_v47 = vmul.f32 %v2561_v4, %v8034_v29  ;;  %v2571_v12 = vmul.f32 %v7176_v48, %v2570_v0  ;;  %v2840_v0 = vunpack.c.l.bf16 %v7574_v35  ;;  %v8284_v40 = vor.u32 %v6981_v7, %v6446_v45  ;;  %v6975_v35 = vld [vmem:[%s8230_s3 + $0xac] sm:$0xf] }
 0x503   :  { %v6967_v43 = vld [vmem:[%s8230_s3 + $0x6c] sm:$0xf] }
 0x504   :  { %v8219_v28 = vadd.f32 %v2584_v11, %v2583_v47  ;;  %v2572_v13 = vadd.f32 %v7176_v48, %v2571_v12  ;;  %v8280_v47 = vor.u32 %v6979_v55, %v6448_v59  ;;  %v6976_v12 = vld [vmem:[%s8230_s3 + $0xac] sm:$0xf0] }
 0x506   :  { %7179 = vtanh.f32 %v8219_v28  ;;  %v2576_v18 = vsel %vm2575_vm3, %v7176_v48, %v2572_v13  ;;  %v8248_v48 = vor.u32 %v6985_v10, %v6462_v44  ;;  %v6974_v13 = vld [vmem:[%s8230_s3 + $0xa4] sm:$0xf] }
 0x507   :  { %v2581_v15 = vsel %vm2578_vm4, %v2580_v63, %v2576_v18  ;;  %v6424_v18 = vld [vmem:[%s8230_s3 + $0xb0] sm:$0xf0] }
 0x50c   :  { %v7180_v29 = vpop.eup %7179 }
 0x50d   :  { %v2587_v16 = vmul.f32 %v7180_v29, %v2581_v15  ;;  %v8295_v15 = vor.u32 %v6976_v12, %v6422_v61  ;;  %v6973_v61 = vld [vmem:[%s8230_s3 + $0x94] sm:$0xf0]  ;;  %v8375_v12 = vld [vmem:[%s8292_s7] sm:$0xf]  ;;  %s8952_s7 = sld [smem:[%s8985_s0 + %s7355_s4]]  }
 0x50e   :  { %v8445_v37 = vperm.slane %v8375_v12, 1 }
 0x50f   :  { %v2588_v25 = vpack.c.bf16 %v2587_v16, %v2587_v16  ;;  %v8297_v16 = vor.u32 %v6974_v13, %v6424_v18  ;;  %v8378_v13 = vor.u32 %v6966_v57, %v6392_v49  ;;  %v6960_v57 = vld [vmem:[%s8230_s3 + $0x2c] sm:$0xf0]  ;;  %v6360_v49 = vld [vmem:[%s8230_s3 + $0x30] sm:$0xf0] }
 0x511   :  { %2590 = vst [vmem:[#allocation3 + $0x18] sm:$0xf] %v2588_v25  ;;  %2794 = vmatmul.bf16.vlgmr.msra.gmra.mxu0 %v2588_v25  ;;  %2807 = vmatmul.bf16.vlgmr.msrb.gmra.mxu1 %v2588_v25 }
 0x512   :  { %2820 = vmatmul.bf16.vlgmr.msra.gmra.mxu2 %v2588_v25  ;;  %2833 = vmatmul.bf16.vlgmr.msra.gmra.mxu3 %v2588_v25  ;;  %v6432_v25 = vld [vmem:[%s8230_s3 + $0xb8] sm:$0xf0] }
 0x513   :  { %3495 = vmatpush.bf16.msra.mxu0 %v8236_v34  ;;  %3508 = vmatpush.bf16.msrb.mxu1 %v8241_v53 }
 0x514   :  { %3534 = vmatpush.bf16.msra.mxu3 %v8243_v38  ;;  %3521 = vmatpush.bf16.msra.mxu2 %v8248_v48 }
 0x517   :  { %3496 = vmatpush.bf16.msra.mxu0 %v8257_v39  ;;  %3509 = vmatpush.bf16.msrb.mxu1 %v8264_v58 }
 0x518   :  { %3535 = vmatpush.bf16.msra.mxu3 %v8280_v47  ;;  %3522 = vmatpush.bf16.msra.mxu2 %v8284_v40 }
 0x51b   :  { %3497 = vmatpush.bf16.msra.mxu0 %v8295_v15  ;;  %3510 = vmatpush.bf16.msrb.mxu1 %v8297_v16 }
 0x521   :  { %3156 = vmatmul.bf16.vlgmr.msrb.gmra.mxu0 %v6918_v17  ;;  %3185 = vmatmul.bf16.vlgmr.msra.gmra.mxu1 %v6918_v17 }
 0x522   :  { %3214 = vmatmul.bf16.vlgmr.msrb.gmra.mxu2 %v6918_v17  ;;  %3243 = vmatmul.bf16.vlgmr.msrb.gmra.mxu3 %v6918_v17  ;;  %v6406_v17 = vld [vmem:[%s8230_s3 + $0x80] sm:$0xf] }
 0x531   :  { %3161 = vmatmul.bf16.gmra.mxu0 %v6919_v20  ;;  %3190 = vmatmul.bf16.gmra.mxu1 %v6919_v20 }
 0x532   :  { %3219 = vmatmul.bf16.gmra.mxu2 %v6919_v20  ;;  %3248 = vmatmul.bf16.gmra.mxu3 %v6919_v20  ;;  %v6972_v20 = vld [vmem:[%s8230_s3 + $0x8c] sm:$0xf0] }
 0x541   :  { %3166 = vmatmul.bf16.gmra.mxu0 %v6920_v3  ;;  %3195 = vmatmul.bf16.gmra.mxu1 %v6920_v3 }
 0x542   :  { %3224 = vmatmul.bf16.gmra.mxu2 %v6920_v3  ;;  %3253 = vmatmul.bf16.gmra.mxu3 %v6920_v3 }
 0x58e   :  { %v2795_v24 = vpop.f32.mrf.mxu0  ;;  %v2808_v52 = vpop.f32.mrf.mxu1 }
 0x58f   :  { %v2842_v62 = vadd.f32 %v2838_v22, %v2795_v24  ;;  %v2843_v2 = vadd.f32 %v2839_v23, %v2808_v52  ;;  %v8306_v23 = vor.u32 %v6975_v35, %v6432_v25  ;;  %v6970_v24 = vld [vmem:[%s8230_s3 + $0x84] sm:$0xf]  ;;  %v6408_v52 = vld [vmem:[%s8230_s3 + $0x90] sm:$0xf0]  ;;  %v6964_v35 = vld [vmem:[%s8230_s3 + $0x4c] sm:$0xf0] }
 0x591   :  { %v6191_v6 = vmul.f32 -1.442695, %v2842_v62  ;;  %v6192_v27 = vmul.f32 -1.442695, %v2843_v2  ;;  %v8314_v2 = vor.u32 %v6972_v20, %v6406_v17  ;;  %3536 = vmatpush.bf16.msra.mxu3 %v8306_v23  ;;  %v6963_v20 = vld [vmem:[%s8230_s3 + $0x4c] sm:$0xf] }
 0x593   :  { %7181 = vpow2.f32 %v6191_v6  ;;  %v8316_v6 = vor.u32 %v6970_v24, %v6408_v52  ;;  %3498 = vmatpush.bf16.msra.mxu0 %v8314_v2  ;;  %v6398_v24 = vld [vmem:[%s8230_s3 + $0x68] sm:$0xf] }
 0x594   :  { %7183 = vpow2.f32 %v6192_v27  ;;  %v6971_v27 = vld [vmem:[%s8230_s3 + $0x8c] sm:$0xf] }
 0x595   :  { %v2821_v9 = vpop.f32.mrf.mxu2  ;;  %v2834_v8 = vpop.f32.mrf.mxu3  ;;  %3511 = vmatpush.bf16.msrb.mxu1 %v8316_v6 }
 0x596   :  { %v2845_v56 = vadd.f32 %v2841_v32, %v2834_v8  ;;  %v2797_v26 = vpop.f32.mrf.mxu0  ;;  %v2810_v33 = vpop.f32.mrf.mxu1  ;;  %v2844_v29 = vadd.f32 %v2840_v0, %v2821_v9  ;;  %v6416_v32 = vld [vmem:[%s8230_s3 + $0x98] sm:$0xf0]  ;;  %v6430_v9 = vld [vmem:[%s8230_s3 + $0xa8] sm:$0xf]  ;;  %v6374_v0 = vld [vmem:[%s8230_s3 + $0x40] sm:$0xf] }
 0x598   :  { %v6193_v46 = vmul.f32 -1.442695, %v2845_v56  ;;  %v6968_v56 = vld [vmem:[%s8230_s3 + $0x6c] sm:$0xf0] }
 0x599   :  { %v7182_v19 = vpop.eup %7181  ;;  %v8364_v7 = vor.u32 %v6968_v56, %v6390_v21  ;;  %3512 = vmatpush.bf16.msrb.mxu1 %v8378_v13  ;;  %v6358_v21 = vld [vmem:[%s8230_s3 + $0x20] sm:$0xf] }
 0x59a   :  { %v7184_v51 = vpop.eup %7183  ;;  %v8255_v42 = vadd.f32 1.0, %v7182_v19  ;;  %7185 = vpow2.f32 %v6193_v46  ;;  %v8344_v46 = vor.u32 %v6971_v27, %v6416_v32  ;;  %v8346_v19 = vor.u32 %v6977_v31, %v6430_v9  ;;  %v6969_v31 = vld [vmem:[%s8230_s3 + $0x74] sm:$0xf0]  ;;  %v6366_v27 = vld [vmem:[%s8230_s3 + $0x28] sm:$0xf] }
 0x59b   :  { %v8262_v41 = vadd.f32 1.0, %v7184_v51  ;;  %3499 = vmatpush.bf16.msra.mxu0 %v8364_v7 }
 0x59c   :  { %7187 = vrcp.f32 %v8255_v42  ;;  %v2859_v1 = vand.u32 2147483647, %v8255_v42  ;;  %v2861_v14 = vand.u32 2147483648, %v8255_v42  ;;  %vm2855_vm6 = vweird.f32 %v8255_v42  ;;  %3523 = vmatpush.bf16.msra.mxu2 %v8346_v19  ;;  %3537 = vmatpush.bf16.msra.mxu3 %v8344_v46 }
 0x59d   :  { %7189 = vrcp.f32 %v8262_v41  ;;  %v2823_v60 = vpop.f32.mrf.mxu2  ;;  %v2836_v5 = vpop.f32.mrf.mxu3  ;;  %v2880_v3 = vand.u32 2147483648, %v8262_v41  ;;  %v2878_v33 = vand.u32 2147483647, %v8262_v41  ;;  %vm2874_vm10 = vweird.f32 %v8262_v41 }
 0x59e   :  { %v8276_v4 = vpop.f32.mrf.mxu0  ;;  %v8278_v11 = vpop.f32.mrf.mxu1  ;;  %vm8336_vm7 = vcmp.eq.f32.partialorder %v2859_v1, 8.507059e+37  ;;  %v2862_v55 = vor.u32 1.1754944e-38, %v2861_v14  ;;  %v6414_v5 = vld [vmem:[%s8230_s3 + $0x88] sm:$0xf] }
 0x59f   :  { %v2881_v51 = vor.u32 1.1754944e-38, %v2880_v3  ;;  %v8382_v18 = vor.u32 %v6973_v61, %v6414_v5  ;;  %v6384_v3 = vld [vmem:[%s8230_s3 + $0x58] sm:$0xf0]  ;;  %vm8406_vm12 = vcmp.eq.f32.partialorder %v2878_v33, 8.507059e+37  ;;  %v8424_v33 = vor.u32 %v6969_v31, %v6398_v24  ;;  %v6342_v31 = vld [vmem:[%s8230_s3] sm:$0xf] }
 0x5a0   :  { %v7186_v63 = vpop.eup %7185 }
 0x5a1   :  { %v8304_v22 = vadd.f32 1.0, %v7186_v63  ;;  %v6962_v63 = vld [vmem:[%s8230_s3 + $0x44] sm:$0xf]  ;;  %3524 = vmatpush.bf16.msra.mxu2 %v8382_v18 }
 0x5a2   :  { %v8310_v62 = vpop.eup %7187 }
 0x5a3   :  { %v8321_v8 = vpop.eup %7189  ;;  %v2851_v30 = vmul.f32 %v8310_v62, %v8255_v42  ;;  %vm2856_vm5 = vweird.f32 %v8310_v62  ;;  %7191 = vrcp.f32 %v8304_v22  ;;  %v6400_v42 = vld [vmem:[%s8230_s3 + $0x78] sm:$0xf0]  ;;  %vm2894_vm14 = vweird.f32 %v8304_v22 }
 0x5a4   :  { %v2870_v26 = vmul.f32 %v8321_v8, %v8262_v41  ;;  %7193 = vtanh.f32 %v2844_v29  ;;  %vm8354_vm8 = vmor %vm2855_vm6, %vm2856_vm5  ;;  %vm2875_vm9 = vweird.f32 %v8321_v8  ;;  %v8380_v14 = vor.u32 %v6967_v43, %v6400_v42  ;;  %v6376_v29 = vld [vmem:[%s8230_s3 + $0x50] sm:$0xf0]  ;;  %v6382_v42 = vld [vmem:[%s8230_s3 + $0x48] sm:$0xf] }
 0x5a5   :  { %v2852_v36 = vsub.f32 1.0, %v2851_v30  ;;  %v8340_v44 = vpop.f32.mrf.mxu2  ;;  %v8342_v10 = vpop.f32.mrf.mxu3  ;;  %vm8396_vm11 = vmor %vm2874_vm10, %vm2875_vm9  ;;  %v8414_v30 = vor.u32 %v6964_v35, %v6374_v0  ;;  %v8442_v0 = vperm.slane %v8375_v12, 0  ;;  %v6368_v35 = vld [vmem:[%s8230_s3 + $0x38] sm:$0xf0]  ;;  %3525 = vmatpush.bf16.msra.mxu2 %v8424_v33 }
 0x5a6   :  { %v2871_v50 = vsub.f32 1.0, %v2870_v26  ;;  %v8358_v59 = vpop.f32.mrf.mxu0  ;;  %v8360_v45 = vpop.f32.mrf.mxu1  ;;  %v8422_v26 = vor.u32 %v6962_v63, %v6376_v29  ;;  %3538 = vmatpush.bf16.msra.mxu3 %v8380_v14 }
 0x5a7   :  { %v2853_v60 = vmul.f32 %v8310_v62, %v2852_v36  ;;  %v6958_v36 = vld [vmem:[%s8230_s3 + $0x24] sm:$0xf]  ;;  %3500 = vmatpush.bf16.msra.mxu0 %v8414_v30 }
 0x5a8   :  { %v2872_v1 = vmul.f32 %v8321_v8, %v2871_v50  ;;  %3513 = vmatpush.bf16.msrb.mxu1 %v8422_v26 }
 0x5a9   :  { %v8387_v25 = vpop.eup %7191  ;;  %v2854_v17 = vadd.f32 %v8310_v62, %v2853_v60  ;;  %v6965_v60 = vld [vmem:[%s8230_s3 + $0x54] sm:$0xf0] }
 0x5aa   :  { %v7194_v52 = vpop.eup %7193  ;;  %v2873_v41 = vadd.f32 %v8321_v8, %v2872_v1  ;;  %v2890_v9 = vmul.f32 %v8387_v25, %v8304_v22  ;;  %v6959_v1 = vld [vmem:[%s8230_s3 + $0x2c] sm:$0xf]  ;;  %vm2895_vm13 = vweird.f32 %v8387_v25 }
 0x5ab   :  { %v2858_v56 = vsel %vm8354_vm8, %v8310_v62, %v2854_v17  ;;  %v8435_v62 = vor.u32 %v6963_v20, %v6384_v3  ;;  %v8456_v20 = vor.u32 %v6960_v57, %v6358_v21  ;;  %v8458_v3 = vor.u32 %v6958_v36, %v6360_v49  ;;  %v6956_v21 = vld [vmem:[%s8230_s3 + $0xc] sm:$0xf0]  ;;  %v6344_v49 = vld [vmem:[%s8230_s3 + $0x10] sm:$0xf0]  ;;  %vm8501_vm15 = vmor %vm2894_vm14, %vm2895_vm13 }
 0x5ac   :  { %v2863_v43 = vsel %vm8336_vm7, %v2862_v55, %v2858_v56  ;;  %v2877_v50 = vsel %vm8396_vm11, %v8321_v8, %v2873_v41  ;;  %v2891_v54 = vsub.f32 1.0, %v2890_v9  ;;  %v6961_v41 = vld [vmem:[%s8230_s3 + $0x34] sm:$0xf0]  ;;  %v8469_v9 = vor.u32 %v6959_v1, %v6368_v35  ;;  %v6954_v56 = vld [vmem:[%s8230_s3 + $0x4] sm:$0xf] }
 0x5ad   :  { %v2882_v5 = vsel %vm8406_vm12, %v2881_v51, %v2877_v50  ;;  %v2905_v61 = vmul.f32 %v7194_v52, %v2863_v43  ;;  %v8447_v55 = vpop.f32.mrf.mxu2  ;;  %v8449_v8 = vpop.f32.mrf.mxu3  ;;  %3539 = vmatpush.bf16.msra.mxu3 %v8435_v62  ;;  %v2900_v43 = vand.u32 2147483648, %v8304_v22  ;;  %3501 = vmatpush.bf16.msra.mxu0 %v8456_v20  ;;  %v8482_v50 = vor.u32 %v6956_v21, %v6342_v31 }
 0x5ae   :  { %9011 = vst [vmem:[#allocation4_spill] sm:$0xff] %v8449_v8  ;;  %v2904_v63 = vmul.f32 %v2882_v5, %v8219_v28  ;;  %v2892_v29 = vmul.f32 %v8387_v25, %v2891_v54  ;;  %v3162_v51 = vpop.f32.mrf.mxu0  ;;  %v3191_v17 = vpop.f32.mrf.mxu1  ;;  %v8464_v28 = vor.u32 %v6965_v60, %v6382_v42  ;;  %v6955_v54 = vld [vmem:[%s8230_s3 + $0xc] sm:$0xf]  ;;  %v6352_v42 = vld [vmem:[%s8230_s3 + $0x18] sm:$0xf0]  ;;  %3514 = vmatpush.bf16.msrb.mxu1 %v8458_v3  ;;  %v8506_v35 = vperm.slane %v8375_v12, 2 }
 0x5af   :  { %v3163_v24 = vadd.f32 %v3162_v51, %v8442_v0  ;;  %v3192_v52 = vadd.f32 %v3191_v17, %v8445_v37  ;;  %v2898_v60 = vand.u32 2147483647, %v8304_v22  ;;  %v8495_v5 = vor.u32 %v6954_v56, %v6344_v49  ;;  %v6350_v22 = vld [vmem:[%s8230_s3 + $0x8] sm:$0xf] }
 0x5b0   :  { %v2906_v32 = vadd.f32 %v2905_v61, %v2904_v63  ;;  %v2893_v57 = vadd.f32 %v8387_v25, %v2892_v29  ;;  %3526 = vmatpush.bf16.msra.mxu2 %v8464_v28  ;;  %v8497_v61 = vor.u32 %v6961_v41, %v6366_v27  ;;  %v8509_v63 = vperm.slane %v8375_v12, 3  ;;  %v6957_v29 = vld [vmem:[%s8230_s3 + $0x14] sm:$0xf0]  ;;  %s8947_s3 = sld [smem:[%s8985_s0 + %s7354_s30]]  }
 0x5b1   :  { %v8476_v36 = vpack.c.bf16 %v3192_v52, %v3163_v24  ;;  %3540 = vmatpush.bf16.msra.mxu3 %v8469_v9  ;;  %v8514_v51 = vor.u32 %v6955_v54, %v6352_v42  ;;  %v2901_v27 = vor.u32 1.1754944e-38, %v2900_v43  ;;  %3502 = vmatpush.bf16.msra.mxu0 %v8482_v50  ;;  %vm2899_vm0 = vcmp.eq.f32.partialorder %v2898_v60, 8.507059e+37 }
 0x5b2   :  { %7195 = vtanh.f32 %v2906_v32  ;;  %2913 = vst [vmem:[%s8403_s11] sm:$0xff] %v2906_v32  ;;  %v2897_v17 = vsel %vm8501_vm15, %v8387_v25, %v2893_v57  ;;  %3515 = vmatpush.bf16.msrb.mxu1 %v8495_v5  ;;  %v8528_v25 = vor.u32 %v6957_v29, %v6350_v22 }
 0x5b3   :  { %9012 = vst [vmem:[#allocation5_spill] sm:$0xff] %v8476_v36  ;;  %v2902_v56 = vsel %vm2899_vm0, %v2901_v27, %v2897_v17 }
 0x5b4   :  { %9015 = vst [vmem:[#allocation6_spill] sm:$0xff] %v8509_v63  ;;  %3527 = vmatpush.bf16.msra.mxu2 %v8497_v61 }
 0x5b5   :  { %v3220_v24 = vpop.f32.mrf.mxu2  ;;  %v3249_v52 = vpop.f32.mrf.mxu3  ;;  %3541 = vmatpush.bf16.msra.mxu3 %v8514_v51  ;;  %3621 = vmatpush.bf16.msrb.mxu0 %v8236_v34 }
 0x5b6   :  { %v3221_v41 = vadd.f32 %v3220_v24, %v8506_v35  ;;  %v3250_v32 = vadd.f32 %v3249_v52, %v8509_v63  ;;  %v8521_v31 = vpop.f32.mrf.mxu0  ;;  %v8523_v12 = vpop.f32.mrf.mxu1  ;;  %3634 = vmatpush.bf16.msra.mxu1 %v8241_v53 }
 0x5b7   :  { %9016 = vst [vmem:[#allocation7_spill] sm:$0xff] %v8521_v31 }
 0x5b8   :  { %9017 = vst [vmem:[#allocation8_spill] sm:$0xff] %v8523_v12  ;;  %v7196_v21 = vpop.eup %7195  ;;  %v8530_v57 = vpack.c.bf16 %v3250_v32, %v3221_v41  ;;  %3528 = vmatpush.bf16.msra.mxu2 %v8528_v25 }
 0x5b9   :  { %v2908_v49 = vmul.f32 %v7196_v21, %v2902_v56  ;;  %3660 = vmatpush.bf16.msrb.mxu3 %v8243_v38  ;;  %3622 = vmatpush.bf16.msrb.mxu0 %v8257_v39 }
 0x5ba   :  { %9018 = vst [vmem:[#allocation9_spill] sm:$0xff] %v8530_v57  ;;  %3635 = vmatpush.bf16.msra.mxu1 %v8264_v58 }
 0x5bb   :  { %v2909_v43 = vpack.c.bf16 %v2908_v49, %v2908_v49  ;;  %2912 = vst [vmem:[%s8489_s15] sm:$0xff] %v2908_v49 }
 0x5bc   :  { %3647 = vmatpush.bf16.msrb.mxu2 %v8248_v48 }
 0x5bd   :  { %2911 = vst [vmem:[#allocation3 + $0x1c] sm:$0xf] %v2909_v43  ;;  %v3222_v54 = vpop.f32.mrf.mxu2  ;;  %v3251_v42 = vpop.f32.mrf.mxu3  ;;  %3661 = vmatpush.bf16.msrb.mxu3 %v8280_v47  ;;  %3623 = vmatpush.bf16.msrb.mxu0 %v8295_v15 }
 0x5be   :  { %v3223_v60 = vadd.f32 %v3222_v54, %v8506_v35  ;;  %v3252_v1 = vadd.f32 %v3251_v42, %v8509_v63  ;;  %v3167_v22 = vpop.f32.mrf.mxu0  ;;  %v3196_v29 = vpop.f32.mrf.mxu1  ;;  %3636 = vmatpush.bf16.msra.mxu1 %v8297_v16  ;;  %v6338_v54 = vld [vmem:[%s7475_s17 + $0x8] sm:$0xff]  ;;  %s8925_s17 = sld [smem:[%s8985_s0 + %s7350_s14]]  }
 0x5bf   :  { %v3168_v17 = vadd.f32 %v3167_v22, %v8442_v0  ;;  %v3197_v24 = vadd.f32 %v3196_v29, %v8445_v37  ;;  %v3302_v42 = vpack.c.bf16 %v6338_v54, %v6338_v54 }
 0x5c0   :  { %v8546_v52 = vpack.c.bf16 %v3252_v1, %v3223_v60  ;;  %3648 = vmatpush.bf16.msrb.mxu2 %v8284_v40 }
 0x5c1   :  { %v8550_v27 = vpack.c.bf16 %v3197_v24, %v3168_v17  ;;  %3662 = vmatpush.bf16.msrb.mxu3 %v8306_v23  ;;  %3624 = vmatpush.bf16.msrb.mxu0 %v8314_v2 }
 0x5c2   :  { %9019 = vst [vmem:[#allocation10_spill] sm:$0xff] %v8546_v52  ;;  %3637 = vmatpush.bf16.msra.mxu1 %v8316_v6 }
 0x5c3   :  { %9020 = vst [vmem:[#allocation11_spill] sm:$0xff] %v8550_v27 }
 0x5c4   :  { %v6921_v41 = vld [vmem:[#allocation3 + $0x18] sm:$0xff]  ;;  %3649 = vmatpush.bf16.msrb.mxu2 %v8346_v19 }
 0x5c5   :  { %v3225_v32 = vpop.f32.mrf.mxu2  ;;  %v3254_v21 = vpop.f32.mrf.mxu3  ;;  %3663 = vmatpush.bf16.msrb.mxu3 %v8344_v46  ;;  %3171 = vmatmul.bf16.gmra.mxu0 %v6921_v41 }
 0x5c6   :  { %v3226_v56 = vadd.f32 %v3225_v32, %v8506_v35  ;;  %v3255_v49 = vadd.f32 %v3254_v21, %v8509_v63  ;;  %3200 = vmatmul.bf16.gmra.mxu1 %v6921_v41  ;;  %3229 = vmatmul.bf16.gmra.mxu2 %v6921_v41  ;;  %v8612_v60 = vpop.f32.mrf.mxu0  ;;  %v8614_v1 = vpop.f32.mrf.mxu1 }
 0x5c7   :  { %3258 = vmatmul.bf16.gmra.mxu3 %v6921_v41  ;;  %3625 = vmatpush.bf16.msrb.mxu0 %v8364_v7  ;;  %9022 = vst [vmem:[#allocation13_spill] sm:$0xff] %v8612_v60 }
 0x5c8   :  { %v8560_v43 = vpack.c.bf16 %v3255_v49, %v3226_v56  ;;  %3650 = vmatpush.bf16.msrb.mxu2 %v8382_v18  ;;  %3638 = vmatpush.bf16.msra.mxu1 %v8378_v13  ;;  %9023 = vst [vmem:[#allocation14_spill] sm:$0xff] %v8614_v1  ;;  %v3158_v56 = vadd.f32 %v8276_v4, %v8442_v0 }
 0x5c9   :  { %3664 = vmatpush.bf16.msrb.mxu3 %v8380_v14  ;;  %v3187_v49 = vadd.f32 %v8278_v11, %v8445_v37  ;;  %v3216_v4 = vadd.f32 %v8340_v44, %v8506_v35  ;;  %v3245_v11 = vadd.f32 %v8342_v10, %v8509_v63 }
 0x5ca   :  { %9021 = vst [vmem:[#allocation12_spill] sm:$0xff] %v8560_v43 }
 0x5cb   :  { %3626 = vmatpush.bf16.msrb.mxu0 %v8414_v30 }
 0x5cc   :  { %3651 = vmatpush.bf16.msrb.mxu2 %v8424_v33  ;;  %3639 = vmatpush.bf16.msra.mxu1 %v8422_v26 }
 0x5cd   :  { %3665 = vmatpush.bf16.msrb.mxu3 %v8435_v62  ;;  %v8616_v22 = vpop.f32.mrf.mxu2  ;;  %v8618_v29 = vpop.f32.mrf.mxu3 }
 0x5ce   :  { %9024 = vst [vmem:[#allocation15_spill] sm:$0xff] %v8616_v22 }
 0x5cf   :  { %3627 = vmatpush.bf16.msrb.mxu0 %v8456_v20  ;;  %9025 = vst [vmem:[#allocation16_spill] sm:$0xff] %v8618_v29 }
 0x5d0   :  { %3652 = vmatpush.bf16.msrb.mxu2 %v8464_v28  ;;  %3640 = vmatpush.bf16.msra.mxu1 %v8458_v3 }
 0x5d1   :  { %3666 = vmatpush.bf16.msrb.mxu3 %v8469_v9 }
 0x5d3   :  { %3628 = vmatpush.bf16.msrb.mxu0 %v8482_v50 }
 0x5d4   :  { %3653 = vmatpush.bf16.msrb.mxu2 %v8497_v61  ;;  %3641 = vmatpush.bf16.msra.mxu1 %v8495_v5 }
 0x5d5   :  { %3667 = vmatpush.bf16.msrb.mxu3 %v8514_v51  ;;  %3503 = vmatmul.bf16.vlgmr.msra.gmra.mxu0 %v3302_v42 }
 0x5d6   :  { %3516 = vmatmul.bf16.vlgmr.msrb.gmra.mxu1 %v3302_v42  ;;  %3529 = vmatmul.bf16.vlgmr.msra.gmra.mxu2 %v3302_v42 }
 0x5d7   :  { %3542 = vmatmul.bf16.vlgmr.msra.gmra.mxu3 %v3302_v42  ;;  %3747 = vmatpush.bf16.msra.mxu0 %v8236_v34 }
 0x5d8   :  { %3654 = vmatpush.bf16.msrb.mxu2 %v8528_v25  ;;  %3760 = vmatpush.bf16.msrb.mxu1 %v8241_v53 }
 0x5d9   :  { %3786 = vmatpush.bf16.msra.mxu3 %v8243_v38 }
 0x5db   :  { %3748 = vmatpush.bf16.msra.mxu0 %v8257_v39 }
 0x5dc   :  { %3773 = vmatpush.bf16.msra.mxu2 %v8248_v48  ;;  %3761 = vmatpush.bf16.msrb.mxu1 %v8264_v58 }
 0x5dd   :  { %3787 = vmatpush.bf16.msra.mxu3 %v8280_v47 }
 0x5df   :  { %3749 = vmatpush.bf16.msra.mxu0 %v8295_v15 }
 0x5e0   :  { %3774 = vmatpush.bf16.msra.mxu2 %v8284_v40  ;;  %3762 = vmatpush.bf16.msrb.mxu1 %v8297_v16 }
 0x5e1   :  { %3788 = vmatpush.bf16.msra.mxu3 %v8306_v23 }
 0x5e3   :  { %3750 = vmatpush.bf16.msra.mxu0 %v8314_v2 }
 0x5e4   :  { %3775 = vmatpush.bf16.msra.mxu2 %v8346_v19  ;;  %3763 = vmatpush.bf16.msrb.mxu1 %v8316_v6 }
 0x5e5   :  { %3789 = vmatpush.bf16.msra.mxu3 %v8344_v46 }
 0x5e7   :  { %3751 = vmatpush.bf16.msra.mxu0 %v8364_v7 }
 0x5e8   :  { %3776 = vmatpush.bf16.msra.mxu2 %v8382_v18  ;;  %3764 = vmatpush.bf16.msrb.mxu1 %v8378_v13 }
 0x5e9   :  { %3790 = vmatpush.bf16.msra.mxu3 %v8380_v14 }
 0x5eb   :  { %3752 = vmatpush.bf16.msra.mxu0 %v8414_v30 }
 0x5ec   :  { %3777 = vmatpush.bf16.msra.mxu2 %v8424_v33  ;;  %3765 = vmatpush.bf16.msrb.mxu1 %v8422_v26 }
 0x5ed   :  { %3791 = vmatpush.bf16.msra.mxu3 %v8435_v62 }
 0x5ef   :  { %3753 = vmatpush.bf16.msra.mxu0 %v8456_v20 }
 0x5f0   :  { %3778 = vmatpush.bf16.msra.mxu2 %v8464_v28  ;;  %3766 = vmatpush.bf16.msrb.mxu1 %v8458_v3 }
 0x5f1   :  { %3792 = vmatpush.bf16.msra.mxu3 %v8469_v9 }
 0x5f3   :  { %3754 = vmatpush.bf16.msra.mxu0 %v8482_v50 }
 0x5f4   :  { %3779 = vmatpush.bf16.msra.mxu2 %v8497_v61  ;;  %3767 = vmatpush.bf16.msrb.mxu1 %v8495_v5 }
 0x5f5   :  { %3793 = vmatpush.bf16.msra.mxu3 %v8514_v51 }
 0x5f8   :  { %3780 = vmatpush.bf16.msra.mxu2 %v8528_v25 }
 0x642   :  { %v3172_v17 = vpop.f32.mrf.mxu0 }
 0x643   :  { %v3201_v24 = vpop.f32.mrf.mxu1  ;;  %v3173_v41 = vadd.f32 %v3172_v17, %v8442_v0 }
 0x644   :  { %v3202_v32 = vadd.f32 %v3201_v24, %v8445_v37 }
 0x646   :  { %v8622_v21 = vpack.c.bf16 %v3202_v32, %v3173_v41  ;;  %v3264_v32 = vpack.c.bf16 %v3187_v49, %v3158_v56  ;;  %v3265_v49 = vpack.c.bf16 %v3245_v11, %v3216_v4 }
 0x648   :  { %9026 = vst [vmem:[#allocation17_spill] sm:$0xff] %v8622_v21  ;;  %v3548_v27 = vunpack.c.h.bf16 %v3264_v32  ;;  %v3550_v10 = vunpack.c.h.bf16 %v3265_v49  ;;  %v3549_v11 = vunpack.c.l.bf16 %v3265_v49 }
 0x649   :  { %v3230_v54 = vpop.f32.mrf.mxu2 }
 0x64a   :  { %v3259_v42 = vpop.f32.mrf.mxu3  ;;  %v3231_v22 = vadd.f32 %v3230_v54, %v8506_v35  ;;  %v3174_v1 = vpop.f32.mrf.mxu0 }
 0x64b   :  { %v3260_v29 = vadd.f32 %v3259_v42, %v8509_v63  ;;  %v3203_v60 = vpop.f32.mrf.mxu1  ;;  %v3175_v17 = vadd.f32 %v3174_v1, %v8442_v0  ;;  %v3547_v42 = vunpack.c.l.bf16 %v3264_v32 }
 0x64c   :  { %v3204_v24 = vadd.f32 %v3203_v60, %v8445_v37 }
 0x64d   :  { %v8632_v41 = vpack.c.bf16 %v3260_v29, %v3231_v22 }
 0x64e   :  { %v8634_v21 = vpack.c.bf16 %v3204_v24, %v3175_v17 }
 0x64f   :  { %9027 = vst [vmem:[#allocation18_spill] sm:$0xff] %v8632_v41 }
 0x650   :  { %9028 = vst [vmem:[#allocation19_spill] sm:$0xff] %v8634_v21 }
 0x651   :  { %v3232_v54 = vpop.f32.mrf.mxu2 }
 0x652   :  { %v3261_v43 = vpop.f32.mrf.mxu3  ;;  %v3233_v52 = vadd.f32 %v3232_v54, %v8506_v35  ;;  %v3504_v60 = vpop.f32.mrf.mxu0 }
 0x653   :  { %v3262_v1 = vadd.f32 %v3261_v43, %v8509_v63  ;;  %v3517_v22 = vpop.f32.mrf.mxu1  ;;  %v3551_v29 = vadd.f32 %v3547_v42, %v3504_v60 }
 0x654   :  { %v3552_v56 = vadd.f32 %v3548_v27, %v3517_v22 }
 0x655   :  { %v8642_v17 = vpack.c.bf16 %v3262_v1, %v3233_v52  ;;  %v6468_v24 = vmul.f32 -1.442695, %v3551_v29 }
 0x656   :  { %v6469_v44 = vmul.f32 -1.442695, %v3552_v56 }
 0x657   :  { %9029 = vst [vmem:[#allocation20_spill] sm:$0xff] %v8642_v17  ;;  %7197 = vpow2.f32 %v6468_v24 }
 0x658   :  { %7199 = vpow2.f32 %v6469_v44 }
 0x659   :  { %v3530_v21 = vpop.f32.mrf.mxu2 }
 0x65a   :  { %v3543_v41 = vpop.f32.mrf.mxu3  ;;  %v3506_v32 = vpop.f32.mrf.mxu0  ;;  %v3553_v22 = vadd.f32 %v3549_v11, %v3530_v21  ;;  %v6339_v11 = vld [vmem:[%s7670_s25 + $0x8] sm:$0xff]  ;;  %s5085_s25 = sld [smem:[%s8985_s0 + %s7352_s22]]  }
 0x65b   :  { %v3554_v12 = vadd.f32 %v3550_v10, %v3543_v41  ;;  %v3519_v31 = vpop.f32.mrf.mxu1 }
 0x65d   :  { %v6470_v54 = vmul.f32 -1.442695, %v3554_v12  ;;  %v7198_v57 = vpop.eup %7197 }
 0x65e   :  { %v7200_v43 = vpop.eup %7199  ;;  %v3558_v36 = vadd.f32 1.0, %v7198_v57 }
 0x65f   :  { %7201 = vpow2.f32 %v6470_v54  ;;  %v3577_v42 = vadd.f32 1.0, %v7200_v43 }
 0x660   :  { %7203 = vrcp.f32 %v3558_v36  ;;  %v3570_v24 = vand.u32 2147483648, %v3558_v36  ;;  %v3568_v10 = vand.u32 2147483647, %v3558_v36  ;;  %vm3564_vm3 = vweird.f32 %v3558_v36 }
 0x661   :  { %7205 = vrcp.f32 %v3577_v42  ;;  %v3532_v27 = vpop.f32.mrf.mxu2  ;;  %v3589_v57 = vand.u32 2147483648, %v3577_v42  ;;  %v3587_v54 = vand.u32 2147483647, %v3577_v42  ;;  %vm3583_vm4 = vweird.f32 %v3577_v42 }
 0x662   :  { %v3545_v52 = vpop.f32.mrf.mxu3  ;;  %v3571_v21 = vor.u32 1.1754944e-38, %v3570_v24  ;;  %vm3569_vm7 = vcmp.eq.f32.partialorder %v3568_v10, 8.507059e+37 }
 0x663   :  { %vm3588_vm8 = vcmp.eq.f32.partialorder %v3587_v54, 8.507059e+37 }
 0x665   :  { %v7202_v4 = vpop.eup %7201 }
 0x666   :  { %v3597_v1 = vadd.f32 1.0, %v7202_v4  ;;  %v7204_v60 = vpop.eup %7203  ;;  %v3590_v4 = vor.u32 1.1754944e-38, %v3589_v57 }
 0x667   :  { %v7206_v29 = vpop.eup %7205  ;;  %v3560_v56 = vmul.f32 %v7204_v60, %v3558_v36  ;;  %vm3565_vm1 = vweird.f32 %v7204_v60 }
 0x668   :  { %7207 = vrcp.f32 %v3597_v1  ;;  %v3579_v41 = vmul.f32 %v7206_v29, %v3577_v42  ;;  %vm3584_vm2 = vweird.f32 %v7206_v29  ;;  %vm3566_vm5 = vmor %vm3564_vm3, %vm3565_vm1  ;;  %v3609_v24 = vand.u32 2147483648, %v3597_v1 }
 0x669   :  { %v3561_v31 = vsub.f32 1.0, %v3560_v56  ;;  %7209 = vtanh.f32 %v3553_v22  ;;  %vm3585_vm6 = vmor %vm3583_vm4, %vm3584_vm2  ;;  %vm3603_vm10 = vweird.f32 %v3597_v1  ;;  %v3607_v57 = vand.u32 2147483647, %v3597_v1 }
 0x66a   :  { %v3580_v12 = vsub.f32 1.0, %v3579_v41  ;;  %v3610_v10 = vor.u32 1.1754944e-38, %v3609_v24 }
 0x66b   :  { %v3562_v44 = vmul.f32 %v7204_v60, %v3561_v31  ;;  %vm3608_vm12 = vcmp.eq.f32.partialorder %v3607_v57, 8.507059e+37 }
 0x66c   :  { %v3581_v32 = vmul.f32 %v7206_v29, %v3580_v12 }
 0x66d   :  { %v3563_v43 = vadd.f32 %v7204_v60, %v3562_v44 }
 0x66e   :  { %v7208_v49 = vpop.eup %7207  ;;  %v3582_v52 = vadd.f32 %v7206_v29, %v3581_v32 }
 0x66f   :  { %v3599_v27 = vmul.f32 %v7208_v49, %v3597_v1  ;;  %v3567_v22 = vsel %vm3566_vm5, %v7204_v60, %v3563_v43  ;;  %v7210_v56 = vpop.eup %7209  ;;  %vm3604_vm9 = vweird.f32 %v7208_v49  ;;  %v3218_v1 = vadd.f32 %v8447_v55, %v8506_v35 }
 0x670   :  { %v3572_v41 = vsel %vm3569_vm7, %v3571_v21, %v3567_v22  ;;  %v3586_v31 = vsel %vm3585_vm6, %v7206_v29, %v3582_v52  ;;  %vm3605_vm11 = vmor %vm3603_vm10, %vm3604_vm9  ;;  %v9031_v21 = vld [vmem:[#allocation4_spill] sm:$0xff] }
 0x671   :  { %v3600_v12 = vsub.f32 1.0, %v3599_v27  ;;  %v3591_v17 = vsel %vm3588_vm8, %v3590_v4, %v3586_v31  ;;  %v3614_v8 = vmul.f32 %v7210_v56, %v3572_v41 }
 0x672   :  { %v3613_v63 = vmul.f32 %v6339_v11, %v3591_v17 }
 0x673   :  { %v3601_v44 = vmul.f32 %v7208_v49, %v3600_v12 }
 0x674   :  { %v8645_v36 = vadd.f32 %v3614_v8, %v3613_v63  ;;  %v3160_v8 = vadd.f32 %v8358_v59, %v8442_v0  ;;  %v3189_v63 = vadd.f32 %v8360_v45, %v8445_v37 }
 0x675   :  { %v3602_v42 = vadd.f32 %v7208_v49, %v3601_v44 }
 0x676   :  { %7211 = vtanh.f32 %v8645_v36  ;;  %v3266_v17 = vpack.c.bf16 %v3189_v63, %v3160_v8 }
 0x677   :  { %v3606_v60 = vsel %vm3605_vm11, %v7208_v49, %v3602_v42  ;;  %v9030_v49 = vld [vmem:[#allocation6_spill] sm:$0xff] }
 0x678   :  { %v3611_v32 = vsel %vm3608_vm12, %v3610_v10, %v3606_v60  ;;  %v3247_v52 = vadd.f32 %v9031_v21, %v9030_v49  ;;  %v3673_v27 = vunpack.c.l.bf16 %v3266_v17  ;;  %v3674_v4 = vunpack.c.h.bf16 %v3266_v17 }
 0x67a   :  { %v3267_v31 = vpack.c.bf16 %v3247_v52, %v3218_v1 }
 0x67c   :  { %v7212_v29 = vpop.eup %7211  ;;  %v3676_v59 = vunpack.c.h.bf16 %v3267_v31  ;;  %v3675_v17 = vunpack.c.l.bf16 %v3267_v31 }
 0x67d   :  { %v3617_v54 = vmul.f32 %v7212_v29, %v3611_v32 }
 0x67f   :  { %v3620_v43 = vpack.c.bf16 %v3617_v54, %v3617_v54 }
 0x681   :  { %3629 = vmatmul.bf16.vlgmr.msrb.gmra.mxu0 %v3620_v43  ;;  %3642 = vmatmul.bf16.vlgmr.msra.gmra.mxu1 %v3620_v43 }
 0x682   :  { %3655 = vmatmul.bf16.vlgmr.msrb.gmra.mxu2 %v3620_v43  ;;  %3668 = vmatmul.bf16.vlgmr.msrb.gmra.mxu3 %v3620_v43 }
 0x683   :  { %3873 = vmatpush.bf16.msrb.mxu0 %v8236_v34  ;;  %3886 = vmatpush.bf16.msra.mxu1 %v8241_v53 }
 0x684   :  { %3899 = vmatpush.bf16.msrb.mxu2 %v8248_v48  ;;  %3912 = vmatpush.bf16.msrb.mxu3 %v8243_v38 }
 0x687   :  { %3874 = vmatpush.bf16.msrb.mxu0 %v8257_v39  ;;  %3887 = vmatpush.bf16.msra.mxu1 %v8264_v58 }
 0x688   :  { %3900 = vmatpush.bf16.msrb.mxu2 %v8284_v40  ;;  %3913 = vmatpush.bf16.msrb.mxu3 %v8280_v47 }
 0x68b   :  { %3875 = vmatpush.bf16.msrb.mxu0 %v8295_v15  ;;  %3888 = vmatpush.bf16.msra.mxu1 %v8297_v16 }
 0x68c   :  { %3901 = vmatpush.bf16.msrb.mxu2 %v8346_v19  ;;  %3914 = vmatpush.bf16.msrb.mxu3 %v8306_v23 }
 0x68f   :  { %3876 = vmatpush.bf16.msrb.mxu0 %v8314_v2  ;;  %3889 = vmatpush.bf16.msra.mxu1 %v8316_v6 }
 0x690   :  { %3902 = vmatpush.bf16.msrb.mxu2 %v8382_v18  ;;  %3915 = vmatpush.bf16.msrb.mxu3 %v8344_v46 }
 0x693   :  { %3877 = vmatpush.bf16.msrb.mxu0 %v8364_v7  ;;  %3890 = vmatpush.bf16.msra.mxu1 %v8378_v13 }
 0x694   :  { %3903 = vmatpush.bf16.msrb.mxu2 %v8424_v33  ;;  %3916 = vmatpush.bf16.msrb.mxu3 %v8380_v14 }
 0x697   :  { %3878 = vmatpush.bf16.msrb.mxu0 %v8414_v30  ;;  %3891 = vmatpush.bf16.msra.mxu1 %v8422_v26 }
 0x698   :  { %3904 = vmatpush.bf16.msrb.mxu2 %v8464_v28  ;;  %3917 = vmatpush.bf16.msrb.mxu3 %v8435_v62 }
 0x69b   :  { %3879 = vmatpush.bf16.msrb.mxu0 %v8456_v20  ;;  %3892 = vmatpush.bf16.msra.mxu1 %v8458_v3 }
 0x69c   :  { %3905 = vmatpush.bf16.msrb.mxu2 %v8497_v61  ;;  %3918 = vmatpush.bf16.msrb.mxu3 %v8469_v9 }
 0x69f   :  { %3880 = vmatpush.bf16.msrb.mxu0 %v8482_v50  ;;  %3893 = vmatpush.bf16.msra.mxu1 %v8495_v5 }
 0x6a0   :  { %3906 = vmatpush.bf16.msrb.mxu2 %v8528_v25  ;;  %3919 = vmatpush.bf16.msrb.mxu3 %v8514_v51 }
 0x6fe   :  { %v3630_v11 = vpop.f32.mrf.mxu0  ;;  %v3643_v22 = vpop.f32.mrf.mxu1 }
 0x6ff   :  { %v3677_v56 = vadd.f32 %v3673_v27, %v3630_v11  ;;  %v3678_v41 = vadd.f32 %v3674_v4, %v3643_v22 }
 0x701   :  { %v6471_v12 = vmul.f32 -1.442695, %v3677_v56  ;;  %v6472_v44 = vmul.f32 -1.442695, %v3678_v41 }
 0x703   :  { %7213 = vpow2.f32 %v6471_v12 }
 0x704   :  { %7215 = vpow2.f32 %v6472_v44 }
 0x705   :  { %v3656_v45 = vpop.f32.mrf.mxu2  ;;  %v3669_v42 = vpop.f32.mrf.mxu3 }
 0x706   :  { %v3680_v24 = vadd.f32 %v3676_v59, %v3669_v42  ;;  %v3632_v57 = vpop.f32.mrf.mxu0  ;;  %v3645_v55 = vpop.f32.mrf.mxu1  ;;  %v3679_v52 = vadd.f32 %v3675_v17, %v3656_v45 }
 0x708   :  { %v6473_v60 = vmul.f32 -1.442695, %v3680_v24 }
 0x709   :  { %v7214_v10 = vpop.eup %7213 }
 0x70a   :  { %v7216_v29 = vpop.eup %7215  ;;  %v3684_v32 = vadd.f32 1.0, %v7214_v10  ;;  %7217 = vpow2.f32 %v6473_v60 }
 0x70b   :  { %v3703_v54 = vadd.f32 1.0, %v7216_v29 }
 0x70c   :  { %7219 = vrcp.f32 %v3684_v32  ;;  %v3696_v41 = vand.u32 2147483648, %v3684_v32  ;;  %v3694_v59 = vand.u32 2147483647, %v3684_v32  ;;  %vm3690_vm15 = vweird.f32 %v3684_v32 }
 0x70d   :  { %7221 = vrcp.f32 %v3703_v54  ;;  %v3658_v43 = vpop.f32.mrf.mxu2  ;;  %v3671_v8 = vpop.f32.mrf.mxu3  ;;  %v3715_v12 = vand.u32 2147483648, %v3703_v54  ;;  %v3713_v24 = vand.u32 2147483647, %v3703_v54  ;;  %vm3709_vm0 = vweird.f32 %v3703_v54 }
 0x70e   :  { %v3697_v45 = vor.u32 1.1754944e-38, %v3696_v41  ;;  %vm3695_vm3 = vcmp.eq.f32.partialorder %v3694_v59, 8.507059e+37 }
 0x70f   :  { %v3716_v10 = vor.u32 1.1754944e-38, %v3715_v12  ;;  %vm3714_vm4 = vcmp.eq.f32.partialorder %v3713_v24, 8.507059e+37 }
 0x710   :  { %v7218_v63 = vpop.eup %7217 }
 0x711   :  { %v3723_v1 = vadd.f32 1.0, %v7218_v63 }
 0x712   :  { %v7220_v21 = vpop.eup %7219 }
 0x713   :  { %v7222_v27 = vpop.eup %7221  ;;  %v3686_v4 = vmul.f32 %v7220_v21, %v3684_v32  ;;  %7223 = vrcp.f32 %v3723_v1  ;;  %vm3691_vm13 = vweird.f32 %v7220_v21  ;;  %vm3729_vm6 = vweird.f32 %v3723_v1 }
 0x714   :  { %v3705_v11 = vmul.f32 %v7222_v27, %v3703_v54  ;;  %7225 = vtanh.f32 %v3679_v52  ;;  %vm3710_vm14 = vweird.f32 %v7222_v27  ;;  %vm3692_vm1 = vmor %vm3690_vm15, %vm3691_vm13 }
 0x715   :  { %v3687_v22 = vsub.f32 1.0, %v3686_v4  ;;  %vm3711_vm2 = vmor %vm3709_vm0, %vm3710_vm14 }
 0x716   :  { %v3706_v56 = vsub.f32 1.0, %v3705_v11 }
 0x717   :  { %v3688_v44 = vmul.f32 %v7220_v21, %v3687_v22 }
 0x718   :  { %v3707_v42 = vmul.f32 %v7222_v27, %v3706_v56  ;;  %v3735_v56 = vand.u32 2147483648, %v3723_v1 }
 0x719   :  { %v7224_v57 = vpop.eup %7223  ;;  %v3689_v31 = vadd.f32 %v7220_v21, %v3688_v44 }
 0x71a   :  { %v3708_v55 = vadd.f32 %v7222_v27, %v3707_v42  ;;  %v3725_v60 = vmul.f32 %v7224_v57, %v3723_v1  ;;  %v7226_v43 = vpop.eup %7225  ;;  %vm3730_vm5 = vweird.f32 %v7224_v57  ;;  %v3736_v12 = vor.u32 1.1754944e-38, %v3735_v56 }
 0x71b   :  { %v3693_v29 = vsel %vm3692_vm1, %v7220_v21, %v3689_v31  ;;  %v3733_v21 = vand.u32 2147483647, %v3723_v1  ;;  %vm3731_vm7 = vmor %vm3729_vm6, %vm3730_vm5 }
 0x71c   :  { %v3698_v8 = vsel %vm3695_vm3, %v3697_v45, %v3693_v29  ;;  %v3712_v63 = vsel %vm3711_vm2, %v7222_v27, %v3708_v55  ;;  %v3726_v17 = vsub.f32 1.0, %v3725_v60  ;;  %v9033_v29 = vld [vmem:[#allocation9_spill] sm:$0xff] }
 0x71d   :  { %v3717_v52 = vsel %vm3714_vm4, %v3716_v10, %v3712_v63  ;;  %v3740_v4 = vmul.f32 %v7226_v43, %v3698_v8  ;;  %vm3734_vm8 = vcmp.eq.f32.partialorder %v3733_v21, 8.507059e+37  ;;  %v3802_v43 = vunpack.c.h.bf16 %v9033_v29 }
 0x71e   :  { %v3739_v11 = vmul.f32 %v3717_v52, %v8645_v36  ;;  %v3727_v22 = vmul.f32 %v7224_v57, %v3726_v17  ;;  %v9032_v36 = vld [vmem:[#allocation5_spill] sm:$0xff] }
 0x71f   :  { %v3799_v1 = vunpack.c.l.bf16 %v9032_v36  ;;  %v3800_v24 = vunpack.c.h.bf16 %v9032_v36 }
 0x720   :  { %v8689_v32 = vadd.f32 %v3740_v4, %v3739_v11  ;;  %v3728_v54 = vadd.f32 %v7224_v57, %v3727_v22 }
 0x722   :  { %7227 = vtanh.f32 %v8689_v32  ;;  %v3732_v41 = vsel %vm3731_vm7, %v7224_v57, %v3728_v54 }
 0x723   :  { %v3737_v44 = vsel %vm3734_vm8, %v3736_v12, %v3732_v41 }
 0x728   :  { %v7228_v27 = vpop.eup %7227 }
 0x729   :  { %v3743_v59 = vmul.f32 %v7228_v27, %v3737_v44  ;;  %v3801_v44 = vunpack.c.l.bf16 %v9033_v29 }
 0x72b   :  { %v3746_v42 = vpack.c.bf16 %v3743_v59, %v3743_v59 }
 0x72d   :  { %3755 = vmatmul.bf16.vlgmr.msra.gmra.mxu0 %v3746_v42  ;;  %3768 = vmatmul.bf16.vlgmr.msrb.gmra.mxu1 %v3746_v42 }
 0x72e   :  { %3781 = vmatmul.bf16.vlgmr.msra.gmra.mxu2 %v3746_v42  ;;  %3794 = vmatmul.bf16.vlgmr.msra.gmra.mxu3 %v3746_v42 }
 0x72f   :  { %3999 = vmatpush.bf16.msra.mxu0 %v8236_v34  ;;  %4012 = vmatpush.bf16.msrb.mxu1 %v8241_v53 }
 0x730   :  { %4025 = vmatpush.bf16.msra.mxu2 %v8248_v48  ;;  %4038 = vmatpush.bf16.msra.mxu3 %v8243_v38 }
 0x733   :  { %4000 = vmatpush.bf16.msra.mxu0 %v8257_v39  ;;  %4013 = vmatpush.bf16.msrb.mxu1 %v8264_v58 }
 0x734   :  { %4026 = vmatpush.bf16.msra.mxu2 %v8284_v40  ;;  %4039 = vmatpush.bf16.msra.mxu3 %v8280_v47 }
 0x737   :  { %4001 = vmatpush.bf16.msra.mxu0 %v8295_v15  ;;  %4014 = vmatpush.bf16.msrb.mxu1 %v8297_v16 }
 0x738   :  { %4027 = vmatpush.bf16.msra.mxu2 %v8346_v19  ;;  %4040 = vmatpush.bf16.msra.mxu3 %v8306_v23 }
 0x73b   :  { %4002 = vmatpush.bf16.msra.mxu0 %v8314_v2  ;;  %4015 = vmatpush.bf16.msrb.mxu1 %v8316_v6 }
 0x73c   :  { %4028 = vmatpush.bf16.msra.mxu2 %v8382_v18  ;;  %4041 = vmatpush.bf16.msra.mxu3 %v8344_v46 }
 0x73f   :  { %4003 = vmatpush.bf16.msra.mxu0 %v8364_v7  ;;  %4016 = vmatpush.bf16.msrb.mxu1 %v8378_v13 }
 0x740   :  { %4029 = vmatpush.bf16.msra.mxu2 %v8424_v33  ;;  %4042 = vmatpush.bf16.msra.mxu3 %v8380_v14 }
 0x743   :  { %4004 = vmatpush.bf16.msra.mxu0 %v8414_v30  ;;  %4017 = vmatpush.bf16.msrb.mxu1 %v8422_v26 }
 0x744   :  { %4030 = vmatpush.bf16.msra.mxu2 %v8464_v28  ;;  %4043 = vmatpush.bf16.msra.mxu3 %v8435_v62 }
 0x747   :  { %4005 = vmatpush.bf16.msra.mxu0 %v8456_v20  ;;  %4018 = vmatpush.bf16.msrb.mxu1 %v8458_v3 }
 0x748   :  { %4031 = vmatpush.bf16.msra.mxu2 %v8497_v61  ;;  %4044 = vmatpush.bf16.msra.mxu3 %v8469_v9 }
 0x74b   :  { %4006 = vmatpush.bf16.msra.mxu0 %v8482_v50  ;;  %4019 = vmatpush.bf16.msrb.mxu1 %v8495_v5 }
 0x74c   :  { %4032 = vmatpush.bf16.msra.mxu2 %v8528_v25  ;;  %4045 = vmatpush.bf16.msra.mxu3 %v8514_v51 }
 0x7aa   :  { %v3756_v57 = vpop.f32.mrf.mxu0  ;;  %v3769_v31 = vpop.f32.mrf.mxu1 }
 0x7ab   :  { %v3803_v45 = vadd.f32 %v3799_v1, %v3756_v57  ;;  %v3804_v55 = vadd.f32 %v3800_v24, %v3769_v31 }
 0x7ad   :  { %v6474_v60 = vmul.f32 -1.442695, %v3803_v45  ;;  %v6475_v10 = vmul.f32 -1.442695, %v3804_v55 }
 0x7af   :  { %7229 = vpow2.f32 %v6474_v60 }
 0x7b0   :  { %7231 = vpow2.f32 %v6475_v10 }
 0x7b1   :  { %v3782_v8 = vpop.f32.mrf.mxu2  ;;  %v3795_v63 = vpop.f32.mrf.mxu3 }
 0x7b2   :  { %v3806_v17 = vadd.f32 %v3802_v43, %v3795_v63  ;;  %v3758_v52 = vpop.f32.mrf.mxu0  ;;  %v3771_v4 = vpop.f32.mrf.mxu1  ;;  %v3805_v36 = vadd.f32 %v3801_v44, %v3782_v8 }
 0x7b4   :  { %v6476_v11 = vmul.f32 -1.442695, %v3806_v17 }
 0x7b5   :  { %v7230_v22 = vpop.eup %7229 }
 0x7b6   :  { %v7232_v54 = vpop.eup %7231  ;;  %v3810_v56 = vadd.f32 1.0, %v7230_v22  ;;  %7233 = vpow2.f32 %v6476_v11 }
 0x7b7   :  { %v3829_v21 = vadd.f32 1.0, %v7232_v54 }
 0x7b8   :  { %7235 = vrcp.f32 %v3810_v56  ;;  %v3822_v55 = vand.u32 2147483648, %v3810_v56  ;;  %v3820_v43 = vand.u32 2147483647, %v3810_v56  ;;  %vm3816_vm11 = vweird.f32 %v3810_v56 }
 0x7b9   :  { %7237 = vrcp.f32 %v3829_v21  ;;  %v3784_v41 = vpop.f32.mrf.mxu2  ;;  %v3797_v12 = vpop.f32.mrf.mxu3  ;;  %v3841_v60 = vand.u32 2147483648, %v3829_v21  ;;  %v3839_v17 = vand.u32 2147483647, %v3829_v21  ;;  %vm3835_vm12 = vweird.f32 %v3829_v21 }
 0x7ba   :  { %v3823_v8 = vor.u32 1.1754944e-38, %v3822_v55  ;;  %vm3821_vm15 = vcmp.eq.f32.partialorder %v3820_v43, 8.507059e+37 }
 0x7bb   :  { %v3842_v22 = vor.u32 1.1754944e-38, %v3841_v60  ;;  %vm3840_vm0 = vcmp.eq.f32.partialorder %v3839_v17, 8.507059e+37  ;;  %v9035_v17 = vld [vmem:[#allocation8_spill] sm:$0xff] }
 0x7bc   :  { %v7234_v27 = vpop.eup %7233 }
 0x7bd   :  { %v3849_v59 = vadd.f32 1.0, %v7234_v27 }
 0x7be   :  { %v7236_v42 = vpop.eup %7235 }
 0x7bf   :  { %v7238_v1 = vpop.eup %7237  ;;  %v3812_v24 = vmul.f32 %v7236_v42, %v3810_v56  ;;  %7239 = vrcp.f32 %v3849_v59  ;;  %vm3817_vm9 = vweird.f32 %v7236_v42  ;;  %vm3855_vm2 = vweird.f32 %v3849_v59 }
 0x7c0   :  { %v3831_v57 = vmul.f32 %v7238_v1, %v3829_v21  ;;  %7241 = vtanh.f32 %v3805_v36  ;;  %vm3836_vm10 = vweird.f32 %v7238_v1  ;;  %vm3818_vm13 = vmor %vm3816_vm11, %vm3817_vm9 }
 0x7c1   :  { %v3813_v31 = vsub.f32 1.0, %v3812_v24  ;;  %vm3837_vm14 = vmor %vm3835_vm12, %vm3836_vm10 }
 0x7c2   :  { %v3832_v45 = vsub.f32 1.0, %v3831_v57 }
 0x7c3   :  { %v3814_v10 = vmul.f32 %v7236_v42, %v3813_v31 }
 0x7c4   :  { %v3833_v63 = vmul.f32 %v7238_v1, %v3832_v45  ;;  %v3861_v45 = vand.u32 2147483648, %v3849_v59 }
 0x7c5   :  { %v7240_v52 = vpop.eup %7239  ;;  %v3815_v29 = vadd.f32 %v7236_v42, %v3814_v10 }
 0x7c6   :  { %v3834_v4 = vadd.f32 %v7238_v1, %v3833_v63  ;;  %v3851_v11 = vmul.f32 %v7240_v52, %v3849_v59  ;;  %v7242_v41 = vpop.eup %7241  ;;  %vm3856_vm1 = vweird.f32 %v7240_v52  ;;  %v3862_v60 = vor.u32 1.1754944e-38, %v3861_v45 }
 0x7c7   :  { %v3819_v54 = vsel %vm3818_vm13, %v7236_v42, %v3815_v29  ;;  %v3859_v42 = vand.u32 2147483647, %v3849_v59  ;;  %vm3857_vm3 = vmor %vm3855_vm2, %vm3856_vm1 }
 0x7c8   :  { %v3824_v12 = vsel %vm3821_vm15, %v3823_v8, %v3819_v54  ;;  %v3838_v27 = vsel %vm3837_vm14, %v7238_v1, %v3834_v4  ;;  %v3852_v44 = vsub.f32 1.0, %v3851_v11 }
 0x7c9   :  { %v3843_v36 = vsel %vm3840_vm0, %v3842_v22, %v3838_v27  ;;  %v3866_v24 = vmul.f32 %v7242_v41, %v3824_v12  ;;  %vm3860_vm4 = vcmp.eq.f32.partialorder %v3859_v42, 8.507059e+37 }
 0x7ca   :  { %v3865_v57 = vmul.f32 %v3843_v36, %v8689_v32  ;;  %v3853_v31 = vmul.f32 %v7240_v52, %v3852_v44  ;;  %v9034_v32 = vld [vmem:[#allocation7_spill] sm:$0xff]  ;;  %v9036_v44 = vld [vmem:[#allocation10_spill] sm:$0xff] }
 0x7cb   :  { %v3165_v59 = vadd.f32 %v9034_v32, %v8442_v0  ;;  %v3928_v36 = vunpack.c.h.bf16 %v9036_v44 }
 0x7cc   :  { %v8729_v56 = vadd.f32 %v3866_v24, %v3865_v57  ;;  %v3854_v21 = vadd.f32 %v7240_v52, %v3853_v31 }
 0x7ce   :  { %7243 = vtanh.f32 %v8729_v56  ;;  %v3858_v55 = vsel %vm3857_vm3, %v7240_v52, %v3854_v21  ;;  %v3194_v52 = vadd.f32 %v9035_v17, %v8445_v37 }
 0x7cf   :  { %v3863_v10 = vsel %vm3860_vm4, %v3862_v60, %v3858_v55 }
 0x7d0   :  { %v3270_v29 = vpack.c.bf16 %v3194_v52, %v3165_v59  ;;  %v3927_v59 = vunpack.c.l.bf16 %v9036_v44 }
 0x7d2   :  { %v3925_v8 = vunpack.c.l.bf16 %v3270_v29  ;;  %v3926_v4 = vunpack.c.h.bf16 %v3270_v29 }
 0x7d4   :  { %v7244_v1 = vpop.eup %7243 }
 0x7d5   :  { %v3869_v43 = vmul.f32 %v7244_v1, %v3863_v10 }
 0x7d7   :  { %v3872_v63 = vpack.c.bf16 %v3869_v43, %v3869_v43 }
 0x7d9   :  { %3881 = vmatmul.bf16.vlgmr.msrb.gmra.mxu0 %v3872_v63  ;;  %3894 = vmatmul.bf16.vlgmr.msra.gmra.mxu1 %v3872_v63 }
 0x7da   :  { %3907 = vmatmul.bf16.vlgmr.msrb.gmra.mxu2 %v3872_v63  ;;  %3920 = vmatmul.bf16.vlgmr.msrb.gmra.mxu3 %v3872_v63 }
 0x7db   :  { %4125 = vmatpush.bf16.msrb.mxu0 %v8236_v34  ;;  %4138 = vmatpush.bf16.msra.mxu1 %v8241_v53 }
 0x7dc   :  { %4151 = vmatpush.bf16.msrb.mxu2 %v8248_v48  ;;  %4164 = vmatpush.bf16.msrb.mxu3 %v8243_v38 }
 0x7df   :  { %4126 = vmatpush.bf16.msrb.mxu0 %v8257_v39  ;;  %4139 = vmatpush.bf16.msra.mxu1 %v8264_v58 }
 0x7e0   :  { %4152 = vmatpush.bf16.msrb.mxu2 %v8284_v40  ;;  %4165 = vmatpush.bf16.msrb.mxu3 %v8280_v47 }
 0x7e3   :  { %4127 = vmatpush.bf16.msrb.mxu0 %v8295_v15  ;;  %4140 = vmatpush.bf16.msra.mxu1 %v8297_v16 }
 0x7e4   :  { %4153 = vmatpush.bf16.msrb.mxu2 %v8346_v19  ;;  %4166 = vmatpush.bf16.msrb.mxu3 %v8306_v23 }
 0x7e7   :  { %4128 = vmatpush.bf16.msrb.mxu0 %v8314_v2  ;;  %4141 = vmatpush.bf16.msra.mxu1 %v8316_v6 }
 0x7e8   :  { %4154 = vmatpush.bf16.msrb.mxu2 %v8382_v18  ;;  %4167 = vmatpush.bf16.msrb.mxu3 %v8344_v46 }
 0x7eb   :  { %4129 = vmatpush.bf16.msrb.mxu0 %v8364_v7  ;;  %4142 = vmatpush.bf16.msra.mxu1 %v8378_v13 }
 0x7ec   :  { %4155 = vmatpush.bf16.msrb.mxu2 %v8424_v33  ;;  %4168 = vmatpush.bf16.msrb.mxu3 %v8380_v14 }
 0x7ef   :  { %4130 = vmatpush.bf16.msrb.mxu0 %v8414_v30  ;;  %4143 = vmatpush.bf16.msra.mxu1 %v8422_v26 }
 0x7f0   :  { %4156 = vmatpush.bf16.msrb.mxu2 %v8464_v28  ;;  %4169 = vmatpush.bf16.msrb.mxu3 %v8435_v62 }
 0x7f3   :  { %4131 = vmatpush.bf16.msrb.mxu0 %v8456_v20  ;;  %4144 = vmatpush.bf16.msra.mxu1 %v8458_v3 }
 0x7f4   :  { %4157 = vmatpush.bf16.msrb.mxu2 %v8497_v61  ;;  %4170 = vmatpush.bf16.msrb.mxu3 %v8469_v9 }
 0x7f7   :  { %4132 = vmatpush.bf16.msrb.mxu0 %v8482_v50  ;;  %4145 = vmatpush.bf16.msra.mxu1 %v8495_v5 }
 0x7f8   :  { %4158 = vmatpush.bf16.msrb.mxu2 %v8528_v25  ;;  %4171 = vmatpush.bf16.msrb.mxu3 %v8514_v51 }
 0x856   :  { %v3882_v11 = vpop.f32.mrf.mxu0  ;;  %v3895_v22 = vpop.f32.mrf.mxu1 }
 0x857   :  { %v3929_v54 = vadd.f32 %v3925_v8, %v3882_v11  ;;  %v3930_v41 = vadd.f32 %v3926_v4, %v3895_v22 }
 0x859   :  { %v6477_v12 = vmul.f32 -1.442695, %v3929_v54  ;;  %v6478_v27 = vmul.f32 -1.442695, %v3930_v41 }
 0x85b   :  { %7245 = vpow2.f32 %v6477_v12 }
 0x85c   :  { %7247 = vpow2.f32 %v6478_v27 }
 0x85d   :  { %v3908_v24 = vpop.f32.mrf.mxu2  ;;  %v3921_v57 = vpop.f32.mrf.mxu3 }
 0x85e   :  { %v3932_v31 = vadd.f32 %v3928_v36, %v3921_v57  ;;  %v3884_v21 = vpop.f32.mrf.mxu0  ;;  %v3897_v45 = vpop.f32.mrf.mxu1  ;;  %v3931_v29 = vadd.f32 %v3927_v59, %v3908_v24 }
 0x860   :  { %v6479_v42 = vmul.f32 -1.442695, %v3932_v31 }
 0x861   :  { %v7246_v55 = vpop.eup %7245 }
 0x862   :  { %v7248_v60 = vpop.eup %7247  ;;  %v3936_v1 = vadd.f32 1.0, %v7246_v55  ;;  %7249 = vpow2.f32 %v6479_v42 }
 0x863   :  { %v3955_v10 = vadd.f32 1.0, %v7248_v60 }
 0x864   :  { %7251 = vrcp.f32 %v3936_v1  ;;  %v3948_v41 = vand.u32 2147483648, %v3936_v1  ;;  %v3946_v36 = vand.u32 2147483647, %v3936_v1  ;;  %vm3942_vm7 = vweird.f32 %v3936_v1 }
 0x865   :  { %7253 = vrcp.f32 %v3955_v10  ;;  %v3910_v43 = vpop.f32.mrf.mxu2  ;;  %v3923_v63 = vpop.f32.mrf.mxu3  ;;  %v3967_v12 = vand.u32 2147483648, %v3955_v10  ;;  %v3965_v31 = vand.u32 2147483647, %v3955_v10  ;;  %vm3961_vm8 = vweird.f32 %v3955_v10 }
 0x866   :  { %v3949_v24 = vor.u32 1.1754944e-38, %v3948_v41  ;;  %vm3947_vm11 = vcmp.eq.f32.partialorder %v3946_v36, 8.507059e+37 }
 0x867   :  { %v3968_v55 = vor.u32 1.1754944e-38, %v3967_v12  ;;  %vm3966_vm12 = vcmp.eq.f32.partialorder %v3965_v31, 8.507059e+37 }
 0x868   :  { %v7250_v32 = vpop.eup %7249 }
 0x869   :  { %v3975_v17 = vadd.f32 1.0, %v7250_v32 }
 0x86a   :  { %v7252_v52 = vpop.eup %7251 }
 0x86b   :  { %v7254_v8 = vpop.eup %7253  ;;  %v3938_v4 = vmul.f32 %v7252_v52, %v3936_v1  ;;  %7255 = vrcp.f32 %v3975_v17  ;;  %vm3943_vm5 = vweird.f32 %v7252_v52  ;;  %vm3981_vm14 = vweird.f32 %v3975_v17 }
 0x86c   :  { %v3957_v11 = vmul.f32 %v7254_v8, %v3955_v10  ;;  %7257 = vtanh.f32 %v3931_v29  ;;  %vm3962_vm6 = vweird.f32 %v7254_v8  ;;  %vm3944_vm9 = vmor %vm3942_vm7, %vm3943_vm5 }
 0x86d   :  { %v3939_v22 = vsub.f32 1.0, %v3938_v4  ;;  %vm3963_vm10 = vmor %vm3961_vm8, %vm3962_vm6 }
 0x86e   :  { %v3958_v54 = vsub.f32 1.0, %v3957_v11 }
 0x86f   :  { %v3940_v27 = vmul.f32 %v7252_v52, %v3939_v22 }
 0x870   :  { %v3959_v57 = vmul.f32 %v7254_v8, %v3958_v54  ;;  %v3987_v54 = vand.u32 2147483648, %v3975_v17 }
 0x871   :  { %v7256_v21 = vpop.eup %7255  ;;  %v3941_v44 = vadd.f32 %v7252_v52, %v3940_v27 }
 0x872   :  { %v3960_v45 = vadd.f32 %v7254_v8, %v3959_v57  ;;  %v3977_v42 = vmul.f32 %v7256_v21, %v3975_v17  ;;  %v7258_v43 = vpop.eup %7257  ;;  %vm3982_vm13 = vweird.f32 %v7256_v21  ;;  %v3988_v12 = vor.u32 1.1754944e-38, %v3987_v54 }
 0x873   :  { %v3945_v60 = vsel %vm3944_vm9, %v7252_v52, %v3941_v44  ;;  %v3985_v52 = vand.u32 2147483647, %v3975_v17  ;;  %vm3983_vm15 = vmor %vm3981_vm14, %vm3982_vm13 }
 0x874   :  { %v3950_v63 = vsel %vm3947_vm11, %v3949_v24, %v3945_v60  ;;  %v3964_v32 = vsel %vm3963_vm10, %v7254_v8, %v3960_v45  ;;  %v3978_v59 = vsub.f32 1.0, %v3977_v42  ;;  %v9038_v60 = vld [vmem:[#allocation12_spill] sm:$0xff] }
 0x875   :  { %v3969_v29 = vsel %vm3966_vm12, %v3968_v55, %v3964_v32  ;;  %v3992_v4 = vmul.f32 %v7258_v43, %v3950_v63  ;;  %vm3986_vm0 = vcmp.eq.f32.partialorder %v3985_v52, 8.507059e+37  ;;  %v4054_v43 = vunpack.c.h.bf16 %v9038_v60 }
 0x876   :  { %v3991_v11 = vmul.f32 %v3969_v29, %v8729_v56  ;;  %v3979_v22 = vmul.f32 %v7256_v21, %v3978_v59  ;;  %v9037_v56 = vld [vmem:[#allocation11_spill] sm:$0xff] }
 0x877   :  { %v4051_v17 = vunpack.c.l.bf16 %v9037_v56  ;;  %v4052_v31 = vunpack.c.h.bf16 %v9037_v56 }
 0x878   :  { %v8771_v1 = vadd.f32 %v3992_v4, %v3991_v11  ;;  %v3980_v10 = vadd.f32 %v7256_v21, %v3979_v22 }
 0x87a   :  { %7259 = vtanh.f32 %v8771_v1  ;;  %v3984_v41 = vsel %vm3983_vm15, %v7256_v21, %v3980_v10 }
 0x87b   :  { %v3989_v27 = vsel %vm3986_vm0, %v3988_v12, %v3984_v41 }
 0x880   :  { %v7260_v8 = vpop.eup %7259 }
 0x881   :  { %v3995_v36 = vmul.f32 %v7260_v8, %v3989_v27  ;;  %v4053_v27 = vunpack.c.l.bf16 %v9038_v60 }
 0x883   :  { %v3998_v57 = vpack.c.bf16 %v3995_v36, %v3995_v36 }
 0x885   :  { %4007 = vmatmul.bf16.vlgmr.msra.gmra.mxu0 %v3998_v57  ;;  %4020 = vmatmul.bf16.vlgmr.msrb.gmra.mxu1 %v3998_v57 }
 0x886   :  { %4033 = vmatmul.bf16.vlgmr.msra.gmra.mxu2 %v3998_v57  ;;  %4046 = vmatmul.bf16.vlgmr.msra.gmra.mxu3 %v3998_v57 }
 0x887   :  { %4251 = vmatpush.bf16.msra.mxu0 %v8236_v34  ;;  %4264 = vmatpush.bf16.msrb.mxu1 %v8241_v53 }
 0x888   :  { %4277 = vmatpush.bf16.msra.mxu2 %v8248_v48  ;;  %4290 = vmatpush.bf16.msra.mxu3 %v8243_v38 }
 0x88b   :  { %4252 = vmatpush.bf16.msra.mxu0 %v8257_v39  ;;  %4265 = vmatpush.bf16.msrb.mxu1 %v8264_v58 }
 0x88c   :  { %4278 = vmatpush.bf16.msra.mxu2 %v8284_v40  ;;  %4291 = vmatpush.bf16.msra.mxu3 %v8280_v47 }
 0x88f   :  { %4253 = vmatpush.bf16.msra.mxu0 %v8295_v15  ;;  %4266 = vmatpush.bf16.msrb.mxu1 %v8297_v16 }
 0x890   :  { %4279 = vmatpush.bf16.msra.mxu2 %v8346_v19  ;;  %4292 = vmatpush.bf16.msra.mxu3 %v8306_v23 }
 0x893   :  { %4254 = vmatpush.bf16.msra.mxu0 %v8314_v2  ;;  %4267 = vmatpush.bf16.msrb.mxu1 %v8316_v6 }
 0x894   :  { %4280 = vmatpush.bf16.msra.mxu2 %v8382_v18  ;;  %4293 = vmatpush.bf16.msra.mxu3 %v8344_v46 }
 0x897   :  { %4255 = vmatpush.bf16.msra.mxu0 %v8364_v7  ;;  %4268 = vmatpush.bf16.msrb.mxu1 %v8378_v13 }
 0x898   :  { %4281 = vmatpush.bf16.msra.mxu2 %v8424_v33  ;;  %4294 = vmatpush.bf16.msra.mxu3 %v8380_v14 }
 0x89b   :  { %4256 = vmatpush.bf16.msra.mxu0 %v8414_v30  ;;  %4269 = vmatpush.bf16.msrb.mxu1 %v8422_v26 }
 0x89c   :  { %4282 = vmatpush.bf16.msra.mxu2 %v8464_v28  ;;  %4295 = vmatpush.bf16.msra.mxu3 %v8435_v62 }
 0x89f   :  { %4257 = vmatpush.bf16.msra.mxu0 %v8456_v20  ;;  %4270 = vmatpush.bf16.msrb.mxu1 %v8458_v3 }
 0x8a0   :  { %4283 = vmatpush.bf16.msra.mxu2 %v8497_v61  ;;  %4296 = vmatpush.bf16.msra.mxu3 %v8469_v9 }
 0x8a3   :  { %4258 = vmatpush.bf16.msra.mxu0 %v8482_v50  ;;  %4271 = vmatpush.bf16.msrb.mxu1 %v8495_v5 }
 0x8a4   :  { %4284 = vmatpush.bf16.msra.mxu2 %v8528_v25  ;;  %4297 = vmatpush.bf16.msra.mxu3 %v8514_v51 }
 0x902   :  { %v4008_v21 = vpop.f32.mrf.mxu0  ;;  %v4021_v44 = vpop.f32.mrf.mxu1 }
 0x903   :  { %v4055_v24 = vadd.f32 %v4051_v17, %v4008_v21  ;;  %v4056_v45 = vadd.f32 %v4052_v31, %v4021_v44 }
 0x905   :  { %v6480_v42 = vmul.f32 -1.442695, %v4055_v24  ;;  %v6481_v55 = vmul.f32 -1.442695, %v4056_v45 }
 0x907   :  { %7261 = vpow2.f32 %v6480_v42 }
 0x908   :  { %7263 = vpow2.f32 %v6481_v55 }
 0x909   :  { %v4034_v63 = vpop.f32.mrf.mxu2  ;;  %v4047_v32 = vpop.f32.mrf.mxu3 }
 0x90a   :  { %v4058_v59 = vadd.f32 %v4054_v43, %v4047_v32  ;;  %v4010_v29 = vpop.f32.mrf.mxu0  ;;  %v4023_v4 = vpop.f32.mrf.mxu1  ;;  %v4057_v56 = vadd.f32 %v4053_v27, %v4034_v63 }
 0x90c   :  { %v6482_v11 = vmul.f32 -1.442695, %v4058_v59 }
 0x90d   :  { %v7262_v22 = vpop.eup %7261 }
 0x90e   :  { %v7264_v10 = vpop.eup %7263  ;;  %v4062_v54 = vadd.f32 1.0, %v7262_v22  ;;  %7265 = vpow2.f32 %v6482_v11 }
 0x90f   :  { %v4081_v52 = vadd.f32 1.0, %v7264_v10 }
 0x910   :  { %7267 = vrcp.f32 %v4062_v54  ;;  %v4074_v45 = vand.u32 2147483648, %v4062_v54  ;;  %v4072_v43 = vand.u32 2147483647, %v4062_v54  ;;  %vm4068_vm3 = vweird.f32 %v4062_v54 }
 0x911   :  { %7269 = vrcp.f32 %v4081_v52  ;;  %v4036_v41 = vpop.f32.mrf.mxu2  ;;  %v4049_v12 = vpop.f32.mrf.mxu3  ;;  %v4093_v42 = vand.u32 2147483648, %v4081_v52  ;;  %v4091_v59 = vand.u32 2147483647, %v4081_v52  ;;  %vm4087_vm4 = vweird.f32 %v4081_v52 }
 0x912   :  { %v4075_v63 = vor.u32 1.1754944e-38, %v4074_v45  ;;  %vm4073_vm7 = vcmp.eq.f32.partialorder %v4072_v43, 8.507059e+37 }
 0x913   :  { %v4094_v22 = vor.u32 1.1754944e-38, %v4093_v42  ;;  %vm4092_vm8 = vcmp.eq.f32.partialorder %v4091_v59, 8.507059e+37 }
 0x914   :  { %v7266_v8 = vpop.eup %7265 }
 0x915   :  { %v4101_v36 = vadd.f32 1.0, %v7266_v8 }
 0x916   :  { %v7268_v57 = vpop.eup %7267 }
 0x917   :  { %v7270_v17 = vpop.eup %7269  ;;  %v4064_v31 = vmul.f32 %v7268_v57, %v4062_v54  ;;  %7271 = vrcp.f32 %v4101_v36  ;;  %vm4069_vm1 = vweird.f32 %v7268_v57  ;;  %vm4107_vm10 = vweird.f32 %v4101_v36 }
 0x918   :  { %v4083_v21 = vmul.f32 %v7270_v17, %v4081_v52  ;;  %7273 = vtanh.f32 %v4057_v56  ;;  %vm4088_vm2 = vweird.f32 %v7270_v17  ;;  %vm4070_vm5 = vmor %vm4068_vm3, %vm4069_vm1 }
 0x919   :  { %v4065_v44 = vsub.f32 1.0, %v4064_v31  ;;  %vm4089_vm6 = vmor %vm4087_vm4, %vm4088_vm2 }
 0x91a   :  { %v4084_v24 = vsub.f32 1.0, %v4083_v21 }
 0x91b   :  { %v4066_v55 = vmul.f32 %v7268_v57, %v4065_v44 }
 0x91c   :  { %v4085_v32 = vmul.f32 %v7270_v17, %v4084_v24  ;;  %v4113_v24 = vand.u32 2147483648, %v4101_v36 }
 0x91d   :  { %v7272_v29 = vpop.eup %7271  ;;  %v4067_v60 = vadd.f32 %v7268_v57, %v4066_v55 }
 0x91e   :  { %v4086_v4 = vadd.f32 %v7270_v17, %v4085_v32  ;;  %v4103_v11 = vmul.f32 %v7272_v29, %v4101_v36  ;;  %v7274_v41 = vpop.eup %7273  ;;  %vm4108_vm9 = vweird.f32 %v7272_v29  ;;  %v4114_v42 = vor.u32 1.1754944e-38, %v4113_v24 }
 0x91f   :  { %v4071_v10 = vsel %vm4070_vm5, %v7268_v57, %v4067_v60  ;;  %v4111_v57 = vand.u32 2147483647, %v4101_v36  ;;  %vm4109_vm11 = vmor %vm4107_vm10, %vm4108_vm9 }
 0x920   :  { %v4076_v12 = vsel %vm4073_vm7, %v4075_v63, %v4071_v10  ;;  %v4090_v8 = vsel %vm4089_vm6, %v7270_v17, %v4086_v4  ;;  %v4104_v27 = vsub.f32 1.0, %v4103_v11 }
 0x921   :  { %v4095_v56 = vsel %vm4092_vm8, %v4094_v22, %v4090_v8  ;;  %v4118_v31 = vmul.f32 %v7274_v41, %v4076_v12  ;;  %vm4112_vm12 = vcmp.eq.f32.partialorder %v4111_v57, 8.507059e+37 }
 0x922   :  { %v4117_v21 = vmul.f32 %v4095_v56, %v8771_v1  ;;  %v4105_v44 = vmul.f32 %v7272_v29, %v4104_v27 }
 0x924   :  { %v8811_v54 = vadd.f32 %v4118_v31, %v4117_v21  ;;  %v4106_v52 = vadd.f32 %v7272_v29, %v4105_v44 }
 0x926   :  { %7275 = vtanh.f32 %v8811_v54  ;;  %v4110_v45 = vsel %vm4109_vm11, %v7272_v29, %v4106_v52 }
 0x927   :  { %v4115_v55 = vsel %vm4112_vm12, %v4114_v42, %v4110_v45 }
 0x92c   :  { %v7276_v17 = vpop.eup %7275 }
 0x92d   :  { %v4121_v43 = vmul.f32 %v7276_v17, %v4115_v55 }
 0x92f   :  { %v4124_v32 = vpack.c.bf16 %v4121_v43, %v4121_v43 }
 0x931   :  { %4133 = vmatmul.bf16.vlgmr.msrb.gmra.mxu0 %v4124_v32  ;;  %4146 = vmatmul.bf16.vlgmr.msra.gmra.mxu1 %v4124_v32 }
 0x932   :  { %4159 = vmatmul.bf16.vlgmr.msrb.gmra.mxu2 %v4124_v32  ;;  %4172 = vmatmul.bf16.vlgmr.msrb.gmra.mxu3 %v4124_v32 }
 0x933   :  { %4377 = vmatpush.bf16.msrb.mxu0 %v8236_v34  ;;  %4390 = vmatpush.bf16.msra.mxu1 %v8241_v53  ;;  %v9039_v34 = vld [vmem:[#allocation13_spill] sm:$0xff] }
 0x934   :  { %4403 = vmatpush.bf16.msrb.mxu2 %v8248_v48  ;;  %4416 = vmatpush.bf16.msrb.mxu3 %v8243_v38  ;;  %v3170_v53 = vadd.f32 %v9039_v34, %v8442_v0  ;;  %v9040_v38 = vld [vmem:[#allocation14_spill] sm:$0xff] }
 0x935   :  { %v3199_v48 = vadd.f32 %v9040_v38, %v8445_v37 }
 0x937   :  { %4378 = vmatpush.bf16.msrb.mxu0 %v8257_v39  ;;  %4391 = vmatpush.bf16.msra.mxu1 %v8264_v58  ;;  %v3274_v39 = vpack.c.bf16 %v3199_v48, %v3170_v53  ;;  %v9041_v58 = vld [vmem:[#allocation15_spill] sm:$0xff] }
 0x938   :  { %4404 = vmatpush.bf16.msrb.mxu2 %v8284_v40  ;;  %4417 = vmatpush.bf16.msrb.mxu3 %v8280_v47  ;;  %v3228_v47 = vadd.f32 %v9041_v58, %v8506_v35  ;;  %v9042_v40 = vld [vmem:[#allocation16_spill] sm:$0xff] }
 0x93b   :  { %4379 = vmatpush.bf16.msrb.mxu0 %v8295_v15  ;;  %4392 = vmatpush.bf16.msra.mxu1 %v8297_v16  ;;  %v3257_v15 = vadd.f32 %v9042_v40, %v9030_v49  ;;  %v4177_v16 = vunpack.c.l.bf16 %v3274_v39 }
 0x93c   :  { %4405 = vmatpush.bf16.msrb.mxu2 %v8346_v19  ;;  %4418 = vmatpush.bf16.msrb.mxu3 %v8306_v23  ;;  %v4178_v23 = vunpack.c.h.bf16 %v3274_v39 }
 0x93f   :  { %4380 = vmatpush.bf16.msrb.mxu0 %v8314_v2  ;;  %4393 = vmatpush.bf16.msra.mxu1 %v8316_v6 }
 0x940   :  { %4406 = vmatpush.bf16.msrb.mxu2 %v8382_v18  ;;  %4419 = vmatpush.bf16.msrb.mxu3 %v8344_v46 }
 0x943   :  { %4381 = vmatpush.bf16.msrb.mxu0 %v8364_v7  ;;  %4394 = vmatpush.bf16.msra.mxu1 %v8378_v13  ;;  %v3275_v7 = vpack.c.bf16 %v3257_v15, %v3228_v47 }
 0x944   :  { %4407 = vmatpush.bf16.msrb.mxu2 %v8424_v33  ;;  %4420 = vmatpush.bf16.msrb.mxu3 %v8380_v14 }
 0x945   :  { %v4180_v18 = vunpack.c.h.bf16 %v3275_v7  ;;  %v4179_v35 = vunpack.c.l.bf16 %v3275_v7 }
 0x947   :  { %4382 = vmatpush.bf16.msrb.mxu0 %v8414_v30  ;;  %4395 = vmatpush.bf16.msra.mxu1 %v8422_v26 }
 0x948   :  { %4408 = vmatpush.bf16.msrb.mxu2 %v8464_v28  ;;  %4421 = vmatpush.bf16.msrb.mxu3 %v8435_v62 }
 0x94b   :  { %4383 = vmatpush.bf16.msrb.mxu0 %v8456_v20  ;;  %4396 = vmatpush.bf16.msra.mxu1 %v8458_v3 }
 0x94c   :  { %4409 = vmatpush.bf16.msrb.mxu2 %v8497_v61  ;;  %4422 = vmatpush.bf16.msrb.mxu3 %v8469_v9 }
 0x94f   :  { %4384 = vmatpush.bf16.msrb.mxu0 %v8482_v50  ;;  %4397 = vmatpush.bf16.msra.mxu1 %v8495_v5 }
 0x950   :  { %4410 = vmatpush.bf16.msrb.mxu2 %v8528_v25  ;;  %4423 = vmatpush.bf16.msrb.mxu3 %v8514_v51 }
 0x9ae   :  { %v4134_v2 = vpop.f32.mrf.mxu0  ;;  %v4147_v6 = vpop.f32.mrf.mxu1 }
 0x9af   :  { %v4181_v46 = vadd.f32 %v4177_v16, %v4134_v2  ;;  %v4182_v19 = vadd.f32 %v4178_v23, %v4147_v6 }
 0x9b1   :  { %v6483_v13 = vmul.f32 -1.442695, %v4181_v46  ;;  %v6484_v14 = vmul.f32 -1.442695, %v4182_v19 }
 0x9b3   :  { %7277 = vpow2.f32 %v6483_v13 }
 0x9b4   :  { %7279 = vpow2.f32 %v6484_v14  ;;  %v9044_v14 = vld [vmem:[#allocation18_spill] sm:$0xff] }
 0x9b5   :  { %v4160_v30 = vpop.f32.mrf.mxu2  ;;  %v4173_v26 = vpop.f32.mrf.mxu3 }
 0x9b6   :  { %v4184_v33 = vadd.f32 %v4180_v18, %v4173_v26  ;;  %v4136_v62 = vpop.f32.mrf.mxu0  ;;  %v4149_v0 = vpop.f32.mrf.mxu1  ;;  %v4183_v49 = vadd.f32 %v4179_v35, %v4160_v30  ;;  %v4306_v18 = vunpack.c.h.bf16 %v9044_v14  ;;  %v4305_v35 = vunpack.c.l.bf16 %v9044_v14 }
 0x9b8   :  { %v6485_v37 = vmul.f32 -1.442695, %v4184_v33 }
 0x9b9   :  { %v7278_v20 = vpop.eup %7277 }
 0x9ba   :  { %v7280_v3 = vpop.eup %7279  ;;  %v4188_v28 = vadd.f32 1.0, %v7278_v20  ;;  %7281 = vpow2.f32 %v6485_v37 }
 0x9bb   :  { %v4207_v9 = vadd.f32 1.0, %v7280_v3 }
 0x9bc   :  { %7283 = vrcp.f32 %v4188_v28  ;;  %v4200_v63 = vand.u32 2147483648, %v4188_v28  ;;  %v4198_v22 = vand.u32 2147483647, %v4188_v28  ;;  %vm4194_vm15 = vweird.f32 %v4188_v28 }
 0x9bd   :  { %7285 = vrcp.f32 %v4207_v9  ;;  %v4162_v50 = vpop.f32.mrf.mxu2  ;;  %v4175_v5 = vpop.f32.mrf.mxu3  ;;  %v4219_v4 = vand.u32 2147483648, %v4207_v9  ;;  %v4217_v41 = vand.u32 2147483647, %v4207_v9  ;;  %vm4213_vm0 = vweird.f32 %v4207_v9 }
 0x9be   :  { %v4201_v27 = vor.u32 1.1754944e-38, %v4200_v63  ;;  %vm4199_vm3 = vcmp.eq.f32.partialorder %v4198_v22, 8.507059e+37 }
 0x9bf   :  { %v4220_v21 = vor.u32 1.1754944e-38, %v4219_v4  ;;  %vm4218_vm4 = vcmp.eq.f32.partialorder %v4217_v41, 8.507059e+37 }
 0x9c0   :  { %v7282_v61 = vpop.eup %7281 }
 0x9c1   :  { %v4227_v51 = vadd.f32 1.0, %v7282_v61 }
 0x9c2   :  { %v7284_v25 = vpop.eup %7283 }
 0x9c3   :  { %v7286_v1 = vpop.eup %7285  ;;  %v4190_v36 = vmul.f32 %v7284_v25, %v4188_v28  ;;  %7287 = vrcp.f32 %v4227_v51  ;;  %vm4195_vm13 = vweird.f32 %v7284_v25  ;;  %v4239_v53 = vand.u32 2147483648, %v4227_v51 }
 0x9c4   :  { %v4209_v59 = vmul.f32 %v7286_v1, %v4207_v9  ;;  %7289 = vtanh.f32 %v4183_v49  ;;  %vm4214_vm14 = vweird.f32 %v7286_v1  ;;  %vm4196_vm1 = vmor %vm4194_vm15, %vm4195_vm13  ;;  %vm4233_vm6 = vweird.f32 %v4227_v51 }
 0x9c5   :  { %v4191_v29 = vsub.f32 1.0, %v4190_v36  ;;  %vm4215_vm2 = vmor %vm4213_vm0, %vm4214_vm14  ;;  %v4237_v38 = vand.u32 2147483647, %v4227_v51  ;;  %v4240_v39 = vor.u32 1.1754944e-38, %v4239_v53 }
 0x9c6   :  { %v4210_v60 = vsub.f32 1.0, %v4209_v59 }
 0x9c7   :  { %v4192_v11 = vmul.f32 %v7284_v25, %v4191_v29  ;;  %vm4238_vm8 = vcmp.eq.f32.partialorder %v4237_v38, 8.507059e+37 }
 0x9c8   :  { %v4211_v10 = vmul.f32 %v7286_v1, %v4210_v60 }
 0x9c9   :  { %v7288_v12 = vpop.eup %7287  ;;  %v4193_v8 = vadd.f32 %v7284_v25, %v4192_v11 }
 0x9ca   :  { %v4212_v56 = vadd.f32 %v7286_v1, %v4211_v10  ;;  %v4229_v31 = vmul.f32 %v7288_v12, %v4227_v51  ;;  %v7290_v52 = vpop.eup %7289  ;;  %vm4234_vm5 = vweird.f32 %v7288_v12 }
 0x9cb   :  { %v4197_v44 = vsel %vm4196_vm1, %v7284_v25, %v4193_v8  ;;  %vm4235_vm7 = vmor %vm4233_vm6, %vm4234_vm5 }
 0x9cc   :  { %v4202_v24 = vsel %vm4199_vm3, %v4201_v27, %v4197_v44  ;;  %v4216_v57 = vsel %vm4215_vm2, %v7286_v1, %v4212_v56  ;;  %v4230_v45 = vsub.f32 1.0, %v4229_v31 }
 0x9cd   :  { %v4221_v42 = vsel %vm4218_vm4, %v4220_v21, %v4216_v57  ;;  %v4244_v17 = vmul.f32 %v7290_v52, %v4202_v24 }
 0x9ce   :  { %v4243_v55 = vmul.f32 %v4221_v42, %v8811_v54  ;;  %v4231_v43 = vmul.f32 %v7288_v12, %v4230_v45  ;;  %v9043_v54 = vld [vmem:[#allocation17_spill] sm:$0xff] }
 0x9cf   :  { %v4303_v16 = vunpack.c.l.bf16 %v9043_v54  ;;  %v4304_v23 = vunpack.c.h.bf16 %v9043_v54 }
 0x9d0   :  { %v8855_v32 = vadd.f32 %v4244_v17, %v4243_v55  ;;  %v4232_v34 = vadd.f32 %v7288_v12, %v4231_v43 }
 0x9d2   :  { %7291 = vtanh.f32 %v8855_v32  ;;  %v4236_v48 = vsel %vm4235_vm7, %v7288_v12, %v4232_v34 }
 0x9d3   :  { %v4241_v47 = vsel %vm4238_vm8, %v4240_v39, %v4236_v48 }
 0x9d8   :  { %v7292_v58 = vpop.eup %7291 }
 0x9d9   :  { %v4247_v40 = vmul.f32 %v7292_v58, %v4241_v47 }
 0x9db   :  { %v4250_v15 = vpack.c.bf16 %v4247_v40, %v4247_v40 }
 0x9dd   :  { %4259 = vmatmul.bf16.vlgmr.msra.gmra.mxu0 %v4250_v15  ;;  %4272 = vmatmul.bf16.vlgmr.msrb.gmra.mxu1 %v4250_v15 }
 0x9de   :  { %4285 = vmatmul.bf16.vlgmr.msra.gmra.mxu2 %v4250_v15  ;;  %4298 = vmatmul.bf16.vlgmr.msra.gmra.mxu3 %v4250_v15 }
 0xa5a   :  { %v4260_v2 = vpop.f32.mrf.mxu0  ;;  %v4273_v6 = vpop.f32.mrf.mxu1 }
 0xa5b   :  { %v4307_v46 = vadd.f32 %v4303_v16, %v4260_v2  ;;  %v4308_v19 = vadd.f32 %v4304_v23, %v4273_v6  ;;  %v6992_v16 = vld [vmem:[%s8874_s23 + $0x30] sm:$0xff]  ;;  %v6991_v23 = vld [vmem:[%s8874_s23 + $0x28] sm:$0xff]  ;;  %v6990_v2 = vld [vmem:[%s8874_s23 + $0x20] sm:$0xff] }
 0xa5c   :  { %v9045_v6 = vld [vmem:[#allocation19_spill] sm:$0xff] }
 0xa5d   :  { %v6486_v7 = vmul.f32 -1.442695, %v4307_v46  ;;  %v6487_v13 = vmul.f32 -1.442695, %v4308_v19  ;;  %v4429_v46 = vunpack.c.l.bf16 %v9045_v6  ;;  %v4430_v19 = vunpack.c.h.bf16 %v9045_v6 }
 0xa5f   :  { %7293 = vpow2.f32 %v6486_v7 }
 0xa60   :  { %7295 = vpow2.f32 %v6487_v13 }
 0xa61   :  { %v4286_v30 = vpop.f32.mrf.mxu2  ;;  %v4299_v26 = vpop.f32.mrf.mxu3 }
 0xa62   :  { %v4310_v33 = vadd.f32 %v4306_v18, %v4299_v26  ;;  %v4262_v62 = vpop.f32.mrf.mxu0  ;;  %v4275_v0 = vpop.f32.mrf.mxu1  ;;  %v4309_v49 = vadd.f32 %v4305_v35, %v4286_v30  ;;  %v6989_v30 = vld [vmem:[%s8874_s23 + $0x18] sm:$0xff] }
 0xa63   :  { %v6988_v62 = vld [vmem:[%s8874_s23 + $0x10] sm:$0xff]  ;;  %v9046_v0 = vld [vmem:[#allocation20_spill] sm:$0xff] }
 0xa64   :  { %v6488_v37 = vmul.f32 -1.442695, %v4310_v33 }
 0xa65   :  { %v7294_v20 = vpop.eup %7293 }
 0xa66   :  { %v7296_v3 = vpop.eup %7295  ;;  %v4314_v28 = vadd.f32 1.0, %v7294_v20  ;;  %7297 = vpow2.f32 %v6488_v37  ;;  %v4432_v37 = vunpack.c.h.bf16 %v9046_v0 }
 0xa67   :  { %v4333_v9 = vadd.f32 1.0, %v7296_v3 }
 0xa68   :  { %7299 = vrcp.f32 %v4314_v28  ;;  %v4326_v63 = vand.u32 2147483648, %v4314_v28  ;;  %v4324_v22 = vand.u32 2147483647, %v4314_v28  ;;  %vm4320_vm11 = vweird.f32 %v4314_v28 }
 0xa69   :  { %7301 = vrcp.f32 %v4333_v9  ;;  %v4288_v50 = vpop.f32.mrf.mxu2  ;;  %v4301_v5 = vpop.f32.mrf.mxu3  ;;  %v4345_v4 = vand.u32 2147483648, %v4333_v9  ;;  %v4343_v41 = vand.u32 2147483647, %v4333_v9  ;;  %vm4339_vm12 = vweird.f32 %v4333_v9 }
 0xa6a   :  { %v4327_v27 = vor.u32 1.1754944e-38, %v4326_v63  ;;  %vm4325_vm15 = vcmp.eq.f32.partialorder %v4324_v22, 8.507059e+37 }
 0xa6b   :  { %v4346_v21 = vor.u32 1.1754944e-38, %v4345_v4  ;;  %vm4344_vm0 = vcmp.eq.f32.partialorder %v4343_v41, 8.507059e+37 }
 0xa6c   :  { %v7298_v61 = vpop.eup %7297 }
 0xa6d   :  { %v4353_v51 = vadd.f32 1.0, %v7298_v61 }
 0xa6e   :  { %v7300_v25 = vpop.eup %7299 }
 0xa6f   :  { %v7302_v1 = vpop.eup %7301  ;;  %v4316_v36 = vmul.f32 %v7300_v25, %v4314_v28  ;;  %7303 = vrcp.f32 %v4353_v51  ;;  %vm4321_vm9 = vweird.f32 %v7300_v25  ;;  %v4365_v38 = vand.u32 2147483648, %v4353_v51  ;;  %v6987_v28 = vld [vmem:[%s8874_s23 + $0x8] sm:$0xff] }
 0xa70   :  { %v4335_v59 = vmul.f32 %v7302_v1, %v4333_v9  ;;  %7305 = vtanh.f32 %v4309_v49  ;;  %vm4340_vm10 = vweird.f32 %v7302_v1  ;;  %vm4322_vm13 = vmor %vm4320_vm11, %vm4321_vm9  ;;  %vm4359_vm2 = vweird.f32 %v4353_v51 }
 0xa71   :  { %v4317_v29 = vsub.f32 1.0, %v4316_v36  ;;  %vm4341_vm14 = vmor %vm4339_vm12, %vm4340_vm10  ;;  %v4363_v48 = vand.u32 2147483647, %v4353_v51  ;;  %v4366_v58 = vor.u32 1.1754944e-38, %v4365_v38 }
 0xa72   :  { %v4336_v60 = vsub.f32 1.0, %v4335_v59 }
 0xa73   :  { %v4318_v11 = vmul.f32 %v7300_v25, %v4317_v29  ;;  %vm4364_vm4 = vcmp.eq.f32.partialorder %v4363_v48, 8.507059e+37 }
 0xa74   :  { %v4337_v10 = vmul.f32 %v7302_v1, %v4336_v60  ;;  %v4431_v60 = vunpack.c.l.bf16 %v9046_v0 }
 0xa75   :  { %v7304_v12 = vpop.eup %7303  ;;  %v4319_v8 = vadd.f32 %v7300_v25, %v4318_v11 }
 0xa76   :  { %v4338_v56 = vadd.f32 %v7302_v1, %v4337_v10  ;;  %v4355_v31 = vmul.f32 %v7304_v12, %v4353_v51  ;;  %v7306_v52 = vpop.eup %7305  ;;  %vm4360_vm1 = vweird.f32 %v7304_v12  ;;  %v6986_v51 = vld [vmem:[%s8874_s23] sm:$0xff] }
 0xa77   :  { %v4323_v44 = vsel %vm4322_vm13, %v7300_v25, %v4319_v8  ;;  %vm4361_vm3 = vmor %vm4359_vm2, %vm4360_vm1 }
 0xa78   :  { %v4328_v24 = vsel %vm4325_vm15, %v4327_v27, %v4323_v44  ;;  %v4342_v57 = vsel %vm4341_vm14, %v7302_v1, %v4338_v56  ;;  %v4356_v45 = vsub.f32 1.0, %v4355_v31 }
 0xa79   :  { %v4347_v42 = vsel %vm4344_vm0, %v4346_v21, %v4342_v57  ;;  %v4370_v17 = vmul.f32 %v7306_v52, %v4328_v24 }
 0xa7a   :  { %v4369_v55 = vmul.f32 %v4347_v42, %v8855_v32  ;;  %v4357_v43 = vmul.f32 %v7304_v12, %v4356_v45  ;;  %v6993_v32 = vld [vmem:[%s8874_s23 + $0x38] sm:$0xff]  ;;  %s8974_s23 = sld [smem:[%s8985_s0 + %s7359_s20]]  }
 0xa7b   :  { %4573 = vmatpush.bf16.msra.mxu0 %v6993_v32 }
 0xa7c   :  { %v8863_v34 = vadd.f32 %v4370_v17, %v4369_v55  ;;  %v4358_v53 = vadd.f32 %v7304_v12, %v4357_v43 }
 0xa7e   :  { %7307 = vtanh.f32 %v8863_v34  ;;  %v4362_v39 = vsel %vm4361_vm3, %v7304_v12, %v4358_v53 }
 0xa7f   :  { %v4367_v40 = vsel %vm4364_vm4, %v4366_v58, %v4362_v39  ;;  %4574 = vmatpush.bf16.msra.mxu0 %v6992_v16 }
 0xa83   :  { %4575 = vmatpush.bf16.msra.mxu0 %v6991_v23 }
 0xa84   :  { %v7308_v47 = vpop.eup %7307 }
 0xa85   :  { %v4373_v15 = vmul.f32 %v7308_v47, %v4367_v40 }
 0xa87   :  { %v4376_v54 = vpack.c.bf16 %v4373_v15, %v4373_v15  ;;  %4576 = vmatpush.bf16.msra.mxu0 %v6990_v2 }
 0xa89   :  { %4385 = vmatmul.bf16.vlgmr.msrb.gmra.mxu0 %v4376_v54  ;;  %4398 = vmatmul.bf16.vlgmr.msra.gmra.mxu1 %v4376_v54 }
 0xa8a   :  { %4411 = vmatmul.bf16.vlgmr.msrb.gmra.mxu2 %v4376_v54  ;;  %4424 = vmatmul.bf16.vlgmr.msrb.gmra.mxu3 %v4376_v54 }
 0xa8b   :  { %4577 = vmatpush.bf16.msra.mxu0 %v6989_v30 }
 0xa8f   :  { %4578 = vmatpush.bf16.msra.mxu0 %v6988_v62 }
 0xa93   :  { %4579 = vmatpush.bf16.msra.mxu0 %v6987_v28  ;;  %v7001_v28 = vld [vmem:[%s5081_s9 + $0x38] sm:$0xff] }
 0xa94   :  { %4692 = vmatpush.bf16.msrb.mxu1 %v7001_v28 }
 0xa97   :  { %4580 = vmatpush.bf16.msra.mxu0 %v6986_v51  ;;  %v6995_v51 = vld [vmem:[%s5081_s9 + $0x8] sm:$0xff] }
 0xb06   :  { %v4386_v7 = vpop.f32.mrf.mxu0  ;;  %v4399_v13 = vpop.f32.mrf.mxu1 }
 0xb07   :  { %v4433_v14 = vadd.f32 %v4429_v46, %v4386_v7  ;;  %v4434_v18 = vadd.f32 %v4430_v19, %v4399_v13  ;;  %v7056_v13 = vld [vmem:[%s8869_s19] ss:$0 sm:$0xff]  ;;  %s8969_s19 = sld [smem:[%s8985_s0 + %s7358_s16]]  }
 0xb09   :  { %v6489_v26 = vmul.f32 -1.442695, %v4433_v14  ;;  %v6490_v33 = vmul.f32 -1.442695, %v4434_v18 }
 0xb0b   :  { %7309 = vpow2.f32 %v6489_v26  ;;  %v4590_v26 = vlaneseq }
 0xb0c   :  { %7311 = vpow2.f32 %v6490_v33 }
 0xb0d   :  { %v4412_v20 = vpop.f32.mrf.mxu2  ;;  %v4425_v3 = vpop.f32.mrf.mxu3  ;;  %v8897_v33 = vand.u32 127, %v4590_v26 }
 0xb0e   :  { %v4436_v9 = vadd.f32 %v4432_v37, %v4425_v3  ;;  %v4388_v50 = vpop.f32.mrf.mxu0  ;;  %v4401_v5 = vpop.f32.mrf.mxu1  ;;  %v4435_v11 = vadd.f32 %v4431_v60, %v4412_v20 }
 0xb0f   :  { %vm4592_vm1 = vcmp.lt.s32.totalorder %v8897_v33, 16  ;;  %v6999_v50 = vld [vmem:[%s5081_s9 + $0x28] sm:$0xff]  ;;  %v6998_v5 = vld [vmem:[%s5081_s9 + $0x20] sm:$0xff] }
 0xb10   :  { %v6491_v61 = vmul.f32 -1.442695, %v4436_v9  ;;  %v7000_v9 = vld [vmem:[%s5081_s9 + $0x30] sm:$0xff] }
 0xb11   :  { %v7310_v35 = vpop.eup %7309  ;;  %4693 = vmatpush.bf16.msrb.mxu1 %v7000_v9 }
 0xb12   :  { %v7312_v25 = vpop.eup %7311  ;;  %v4440_v49 = vadd.f32 1.0, %v7310_v35  ;;  %7313 = vpow2.f32 %v6491_v61  ;;  %v6997_v61 = vld [vmem:[%s5081_s9 + $0x18] sm:$0xff]  ;;  %v6996_v35 = vld [vmem:[%s5081_s9 + $0x10] sm:$0xff] }
 0xb13   :  { %v4459_v1 = vadd.f32 1.0, %v7312_v25  ;;  %v6994_v25 = vld [vmem:[%s5081_s9] sm:$0xff] }
 0xb14   :  { %7315 = vrcp.f32 %v4440_v49  ;;  %v4452_v27 = vand.u32 2147483648, %v4440_v49  ;;  %v4450_v21 = vand.u32 2147483647, %v4440_v49  ;;  %vm4446_vm7 = vweird.f32 %v4440_v49 }
 0xb15   :  { %7317 = vrcp.f32 %v4459_v1  ;;  %v4414_v36 = vpop.f32.mrf.mxu2  ;;  %v4427_v59 = vpop.f32.mrf.mxu3  ;;  %v4471_v56 = vand.u32 2147483648, %v4459_v1  ;;  %v4469_v52 = vand.u32 2147483647, %v4459_v1  ;;  %vm4465_vm8 = vweird.f32 %v4459_v1  ;;  %4694 = vmatpush.bf16.msrb.mxu1 %v6999_v50 }
 0xb16   :  { %v4453_v45 = vor.u32 1.1754944e-38, %v4452_v27  ;;  %vm4451_vm11 = vcmp.eq.f32.partialorder %v4450_v21, 8.507059e+37  ;;  %v7059_v21 = vld [vmem:[%s8908_s5] ss:$0 sm:$0xff] }
 0xb17   :  { %v4472_v55 = vor.u32 1.1754944e-38, %v4471_v56  ;;  %vm4470_vm12 = vcmp.eq.f32.partialorder %v4469_v52, 8.507059e+37 }
 0xb18   :  { %v7314_v29 = vpop.eup %7313 }
 0xb19   :  { %v4479_v63 = vadd.f32 1.0, %v7314_v29  ;;  %4695 = vmatpush.bf16.msrb.mxu1 %v6998_v5 }
 0xb1a   :  { %v7316_v4 = vpop.eup %7315 }
 0xb1b   :  { %v7318_v22 = vpop.eup %7317  ;;  %v4442_v10 = vmul.f32 %v7316_v4, %v4440_v49  ;;  %7319 = vrcp.f32 %v4479_v63  ;;  %vm4447_vm5 = vweird.f32 %v7316_v4  ;;  %v4491_v16 = vand.u32 2147483648, %v4479_v63 }
 0xb1c   :  { %v4461_v41 = vmul.f32 %v7318_v22, %v4459_v1  ;;  %7321 = vtanh.f32 %v4435_v11  ;;  %vm4466_vm6 = vweird.f32 %v7318_v22  ;;  %vm4448_vm9 = vmor %vm4446_vm7, %vm4447_vm5  ;;  %vm4485_vm14 = vweird.f32 %v4479_v63 }
 0xb1d   :  { %v4443_v12 = vsub.f32 1.0, %v4442_v10  ;;  %vm4467_vm10 = vmor %vm4465_vm8, %vm4466_vm6  ;;  %v4489_v23 = vand.u32 2147483647, %v4479_v63  ;;  %v4492_v6 = vor.u32 1.1754944e-38, %v4491_v16  ;;  %4696 = vmatpush.bf16.msrb.mxu1 %v6997_v61  ;;  %vm4709_vm5 = vcmp.lt.s32.totalorder %v8897_v33, 8 }
 0xb1e   :  { %v4462_v8 = vsub.f32 1.0, %v4461_v41 }
 0xb1f   :  { %v4444_v31 = vmul.f32 %v7316_v4, %v4443_v12  ;;  %vm4490_vm0 = vcmp.eq.f32.partialorder %v4489_v23, 8.507059e+37  ;;  %v7058_v12 = vld [vmem:[%s8903_s1] ss:$0 sm:$0xff]  ;;  %s5095_s1 = sld [smem:[%s8985_s0 + %s7361_s28]]  }
 0xb20   :  { %v4463_v44 = vmul.f32 %v7318_v22, %v4462_v8 }
 0xb21   :  { %v7320_v24 = vpop.eup %7319  ;;  %v4445_v57 = vadd.f32 %v7316_v4, %v4444_v31  ;;  %4697 = vmatpush.bf16.msrb.mxu1 %v6996_v35 }
 0xb22   :  { %v4464_v42 = vadd.f32 %v7318_v22, %v4463_v44  ;;  %v4481_v17 = vmul.f32 %v7320_v24, %v4479_v63  ;;  %v7322_v53 = vpop.eup %7321  ;;  %vm4486_vm13 = vweird.f32 %v7320_v24 }
 0xb23   :  { %v4449_v43 = vsel %vm4448_vm9, %v7316_v4, %v4445_v57  ;;  %vm4487_vm15 = vmor %vm4485_vm14, %vm4486_vm13  ;;  %vm4826_vm9 = vcmp.lt.s32.totalorder %v8897_v33, 4  ;;  %vm4943_vm13 = vcmp.lt.s32.totalorder %v8897_v33, 2 }
 0xb24   :  { %v4454_v38 = vsel %vm4451_vm11, %v4453_v45, %v4449_v43  ;;  %v4468_v48 = vsel %vm4467_vm10, %v7318_v22, %v4464_v42  ;;  %v4482_v39 = vsub.f32 1.0, %v4481_v17  ;;  %v7057_v22 = vld [vmem:[%s8895_s27] ss:$0 sm:$0xff]  ;;  %v7009_v43 = vld [vmem:[%s5085_s25 + $0x38] sm:$0xff]  ;;  %s5093_s27 = sld [smem:[%s8985_s0 + %s7360_s24]]  }
 0xb25   :  { %v4473_v58 = vsel %vm4470_vm12, %v4472_v55, %v4468_v48  ;;  %v4496_v47 = vmul.f32 %v7322_v53, %v4454_v38  ;;  %4698 = vmatpush.bf16.msrb.mxu1 %v6995_v51  ;;  %4809 = vmatpush.bf16.msra.mxu2 %v7009_v43  ;;  %v7008_v53 = vld [vmem:[%s5085_s25 + $0x30] sm:$0xff]  ;;  %v7007_v38 = vld [vmem:[%s5085_s25 + $0x28] sm:$0xff]  ;;  %v7006_v48 = vld [vmem:[%s5085_s25 + $0x20] sm:$0xff] }
 0xb26   :  { %v4495_v40 = vmul.f32 %v4473_v58, %v8863_v34  ;;  %v4483_v15 = vmul.f32 %v7320_v24, %v4482_v39  ;;  %v7005_v39 = vld [vmem:[%s5085_s25 + $0x18] sm:$0xff]  ;;  %v7004_v58 = vld [vmem:[%s5085_s25 + $0x10] sm:$0xff] }
 0xb28   :  { %v4497_v54 = vadd.f32 %v4496_v47, %v4495_v40  ;;  %v4484_v32 = vadd.f32 %v7320_v24, %v4483_v15  ;;  %v7003_v47 = vld [vmem:[%s5085_s25 + $0x8] sm:$0xff]  ;;  %v7002_v40 = vld [vmem:[%s5085_s25] sm:$0xff] }
 0xb29   :  { %4699 = vmatpush.bf16.msrb.mxu1 %v6994_v25  ;;  %4810 = vmatpush.bf16.msra.mxu2 %v7008_v53 }
 0xb2a   :  { %7323 = vtanh.f32 %v4497_v54  ;;  %6493 = vst [vmem:[%s8403_s11 + $0x8] sm:$0xff] %v4497_v54  ;;  %v4488_v2 = vsel %vm4487_vm15, %v7320_v24, %v4484_v32  ;;  %s5089_s11 = sld [smem:[%s8985_s0 + %s7356_s8]]   ;;  %v7025_v33 = vld [vmem:[%s5093_s27 + $0x38] sm:$0xff] }
 0xb2b   :  { %v4493_v19 = vsel %vm4490_vm0, %v4492_v6, %v4488_v2  ;;  %5043 = vmatpush.bf16.msrb.mxu0 %v7025_v33 }
 0xb2d   :  { %4811 = vmatpush.bf16.msra.mxu2 %v7007_v38 }
 0xb30   :  { %v7324_v46 = vpop.eup %7323  ;;  %v7017_v35 = vld [vmem:[%s5089_s11 + $0x38] sm:$0xff]  ;;  %v7016_v51 = vld [vmem:[%s5089_s11 + $0x30] sm:$0xff]  ;;  %v7015_v25 = vld [vmem:[%s5089_s11 + $0x28] sm:$0xff] }
 0xb31   :  { %v4499_v7 = vmul.f32 %v7324_v46, %v4493_v19  ;;  %4812 = vmatpush.bf16.msra.mxu2 %v7006_v48  ;;  %4926 = vmatpush.bf16.msra.mxu3 %v7017_v35 }
 0xb33   :  { %6492 = vst [vmem:[%s8489_s15 + $0x8] sm:$0xff] %v4499_v7  ;;  %v4504_v34 = vpack.c.bf16 %v4499_v7, %v4499_v7  ;;  %v7060_v7 = vld [vmem:[%s8919_s13] ss:$0 sm:$0xff]  ;;  %s8963_s15 = sld [smem:[%s8985_s0 + %s7357_s12]]  }
 0xb35   :  { %4581 = vmatmul.bf16.vlgmr.msra.gmra.mxu0 %v4504_v34  ;;  %4813 = vmatpush.bf16.msra.mxu2 %v7005_v39 }
 0xb36   :  { %4927 = vmatpush.bf16.msra.mxu3 %v7016_v51 }
 0xb39   :  { %4814 = vmatpush.bf16.msra.mxu2 %v7004_v58  ;;  %v7024_v58 = vld [vmem:[%s5093_s27 + $0x30] sm:$0xff] }
 0xb3a   :  { %4928 = vmatpush.bf16.msra.mxu3 %v7015_v25  ;;  %5044 = vmatpush.bf16.msrb.mxu0 %v7024_v58 }
 0xb3d   :  { %4815 = vmatpush.bf16.msra.mxu2 %v7003_v47  ;;  %v7023_v47 = vld [vmem:[%s5093_s27 + $0x28] sm:$0xff] }
 0xb3e   :  { %5045 = vmatpush.bf16.msrb.mxu0 %v7023_v47 }
 0xb41   :  { %4816 = vmatpush.bf16.msra.mxu2 %v7002_v40  ;;  %v7022_v40 = vld [vmem:[%s5093_s27 + $0x20] sm:$0xff] }
 0xb42   :  { %5046 = vmatpush.bf16.msrb.mxu0 %v7022_v40 }
 0xbb2   :  { %v4582_v14 = vpop.f32.mrf.mxu0 }
 0xbb3   :  { %v4583_v18 = vadd.f32 %v7056_v13, %v4582_v14  ;;  %v7061_v14 = vld [vmem:[%s8925_s17] ss:$0 sm:$0xff] }
 0xbb5   :  { %4586 = vadd.xlane.f32.xlu0 %v4583_v18 }
 0xbba   :  { %v4584_v30 = vpop.f32.mrf.mxu0 }
 0xc28   :  { %v4587_v62 = vpop.xlane.xlu0 %4586 }
 0xc29   :  { %v4588_v0 = vmul.f32 0.0625, %v4587_v62 }
 0xc2b   :  { %v4589_v37 = vsub.f32 %v4583_v18, %v4588_v0  ;;  %v7062_v0 = vld [vmem:[%s8930_s21] ss:$0 sm:$0xff] }
 0xc2d   :  { %v4595_v20 = vsel %vm4592_vm1, %v4589_v37, 0.0 }
 0xc2e   :  { %v4596_v3 = vmul.f32 %v4595_v20, %v4595_v20 }
 0xc30   :  { %4597 = vadd.xlane.f32.xlu0 %v4596_v3 }
 0xca3   :  { %v4598_v49 = vpop.xlane.xlu0 %4597 }
 0xca4   :  { %v4599_v1 = vmul.f32 0.0625, %v4598_v49  ;;  %v7014_v49 = vld [vmem:[%s5089_s11 + $0x20] sm:$0xff] }
 0xca5   :  { %4929 = vmatpush.bf16.msra.mxu3 %v7014_v49 }
 0xca6   :  { %v4600_v36 = vadd.f32 1e-05, %v4599_v1  ;;  %v7013_v1 = vld [vmem:[%s5089_s11 + $0x18] sm:$0xff] }
 0xca8   :  { %7325 = vrsqrt.f32 %v4600_v36  ;;  %vm4607_vm3 = vweird.f32 %v4600_v36 }
 0xca9   :  { %4930 = vmatpush.bf16.msra.mxu3 %v7013_v1 }
 0xcae   :  { %v7326_v59 = vpop.eup %7325 }
 0xcaf   :  { %v4602_v29 = vmul.f32 %v7326_v59, %v4600_v36  ;;  %vm4608_vm2 = vweird.f32 %v7326_v59  ;;  %v7012_v36 = vld [vmem:[%s5089_s11 + $0x10] sm:$0xff] }
 0xcb0   :  { %vm4609_vm4 = vmor %vm4607_vm3, %vm4608_vm2  ;;  %4931 = vmatpush.bf16.msra.mxu3 %v7012_v36 }
 0xcb1   :  { %v4603_v60 = vmul.f32 %v7326_v59, %v4602_v29  ;;  %v7010_v29 = vld [vmem:[%s5089_s11] sm:$0xff] }
 0xcb3   :  { %v4604_v63 = vmul.f32 0.5, %v4603_v60 }
 0xcb5   :  { %v4605_v4 = vsub.f32 1.5, %v4604_v63 }
 0xcb7   :  { %v4606_v11 = vmul.f32 %v7326_v59, %v4605_v4 }
 0xcb9   :  { %v4610_v10 = vsel %vm4609_vm4, %v7326_v59, %v4606_v11  ;;  %v7011_v59 = vld [vmem:[%s5089_s11 + $0x8] sm:$0xff] }
 0xcba   :  { %v4611_v41 = vmul.f32 %v4610_v10, %v4589_v37  ;;  %4932 = vmatpush.bf16.msra.mxu3 %v7011_v59 }
 0xcbc   :  { %v4616_v8 = vmul.f32 %v7057_v22, %v4611_v41 }
 0xcbe   :  { %v4621_v27 = vadd.f32 %v7058_v12, %v4616_v8  ;;  %4933 = vmatpush.bf16.msra.mxu3 %v7010_v29 }
 0xcc0   :  { %v4622_v56 = vmax.f32 %v4621_v27, 0.0  ;;  %v7063_v27 = vld [vmem:[%s8941_s29] ss:$0 sm:$0xff] }
 0xcc2   :  { %v4623_v31 = vpack.c.bf16 %v4622_v56, %v4622_v56 }
 0xcc4   :  { %4700 = vmatmul.bf16.vlgmr.msrb.gmra.mxu1 %v4623_v31 }
 0xd41   :  { %v4701_v44 = vpop.f32.mrf.mxu1 }
 0xd42   :  { %v4702_v52 = vadd.f32 %v7059_v21, %v4701_v44  ;;  %v7064_v21 = vld [vmem:[%s8947_s3] ss:$0 sm:$0xff] }
 0xd44   :  { %4705 = vadd.xlane.f32.xlu1 %v4702_v52 }
 0xd49   :  { %v4703_v24 = vpop.f32.mrf.mxu1 }
 0xdb7   :  { %v4706_v57 = vpop.xlane.xlu1 %4705 }
 0xdb8   :  { %v4707_v45 = vmul.f32 0.125, %v4706_v57 }
 0xdba   :  { %v4708_v42 = vsub.f32 %v4702_v52, %v4707_v45  ;;  %v7065_v45 = vld [vmem:[%s8952_s7] ss:$0 sm:$0xff] }
 0xdbc   :  { %v4712_v17 = vsel %vm4709_vm5, %v4708_v42, 0.0 }
 0xdbd   :  { %v4713_v55 = vmul.f32 %v4712_v17, %v4712_v17 }
 0xdbf   :  { %4714 = vadd.xlane.f32.xlu1 %v4713_v55 }
 0xe32   :  { %v4715_v15 = vpop.xlane.xlu1 %4714 }
 0xe33   :  { %v4716_v54 = vmul.f32 0.125, %v4715_v15  ;;  %v7021_v15 = vld [vmem:[%s5093_s27 + $0x18] sm:$0xff] }
 0xe34   :  { %5047 = vmatpush.bf16.msrb.mxu0 %v7021_v15 }
 0xe35   :  { %v4717_v32 = vadd.f32 1e-05, %v4716_v54  ;;  %v7020_v54 = vld [vmem:[%s5093_s27 + $0x10] sm:$0xff] }
 0xe37   :  { %7327 = vrsqrt.f32 %v4717_v32  ;;  %vm4724_vm7 = vweird.f32 %v4717_v32 }
 0xe38   :  { %5048 = vmatpush.bf16.msrb.mxu0 %v7020_v54 }
 0xe3d   :  { %v7328_v16 = vpop.eup %7327 }
 0xe3e   :  { %v4719_v23 = vmul.f32 %v7328_v16, %v4717_v32  ;;  %vm4725_vm6 = vweird.f32 %v7328_v16  ;;  %v7019_v32 = vld [vmem:[%s5093_s27 + $0x8] sm:$0xff] }
 0xe3f   :  { %vm4726_vm8 = vmor %vm4724_vm7, %vm4725_vm6  ;;  %5049 = vmatpush.bf16.msrb.mxu0 %v7019_v32 }
 0xe40   :  { %v4720_v2 = vmul.f32 %v7328_v16, %v4719_v23 }
 0xe42   :  { %v4721_v6 = vmul.f32 0.5, %v4720_v2 }
 0xe44   :  { %v4722_v46 = vsub.f32 1.5, %v4721_v6 }
 0xe46   :  { %v4723_v19 = vmul.f32 %v7328_v16, %v4722_v46 }
 0xe48   :  { %v4727_v34 = vsel %vm4726_vm8, %v7328_v16, %v4723_v19  ;;  %v7018_v16 = vld [vmem:[%s5093_s27] sm:$0xff] }
 0xe49   :  { %v4728_v13 = vmul.f32 %v4727_v34, %v4708_v42  ;;  %5050 = vmatpush.bf16.msrb.mxu0 %v7018_v16 }
 0xe4b   :  { %v4733_v18 = vmul.f32 %v7060_v7, %v4728_v13 }
 0xe4d   :  { %v4738_v30 = vadd.f32 %v7061_v14, %v4733_v18  ;;  %v7066_v18 = vld [vmem:[%s8963_s15] ss:$0 sm:$0xff] }
 0xe4f   :  { %v4739_v26 = vmax.f32 %v4738_v30, 0.0 }
 0xe51   :  { %v4740_v62 = vpack.c.bf16 %v4739_v26, %v4739_v26 }
 0xe53   :  { %4817 = vmatmul.bf16.vlgmr.msra.gmra.mxu2 %v4740_v62  ;;  %v7067_v62 = vld [vmem:[%s8969_s19] ss:$0 sm:$0xff] }
 0xed6   :  { %v4818_v37 = vpop.f32.mrf.mxu2 }
 0xed7   :  { %v4819_v20 = vadd.f32 %v7062_v0, %v4818_v37 }
 0xed9   :  { %4822 = vadd.xlane.f32.xlu2 %v4819_v20 }
 0xede   :  { %v4820_v3 = vpop.f32.mrf.mxu2 }
 0xf4c   :  { %v4823_v28 = vpop.xlane.xlu2 %4822 }
 0xf4d   :  { %v4824_v9 = vmul.f32 0.25, %v4823_v28  ;;  %v7068_v28 = vld [vmem:[%s8974_s23] ss:$0 sm:$0xff] }
 0xf4f   :  { %v4825_v50 = vsub.f32 %v4819_v20, %v4824_v9 }
 0xf51   :  { %v4829_v5 = vsel %vm4826_vm9, %v4825_v50, 0.0 }
 0xf52   :  { %v4830_v61 = vmul.f32 %v4829_v5, %v4829_v5 }
 0xf54   :  { %4831 = vadd.xlane.f32.xlu2 %v4830_v61 }
 0xfc7   :  { %v4832_v60 = vpop.xlane.xlu2 %4831 }
 0xfc8   :  { %v4833_v63 = vmul.f32 0.25, %v4832_v60 }
 0xfca   :  { %v4834_v4 = vadd.f32 1e-05, %v4833_v63 }
 0xfcc   :  { %7329 = vrsqrt.f32 %v4834_v4  ;;  %vm4841_vm11 = vweird.f32 %v4834_v4 }
 0xfd2   :  { %v7330_v11 = vpop.eup %7329 }
 0xfd3   :  { %v4836_v22 = vmul.f32 %v7330_v11, %v4834_v4  ;;  %vm4842_vm10 = vweird.f32 %v7330_v11 }
 0xfd4   :  { %vm4843_vm12 = vmor %vm4841_vm11, %vm4842_vm10 }
 0xfd5   :  { %v4837_v10 = vmul.f32 %v7330_v11, %v4836_v22 }
 0xfd7   :  { %v4838_v41 = vmul.f32 0.5, %v4837_v10 }
 0xfd9   :  { %v4839_v12 = vsub.f32 1.5, %v4838_v41 }
 0xfdb   :  { %v4840_v8 = vmul.f32 %v7330_v11, %v4839_v12 }
 0xfdd   :  { %v4844_v56 = vsel %vm4843_vm12, %v7330_v11, %v4840_v8 }
 0xfde   :  { %v4845_v31 = vmul.f32 %v4844_v56, %v4825_v50 }
 0xfe0   :  { %v4850_v44 = vmul.f32 %v7063_v27, %v4845_v31 }
 0xfe2   :  { %v4855_v52 = vadd.f32 %v7064_v21, %v4850_v44 }
 0xfe4   :  { %v4856_v24 = vmax.f32 %v4855_v52, 0.0 }
 0xfe6   :  { %v4857_v57 = vpack.c.bf16 %v4856_v24, %v4856_v24 }
 0xfe8   :  { %4934 = vmatmul.bf16.vlgmr.msra.gmra.mxu3 %v4857_v57 }
0x106b   :  { %v4935_v42 = vpop.f32.mrf.mxu3 }
0x106c   :  { %v4936_v17 = vadd.f32 %v7065_v45, %v4935_v42 }
0x106e   :  { %4939 = vadd.xlane.f32.xlu0 %v4936_v17 }
0x1073   :  { %v4937_v55 = vpop.f32.mrf.mxu3 }
0x10e1   :  { %v4940_v43 = vpop.xlane.xlu0 %4939 }
0x10e2   :  { %v4941_v53 = vmul.f32 0.5, %v4940_v43 }
0x10e4   :  { %v4942_v38 = vsub.f32 %v4936_v17, %v4941_v53 }
0x10e6   :  { %v4946_v48 = vsel %vm4943_vm13, %v4942_v38, 0.0 }
0x10e7   :  { %v4947_v39 = vmul.f32 %v4946_v48, %v4946_v48 }
0x10e9   :  { %4948 = vadd.xlane.f32.xlu1 %v4947_v39 }
0x115c   :  { %v4949_v23 = vpop.xlane.xlu1 %4948 }
0x115d   :  { %v4950_v2 = vmul.f32 0.5, %v4949_v23 }
0x115f   :  { %v4951_v6 = vadd.f32 1e-05, %v4950_v2 }
0x1161   :  { %7331 = vrsqrt.f32 %v4951_v6  ;;  %vm4958_vm15 = vweird.f32 %v4951_v6 }
0x1167   :  { %v7332_v46 = vpop.eup %7331 }
0x1168   :  { %v4953_v19 = vmul.f32 %v7332_v46, %v4951_v6  ;;  %vm4959_vm14 = vweird.f32 %v7332_v46 }
0x1169   :  { %vm4960_vm0 = vmor %vm4958_vm15, %vm4959_vm14 }
0x116a   :  { %v4954_v7 = vmul.f32 %v7332_v46, %v4953_v19 }
0x116c   :  { %v4955_v34 = vmul.f32 0.5, %v4954_v7 }
0x116e   :  { %v4956_v13 = vsub.f32 1.5, %v4955_v34 }
0x1170   :  { %v4957_v14 = vmul.f32 %v7332_v46, %v4956_v13 }
0x1172   :  { %v4961_v30 = vsel %vm4960_vm0, %v7332_v46, %v4957_v14 }
0x1173   :  { %v4962_v26 = vmul.f32 %v4961_v30, %v4942_v38 }
0x1175   :  { %v4967_v0 = vmul.f32 %v7066_v18, %v4962_v26 }
0x1177   :  { %v4972_v37 = vadd.f32 %v7067_v62, %v4967_v0 }
0x1179   :  { %v4973_v20 = vmax.f32 %v4972_v37, 0.0 }
0x117b   :  { %v4974_v3 = vpack.c.bf16 %v4973_v20, %v4973_v20 }
0x117d   :  { %5051 = vmatmul.bf16.vlgmr.msrb.gmra.mxu0 %v4974_v3 }
0x11fa   :  { %v5052_v9 = vpop.f32.mrf.mxu0 }
0x11fb   :  { %v5053_v50 = vadd.f32 %v7068_v28, %v5052_v9 }
0x11fd   :  { %5056 = vst [vmem:[%s5095_s1] sm:$0xff] %v5053_v50 }
0x1202   :  { %v5054_v5 = vpop.f32.mrf.mxu0 }

</bundles_post_ra>
